<compile_context>
chip_gen: v5e
topology: v5e:2x2
jax: 0.10.0
libtpu: 0.0.40
codegen_flags: <defaults>
</compile_context>

<pallas_src>
import functools

import jax
import jax.numpy as jnp
from jax import lax
from jax.experimental import pallas as pl
from jax.experimental.pallas import tpu as pltpu


def _round_up(x, m):
    return (x + m - 1) // m * m


def _pick_tile_h(H):
    for th in (16, 8):
        if H % th == 0:
            return th
    return H


def _vmem_limit():
    # Raise the scoped-VMEM budget with headroom, sized per chip (64 MiB on v7x).
    try:
        cap = int(pltpu.get_tpu_info().vmem_capacity_bytes)
        return min(cap * 3 // 4, 96 * 1024 * 1024)
    except Exception:  # noqa: BLE001 - fall back to compiler default
        return None


def _double_conv_kernel(xm_ref, xt_ref, xb_ref, w1_ref, b1_ref, w2_ref, b2_ref,
                        o_ref, *, TH, H, W, Cpin, Cpmid, Cpout, NH):
    """Fused (conv3x3 + folded BN + ReLU) x 2 for one (batch, H-tile) block.

    xm_ref: (1, TH,  W, Cpin)   main input rows  [h*TH, h*TH+TH)
    xt_ref: (1, 2,   W, Cpin)   top halo rows    [h*TH-2, h*TH)      (clamped)
    xb_ref: (1, 2,   W, Cpin)   bottom halo rows [h*TH+TH, h*TH+TH+2) (clamped)
    w1_ref: (3, 3*Cpin,  Cpmid) conv1 weights, BN1 folded, kx packed into K
    b1_ref: (1, Cpmid)          conv1 folded bias
    w2_ref: (3, 3*Cpmid, Cpout) conv2 weights, BN2 folded, kx packed into K
    b2_ref: (1, Cpout)          conv2 folded bias
    o_ref : (1, TH, W, Cpout)
    """
    h = pl.program_id(1)
    dt = xm_ref.dtype

    # ---- assemble input slab with a 2-row halo on each side -----------------
    # Halo rows falling outside the image are zeroed (== conv1's H zero-pad).
    top = xt_ref[0] * (h > 0).astype(dt)
    bot = xb_ref[0] * (h < NH - 1).astype(dt)
    xin = jnp.concatenate([top, xm_ref[0], bot], axis=0)          # (TH+4, W, Cpin)

    # ---- conv1 + folded BN1 + ReLU ------------------------------------------
    zc1 = jnp.zeros((TH + 4, 1, Cpin), dt)
    xp = jnp.concatenate([zc1, xin, zc1], axis=1)                 # (TH+4, W+2, Cpin)
    # Pack the 3 kx taps along channels -> K = 3*Cpin.
    xcat = jnp.concatenate([xp[:, kx:kx + W, :] for kx in range(3)], axis=-1)
    acc1 = jnp.zeros(((TH + 2) * W, Cpmid), jnp.float32)
    for ky in range(3):
        lhs = xcat[ky:ky + TH + 2].reshape((TH + 2) * W, 3 * Cpin)
        acc1 = acc1 + jnp.dot(lhs, w1_ref[ky],
                              preferred_element_type=jnp.float32)
    y = jnp.maximum(acc1 + b1_ref[...], 0.0).reshape(TH + 2, W, Cpmid)

    # Intermediate rows outside the image are conv2's zero padding (not conv1
    # applied to padded input), so mask them explicitly.
    g = lax.broadcasted_iota(jnp.int32, (TH + 2, 1), 0) + (h * TH - 1)
    valid = jnp.logical_and(g >= 0, g < H).astype(jnp.float32)
    y = (y * valid[:, :, None]).astype(w2_ref.dtype)

    # ---- conv2 + folded BN2 + ReLU ------------------------------------------
    zc2 = jnp.zeros((TH + 2, 1, Cpmid), y.dtype)
    yp = jnp.concatenate([zc2, y, zc2], axis=1)                   # (TH+2, W+2, Cpmid)
    ycat = jnp.concatenate([yp[:, kx:kx + W, :] for kx in range(3)], axis=-1)
    acc2 = jnp.zeros((TH * W, Cpout), jnp.float32)
    for ky in range(3):
        lhs = ycat[ky:ky + TH].reshape(TH * W, 3 * Cpmid)
        acc2 = acc2 + jnp.dot(lhs, w2_ref[ky],
                              preferred_element_type=jnp.float32)
    out = jnp.maximum(acc2 + b2_ref[...], 0.0).reshape(TH, W, Cpout)
    o_ref[0] = out.astype(o_ref.dtype)


def _fold_and_pack(w, b, gamma, beta, mean, var, cin_p, cout_p, dtype, eps=1e-5):
    """Fold BN (running stats) into conv weights/bias, pad channels, pack kx into K."""
    s = gamma / jnp.sqrt(var + eps)
    wf = w * s[None, None, None, :]
    bf = beta + (b - mean) * s
    cin, cout = w.shape[2], w.shape[3]
    wf = jnp.pad(wf, ((0, 0), (0, 0), (0, cin_p - cin), (0, cout_p - cout)))
    bf = jnp.pad(bf, (0, cout_p - cout))
    # (3, 3, cin_p, cout_p) -> (3, 3*cin_p, cout_p); row index = kx*cin_p + ci,
    # matching the kernel's kx-concatenation order of the input taps.
    return (wf.reshape(3, 3 * cin_p, cout_p).astype(dtype),
            bf.reshape(1, cout_p).astype(jnp.float32))


def double_conv(x_nchw, params, *, tile_h=None, compute_dtype=None):
    """DoubleConv forward. x_nchw: (N, Cin, H, W) -> (N, Cout, H, W)."""
    N, Cin, H, W = x_nchw.shape
    Cout = params["w1"].shape[-1]
    assert W % 8 == 0, "W must be a multiple of 8"
    assert H % 2 == 0, "H must be even"

    cdt = compute_dtype or x_nchw.dtype          # e.g. jnp.bfloat16 on v6e/v7x
    Cpin = _round_up(Cin, 128)
    Cpmid = _round_up(Cout, 128)
    Cpout = Cpmid

    TH = tile_h or _pick_tile_h(H)
    assert H % TH == 0 and TH % 2 == 0
    NH = H // TH
    hh = TH // 2

    x = jnp.transpose(x_nchw, (0, 2, 3, 1))      # NCHW -> NHWC (lane = channels)
    if Cpin != Cin:
        x = jnp.pad(x, ((0, 0), (0, 0), (0, 0), (0, Cpin - Cin)))
    x = x.astype(cdt)

    w1c, b1f = _fold_and_pack(params["w1"], params["b1"], params["gamma1"],
                              params["beta1"], params["mean1"], params["var1"],
                              Cpin, Cpmid, cdt)
    w2c, b2f = _fold_and_pack(params["w2"], params["b2"], params["gamma2"],
                              params["beta2"], params["mean2"], params["var2"],
                              Cpmid, Cpout, cdt)

    kernel = functools.partial(_double_conv_kernel, TH=TH, H=H, W=W,
                               Cpin=Cpin, Cpmid=Cpmid, Cpout=Cpout, NH=NH)

    out = pl.pallas_call(
        kernel,
        out_shape=jax.ShapeDtypeStruct((N, H, W, Cpout), x_nchw.dtype),
        grid=(N, NH),
        in_specs=[
            # main H tile
            pl.BlockSpec((1, TH, W, Cpin), lambda n, h: (n, h, 0, 0)),
            # 2-row top halo (block size 2 along H); clamped at the top edge,
            # the kernel masks it to zero there.
            pl.BlockSpec((1, 2, W, Cpin),
                         lambda n, h: (n, jnp.maximum(h * hh - 1, 0), 0, 0)),
            # 2-row bottom halo; clamped at the bottom edge, masked in-kernel.
            pl.BlockSpec((1, 2, W, Cpin),
                         lambda n, h: (n, jnp.minimum((h + 1) * hh, H // 2 - 1), 0, 0)),
            # weights / biases stay resident (constant index maps)
            pl.BlockSpec((3, 3 * Cpin, Cpmid), lambda n, h: (0, 0, 0)),
            pl.BlockSpec((1, Cpmid), lambda n, h: (0, 0)),
            pl.BlockSpec((3, 3 * Cpmid, Cpout), lambda n, h: (0, 0, 0)),
            pl.BlockSpec((1, Cpout), lambda n, h: (0, 0)),
        ],
        out_specs=pl.BlockSpec((1, TH, W, Cpout), lambda n, h: (n, h, 0, 0)),
        compiler_params=pltpu.CompilerParams(
            dimension_semantics=("parallel", "parallel"),
            vmem_limit_bytes=_vmem_limit(),
        ),
    )(x, x, x, w1c, b1f, w2c, b2f)

    out = out[..., :Cout]                        # drop channel padding
    return jnp.transpose(out, (0, 3, 1, 2))      # NHWC -> NCHW


def _reference_double_conv(x_nchw, params):
    """Plain-JAX reference (correctness check only)."""
    def block(x, w, b, gamma, beta, mean, var, eps=1e-5):
        y = lax.conv_general_dilated(
            x, w, window_strides=(1, 1), padding="SAME",
            dimension_numbers=("NHWC", "HWIO", "NHWC"))
        y = y + b
        y = (y - mean) / jnp.sqrt(var + eps) * gamma + beta
        return jnp.maximum(y, 0.0)

    x = jnp.transpose(x_nchw, (0, 2, 3, 1))
    x = block(x, params["w1"], params["b1"], params["gamma1"], params["beta1"],
              params["mean1"], params["var1"])
    x = block(x, params["w2"], params["b2"], params["gamma2"], params["beta2"],
              params["mean2"], params["var2"])
    return jnp.transpose(x, (0, 3, 1, 2))


def init_params(key, in_channels, out_channels):
    ks = jax.random.split(key, 8)
    return {
        "w1": 0.1 * jax.random.normal(ks[0], (3, 3, in_channels, out_channels),
                                      jnp.float32),
        "b1": 0.1 * jax.random.normal(ks[1], (out_channels,), jnp.float32),
        "gamma1": 1.0 + 0.1 * jax.random.normal(ks[2], (out_channels,), jnp.float32),
        "beta1": 0.1 * jax.random.normal(ks[3], (out_channels,), jnp.float32),
        "mean1": jnp.zeros((out_channels,), jnp.float32),
        "var1": jnp.ones((out_channels,), jnp.float32),

        "w2": 0.1 * jax.random.normal(ks[4], (3, 3, out_channels, out_channels),
                                      jnp.float32),
        "b2": 0.1 * jax.random.normal(ks[5], (out_channels,), jnp.float32),
        "gamma2": 1.0 + 0.1 * jax.random.normal(ks[6], (out_channels,), jnp.float32),
        "beta2": 0.1 * jax.random.normal(ks[7], (out_channels,), jnp.float32),
        "mean2": jnp.zeros((out_channels,), jnp.float32),
        "var2": jnp.ones((out_channels,), jnp.float32),
    }


if __name__ == "__main__":
    key = jax.random.PRNGKey(0)
    kx, kp = jax.random.split(key)

    N, Cin, Cout, H, W = 2, 4, 8, 16, 16
    x = jax.random.normal(kx, (N, Cin, H, W), jnp.float32)       # NCHW like PyTorch
    params = init_params(kp, Cin, Cout)

    out = jax.jit(double_conv)(x, params)
    out = jax.block_until_ready(out)

    ref = _reference_double_conv(x, params)
    assert out.shape == (N, Cout, H, W)
    assert jnp.max(jnp.abs(out - ref)) < 2e-4

    print("KERNEL_OK")
</pallas_src>

<mosaic_0001>
module attributes {stable_mosaic.version = 11 : i64} {
  func.func @_double_conv_kernel(%arg0: i32, %arg1: i32, %arg2: memref<1x16x16x128xf32, #tpu.memory_space<vmem>>, %arg3: memref<1x2x16x128xf32, #tpu.memory_space<vmem>>, %arg4: memref<1x2x16x128xf32, #tpu.memory_space<vmem>>, %arg5: memref<3x384x128xf32, #tpu.memory_space<vmem>>, %arg6: memref<1x128xf32, #tpu.memory_space<vmem>>, %arg7: memref<3x384x128xf32, #tpu.memory_space<vmem>>, %arg8: memref<1x128xf32, #tpu.memory_space<vmem>>, %arg9: memref<1x16x16x128xf32, #tpu.memory_space<vmem>>) attributes {dimension_semantics = [#tpu.dimension_semantics<parallel>, #tpu.dimension_semantics<parallel>], iteration_bounds = array<i64: 2, 1>, scalar_prefetch = 0 : i64, scratch_operands = 0 : i64, tpu.core_type = #tpu.core_type<tc>, window_params = [{transform_indices = @transform_0, window_bounds = array<i64: 1, 16, 16, 128>}, {transform_indices = @transform_1, window_bounds = array<i64: 1, 2, 16, 128>}, {transform_indices = @transform_2, window_bounds = array<i64: 1, 2, 16, 128>}, {pipeline_mode = #tpu.pipeline_mode<synchronous>, transform_indices = @transform_3, window_bounds = array<i64: 3, 384, 128>}, {pipeline_mode = #tpu.pipeline_mode<synchronous>, transform_indices = @transform_4, window_bounds = array<i64: 1, 128>}, {pipeline_mode = #tpu.pipeline_mode<synchronous>, transform_indices = @transform_5, window_bounds = array<i64: 3, 384, 128>}, {pipeline_mode = #tpu.pipeline_mode<synchronous>, transform_indices = @transform_6, window_bounds = array<i64: 1, 128>}, {transform_indices = @transform_7, window_bounds = array<i64: 1, 16, 16, 128>}]} {
    %c0 = arith.constant 0 : index
    %c0_0 = arith.constant 0 : index
    %c0_1 = arith.constant 0 : index
    %c0_2 = arith.constant 0 : index
    %0 = vector.load %arg3[%c0, %c0_0, %c0_1, %c0_2] : memref<1x2x16x128xf32, #tpu.memory_space<vmem>>, vector<1x2x16x128xf32>
    %1 = vector.shape_cast %0 : vector<1x2x16x128xf32> to vector<2x16x128xf32>
    %c0_i32 = arith.constant 0 : i32
    %2 = arith.cmpi sgt, %arg1, %c0_i32 : i32
    %3 = arith.extui %2 : i1 to i32
    %4 = arith.sitofp %3 : i32 to f32
    %5 = vector.broadcast %4 : f32 to vector<2x16x128xf32>
    %6 = arith.mulf %1, %5 : vector<2x16x128xf32>
    %c0_3 = arith.constant 0 : index
    %c0_4 = arith.constant 0 : index
    %c0_5 = arith.constant 0 : index
    %c0_6 = arith.constant 0 : index
    %7 = vector.load %arg4[%c0_3, %c0_4, %c0_5, %c0_6] : memref<1x2x16x128xf32, #tpu.memory_space<vmem>>, vector<1x2x16x128xf32>
    %8 = vector.shape_cast %7 : vector<1x2x16x128xf32> to vector<2x16x128xf32>
    %c0_i32_7 = arith.constant 0 : i32
    %9 = arith.cmpi slt, %arg1, %c0_i32_7 : i32
    %10 = arith.extui %9 : i1 to i32
    %11 = arith.sitofp %10 : i32 to f32
    %12 = vector.broadcast %11 : f32 to vector<2x16x128xf32>
    %13 = arith.mulf %8, %12 : vector<2x16x128xf32>
    %c0_8 = arith.constant 0 : index
    %c0_9 = arith.constant 0 : index
    %c0_10 = arith.constant 0 : index
    %c0_11 = arith.constant 0 : index
    %14 = vector.load %arg2[%c0_8, %c0_9, %c0_10, %c0_11] : memref<1x16x16x128xf32, #tpu.memory_space<vmem>>, vector<1x16x16x128xf32>
    %15 = vector.shape_cast %14 : vector<1x16x16x128xf32> to vector<16x16x128xf32>
    %16 = tpu.concatenate %6, %15, %13 in 0 : vector<2x16x128xf32>, vector<16x16x128xf32>, vector<2x16x128xf32> -> vector<20x16x128xf32>
    %cst = arith.constant 0.000000e+00 : f32
    %17 = vector.broadcast %cst : f32 to vector<20x1x128xf32>
    %18 = tpu.concatenate %17, %16, %17 in 1 : vector<20x1x128xf32>, vector<20x16x128xf32>, vector<20x1x128xf32> -> vector<20x18x128xf32>
    %19 = vector.extract_strided_slice %18 {offsets = [0, 0, 0], sizes = [20, 16, 128], strides = [1, 1, 1]} : vector<20x18x128xf32> to vector<20x16x128xf32>
    %20 = vector.extract_strided_slice %18 {offsets = [0, 1, 0], sizes = [20, 16, 128], strides = [1, 1, 1]} : vector<20x18x128xf32> to vector<20x16x128xf32>
    %21 = vector.extract_strided_slice %18 {offsets = [0, 2, 0], sizes = [20, 16, 128], strides = [1, 1, 1]} : vector<20x18x128xf32> to vector<20x16x128xf32>
    %22 = tpu.concatenate %19, %20, %21 in 2 : vector<20x16x128xf32>, vector<20x16x128xf32>, vector<20x16x128xf32> -> vector<20x16x384xf32>
    %cst_12 = arith.constant 0.000000e+00 : f32
    %23 = vector.broadcast %cst_12 : f32 to vector<288x128xf32>
    %24 = vector.extract_strided_slice %22 {offsets = [0, 0, 0], sizes = [18, 16, 384], strides = [1, 1, 1]} : vector<20x16x384xf32> to vector<18x16x384xf32>
    %25 = vector.shape_cast %24 : vector<18x16x384xf32> to vector<288x384xf32>
    %c0_13 = arith.constant 0 : index
    %c0_14 = arith.constant 0 : index
    %c0_15 = arith.constant 0 : index
    %26 = vector.load %arg5[%c0_13, %c0_14, %c0_15] : memref<3x384x128xf32, #tpu.memory_space<vmem>>, vector<1x384x128xf32>
    %27 = vector.shape_cast %26 : vector<1x384x128xf32> to vector<384x128xf32>
    %cst_16 = arith.constant dense<0.000000e+00> : vector<288x128xf32>
    %28 = tpu.matmul %25, %27, %cst_16 {dimension_numbers = #tpu.dot_dimension_numbers<[1], [0], [0], [1], [0, 0, 1, 1], [], []>} : vector<288x384xf32>, vector<384x128xf32>, vector<288x128xf32> -> vector<288x128xf32>
    %29 = arith.addf %23, %28 : vector<288x128xf32>
    %30 = vector.extract_strided_slice %22 {offsets = [1, 0, 0], sizes = [18, 16, 384], strides = [1, 1, 1]} : vector<20x16x384xf32> to vector<18x16x384xf32>
    %31 = vector.shape_cast %30 : vector<18x16x384xf32> to vector<288x384xf32>
    %c1 = arith.constant 1 : index
    %c0_17 = arith.constant 0 : index
    %c0_18 = arith.constant 0 : index
    %32 = vector.load %arg5[%c1, %c0_17, %c0_18] : memref<3x384x128xf32, #tpu.memory_space<vmem>>, vector<1x384x128xf32>
    %33 = vector.shape_cast %32 : vector<1x384x128xf32> to vector<384x128xf32>
    %cst_19 = arith.constant dense<0.000000e+00> : vector<288x128xf32>
    %34 = tpu.matmul %31, %33, %cst_19 {dimension_numbers = #tpu.dot_dimension_numbers<[1], [0], [0], [1], [0, 0, 1, 1], [], []>} : vector<288x384xf32>, vector<384x128xf32>, vector<288x128xf32> -> vector<288x128xf32>
    %35 = arith.addf %29, %34 : vector<288x128xf32>
    %36 = vector.extract_strided_slice %22 {offsets = [2, 0, 0], sizes = [18, 16, 384], strides = [1, 1, 1]} : vector<20x16x384xf32> to vector<18x16x384xf32>
    %37 = vector.shape_cast %36 : vector<18x16x384xf32> to vector<288x384xf32>
    %c2 = arith.constant 2 : index
    %c0_20 = arith.constant 0 : index
    %c0_21 = arith.constant 0 : index
    %38 = vector.load %arg5[%c2, %c0_20, %c0_21] : memref<3x384x128xf32, #tpu.memory_space<vmem>>, vector<1x384x128xf32>
    %39 = vector.shape_cast %38 : vector<1x384x128xf32> to vector<384x128xf32>
    %cst_22 = arith.constant dense<0.000000e+00> : vector<288x128xf32>
    %40 = tpu.matmul %37, %39, %cst_22 {dimension_numbers = #tpu.dot_dimension_numbers<[1], [0], [0], [1], [0, 0, 1, 1], [], []>} : vector<288x384xf32>, vector<384x128xf32>, vector<288x128xf32> -> vector<288x128xf32>
    %41 = arith.addf %35, %40 : vector<288x128xf32>
    %c0_23 = arith.constant 0 : index
    %c0_24 = arith.constant 0 : index
    %42 = vector.load %arg6[%c0_23, %c0_24] : memref<1x128xf32, #tpu.memory_space<vmem>>, vector<1x128xf32>
    %43 = vector.broadcast %42 : vector<1x128xf32> to vector<288x128xf32>
    %44 = arith.addf %41, %43 : vector<288x128xf32>
    %cst_25 = arith.constant 0.000000e+00 : f32
    %45 = vector.broadcast %cst_25 : f32 to vector<288x128xf32>
    %46 = arith.maximumf %44, %45 : vector<288x128xf32>
    %47 = vector.shape_cast %46 : vector<288x128xf32> to vector<18x16x128xf32>
    %48 = tpu.iota {dimensions = array<i32: 0>} : vector<18x1xi32>
    %c16_i32 = arith.constant 16 : i32
    %49 = arith.muli %arg1, %c16_i32 : i32
    %c1_i32 = arith.constant 1 : i32
    %50 = arith.subi %49, %c1_i32 : i32
    %51 = vector.broadcast %50 : i32 to vector<18x1xi32>
    %52 = arith.addi %48, %51 : vector<18x1xi32>
    %c0_i32_26 = arith.constant 0 : i32
    %53 = vector.broadcast %c0_i32_26 : i32 to vector<18x1xi32>
    %54 = arith.cmpi sge, %52, %53 : vector<18x1xi32>
    %c16_i32_27 = arith.constant 16 : i32
    %55 = vector.broadcast %c16_i32_27 : i32 to vector<18x1xi32>
    %56 = arith.cmpi slt, %52, %55 : vector<18x1xi32>
    %57 = arith.andi %54, %56 : vector<18x1xi1>
    %58 = arith.extui %57 : vector<18x1xi1> to vector<18x1xi32>
    %59 = arith.sitofp %58 : vector<18x1xi32> to vector<18x1xf32>
    %60 = vector.shape_cast %59 : vector<18x1xf32> to vector<18x1x1xf32>
    %61 = vector.broadcast %60 : vector<18x1x1xf32> to vector<18x16x128xf32>
    %62 = arith.mulf %47, %61 : vector<18x16x128xf32>
    %cst_28 = arith.constant 0.000000e+00 : f32
    %63 = vector.broadcast %cst_28 : f32 to vector<18x1x128xf32>
    %64 = tpu.concatenate %63, %62, %63 in 1 : vector<18x1x128xf32>, vector<18x16x128xf32>, vector<18x1x128xf32> -> vector<18x18x128xf32>
    %65 = vector.extract_strided_slice %64 {offsets = [0, 0, 0], sizes = [18, 16, 128], strides = [1, 1, 1]} : vector<18x18x128xf32> to vector<18x16x128xf32>
    %66 = vector.extract_strided_slice %64 {offsets = [0, 1, 0], sizes = [18, 16, 128], strides = [1, 1, 1]} : vector<18x18x128xf32> to vector<18x16x128xf32>
    %67 = vector.extract_strided_slice %64 {offsets = [0, 2, 0], sizes = [18, 16, 128], strides = [1, 1, 1]} : vector<18x18x128xf32> to vector<18x16x128xf32>
    %68 = tpu.concatenate %65, %66, %67 in 2 : vector<18x16x128xf32>, vector<18x16x128xf32>, vector<18x16x128xf32> -> vector<18x16x384xf32>
    %cst_29 = arith.constant 0.000000e+00 : f32
    %69 = vector.broadcast %cst_29 : f32 to vector<256x128xf32>
    %70 = vector.extract_strided_slice %68 {offsets = [0, 0, 0], sizes = [16, 16, 384], strides = [1, 1, 1]} : vector<18x16x384xf32> to vector<16x16x384xf32>
    %71 = vector.shape_cast %70 : vector<16x16x384xf32> to vector<256x384xf32>
    %c0_30 = arith.constant 0 : index
    %c0_31 = arith.constant 0 : index
    %c0_32 = arith.constant 0 : index
    %72 = vector.load %arg7[%c0_30, %c0_31, %c0_32] : memref<3x384x128xf32, #tpu.memory_space<vmem>>, vector<1x384x128xf32>
    %73 = vector.shape_cast %72 : vector<1x384x128xf32> to vector<384x128xf32>
    %cst_33 = arith.constant dense<0.000000e+00> : vector<256x128xf32>
    %74 = tpu.matmul %71, %73, %cst_33 {dimension_numbers = #tpu.dot_dimension_numbers<[1], [0], [0], [1], [0, 0, 1, 1], [], []>} : vector<256x384xf32>, vector<384x128xf32>, vector<256x128xf32> -> vector<256x128xf32>
    %75 = arith.addf %69, %74 : vector<256x128xf32>
    %76 = vector.extract_strided_slice %68 {offsets = [1, 0, 0], sizes = [16, 16, 384], strides = [1, 1, 1]} : vector<18x16x384xf32> to vector<16x16x384xf32>
    %77 = vector.shape_cast %76 : vector<16x16x384xf32> to vector<256x384xf32>
    %c1_34 = arith.constant 1 : index
    %c0_35 = arith.constant 0 : index
    %c0_36 = arith.constant 0 : index
    %78 = vector.load %arg7[%c1_34, %c0_35, %c0_36] : memref<3x384x128xf32, #tpu.memory_space<vmem>>, vector<1x384x128xf32>
    %79 = vector.shape_cast %78 : vector<1x384x128xf32> to vector<384x128xf32>
    %cst_37 = arith.constant dense<0.000000e+00> : vector<256x128xf32>
    %80 = tpu.matmul %77, %79, %cst_37 {dimension_numbers = #tpu.dot_dimension_numbers<[1], [0], [0], [1], [0, 0, 1, 1], [], []>} : vector<256x384xf32>, vector<384x128xf32>, vector<256x128xf32> -> vector<256x128xf32>
    %81 = arith.addf %75, %80 : vector<256x128xf32>
    %82 = vector.extract_strided_slice %68 {offsets = [2, 0, 0], sizes = [16, 16, 384], strides = [1, 1, 1]} : vector<18x16x384xf32> to vector<16x16x384xf32>
    %83 = vector.shape_cast %82 : vector<16x16x384xf32> to vector<256x384xf32>
    %c2_38 = arith.constant 2 : index
    %c0_39 = arith.constant 0 : index
    %c0_40 = arith.constant 0 : index
    %84 = vector.load %arg7[%c2_38, %c0_39, %c0_40] : memref<3x384x128xf32, #tpu.memory_space<vmem>>, vector<1x384x128xf32>
    %85 = vector.shape_cast %84 : vector<1x384x128xf32> to vector<384x128xf32>
    %cst_41 = arith.constant dense<0.000000e+00> : vector<256x128xf32>
    %86 = tpu.matmul %83, %85, %cst_41 {dimension_numbers = #tpu.dot_dimension_numbers<[1], [0], [0], [1], [0, 0, 1, 1], [], []>} : vector<256x384xf32>, vector<384x128xf32>, vector<256x128xf32> -> vector<256x128xf32>
    %87 = arith.addf %81, %86 : vector<256x128xf32>
    %c0_42 = arith.constant 0 : index
    %c0_43 = arith.constant 0 : index
    %88 = vector.load %arg8[%c0_42, %c0_43] : memref<1x128xf32, #tpu.memory_space<vmem>>, vector<1x128xf32>
    %89 = vector.broadcast %88 : vector<1x128xf32> to vector<256x128xf32>
    %90 = arith.addf %87, %89 : vector<256x128xf32>
    %cst_44 = arith.constant 0.000000e+00 : f32
    %91 = vector.broadcast %cst_44 : f32 to vector<256x128xf32>
    %92 = arith.maximumf %90, %91 : vector<256x128xf32>
    %93 = vector.shape_cast %92 : vector<256x128xf32> to vector<16x16x128xf32>
    %c0_45 = arith.constant 0 : index
    %c0_46 = arith.constant 0 : index
    %c0_47 = arith.constant 0 : index
    %c0_48 = arith.constant 0 : index
    %94 = vector.load %arg9[%c0_45, %c0_46, %c0_47, %c0_48] : memref<1x16x16x128xf32, #tpu.memory_space<vmem>>, vector<1x16x16x128xf32>
    %95 = vector.shape_cast %94 : vector<1x16x16x128xf32> to vector<16x16x128xf32>
    %96 = vector.shape_cast %93 : vector<16x16x128xf32> to vector<1x16x16x128xf32>
    tpu.vector_store %arg9[%c0_45, %c0_46, %c0_47, %c0_48], %96 {strides = array<i32>} : memref<1x16x16x128xf32, #tpu.memory_space<vmem>>, vector<1x16x16x128xf32>,
    return
  }
  func.func @transform_0(%arg0: i32, %arg1: i32) -> (i32, i32, i32, i32) {
    %c0_i32 = arith.constant 0 : i32
    %c0_i32_0 = arith.constant 0 : i32
    %c0_i32_1 = arith.constant 0 : i32
    return %arg0, %arg1, %c0_i32, %c0_i32_0 : i32, i32, i32, i32
  }
  func.func @transform_1(%arg0: i32, %arg1: i32) -> (i32, i32, i32, i32) {
    %c8_i32 = arith.constant 8 : i32
    %0 = arith.muli %arg1, %c8_i32 : i32
    %c1_i32 = arith.constant 1 : i32
    %1 = arith.subi %0, %c1_i32 : i32
    %c0_i32 = arith.constant 0 : i32
    %2 = arith.maxsi %1, %c0_i32 : i32
    %c0_i32_0 = arith.constant 0 : i32
    %c0_i32_1 = arith.constant 0 : i32
    %c0_i32_2 = arith.constant 0 : i32
    return %arg0, %2, %c0_i32_0, %c0_i32_1 : i32, i32, i32, i32
  }
  func.func @transform_2(%arg0: i32, %arg1: i32) -> (i32, i32, i32, i32) {
    %c1_i32 = arith.constant 1 : i32
    %0 = arith.addi %arg1, %c1_i32 : i32
    %c8_i32 = arith.constant 8 : i32
    %1 = arith.muli %0, %c8_i32 : i32
    %c7_i32 = arith.constant 7 : i32
    %2 = arith.minsi %1, %c7_i32 : i32
    %c0_i32 = arith.constant 0 : i32
    %c0_i32_0 = arith.constant 0 : i32
    %c0_i32_1 = arith.constant 0 : i32
    return %arg0, %2, %c0_i32, %c0_i32_0 : i32, i32, i32, i32
  }
  func.func @transform_3(%arg0: i32, %arg1: i32) -> (i32, i32, i32) {
    %c0_i32 = arith.constant 0 : i32
    %c0_i32_0 = arith.constant 0 : i32
    %c0_i32_1 = arith.constant 0 : i32
    %c0_i32_2 = arith.constant 0 : i32
    return %c0_i32, %c0_i32_0, %c0_i32_1 : i32, i32, i32
  }
  func.func @transform_4(%arg0: i32, %arg1: i32) -> (i32, i32) {
    %c0_i32 = arith.constant 0 : i32
    %c0_i32_0 = arith.constant 0 : i32
    %c0_i32_1 = arith.constant 0 : i32
    return %c0_i32, %c0_i32_0 : i32, i32
  }
  func.func @transform_5(%arg0: i32, %arg1: i32) -> (i32, i32, i32) {
    %c0_i32 = arith.constant 0 : i32
    %c0_i32_0 = arith.constant 0 : i32
    %c0_i32_1 = arith.constant 0 : i32
    %c0_i32_2 = arith.constant 0 : i32
    return %c0_i32, %c0_i32_0, %c0_i32_1 : i32, i32, i32
  }
  func.func @transform_6(%arg0: i32, %arg1: i32) -> (i32, i32) {
    %c0_i32 = arith.constant 0 : i32
    %c0_i32_0 = arith.constant 0 : i32
    %c0_i32_1 = arith.constant 0 : i32
    return %c0_i32, %c0_i32_0 : i32, i32
  }
  func.func @transform_7(%arg0: i32, %arg1: i32) -> (i32, i32, i32, i32) {
    %c0_i32 = arith.constant 0 : i32
    %c0_i32_0 = arith.constant 0 : i32
    %c0_i32_1 = arith.constant 0 : i32
    return %arg0, %arg1, %c0_i32, %c0_i32_0 : i32, i32, i32, i32
  }
}

</mosaic_0001>

<bundles_post_ra>
// kernel: double_conv.1
= control target key start
LH: loop header
LB: loop body
LE: loop exit
PB: predicated region body
PF: predicated region fallthrough
CT: control target
= control target key end

     0   :  { %s4999_s24 = smov 0   ;;  %s5001_s25 = smov 0   ;;  %s9107_s0 = inlined_call_operand.vmem [shape: f32[2,16,16,128], index: 0, kind: input, shape index: {}, may-alias: {0,1,2}]   ;;  %s9108_s1 = inlined_call_operand.vmem [shape: f32[2,16,16,128], index: 1, kind: input, shape index: {}, may-alias: {0,1,2}]   ;;  %s9109_s2 = inlined_call_operand.vmem [shape: f32[2,16,16,128], index: 2, kind: input, shape index: {}, may-alias: {0,1,2}]   ;;  %s9110_s3 = inlined_call_operand.vmem [shape: f32[3,384,128], index: 3, kind: input, shape index: {}]   ;;  %s9111_s4 = inlined_call_operand.vmem [shape: f32[1,128], index: 4, kind: input, shape index: {}]   ;;  %s9112_s5 = inlined_call_operand.vmem [shape: f32[3,384,128], index: 5, kind: input, shape index: {}]   ;;  %s9113_s6 = inlined_call_operand.vmem [shape: f32[1,128], index: 6, kind: input, shape index: {}]   ;;  %s9114_s7 = inlined_call_operand.vmem [shape: f32[2,16,16,128], index: 7, kind: output, shape index: {}]  }
   0x1   :  { %s5003_s26 = smov 0  }
   0x2 LB: > { %s29_s27 = sadd.s32 1, %s4951_s25  ;;  %p4424_p0 = scmp.ge.s32.totalorder %s4955_s26, 1  ;;  %s4955_s26 = sphi %s5003_s26, %s17_s26   ;;  %s4951_s25 = sphi %s5001_s25, %s10222_s25   ;;  %s4947_s24 = sphi %s4999_s24, %s10221_s24  }
   0x3   : > { %p31_p1 = scmp.ge.s32.totalorder %s29_s27, 2  ;;  %p327_p2 = scmp.lt.s32.totalorder %s4955_s26, 3 }
   0x5   : > { %s10224_s27 = smov (%p31_p1, %s29_s27), 0  ;;  %p328_p3 = pnand %p4424_p0, %p327_p2 }
   0x7   : > { %331 = sbr.rel (%p328_p3) target bundleno = 1808 (0x710), region = 48 }
   0xc   : > { %v4448_v0 = vld [vmem:[%s9110_s3 + $0x1f8] sm:$0xff]  ;;  %v4447_v2 = vld [vmem:[%s9110_s3 + $0x1f0] sm:$0xff]  ;;  %p398_p4 = scmp.lt.s32.totalorder %s4947_s24, 1  ;;  %v4446_v4 = vld [vmem:[%s9110_s3 + $0x1e8] sm:$0xff]  ;;  %vm553_vm0 = vcmask 1040384   ;;  %vm754_vm1 = vcmask 1046528  }
   0xd   : > { %v4464_v1 = vld [vmem:[%s9110_s3 + $0x278] sm:$0xff]  ;;  %1133 = vmatpush.msra.mxu0 %v4448_v0  ;;  %v4463_v3 = vld [vmem:[%s9110_s3 + $0x270] sm:$0xff]  ;;  %v4462_v5 = vld [vmem:[%s9110_s3 + $0x268] sm:$0xff]  ;;  %vm895_vm3 = vcmask 1045504  }
   0xe   : > { %1258 = vmatpush.msra.mxu1 %v4464_v1  ;;  %4839 = vmatpush.msra.mxu3 %v4464_v1  ;;  %s10226_s24 = smov (!%p398_p4, %s4947_s24), 1  ;;  %v4445_v6 = vld [vmem:[%s9110_s3 + $0x1e0] sm:$0xff]  ;;  %v4444_v8 = vld [vmem:[%s9110_s3 + $0x1d8] sm:$0xff]  ;;  %v4443_v10 = vld [vmem:[%s9110_s3 + $0x1d0] sm:$0xff] }
   0xf   : > { %1134 = vmatpush.msra.mxu0 %v4447_v2  ;;  %v4461_v7 = vld [vmem:[%s9110_s3 + $0x260] sm:$0xff]  ;;  %v4460_v9 = vld [vmem:[%s9110_s3 + $0x258] sm:$0xff]  ;;  %s5047_s29 = sshll.u32 %s10226_s24, 8  ;;  %v4459_v11 = vld [vmem:[%s9110_s3 + $0x250] sm:$0xff] }
  0x10   : > { %1259 = vmatpush.msra.mxu1 %v4463_v3  ;;  %4840 = vmatpush.msra.mxu3 %v4463_v3  ;;  %s5059_s24 = scalar_lea.vmem %s9108_s1, %s5047_s29  ;;  %v4442_v12 = vld [vmem:[%s9110_s3 + $0x1c8] sm:$0xff]  ;;  %v4441_v14 = vld [vmem:[%s9110_s3 + $0x1c0] sm:$0xff]  ;;  %v5078_v18 = vld [vmem:[%s9110_s3 + $0x2f8] sm:$0xff]  ;;  %s5084_s30 = scalar_lea.vmem %s9107_s0, %s5047_s29 }
  0x11   : > { %1135 = vmatpush.msra.mxu0 %v4446_v4  ;;  %v4458_v13 = vld [vmem:[%s9110_s3 + $0x248] sm:$0xff]  ;;  %v4457_v15 = vld [vmem:[%s9110_s3 + $0x240] sm:$0xff]  ;;  %v459_v16 = vld [vmem:[%s5059_s24 + $0x10] sm:$0xff]  ;;  %4855 = vmatpush.msra.mxu2 %v5078_v18  ;;  %s4836_s18 = sadd.s32 224, %s5047_s29  ;;  %s8929_s11 = scalar_lea.vmem %s9114_s7, %s5047_s29 }
  0x12   : > { %1260 = vmatpush.msra.mxu1 %v4462_v5  ;;  %4841 = vmatpush.msra.mxu3 %v4462_v5  ;;  %v460_v17 = vld [vmem:[%s5059_s24 + $0x18] sm:$0xff]  ;;  %v4439_v21 = vld [vmem:[%s9110_s3 + $0x1b0] sm:$0xff]  ;;  %v467_v22 = vmul.f32 0.0, %v459_v16  ;;  %v4438_v28 = vld [vmem:[%s9110_s3 + $0x1a8] sm:$0xff]  ;;  %s5577_s8 = scalar_lea.vmem %s9109_s2, %s4836_s18 }
  0x13   : > { %1136 = vmatpush.msra.mxu0 %v4445_v6  ;;  %v4440_v19 = vld [vmem:[%s9110_s3 + $0x1b8] sm:$0xff]  ;;  %v5096_v23 = vmul.f32 0.0, %v460_v17  ;;  %v4455_v24 = vld [vmem:[%s9110_s3 + $0x230] sm:$0xff]  ;;  %v4454_v29 = vld [vmem:[%s9110_s3 + $0x228] sm:$0xff] }
  0x14   : > { %1261 = vmatpush.msra.mxu1 %v4461_v7  ;;  %4842 = vmatpush.msra.mxu3 %v4461_v7  ;;  %v4456_v20 = vld [vmem:[%s9110_s3 + $0x238] sm:$0xff]  ;;  %v499_v25 = vld [vmem:[%s5084_s30 + $0x90] sm:$0xff]  ;;  %v5115_v30 = vrot.slane %v467_v22, 7  ;;  %v4437_v34 = vld [vmem:[%s9110_s3 + $0x1a0] sm:$0xff] }
  0x15   : > { %1137 = vmatpush.msra.mxu0 %v4444_v8  ;;  %v500_v26 = vld [vmem:[%s5084_s30 + $0x98] sm:$0xff]  ;;  %v5106_v27 = vld [vmem:[%s9110_s3 + $0x2f0] sm:$0xff]  ;;  %v558_v31 = vrot.slane %v5096_v23, 7  ;;  %v5118_v32 = vrot.slane %v499_v25, 7  ;;  %v4453_v35 = vld [vmem:[%s9110_s3 + $0x220] sm:$0xff] }
  0x16   : > { %1262 = vmatpush.msra.mxu1 %v4460_v9  ;;  %4843 = vmatpush.msra.mxu3 %v4460_v9  ;;  %v588_v33 = vrot.slane %v500_v26, 7  ;;  %v4436_v36 = vld [vmem:[%s9110_s3 + $0x198] sm:$0xff]  ;;  %v4435_v38 = vld [vmem:[%s9110_s3 + $0x190] sm:$0xff]  ;;  %v5141_v40 = vsel %vm553_vm0, 0.0, %v5115_v30  ;;  %v501_v44 = vld [vmem:[%s5084_s30 + $0xa0] sm:$0xff] }
  0x17   : > { %1138 = vmatpush.msra.mxu0 %v4443_v10  ;;  %4856 = vmatpush.msra.mxu2 %v5106_v27  ;;  %9366 = vst [vmem:[#allocation2_spill] sm:$0xff] %v5118_v32  ;;  %v4452_v37 = vld [vmem:[%s9110_s3 + $0x218] sm:$0xff]  ;;  %v5137_v39 = vsel %vm553_vm0, %v5115_v30, %v558_v31  ;;  %v4451_v43 = vld [vmem:[%s9110_s3 + $0x210] sm:$0xff]  ;;  %v502_v45 = vld [vmem:[%s5084_s30 + $0xa8] sm:$0xff]  ;;  %v760_v48 = vrot.slane %v5141_v40, 1  ;;  %v5165_v52 = vrot.slane %v501_v44, 7 }
  0x18   : > { %1263 = vmatpush.msra.mxu1 %v4459_v11  ;;  %4844 = vmatpush.msra.mxu3 %v4459_v11  ;;  %9367 = vst [vmem:[#allocation3_spill] sm:$0xff] %v5141_v40  ;;  %v5145_v41 = vsel %vm553_vm0, %v5118_v32, %v588_v33  ;;  %v5148_v42 = vsel %vm553_vm0, %v588_v33, 0.0  ;;  %v4434_v46 = vld [vmem:[%s9110_s3 + $0x188] sm:$0xff]  ;;  %v761_v49 = vrot.slane %v5137_v39, 1  ;;  %v591_v53 = vrot.slane %v502_v45, 7  ;;  %v4433_v54 = vld [vmem:[%s9110_s3 + $0x180] sm:$0xff]  ;;  %vm5174_vm2 = vmneg %vm553_vm0 }
  0x19   : > { %1139 = vmatpush.msra.mxu0 %v4442_v12  ;;  %9368 = vst [vmem:[#allocation4_spill] sm:$0xff] %v5145_v41  ;;  %v4450_v47 = vld [vmem:[%s9110_s3 + $0x208] sm:$0xff]  ;;  %v9115_v50 = vrot.slane %v5145_v41, 1  ;;  %v813_v51 = vrot.slane %v5148_v42, 1  ;;  %v4449_v55 = vld [vmem:[%s9110_s3 + $0x200] sm:$0xff]  ;;  %v5187_v59 = vsel %vm553_vm0, %v558_v31, 0.0 }
  0x1a   : > { %1264 = vmatpush.msra.mxu1 %v4458_v13  ;;  %4845 = vmatpush.msra.mxu3 %v4458_v13  ;;  %9369 = vst [vmem:[#allocation5_spill] sm:$0xff] %v5165_v52  ;;  %v5179_v57 = vsel %vm754_vm1, %v760_v48, %v761_v49  ;;  %v5191_v60 = vsel %vm553_vm0, %v5165_v52, %v591_v53  ;;  %v5195_v61 = vsel %vm553_vm0, 0.0, %v5165_v52  ;;  %v481_v62 = vld [vmem:[%s5084_s30] sm:$0xff]  ;;  %v482_v63 = vld [vmem:[%s5084_s30 + $0x8] sm:$0xff]  ;;  %v763_v1 = vrot.slane %v5187_v59, 1  ;;  %v503_v11 = vld [vmem:[%s5084_s30 + $0xb0] sm:$0xff] }
  0x1b   : > { %1140 = vmatpush.msra.mxu0 %v4441_v14  ;;  %9372 = vst [vmem:[#allocation6_spill] sm:$0xff] %v5179_v57  ;;  %v5184_v58 = vsel %vm754_vm1, %v9115_v50, %v813_v51  ;;  %v4478_v0 = vld [vmem:[%s9110_s3 + $0x2e8] sm:$0xff]  ;;  %v815_v2 = vrot.slane %v5195_v61, 1  ;;  %v816_v3 = vrot.slane %v5191_v60, 1  ;;  %v5211_v4 = vrot.slane %v481_v62, 7  ;;  %v504_v12 = vld [vmem:[%s5084_s30 + $0xb8] sm:$0xff] }
  0x1c   : > { %1265 = vmatpush.msra.mxu1 %v4457_v15  ;;  %4846 = vmatpush.msra.mxu3 %v4457_v15  ;;  %9373 = vst [vmem:[#allocation7_spill] sm:$0xff] %v5184_v58  ;;  %v561_v5 = vrot.slane %v482_v63, 7  ;;  %v5215_v6 = vsel %vm754_vm1, %v761_v49, %v763_v1  ;;  %v5229_v10 = vsel %vm553_vm0, %v591_v53, 0.0  ;;  %v5239_v16 = vrot.slane %v503_v11, 7  ;;  %v483_v23 = vld [vmem:[%s5084_s30 + $0x10] sm:$0xff]  ;;  %v4477_v25 = vld [vmem:[%s9110_s3 + $0x2e0] sm:$0xff] }
  0x1d   : > { %1141 = vmatpush.msra.mxu0 %v4440_v19  ;;  %9374 = vst [vmem:[#allocation8_spill] sm:$0xff] %v5187_v59  ;;  %4857 = vmatpush.msra.mxu2 %v4478_v0  ;;  %v5218_v7 = vsel %vm754_vm1, %v815_v2, %v816_v3  ;;  %v5226_v9 = vsel %vm553_vm0, 0.0, %v5211_v4  ;;  %v818_v15 = vrot.slane %v5229_v10, 1  ;;  %v594_v17 = vrot.slane %v504_v12, 7  ;;  %v485_v62 = vld [vmem:[%s5084_s30 + $0x20] sm:$0xff]  ;;  %v486_v63 = vld [vmem:[%s5084_s30 + $0x28] sm:$0xff] }
  0x1e   : > { %1266 = vmatpush.msra.mxu1 %v4456_v20  ;;  %4847 = vmatpush.msra.mxu3 %v4456_v20  ;;  %9375 = vst [vmem:[#allocation9_spill] sm:$0xff] %v5191_v60  ;;  %v5222_v8 = vsel %vm553_vm0, %v5211_v4, %v561_v5  ;;  %v765_v13 = vrot.slane %v5226_v9, 1  ;;  %v5248_v20 = vsel %vm553_vm0, %v561_v5, 0.0  ;;  %v5256_v22 = vsel %vm553_vm0, 0.0, %v5239_v16 }
  0x1f   : > { %1142 = vmatpush.msra.mxu0 %v4439_v21  ;;  %9376 = vst [vmem:[#allocation10_spill] sm:$0xff] %v5215_v6  ;;  %v766_v14 = vrot.slane %v5222_v8, 1  ;;  %v5245_v19 = vsel %vm754_vm1, %v816_v3, %v818_v15  ;;  %v5252_v21 = vsel %vm553_vm0, %v5239_v16, %v594_v17  ;;  %v768_v26 = vrot.slane %v5248_v20, 1  ;;  %4858 = vmatpush.msra.mxu2 %v4477_v25 }
  0x20   : > { %1267 = vmatpush.msra.mxu1 %v4455_v24  ;;  %4848 = vmatpush.msra.mxu3 %v4455_v24  ;;  %9377 = vst [vmem:[#allocation11_spill] sm:$0xff] %v5218_v7  ;;  %v484_v24 = vld [vmem:[%s5084_s30 + $0x18] sm:$0xff]  ;;  %v5327_v3 = vrot.slane %v485_v62, 7  ;;  %v567_v5 = vrot.slane %v486_v63, 7 }
  0x21   : > { %1143 = vmatpush.msra.mxu0 %v4438_v28  ;;  %9378 = vst [vmem:[#allocation12_spill] sm:$0xff] %v5226_v9  ;;  %v821_v28 = vrot.slane %v5252_v21, 1  ;;  %v564_v31 = vrot.slane %v484_v24, 7  ;;  %v5274_v33 = vsel %vm754_vm1, %v766_v14, %v768_v26  ;;  %v4476_v24 = vld [vmem:[%s9110_s3 + $0x2d8] sm:$0xff]  ;;  %v1037_v9 = vld [vmem:[%s9110_s3 + $0x8] sm:$0xff] }
  0x22   : > { %1268 = vmatpush.msra.mxu1 %v4454_v29  ;;  %4849 = vmatpush.msra.mxu3 %v4454_v29  ;;  %9379 = vst [vmem:[#allocation13_spill] sm:$0xff] %v5239_v16  ;;  %v5271_v29 = vrot.slane %v483_v23, 7  ;;  %v508_v23 = vld [vmem:[%s5084_s30 + $0xd8] sm:$0xff] }
  0x23   : > { %1144 = vmatpush.msra.mxu0 %v4437_v34  ;;  %9381 = vst [vmem:[#allocation15_spill] sm:$0xff] %v5245_v19  ;;  %v5307_v53 = vsel %vm553_vm0, %v564_v31, 0.0  ;;  %4859 = vmatpush.msra.mxu2 %v4476_v24  ;;  %v488_v62 = vld [vmem:[%s5084_s30 + $0x38] sm:$0xff] }
  0x24   : > { %1269 = vmatpush.msra.mxu1 %v4453_v35  ;;  %4850 = vmatpush.msra.mxu3 %v4453_v35  ;;  %9382 = vst [vmem:[#allocation16_spill] sm:$0xff] %v5248_v20  ;;  %v5281_v35 = vsel %vm553_vm0, %v5271_v29, %v564_v31  ;;  %v600_v31 = vrot.slane %v508_v23, 7 }
  0x25   : > { %1145 = vmatpush.msra.mxu0 %v4436_v36  ;;  %9383 = vst [vmem:[#allocation17_spill] sm:$0xff] %v5252_v21  ;;  %v5285_v36 = vsel %vm553_vm0, 0.0, %v5271_v29  ;;  %v771_v45 = vrot.slane %v5281_v35, 1 }
  0x26   : > { %1270 = vmatpush.msra.mxu1 %v4452_v37  ;;  %4851 = vmatpush.msra.mxu3 %v4452_v37  ;;  %9384 = vst [vmem:[#allocation18_spill] sm:$0xff] %v5274_v33  ;;  %v5288_v37 = vsel %vm553_vm0, %v594_v17, 0.0  ;;  %v770_v44 = vrot.slane %v5285_v36, 1  ;;  %v507_v17 = vld [vmem:[%s5084_s30 + $0xd0] sm:$0xff] }
  0x27   : > { %1146 = vmatpush.msra.mxu0 %v4435_v38  ;;  %9386 = vst [vmem:[#allocation20_spill] sm:$0xff] %v5285_v36  ;;  %v505_v38 = vld [vmem:[%s5084_s30 + $0xc0] sm:$0xff] }
  0x28   : > { %1271 = vmatpush.msra.mxu1 %v4451_v43  ;;  %4852 = vmatpush.msra.mxu3 %v4451_v43  ;;  %v506_v43 = vld [vmem:[%s5084_s30 + $0xc8] sm:$0xff]  ;;  %v5301_v49 = vsel %vm754_vm1, %v770_v44, %v771_v45  ;;  %9390 = vst [vmem:[#allocation24_spill] sm:$0xff] %v5307_v53  ;;  %v5366_v44 = vsel %vm553_vm0, %v567_v5, 0.0  ;;  %v4465_v36 = vld [vmem:[%s9110_s3 + $0x280] sm:$0xff] }
  0x29   : > { %1147 = vmatpush.msra.mxu0 %v4434_v46  ;;  %v823_v46 = vrot.slane %v5288_v37, 1  ;;  %v597_v48 = vrot.slane %v506_v43, 7  ;;  %9388 = vst [vmem:[#allocation22_spill] sm:$0xff] %v5301_v49  ;;  %v778_v63 = vrot.slane %v5366_v44, 1 }
  0x2a   : > { %1272 = vmatpush.msra.mxu1 %v4450_v47  ;;  %4853 = vmatpush.msra.mxu3 %v4450_v47  ;;  %v5298_v47 = vrot.slane %v505_v38, 7  ;;  %9398 = vst [vmem:[#allocation32_spill] sm:$0xff] %v5366_v44 }
  0x2b   : > { %1148 = vmatpush.msra.mxu0 %v4433_v54  ;;  %v5304_v51 = vsel %vm754_vm1, %v821_v28, %v823_v46  ;;  %v5344_v15 = vsel %vm553_vm0, %v597_v48, 0.0 }
  0x2c   : > { %1273 = vmatpush.msra.mxu1 %v4449_v55  ;;  %4854 = vmatpush.msra.mxu3 %v4449_v55  ;;  %9387 = vst [vmem:[#allocation21_spill] sm:$0xff] %v5298_v47  ;;  %v5311_v54 = vsel %vm553_vm0, %v5298_v47, %v597_v48  ;;  %v5315_v55 = vsel %vm553_vm0, 0.0, %v5298_v47  ;;  %v487_v48 = vld [vmem:[%s5084_s30 + $0x30] sm:$0xff] }
  0x2d   : > { %4482 = vmatmul.msk.f32.vlgmr.msra.gmra.mxu0 %vm5174_vm2, %v5115_v30  ;;  %1274 = vmatmul.f32.vlgmr.msra.gmra.mxu1 %v5179_v57  ;;  %9389 = vst [vmem:[#allocation23_spill] sm:$0xff] %v5304_v51  ;;  %v825_v1 = vrot.slane %v5315_v55, 1  ;;  %v826_v2 = vrot.slane %v5311_v54, 1  ;;  %v493_v57 = vld [vmem:[%s5084_s30 + $0x60] sm:$0xff] }
  0x2e   : > { %1337 = vmatmul.f32.vlgmr.msra.gmra.mxu3 %v5184_v58  ;;  %1383 = vmatpush.msrb.mxu0 %v5078_v18  ;;  %v5242_v18 = vsel %vm754_vm1, %v765_v13, %v766_v14  ;;  %9391 = vst [vmem:[#allocation25_spill] sm:$0xff] %v5311_v54  ;;  %v5337_v13 = vsel %vm553_vm0, %v5327_v3, %v567_v5  ;;  %v5341_v14 = vsel %vm553_vm0, 0.0, %v5327_v3  ;;  %v570_v5 = vrot.slane %v488_v62, 7  ;;  %v510_v62 = vld [vmem:[%s5084_s30 + $0xe8] sm:$0xff] }
  0x2f   : > { %9380 = vst [vmem:[#allocation14_spill] sm:$0xff] %v5242_v18  ;;  %v5333_v12 = vsel %vm754_vm1, %v825_v1, %v826_v2  ;;  %v776_v26 = vrot.slane %v5337_v13, 1 }
  0x30   : > { %1384 = vmatpush.msrb.mxu0 %v5106_v27  ;;  %v820_v27 = vrot.slane %v5256_v22, 1  ;;  %9393 = vst [vmem:[#allocation27_spill] sm:$0xff] %v5333_v12 }
  0x31   : > { %9394 = vst [vmem:[#allocation28_spill] sm:$0xff] %v5341_v14 }
  0x32   : > { %1385 = vmatpush.msrb.mxu0 %v4478_v0  ;;  %v5277_v34 = vsel %vm754_vm1, %v820_v27, %v821_v28  ;;  %v773_v0 = vrot.slane %v5307_v53, 1  ;;  %v828_v27 = vrot.slane %v5344_v15, 1  ;;  %v5357_v28 = vrot.slane %v507_v17, 7 }
  0x33   : > { %9385 = vst [vmem:[#allocation19_spill] sm:$0xff] %v5277_v34  ;;  %v5389_v17 = vsel %vm754_vm1, %v776_v26, %v778_v63  ;;  %v4475_v63 = vld [vmem:[%s9110_s3 + $0x2d0] sm:$0xff] }
  0x34   : > { %1386 = vmatpush.msrb.mxu0 %v4477_v25  ;;  %v5330_v11 = vsel %vm754_vm1, %v771_v45, %v773_v0  ;;  %v775_v25 = vrot.slane %v5341_v14, 1  ;;  %9395 = vst [vmem:[#allocation29_spill] sm:$0xff] %v5357_v28  ;;  %v5363_v43 = vsel %vm754_vm1, %v826_v2, %v828_v27  ;;  %v5370_v45 = vsel %vm553_vm0, %v5357_v28, %v600_v31 }
  0x35   : > { %1152 = vmatmul.f32.gmra.mxu0 %v5137_v39  ;;  %1277 = vmatmul.f32.gmra.mxu1 %v5215_v6  ;;  %9392 = vst [vmem:[#allocation26_spill] sm:$0xff] %v5330_v11  ;;  %v5374_v46 = vsel %vm553_vm0, 0.0, %v5357_v28  ;;  %v831_v1 = vrot.slane %v5370_v45, 1  ;;  %v5386_v2 = vrot.slane %v487_v48, 7  ;;  %v5403_v27 = vsel %vm553_vm0, %v600_v31, 0.0  ;;  %v509_v48 = vld [vmem:[%s5084_s30 + $0xe0] sm:$0xff] }
  0x36   : > { %1340 = vmatmul.f32.gmra.mxu3 %v5218_v7  ;;  %1387 = vmatpush.msrb.mxu0 %v4476_v24  ;;  %v5360_v38 = vsel %vm754_vm1, %v775_v25, %v776_v26  ;;  %9397 = vst [vmem:[#allocation31_spill] sm:$0xff] %v5363_v43  ;;  %v830_v0 = vrot.slane %v5374_v46, 1  ;;  %v1051_v26 = vld [vmem:[%s9110_s3 + $0x78] sm:$0xff]  ;;  %v1050_v31 = vld [vmem:[%s9110_s3 + $0x70] sm:$0xff] }
  0x37   : > { %9396 = vst [vmem:[#allocation30_spill] sm:$0xff] %v5360_v38  ;;  %v5396_v24 = vsel %vm553_vm0, %v5386_v2, %v570_v5  ;;  %v5400_v25 = vsel %vm553_vm0, 0.0, %v5386_v2  ;;  %1508 = vmatpush.msrb.mxu3 %v1051_v26  ;;  %4860 = vmatpush.msra.mxu2 %v4475_v63  ;;  %v4468_v6 = vld [vmem:[%s9110_s3 + $0x298] sm:$0xff] }
  0x38   : > { %9399 = vst [vmem:[#allocation33_spill] sm:$0xff] %v5370_v45  ;;  %v5392_v23 = vsel %vm754_vm1, %v830_v0, %v831_v1  ;;  %v780_v0 = vrot.slane %v5400_v25, 1  ;;  %v781_v50 = vrot.slane %v5396_v24, 1  ;;  %1388 = vmatpush.msrb.mxu0 %v4475_v63 }
  0x39   : > { %9400 = vst [vmem:[#allocation34_spill] sm:$0xff] %v5389_v17  ;;  %1509 = vmatpush.msrb.mxu3 %v1050_v31  ;;  %v489_v31 = vld [vmem:[%s5084_s30 + $0x40] sm:$0xff] }
  0x3a   : > { %9401 = vst [vmem:[#allocation35_spill] sm:$0xff] %v5392_v23  ;;  %v5469_v58 = vrot.slane %v489_v31, 7 }
  0x3b   : > { %9402 = vst [vmem:[#allocation36_spill] sm:$0xff] %v5400_v25 }
  0x3d   : > { %4484 = vmatmul.msk.f32.gmra.mxu0 %vm5174_vm2, %v5211_v4  ;;  %1280 = vmatmul.f32.gmra.mxu1 %v5242_v18  ;;  %v1042_v18 = vld [vmem:[%s9110_s3 + $0x30] sm:$0xff] }
  0x3e   : > { %1343 = vmatmul.f32.gmra.mxu3 %v5245_v19  ;;  %v5431_v19 = vsel %vm754_vm1, %v780_v0, %v781_v50  ;;  %v490_v0 = vld [vmem:[%s5084_s30 + $0x48] sm:$0xff] }
  0x3f   : > { %9404 = vst [vmem:[#allocation38_spill] sm:$0xff] %v5431_v19 }
  0x45   : > { %1158 = vmatmul.f32.gmra.mxu0 %v5222_v8  ;;  %1283 = vmatmul.f32.gmra.mxu1 %v5274_v33 }
  0x46   : > { %1346 = vmatmul.f32.gmra.mxu3 %v5277_v34  ;;  %v1048_v34 = vld [vmem:[%s9110_s3 + $0x60] sm:$0xff] }
  0x4d   : > { %4486 = vmatmul.msk.f32.gmra.mxu0 %vm5174_vm2, %v5271_v29  ;;  %1286 = vmatmul.f32.gmra.mxu1 %v5301_v49 }
  0x4e   : > { %1349 = vmatmul.f32.gmra.mxu3 %v5304_v51  ;;  %v1049_v51 = vld [vmem:[%s9110_s3 + $0x68] sm:$0xff] }
  0x4f   : > { %1510 = vmatpush.msrb.mxu3 %v1049_v51  ;;  %v4474_v51 = vld [vmem:[%s9110_s3 + $0x2c8] sm:$0xff] }
  0x50   : > { %4861 = vmatpush.msra.mxu2 %v4474_v51  ;;  %1389 = vmatpush.msrb.mxu0 %v4474_v51 }
  0x51   : > { %1511 = vmatpush.msrb.mxu3 %v1048_v34 }
  0x55   : > { %1164 = vmatmul.f32.gmra.mxu0 %v5281_v35  ;;  %1289 = vmatmul.f32.gmra.mxu1 %v5330_v11 }
  0x56   : > { %1352 = vmatmul.f32.gmra.mxu3 %v5333_v12  ;;  %v603_v12 = vrot.slane %v510_v62, 7 }
  0x58   : > { %v5495_v51 = vsel %vm553_vm0, %v603_v12, 0.0 }
  0x5d   : > { %4488 = vmatmul.msk.f32.gmra.mxu0 %vm5174_vm2, %v5327_v3  ;;  %1292 = vmatmul.f32.gmra.mxu1 %v5360_v38  ;;  %v1045_v38 = vld [vmem:[%s9110_s3 + $0x48] sm:$0xff] }
  0x5e   : > { %1355 = vmatmul.f32.gmra.mxu3 %v5363_v43  ;;  %v833_v43 = vrot.slane %v5403_v27, 1 }
  0x60   : > { %v5434_v26 = vsel %vm754_vm1, %v831_v1, %v833_v43  ;;  %v1047_v43 = vld [vmem:[%s9110_s3 + $0x58] sm:$0xff]  ;;  %v4473_v1 = vld [vmem:[%s9110_s3 + $0x2c0] sm:$0xff] }
  0x61   : > { %9405 = vst [vmem:[#allocation39_spill] sm:$0xff] %v5434_v26  ;;  %1512 = vmatpush.msrb.mxu3 %v1047_v43  ;;  %4862 = vmatpush.msra.mxu2 %v4473_v1  ;;  %v4471_v43 = vld [vmem:[%s9110_s3 + $0x2b0] sm:$0xff] }
  0x62   : > { %1390 = vmatpush.msrb.mxu0 %v4473_v1  ;;  %v511_v1 = vld [vmem:[%s5084_s30 + $0xf0] sm:$0xff] }
  0x65   : > { %1170 = vmatmul.f32.gmra.mxu0 %v5337_v13  ;;  %1295 = vmatmul.f32.gmra.mxu1 %v5389_v17  ;;  %v4472_v17 = vld [vmem:[%s9110_s3 + $0x2b8] sm:$0xff] }
  0x66   : > { %1358 = vmatmul.f32.gmra.mxu3 %v5392_v23  ;;  %v5422_v23 = vrot.slane %v509_v48, 7  ;;  %v5437_v48 = vsel %vm553_vm0, %v570_v5, 0.0  ;;  %4863 = vmatpush.msra.mxu2 %v4472_v17 }
  0x67   : > { %9406 = vst [vmem:[#allocation40_spill] sm:$0xff] %v5437_v48  ;;  %v783_v5 = vrot.slane %v5437_v48, 1  ;;  %1391 = vmatpush.msrb.mxu0 %v4472_v17  ;;  %v4469_v17 = vld [vmem:[%s9110_s3 + $0x2a0] sm:$0xff] }
  0x68   : > { %9403 = vst [vmem:[#allocation37_spill] sm:$0xff] %v5422_v23  ;;  %v5441_v62 = vsel %vm553_vm0, %v5422_v23, %v603_v12  ;;  %v5445_v63 = vsel %vm553_vm0, 0.0, %v5422_v23  ;;  %4864 = vmatpush.msra.mxu2 %v4471_v43  ;;  %v4470_v12 = vld [vmem:[%s9110_s3 + $0x2a8] sm:$0xff] }
  0x69   : > { %v835_v34 = vrot.slane %v5445_v63, 1  ;;  %v836_v7 = vrot.slane %v5441_v62, 1  ;;  %v5481_v31 = vsel %vm754_vm1, %v781_v50, %v783_v5  ;;  %v1044_v50 = vld [vmem:[%s9110_s3 + $0x40] sm:$0xff]  ;;  %v1043_v5 = vld [vmem:[%s9110_s3 + $0x38] sm:$0xff]  ;;  %1392 = vmatpush.msrb.mxu0 %v4471_v43 }
  0x6a   : > { %9407 = vst [vmem:[#allocation41_spill] sm:$0xff] %v5481_v31  ;;  %4865 = vmatpush.msra.mxu2 %v4470_v12 }
  0x6b   : > { %1393 = vmatpush.msrb.mxu0 %v4470_v12  ;;  %v4467_v12 = vld [vmem:[%s9110_s3 + $0x290] sm:$0xff] }
  0x6c   : > { %4866 = vmatpush.msra.mxu2 %v4469_v17 }
  0x6d   : > { %4490 = vmatmul.msk.f32.gmra.mxu0 %vm5174_vm2, %v5386_v2  ;;  %1298 = vmatmul.f32.gmra.mxu1 %v5431_v19  ;;  %v573_v19 = vrot.slane %v490_v0, 7  ;;  %v5484_v0 = vsel %vm754_vm1, %v835_v34, %v836_v7 }
  0x6e   : > { %1361 = vmatmul.f32.gmra.mxu3 %v5434_v26  ;;  %v1046_v26 = vld [vmem:[%s9110_s3 + $0x50] sm:$0xff]  ;;  %9408 = vst [vmem:[#allocation42_spill] sm:$0xff] %v5484_v0  ;;  %4867 = vmatpush.msra.mxu2 %v4468_v6 }
  0x6f   : > { %1513 = vmatpush.msrb.mxu3 %v1046_v26  ;;  %v5488_v11 = vsel %vm553_vm0, %v5469_v58, %v573_v19  ;;  %v5492_v26 = vsel %vm553_vm0, 0.0, %v5469_v58  ;;  %1394 = vmatpush.msrb.mxu0 %v4469_v17  ;;  %v1039_v17 = vld [vmem:[%s9110_s3 + $0x18] sm:$0xff] }
  0x70   : > { %9409 = vst [vmem:[#allocation43_spill] sm:$0xff] %v5492_v26  ;;  %v785_v34 = vrot.slane %v5492_v26, 1  ;;  %v786_v49 = vrot.slane %v5488_v11, 1  ;;  %v1041_v26 = vld [vmem:[%s9110_s3 + $0x28] sm:$0xff]  ;;  %4868 = vmatpush.msra.mxu2 %v4467_v12 }
  0x71   : > { %1514 = vmatpush.msrb.mxu3 %v1045_v38  ;;  %v5503_v38 = vld [vmem:[%s5084_s30 + $0xf8] sm:$0xff]  ;;  %1395 = vmatpush.msrb.mxu0 %v4468_v6 }
  0x72   : > { %v606_v33 = vrot.slane %v5503_v38, 7  ;;  %v5533_v38 = vsel %vm553_vm0, %v573_v19, 0.0  ;;  %v5539_v25 = vsel %vm754_vm1, %v785_v34, %v786_v49 }
  0x73   : > { %1515 = vmatpush.msrb.mxu3 %v1044_v50  ;;  %v494_v50 = vld [vmem:[%s5084_s30 + $0x68] sm:$0xff]  ;;  %9412 = vst [vmem:[#allocation46_spill] sm:$0xff] %v5533_v38  ;;  %1396 = vmatpush.msrb.mxu0 %v4467_v12 }
  0x74   : > { %v579_v48 = vrot.slane %v494_v50, 7  ;;  %9413 = vst [vmem:[#allocation47_spill] sm:$0xff] %v5539_v25  ;;  %v5555_v50 = vld [vmem:[%s5084_s30 + $0x58] sm:$0xff] }
  0x75   : > { %1176 = vmatmul.f32.gmra.mxu0 %v5396_v24  ;;  %1301 = vmatmul.f32.gmra.mxu1 %v5481_v31  ;;  %v838_v31 = vrot.slane %v5495_v51, 1  ;;  %v576_v14 = vrot.slane %v5555_v50, 7 }
  0x76   : > { %1364 = vmatmul.f32.gmra.mxu3 %v5484_v0  ;;  %v5519_v0 = vrot.slane %v511_v1, 7  ;;  %v5529_v1 = vrot.slane %v493_v57, 7 }
  0x77   : > { %1516 = vmatpush.msrb.mxu3 %v1043_v5  ;;  %v5542_v43 = vsel %vm754_vm1, %v836_v7, %v838_v31  ;;  %v491_v5 = vld [vmem:[%s5084_s30 + $0x50] sm:$0xff]  ;;  %v1040_v7 = vld [vmem:[%s9110_s3 + $0x20] sm:$0xff]  ;;  %v5663_v23 = vsel %vm553_vm0, %v576_v14, 0.0 }
  0x78   : > { %9410 = vst [vmem:[#allocation44_spill] sm:$0xff] %v5519_v0  ;;  %v5546_v57 = vsel %vm553_vm0, 0.0, %v5519_v0  ;;  %v5552_v19 = vsel %vm553_vm0, %v5519_v0, %v606_v33  ;;  %v5569_v31 = vsel %vm553_vm0, %v5529_v1, %v579_v48  ;;  %v5590_v44 = vrot.slane %v491_v5, 7  ;;  %v470_v5 = vld [vmem:[%s5577_s8 + $0x8] sm:$0xff] }
  0x79   : > { %9411 = vst [vmem:[#allocation45_spill] sm:$0xff] %v5529_v1  ;;  %1517 = vmatpush.msrb.mxu3 %v1042_v18  ;;  %v788_v18 = vrot.slane %v5533_v38, 1  ;;  %v840_v34 = vrot.slane %v5546_v57, 1  ;;  %v841_v38 = vrot.slane %v5552_v19, 1  ;;  %v9416_v50 = vrot.slane %v5569_v31, 2 }
  0x7a   : > { %9414 = vst [vmem:[#allocation48_spill] sm:$0xff] %v5542_v43  ;;  %v5618_v59 = vsel %vm553_vm0, %v5590_v44, %v576_v14  ;;  %v478_v12 = vmul.f32 0.0, %v470_v5 }
  0x7b   : > { %9415 = vst [vmem:[#allocation49_spill] sm:$0xff] %v5552_v19  ;;  %1518 = vmatpush.msrb.mxu3 %v1041_v26  ;;  %v4466_v26 = vld [vmem:[%s9110_s3 + $0x288] sm:$0xff]  ;;  %v5608_v20 = vsel %vm754_vm1, %v786_v49, %v788_v18  ;;  %v5614_v6 = vsel %vm754_vm1, %v840_v34, %v841_v38  ;;  %v495_v49 = vld [vmem:[%s5084_s30 + $0x70] sm:$0xff]  ;;  %v496_v18 = vld [vmem:[%s5084_s30 + $0x78] sm:$0xff]  ;;  %v791_v5 = vrot.slane %v5618_v59, 1 }
  0x7c   : > { %4869 = vmatpush.msra.mxu2 %v4466_v26  ;;  %9418 = vst [vmem:[#allocation51_spill] sm:$0xff] %v5608_v20  ;;  %v1036_v34 = vld [vmem:[%s9110_s3] sm:$0xff]  ;;  %v5633_v40 = vrot.slane %v495_v49, 7  ;;  %v582_v0 = vrot.slane %v496_v18, 7  ;;  %1397 = vmatpush.msrb.mxu0 %v4466_v26 }
  0x7d   : > { %4492 = vmatmul.msk.f32.gmra.mxu0 %vm5174_vm2, %v5469_v58  ;;  %1304 = vmatmul.f32.gmra.mxu1 %v5539_v25  ;;  %v5586_v25 = vsel %vm553_vm0, %v579_v48, 0.0  ;;  %v1038_v48 = vld [vmem:[%s9110_s3 + $0x10] sm:$0xff]  ;;  %9419 = vst [vmem:[#allocation52_spill] sm:$0xff] %v5614_v6 }
  0x7e   : > { %1367 = vmatmul.f32.gmra.mxu3 %v5542_v43  ;;  %v939_v53 = vrot.slane %v5586_v25, 2  ;;  %v469_v43 = vld [vmem:[%s5577_s8] sm:$0xff]  ;;  %9420 = vst [vmem:[#allocation53_spill] sm:$0xff] %v5618_v59  ;;  %4870 = vmatpush.msra.mxu2 %v4465_v36  ;;  %v5680_v14 = vsel %vm553_vm0, %v582_v0, 0.0 }
  0x7f   : > { %1519 = vmatpush.msrb.mxu3 %v1040_v7  ;;  %9422 = vst [vmem:[#allocation55_spill] sm:$0xff] %v5633_v40  ;;  %1398 = vmatpush.msrb.mxu0 %v4465_v36 }
  0x80   : > { %v5605_v7 = vsel %vm895_vm3, %v9416_v50, %v939_v53  ;;  %v5625_v53 = vsel %vm553_vm0, %v606_v33, 0.0  ;;  %v477_v50 = vmul.f32 0.0, %v469_v43  ;;  %v5641_v43 = vsel %vm553_vm0, %v5633_v40, %v582_v0  ;;  %9428 = vst [vmem:[#allocation61_spill] sm:$0xff] %v5663_v23 }
  0x81   : > { %1520 = vmatpush.msrb.mxu3 %v1039_v17  ;;  %9417 = vst [vmem:[#allocation50_spill] sm:$0xff] %v5605_v7  ;;  %v5622_v17 = vsel %vm553_vm0, 0.0, %v5590_v44  ;;  %1444 = vmatmul.f32.vlgmr.msra.gmra.mxu2 %v5605_v7  ;;  %v843_v26 = vrot.slane %v5625_v53, 1  ;;  %v942_v49 = vrot.slane %v5641_v43, 2 }
  0x82   : > { %9421 = vst [vmem:[#allocation54_spill] sm:$0xff] %v5622_v17  ;;  %v790_v33 = vrot.slane %v5622_v17, 1  ;;  %v5651_v18 = vrot.slane %v477_v50, 7 }
  0x83   : > { %1521 = vmatpush.msrb.mxu3 %v1038_v48  ;;  %9423 = vst [vmem:[#allocation56_spill] sm:$0xff] %v5641_v43  ;;  %v5645_v48 = vsel %vm553_vm0, 0.0, %v5633_v40  ;;  %v5660_v17 = vsel %vm754_vm1, %v841_v38, %v843_v26  ;;  %v793_v38 = vrot.slane %v5663_v23, 1  ;;  %v5702_v23 = vsel %vm553_vm0, 0.0, %v5529_v1 }
  0x84   : > { %9424 = vst [vmem:[#allocation57_spill] sm:$0xff] %v5651_v18  ;;  %v5671_v36 = vsel %vm553_vm0, 0.0, %v5651_v18 }
  0x85   : > { %1182 = vmatmul.f32.gmra.mxu0 %v5488_v11  ;;  %1522 = vmatpush.msrb.mxu3 %v1037_v9  ;;  %v941_v9 = vrot.slane %v5645_v48, 2  ;;  %9427 = vst [vmem:[#allocation60_spill] sm:$0xff] %v5660_v17  ;;  %v845_v50 = vrot.slane %v5671_v36, 1 }
  0x86   : > { %1307 = vmatmul.f32.gmra.mxu1 %v5608_v20  ;;  %1370 = vmatmul.f32.gmra.mxu3 %v5614_v6  ;;  %v609_v6 = vrot.slane %v478_v12, 7  ;;  %v5657_v20 = vsel %vm754_vm1, %v790_v33, %v791_v5  ;;  %v944_v33 = vrot.slane %v5680_v14, 2  ;;  %9434 = vst [vmem:[#allocation67_spill] sm:$0xff] %v5702_v23 }
  0x87   : > { %1523 = vmatpush.msrb.mxu3 %v1036_v34  ;;  %v5654_v7 = vsel %vm895_vm3, %v941_v9, %v942_v49  ;;  %9426 = vst [vmem:[#allocation59_spill] sm:$0xff] %v5657_v20  ;;  %v5690_v9 = vsel %vm754_vm1, %v791_v5, %v793_v38 }
  0x88   : > { %9425 = vst [vmem:[#allocation58_spill] sm:$0xff] %v5654_v7  ;;  %v5667_v34 = vsel %vm553_vm0, %v5651_v18, %v609_v6  ;;  %v5687_v26 = vsel %vm895_vm3, %v942_v49, %v944_v33  ;;  %v5696_v0 = vsel %vm553_vm0, %v609_v6, 0.0 }
  0x89   : > { %9429 = vst [vmem:[#allocation62_spill] sm:$0xff] %v5667_v34  ;;  %1447 = vmatmul.f32.gmra.mxu2 %v5654_v7  ;;  %v846_v12 = vrot.slane %v5667_v34, 1  ;;  %v848_v6 = vrot.slane %v5696_v0, 1  ;;  %v458_v34 = vld [vmem:[%s5059_s24 + $0x8] sm:$0xff] }
  0x8a   : > { %9430 = vst [vmem:[#allocation63_spill] sm:$0xff] %v5687_v26 }
  0x8b   : > { %9431 = vst [vmem:[#allocation64_spill] sm:$0xff] %v5690_v9  ;;  %v5693_v7 = vsel %vm754_vm1, %v845_v50, %v846_v12  ;;  %v795_v50 = vrot.slane %v5702_v23, 1  ;;  %v5727_v18 = vsel %vm754_vm1, %v846_v12, %v848_v6 }
  0x8c   : > { %9432 = vst [vmem:[#allocation65_spill] sm:$0xff] %v5693_v7 }
  0x8d   : > { %4494 = vmatmul.msk.f32.gmra.mxu0 %vm5174_vm2, %v5590_v44  ;;  %9433 = vst [vmem:[#allocation66_spill] sm:$0xff] %v5696_v0  ;;  %v457_v0 = vld [vmem:[%s5059_s24] sm:$0xff] }
  0x8e   : > { %1310 = vmatmul.f32.gmra.mxu1 %v5657_v20  ;;  %1373 = vmatmul.f32.gmra.mxu3 %v5660_v17  ;;  %v497_v17 = vld [vmem:[%s5084_s30 + $0x80] sm:$0xff]  ;;  %v498_v20 = vld [vmem:[%s5084_s30 + $0x88] sm:$0xff]  ;;  %9438 = vst [vmem:[#allocation71_spill] sm:$0xff] %v5727_v18  ;;  %v465_v23 = vmul.f32 0.0, %v457_v0  ;;  %v952_v0 = vrot.slane %v5145_v41, 2 }
  0x8f   : > { %v5705_v49 = vrot.slane %v497_v17, 7  ;;  %v585_v33 = vrot.slane %v498_v20, 7  ;;  %v796_v20 = vrot.slane %v5569_v31, 1 }
  0x90   : > { %v5742_v6 = vrot.slane %v465_v23, 7  ;;  %v685_v23 = vsel %vm553_vm0, 0.0, %v5118_v32 }
  0x91   : > { %1450 = vmatmul.f32.gmra.mxu2 %v5687_v26  ;;  %9435 = vst [vmem:[#allocation68_spill] sm:$0xff] %v5705_v49  ;;  %v5713_v5 = vsel %vm553_vm0, %v5705_v49, %v585_v33  ;;  %v684_v38 = vsel %vm553_vm0, 0.0, %v5705_v49 }
  0x92   : > { %9436 = vst [vmem:[#allocation69_spill] sm:$0xff] %v5713_v5  ;;  %v946_v17 = vrot.slane %v684_v38, 2  ;;  %v947_v26 = vrot.slane %v5713_v5, 2 }
  0x95   : > { %1188 = vmatmul.f32.gmra.mxu0 %v5618_v59 }
  0x96   : > { %1313 = vmatmul.f32.gmra.mxu1 %v5690_v9  ;;  %1376 = vmatmul.f32.gmra.mxu3 %v5693_v7  ;;  %v5721_v9 = vsel %vm895_vm3, %v946_v17, %v947_v26  ;;  %v5724_v7 = vsel %vm754_vm1, %v795_v50, %v796_v20  ;;  %v704_v17 = vsel %vm553_vm0, %v585_v33, 0.0  ;;  %v798_v50 = vrot.slane %v5586_v25, 1 }
  0x97   : > { %9437 = vst [vmem:[#allocation70_spill] sm:$0xff] %v5721_v9  ;;  %v949_v59 = vrot.slane %v704_v17, 2  ;;  %v801_v25 = vrot.slane %v5641_v43, 1 }
  0x99   : > { %1453 = vmatmul.f32.gmra.mxu2 %v5721_v9  ;;  %v5740_v12 = vsel %vm895_vm3, %v947_v26, %v949_v59  ;;  %v5745_v9 = vsel %vm754_vm1, %v796_v20, %v798_v50  ;;  %v800_v59 = vrot.slane %v5645_v48, 1  ;;  %v951_v26 = vrot.slane %v685_v23, 2 }
  0x9b   : > { %v5762_v33 = vsel %vm895_vm3, %v951_v26, %v952_v0  ;;  %v5767_v50 = vsel %vm754_vm1, %v800_v59, %v801_v25  ;;  %v803_v26 = vrot.slane %v5680_v14, 1  ;;  %v954_v59 = vrot.slane %v5148_v42, 2 }
  0x9c   : > { %v805_v14 = vrot.slane %v684_v38, 1  ;;  %v806_v42 = vrot.slane %v5713_v5, 1 }
  0x9d   : > { %4496 = vmatmul.msk.f32.gmra.mxu0 %vm5174_vm2, %v5529_v1  ;;  %v5747_v1 = vmul.f32 0.0, %v458_v34 }
  0x9e   : > { %1316 = vmatmul.f32.gmra.mxu1 %v5724_v7  ;;  %1379 = vmatmul.f32.gmra.mxu3 %v5727_v18 }
  0x9f   : > { %v9206_v34 = vrot.slane %v5747_v1, 7 }
  0xa1   : > { %1456 = vmatmul.f32.gmra.mxu2 %v5740_v12  ;;  %v5773_v48 = vsel %vm553_vm0, %v5742_v6, %v9206_v34  ;;  %v5789_v34 = vsel %vm754_vm1, %v801_v25, %v803_v26 }
  0xa5   : > { %1194 = vmatmul.f32.gmra.mxu0 %v5569_v31 }
  0xa6   : > { %1319 = vmatmul.f32.gmra.mxu1 %v5745_v9  ;;  %4518 = vmatmul.msk.f32.vlgmr.msrb.gmra.mxu3 %vm5174_vm2, %v5742_v6 }
  0xa9   : > { %1459 = vmatmul.f32.gmra.mxu2 %v5762_v33 }
  0xaa   : > { %v5764_v20 = vpop.f32.mrf.mxu0 }
  0xab   : > { %9439 = vst [vmem:[#allocation72_spill] sm:$0xff] %v5764_v20  ;;  %v5784_v20 = vsel %vm895_vm3, %v952_v0, %v954_v59  ;;  %v956_v0 = vrot.slane %v5195_v61, 2  ;;  %v957_v59 = vrot.slane %v5191_v60, 2  ;;  %v959_v61 = vrot.slane %v5229_v10, 2 }
  0xac   : > { %9440 = vst [vmem:[#allocation73_spill] sm:$0xff] %v5784_v20  ;;  %v810_v10 = vrot.slane %v685_v23, 1 }
  0xad   : > { %4498 = vmatmul.msk.f32.gmra.mxu0 %vm5174_vm2, %v5633_v40  ;;  %v5801_v25 = vsel %vm895_vm3, %v956_v0, %v957_v59  ;;  %v5818_v38 = vsel %vm895_vm3, %v957_v59, %v959_v61  ;;  %v962_v59 = vrot.slane %v5252_v21, 2  ;;  %v9447_v61 = vrot.slane %v5145_v41, 1 }
  0xae   : > { %1322 = vmatmul.f32.gmra.mxu1 %v5767_v50  ;;  %1527 = vmatmul.f32.gmra.mxu3 %v5773_v48 }
  0xb1   : > { %1462 = vmatmul.f32.gmra.mxu2 %v5784_v20  ;;  %v5803_v26 = vpop.f32.mrf.mxu3  ;;  %v5808_v20 = vsel %vm754_vm1, %v805_v14, %v806_v42 }
  0xb2   : > { %v5786_v18 = vpop.f32.mrf.mxu0  ;;  %9442 = vst [vmem:[#allocation75_spill] sm:$0xff] %v5803_v26 }
  0xb3   : > { %9441 = vst [vmem:[#allocation74_spill] sm:$0xff] %v5786_v18 }
  0xb5   : > { %1200 = vmatmul.f32.gmra.mxu0 %v5641_v43 }
  0xb6   : > { %1325 = vmatmul.f32.gmra.mxu1 %v5789_v34  ;;  %4520 = vmatmul.msk.f32.gmra.mxu3 %vm5174_vm2, %v5115_v30  ;;  %v808_v30 = vrot.slane %v704_v17, 1  ;;  %v961_v17 = vrot.slane %v5256_v22, 2  ;;  %v964_v22 = vrot.slane %v5288_v37, 2 }
  0xb8   : > { %v5823_v14 = vsel %vm754_vm1, %v806_v42, %v808_v30  ;;  %v5836_v42 = vsel %vm895_vm3, %v961_v17, %v962_v59  ;;  %v5855_v17 = vsel %vm895_vm3, %v962_v59, %v964_v22  ;;  %v969_v22 = vrot.slane %v5344_v15, 2 }
  0xb9   : > { %1465 = vmatmul.f32.gmra.mxu2 %v5801_v25  ;;  %v5825_v26 = vpop.f32.mrf.mxu3 }
  0xba   : > { %v5805_v18 = vpop.f32.mrf.mxu0  ;;  %9445 = vst [vmem:[#allocation78_spill] sm:$0xff] %v5825_v26  ;;  %v5843_v26 = vsel %vm754_vm1, %v810_v10, %v9447_v61  ;;  %v966_v10 = vrot.slane %v5315_v55, 2  ;;  %v967_v61 = vrot.slane %v5311_v54, 2 }
  0xbb   : > { %9443 = vst [vmem:[#allocation76_spill] sm:$0xff] %v5805_v18  ;;  %v9479_v18 = vld [vmem:[#allocation66_spill] sm:$0xff] }
  0xbc   : > { %v5869_v37 = vsel %vm895_vm3, %v966_v10, %v967_v61  ;;  %v5880_v55 = vsel %vm895_vm3, %v967_v61, %v969_v22  ;;  %v971_v10 = vrot.slane %v5374_v46, 2 }
  0xbd   : > { %4500 = vmatmul.msk.f32.gmra.mxu0 %vm5174_vm2, %v5705_v49  ;;  %9451 = vst [vmem:[#allocation83_spill] sm:$0xff] %v5869_v37 }
  0xbe   : > { %1328 = vmatmul.f32.gmra.mxu1 %v5808_v20  ;;  %1533 = vmatmul.f32.gmra.mxu3 %v5137_v39  ;;  %9453 = vst [vmem:[#allocation85_spill] sm:$0xff] %v5880_v55 }
  0xc1   : > { %1468 = vmatmul.f32.gmra.mxu2 %v5818_v38  ;;  %v5849_v23 = vpop.f32.mrf.mxu3 }
  0xc2   : > { %v5820_v0 = vpop.f32.mrf.mxu0  ;;  %9448 = vst [vmem:[#allocation80_spill] sm:$0xff] %v5849_v23 }
  0xc3   : > { %9444 = vst [vmem:[#allocation77_spill] sm:$0xff] %v5820_v0 }
  0xc5   : > { %1206 = vmatmul.f32.gmra.mxu0 %v5713_v5 }
  0xc6   : > { %1331 = vmatmul.f32.gmra.mxu1 %v5823_v14  ;;  %4522 = vmatmul.msk.f32.gmra.mxu3 %vm5174_vm2, %v5211_v4 }
  0xc9   : > { %1471 = vmatmul.f32.gmra.mxu2 %v5836_v42  ;;  %v5866_v23 = vpop.f32.mrf.mxu3 }
  0xca   : > { %v5838_v30 = vpop.f32.mrf.mxu0  ;;  %9450 = vst [vmem:[#allocation82_spill] sm:$0xff] %v5866_v23 }
  0xcb   : > { %9446 = vst [vmem:[#allocation79_spill] sm:$0xff] %v5838_v30 }
  0xcd   : > { %4502 = vmatmul.msk.f32.gmra.mxu0 %vm5174_vm2, %v5118_v32 }
  0xce   : > { %1334 = vmatmul.f32.gmra.mxu1 %v5843_v26  ;;  %1539 = vmatmul.f32.gmra.mxu3 %v5222_v8 }
  0xd1   : > { %1474 = vmatmul.f32.gmra.mxu2 %v5855_v17 }
  0xd2   : > { %v5857_v30 = vpop.f32.mrf.mxu0 }
  0xd3   : > { %9449 = vst [vmem:[#allocation81_spill] sm:$0xff] %v5857_v30  ;;  %v5882_v30 = vpop.f32.mrf.mxu3 }
  0xd4   : > { %9454 = vst [vmem:[#allocation86_spill] sm:$0xff] %v5882_v30  ;;  %v974_v30 = vrot.slane %v5403_v27, 2 }
  0xd5   : > { %1212 = vmatmul.f32.gmra.mxu0 %v5145_v41 }
  0xd6   : > { %4524 = vmatmul.msk.f32.gmra.mxu3 %vm5174_vm2, %v5271_v29 }
  0xd9   : > { %1477 = vmatmul.f32.gmra.mxu2 %v5869_v37 }
  0xda   : > { %v5871_v59 = vpop.f32.mrf.mxu0 }
  0xdb   : > { %9452 = vst [vmem:[#allocation84_spill] sm:$0xff] %v5871_v59  ;;  %v972_v59 = vrot.slane %v5370_v45, 2  ;;  %v5898_v22 = vpop.f32.mrf.mxu3 }
  0xdc   : > { %9458 = vst [vmem:[#allocation90_spill] sm:$0xff] %v5898_v22  ;;  %v976_v22 = vrot.slane %v5445_v63, 2 }
  0xdd   : > { %4504 = vmatmul.msk.f32.gmra.mxu0 %vm5174_vm2, %v5165_v52  ;;  %v5894_v15 = vsel %vm895_vm3, %v971_v10, %v972_v59  ;;  %v5907_v46 = vsel %vm895_vm3, %v972_v59, %v974_v30  ;;  %v979_v59 = vrot.slane %v5495_v51, 2 }
  0xde   : > { %1545 = vmatmul.f32.gmra.mxu3 %v5281_v35  ;;  %9456 = vst [vmem:[#allocation88_spill] sm:$0xff] %v5894_v15 }
  0xdf   : > { %9459 = vst [vmem:[#allocation91_spill] sm:$0xff] %v5907_v46 }
  0xe1   : > { %1480 = vmatmul.f32.gmra.mxu2 %v5880_v55 }
  0xe2   : > { %v5884_v23 = vpop.f32.mrf.mxu0 }
  0xe3   : > { %9455 = vst [vmem:[#allocation87_spill] sm:$0xff] %v5884_v23  ;;  %v5913_v10 = vpop.f32.mrf.mxu3 }
  0xe4   : > { %9461 = vst [vmem:[#allocation93_spill] sm:$0xff] %v5913_v10 }
  0xe5   : > { %1218 = vmatmul.f32.gmra.mxu0 %v5191_v60 }
  0xe6   : > { %4526 = vmatmul.msk.f32.gmra.mxu3 %vm5174_vm2, %v5327_v3 }
  0xe9   : > { %1483 = vmatmul.f32.gmra.mxu2 %v5894_v15 }
  0xea   : > { %v5896_v61 = vpop.f32.mrf.mxu0 }
  0xeb   : > { %9457 = vst [vmem:[#allocation89_spill] sm:$0xff] %v5896_v61  ;;  %v977_v61 = vrot.slane %v5441_v62, 2  ;;  %v5931_v10 = vpop.f32.mrf.mxu3 }
  0xec   : > { %9464 = vst [vmem:[#allocation96_spill] sm:$0xff] %v5931_v10 }
  0xed   : > { %4506 = vmatmul.msk.f32.gmra.mxu0 %vm5174_vm2, %v5239_v16  ;;  %v5921_v27 = vsel %vm895_vm3, %v976_v22, %v977_v61  ;;  %v5934_v63 = vsel %vm895_vm3, %v977_v61, %v979_v59  ;;  %v981_v22 = vrot.slane %v5546_v57, 2  ;;  %v984_v59 = vrot.slane %v5625_v53, 2 }
  0xee   : > { %1551 = vmatmul.f32.gmra.mxu3 %v5337_v13  ;;  %9462 = vst [vmem:[#allocation94_spill] sm:$0xff] %v5921_v27 }
  0xef   : > { %9465 = vst [vmem:[#allocation97_spill] sm:$0xff] %v5934_v63 }
  0xf1   : > { %1486 = vmatmul.f32.gmra.mxu2 %v5907_v46 }
  0xf2   : > { %v5909_v23 = vpop.f32.mrf.mxu0 }
  0xf3   : > { %9460 = vst [vmem:[#allocation92_spill] sm:$0xff] %v5909_v23  ;;  %v5948_v10 = vpop.f32.mrf.mxu3 }
  0xf4   : > { %9468 = vst [vmem:[#allocation100_spill] sm:$0xff] %v5948_v10  ;;  %v986_v10 = vrot.slane %v5671_v36, 2 }
  0xf5   : > { %1224 = vmatmul.f32.gmra.mxu0 %v5252_v21 }
  0xf6   : > { %4528 = vmatmul.msk.f32.gmra.mxu3 %vm5174_vm2, %v5386_v2 }
  0xf9   : > { %1489 = vmatmul.f32.gmra.mxu2 %v5921_v27 }
  0xfa   : > { %v5923_v30 = vpop.f32.mrf.mxu0 }
  0xfb   : > { %9463 = vst [vmem:[#allocation95_spill] sm:$0xff] %v5923_v30  ;;  %v982_v30 = vrot.slane %v5552_v19, 2 }
  0xfd   : > { %4508 = vmatmul.msk.f32.gmra.mxu0 %vm5174_vm2, %v5298_v47  ;;  %v5946_v51 = vsel %vm895_vm3, %v981_v22, %v982_v30  ;;  %v5959_v57 = vsel %vm895_vm3, %v982_v30, %v984_v59  ;;  %v5963_v22 = vpop.f32.mrf.mxu3  ;;  %v9476_v59 = vld [vmem:[#allocation37_spill] sm:$0xff] }
  0xfe   : > { %1557 = vmatmul.f32.gmra.mxu3 %v5396_v24  ;;  %9467 = vst [vmem:[#allocation99_spill] sm:$0xff] %v5946_v51 }
  0xff   : > { %9470 = vst [vmem:[#allocation102_spill] sm:$0xff] %v5959_v57 }
 0x100   : > { %9472 = vst [vmem:[#allocation104_spill] sm:$0xff] %v5963_v22 }
 0x101   : > { %1492 = vmatmul.f32.gmra.mxu2 %v5934_v63 }
 0x102   : > { %v5936_v23 = vpop.f32.mrf.mxu0 }
 0x103   : > { %9466 = vst [vmem:[#allocation98_spill] sm:$0xff] %v5936_v23 }
 0x105   : > { %1230 = vmatmul.f32.gmra.mxu0 %v5311_v54  ;;  %v5981_v22 = vpop.f32.mrf.mxu3 }
 0x106   : > { %4530 = vmatmul.msk.f32.gmra.mxu3 %vm5174_vm2, %v5469_v58  ;;  %9477 = vst [vmem:[#allocation107_spill] sm:$0xff] %v5981_v22 }
 0x109   : > { %1495 = vmatmul.f32.gmra.mxu2 %v5946_v51 }
 0x10a   : > { %v5950_v61 = vpop.f32.mrf.mxu0 }
 0x10b   : > { %9469 = vst [vmem:[#allocation101_spill] sm:$0xff] %v5950_v61  ;;  %v9473_v61 = vld [vmem:[#allocation62_spill] sm:$0xff] }
 0x10c   : > { %v987_v0 = vrot.slane %v9473_v61, 2 }
 0x10d   : > { %4510 = vmatmul.msk.f32.gmra.mxu0 %vm5174_vm2, %v5357_v28 }
 0x10e   : > { %1563 = vmatmul.f32.gmra.mxu3 %v5488_v11  ;;  %v5973_v53 = vsel %vm895_vm3, %v986_v10, %v987_v0  ;;  %v9482_v10 = vld [vmem:[#allocation45_spill] sm:$0xff] }
 0x10f   : > { %9474 = vst [vmem:[#allocation105_spill] sm:$0xff] %v5973_v53 }
 0x111   : > { %1498 = vmatmul.f32.gmra.mxu2 %v5959_v57  ;;  %v989_v57 = vrot.slane %v9479_v18, 2  ;;  %v1067_v18 = vld [vmem:[%s9110_s3 + $0xf8] sm:$0xff] }
 0x112   : > { %v5961_v23 = vpop.f32.mrf.mxu0  ;;  %1633 = vmatpush.msra.mxu0 %v1067_v18  ;;  %v9490_v18 = vld [vmem:[#allocation57_spill] sm:$0xff] }
 0x113   : > { %9471 = vst [vmem:[#allocation103_spill] sm:$0xff] %v5961_v23  ;;  %v9478_v23 = vld [vmem:[#allocation53_spill] sm:$0xff]  ;;  %v5986_v36 = vsel %vm895_vm3, %v987_v0, %v989_v57 }
 0x114   : > { %9480 = vst [vmem:[#allocation53_spill] sm:$0xff] %v5986_v36 }
 0x115   : > { %1236 = vmatmul.f32.gmra.mxu0 %v5370_v45 }
 0x116   : > { %4532 = vmatmul.msk.f32.gmra.mxu3 %vm5174_vm2, %v5590_v44 }
 0x119   : > { %1501 = vmatmul.f32.gmra.mxu2 %v5973_v53  ;;  %v5995_v53 = vpop.f32.mrf.mxu3 }
 0x11a   : > { %v5975_v30 = vpop.f32.mrf.mxu0  ;;  %9483 = vst [vmem:[#allocation45_spill] sm:$0xff] %v5995_v53  ;;  %v1066_v53 = vld [vmem:[%s9110_s3 + $0xf0] sm:$0xff] }
 0x11b   : > { %9475 = vst [vmem:[#allocation106_spill] sm:$0xff] %v5975_v30  ;;  %v9485_v30 = vld [vmem:[#allocation44_spill] sm:$0xff]  ;;  %1634 = vmatpush.msra.mxu0 %v1066_v53  ;;  %v1064_v53 = vld [vmem:[%s9110_s3 + $0xe0] sm:$0xff] }
 0x11d   : > { %4512 = vmatmul.msk.f32.gmra.mxu0 %vm5174_vm2, %v9476_v59 }
 0x11e   : > { %1569 = vmatmul.f32.gmra.mxu3 %v9478_v23 }
 0x121   : > { %1504 = vmatmul.f32.gmra.mxu2 %v5986_v36  ;;  %v6006_v0 = vpop.f32.mrf.mxu3 }
 0x122   : > { %v5988_v51 = vpop.f32.mrf.mxu0  ;;  %9486 = vst [vmem:[#allocation44_spill] sm:$0xff] %v6006_v0  ;;  %v1065_v0 = vld [vmem:[%s9110_s3 + $0xe8] sm:$0xff] }
 0x123   : > { %9481 = vst [vmem:[#allocation66_spill] sm:$0xff] %v5988_v51  ;;  %1635 = vmatpush.msra.mxu0 %v1065_v0 }
 0x125   : > { %1242 = vmatmul.f32.gmra.mxu0 %v5441_v62 }
 0x126   : > { %4534 = vmatmul.msk.f32.gmra.mxu3 %vm5174_vm2, %v9482_v10  ;;  %1636 = vmatpush.msra.mxu0 %v1064_v53 }
 0x12a   : > { %v5997_v22 = vpop.f32.mrf.mxu0 }
 0x12b   : > { %9484 = vst [vmem:[#allocation108_spill] sm:$0xff] %v5997_v22  ;;  %v6019_v22 = vpop.f32.mrf.mxu3 }
 0x12c   : > { %9489 = vst [vmem:[#allocation111_spill] sm:$0xff] %v6019_v22  ;;  %v9492_v22 = vld [vmem:[#allocation3_spill] sm:$0xff] }
 0x12d   : > { %4514 = vmatmul.msk.f32.gmra.mxu0 %vm5174_vm2, %v9485_v30 }
 0x12e   : > { %1575 = vmatmul.f32.gmra.mxu3 %v5569_v31 }
 0x132   : > { %v6008_v57 = vpop.f32.mrf.mxu0 }
 0x133   : > { %9487 = vst [vmem:[#allocation109_spill] sm:$0xff] %v6008_v57  ;;  %v6035_v51 = vpop.f32.mrf.mxu3 }
 0x134   : > { %9493 = vst [vmem:[#allocation3_spill] sm:$0xff] %v6035_v51 }
 0x135   : > { %1248 = vmatmul.f32.gmra.mxu0 %v5552_v19 }
 0x136   : > { %4536 = vmatmul.msk.f32.gmra.mxu3 %vm5174_vm2, %v5633_v40 }
 0x13a   : > { %v6017_v36 = vpop.f32.mrf.mxu0 }
 0x13b   : > { %9488 = vst [vmem:[#allocation110_spill] sm:$0xff] %v6017_v36  ;;  %v901_v36 = vrot.slane %v9492_v22, 2  ;;  %v9495_v22 = vld [vmem:[#allocation8_spill] sm:$0xff] }
 0x13c   : > { %v904_v51 = vrot.slane %v9495_v22, 2 }
 0x13d   : > { %4516 = vmatmul.msk.f32.gmra.mxu0 %vm5174_vm2, %v9490_v18  ;;  %v902_v18 = vrot.slane %v5137_v39, 2 }
 0x13e   : > { %1581 = vmatmul.f32.gmra.mxu3 %v5641_v43 }
 0x13f   : > { %v6057_v53 = vsel %vm895_vm3, %v902_v18, %v904_v51 }
 0x142   : > { %v6028_v57 = vpop.f32.mrf.mxu0 }
 0x143   : > { %9491 = vst [vmem:[#allocation112_spill] sm:$0xff] %v6028_v57  ;;  %v6044_v57 = vsel %vm895_vm3, %v901_v36, %v902_v18  ;;  %v1062_v36 = vld [vmem:[%s9110_s3 + $0xd0] sm:$0xff]  ;;  %v1061_v18 = vld [vmem:[%s9110_s3 + $0xc8] sm:$0xff] }
 0x145   : > { %1254 = vmatmul.f32.gmra.mxu0 %v9473_v61  ;;  %v1063_v61 = vld [vmem:[%s9110_s3 + $0xd8] sm:$0xff] }
 0x146   : > { %4538 = vmatmul.msk.f32.gmra.mxu3 %vm5174_vm2, %v5705_v49  ;;  %1637 = vmatpush.msra.mxu0 %v1063_v61  ;;  %v6052_v49 = vpop.f32.mrf.mxu3  ;;  %v9498_v61 = vld [vmem:[#allocation12_spill] sm:$0xff] }
 0x147   : > { %9496 = vst [vmem:[#allocation8_spill] sm:$0xff] %v6052_v49  ;;  %v906_v22 = vrot.slane %v9498_v61, 2 }
 0x148   : > { %1638 = vmatpush.msra.mxu0 %v1062_v36  ;;  %v9501_v36 = vld [vmem:[#allocation16_spill] sm:$0xff] }
 0x149   : > { %v909_v61 = vrot.slane %v9501_v36, 2 }
 0x14a   : > { %v6041_v0 = vpop.f32.mrf.mxu0  ;;  %1639 = vmatpush.msra.mxu0 %v1061_v18  ;;  %v9504_v18 = vld [vmem:[#allocation20_spill] sm:$0xff] }
 0x14b   : > { %9494 = vst [vmem:[#allocation113_spill] sm:$0xff] %v6041_v0  ;;  %v907_v0 = vrot.slane %v5222_v8, 2  ;;  %v911_v36 = vrot.slane %v9504_v18, 2 }
 0x14d   : > { %1399 = vmatmul.f32.vlgmr.msrb.gmra.mxu0 %v6044_v57  ;;  %v6073_v51 = vsel %vm895_vm3, %v906_v22, %v907_v0  ;;  %v1060_v22 = vld [vmem:[%s9110_s3 + $0xc0] sm:$0xff] }
 0x14e   : > { %1587 = vmatmul.f32.gmra.mxu3 %v5713_v5  ;;  %v6068_v49 = vpop.f32.mrf.mxu3  ;;  %1640 = vmatpush.msra.mxu0 %v1060_v22 }
 0x14f   : > { %9499 = vst [vmem:[#allocation12_spill] sm:$0xff] %v6068_v49  ;;  %v6084_v49 = vsel %vm895_vm3, %v907_v0, %v909_v61  ;;  %v1059_v0 = vld [vmem:[%s9110_s3 + $0xb8] sm:$0xff] }
 0x150   : > { %1641 = vmatpush.msra.mxu0 %v1059_v0 }
 0x152   : > { %v6054_v39 = vpop.f32.mrf.mxu0 }
 0x153   : > { %9497 = vst [vmem:[#allocation114_spill] sm:$0xff] %v6054_v39 }
 0x155   : > { %1402 = vmatmul.f32.gmra.mxu0 %v6057_v53 }
 0x156   : > { %4540 = vmatmul.msk.f32.gmra.mxu3 %vm5174_vm2, %v5118_v32 }
 0x15a   : > { %v6070_v39 = vpop.f32.mrf.mxu0 }
 0x15b   : > { %9500 = vst [vmem:[#allocation115_spill] sm:$0xff] %v6070_v39  ;;  %v6089_v39 = vpop.f32.mrf.mxu3 }
 0x15c   : > { %9503 = vst [vmem:[#allocation116_spill] sm:$0xff] %v6089_v39  ;;  %v9507_v39 = vld [vmem:[#allocation24_spill] sm:$0xff] }
 0x15d   : > { %1405 = vmatmul.f32.gmra.mxu0 %v6073_v51  ;;  %v914_v18 = vrot.slane %v9507_v39, 2  ;;  %v917_v39 = vrot.slane %v5337_v13, 2 }
 0x15e   : > { %1593 = vmatmul.f32.gmra.mxu3 %v5145_v41 }
 0x162   : > { %v6081_v32 = vpop.f32.mrf.mxu0 }
 0x163   : > { %9502 = vst [vmem:[#allocation16_spill] sm:$0xff] %v6081_v32  ;;  %v912_v32 = vrot.slane %v5281_v35, 2  ;;  %v6106_v22 = vpop.f32.mrf.mxu3 }
 0x164   : > { %9506 = vst [vmem:[#allocation117_spill] sm:$0xff] %v6106_v22 }
 0x165   : > { %1408 = vmatmul.f32.gmra.mxu0 %v6084_v49  ;;  %v6103_v41 = vsel %vm895_vm3, %v911_v36, %v912_v32  ;;  %v9509_v36 = vld [vmem:[#allocation28_spill] sm:$0xff] }
 0x166   : > { %4542 = vmatmul.msk.f32.gmra.mxu3 %vm5174_vm2, %v5165_v52  ;;  %v1058_v52 = vld [vmem:[%s9110_s3 + $0xb0] sm:$0xff]  ;;  %v916_v0 = vrot.slane %v9509_v36, 2 }
 0x167   : > { %1642 = vmatpush.msra.mxu0 %v1058_v52  ;;  %v9512_v52 = vld [vmem:[#allocation32_spill] sm:$0xff] }
 0x16a   : > { %v6100_v61 = vpop.f32.mrf.mxu0 }
 0x16b   : > { %9505 = vst [vmem:[#allocation20_spill] sm:$0xff] %v6100_v61  ;;  %v6116_v61 = vsel %vm895_vm3, %v912_v32, %v914_v18  ;;  %v6124_v22 = vpop.f32.mrf.mxu3  ;;  %v6132_v32 = vsel %vm895_vm3, %v916_v0, %v917_v39  ;;  %v919_v18 = vrot.slane %v9512_v52, 2  ;;  %v6147_v0 = vpop.f32.mrf.mxu1 }
 0x16c   : > { %9510 = vst [vmem:[#allocation28_spill] sm:$0xff] %v6124_v22 }
 0x16d   : > { %1411 = vmatmul.f32.gmra.mxu0 %v6103_v41  ;;  %v6142_v22 = vsel %vm895_vm3, %v917_v39, %v919_v18  ;;  %9515 = vst [vmem:[#allocation120_spill] sm:$0xff] %v6147_v0  ;;  %v1055_v39 = vld [vmem:[%s9110_s3 + $0x98] sm:$0xff] }
 0x16e   : > { %1599 = vmatmul.f32.gmra.mxu3 %v5191_v60  ;;  %v1083_v18 = vld [vmem:[%s9110_s3 + $0x178] sm:$0xff] }
 0x16f   : > { %1758 = vmatpush.msrb.mxu1 %v1083_v18 }
 0x172   : > { %v6113_v5 = vpop.f32.mrf.mxu0 }
 0x173   : > { %9508 = vst [vmem:[#allocation24_spill] sm:$0xff] %v6113_v5  ;;  %v1057_v5 = vld [vmem:[%s9110_s3 + $0xa8] sm:$0xff]  ;;  %v6137_v36 = vpop.f32.mrf.mxu3 }
 0x174   : > { %1643 = vmatpush.msra.mxu0 %v1057_v5  ;;  %9513 = vst [vmem:[#allocation32_spill] sm:$0xff] %v6137_v36  ;;  %v9516_v5 = vld [vmem:[#allocation36_spill] sm:$0xff] }
 0x175   : > { %1414 = vmatmul.f32.gmra.mxu0 %v6116_v61  ;;  %v921_v52 = vrot.slane %v9516_v5, 2  ;;  %v1082_v5 = vld [vmem:[%s9110_s3 + $0x170] sm:$0xff] }
 0x176   : > { %4544 = vmatmul.msk.f32.gmra.mxu3 %vm5174_vm2, %v5239_v16  ;;  %1759 = vmatpush.msrb.mxu1 %v1082_v5  ;;  %v1054_v5 = vld [vmem:[%s9110_s3 + $0x90] sm:$0xff] }
 0x17a   : > { %v6129_v60 = vpop.f32.mrf.mxu0 }
 0x17b   : > { %9511 = vst [vmem:[#allocation118_spill] sm:$0xff] %v6129_v60  ;;  %v1056_v60 = vld [vmem:[%s9110_s3 + $0xa0] sm:$0xff]  ;;  %v6169_v0 = vpop.f32.mrf.mxu3 }
 0x17c   : > { %1644 = vmatpush.msra.mxu0 %v1056_v60  ;;  %9518 = vst [vmem:[#allocation121_spill] sm:$0xff] %v6169_v0  ;;  %v1079_v0 = vld [vmem:[%s9110_s3 + $0x158] sm:$0xff] }
 0x17d   : > { %1417 = vmatmul.f32.gmra.mxu0 %v6132_v32 }
 0x17e   : > { %1605 = vmatmul.f32.gmra.mxu3 %v5252_v21  ;;  %1645 = vmatpush.msra.mxu0 %v1055_v39  ;;  %v1081_v39 = vld [vmem:[%s9110_s3 + $0x168] sm:$0xff] }
 0x17f   : > { %1760 = vmatpush.msrb.mxu1 %v1081_v39 }
 0x180   : > { %1646 = vmatpush.msra.mxu0 %v1054_v5 }
 0x182   : > { %v6139_v16 = vpop.f32.mrf.mxu0 }
 0x183   : > { %9514 = vst [vmem:[#allocation119_spill] sm:$0xff] %v6139_v16  ;;  %v922_v16 = vrot.slane %v5396_v24, 2  ;;  %v6200_v5 = vpop.f32.mrf.mxu3 }
 0x184   : > { %9522 = vst [vmem:[#allocation123_spill] sm:$0xff] %v6200_v5 }
 0x185   : > { %1420 = vmatmul.f32.gmra.mxu0 %v6142_v22  ;;  %v6164_v36 = vsel %vm895_vm3, %v921_v52, %v922_v16  ;;  %v9520_v52 = vld [vmem:[#allocation40_spill] sm:$0xff] }
 0x186   : > { %4546 = vmatmul.msk.f32.gmra.mxu3 %vm5174_vm2, %v5298_v47  ;;  %v6174_v47 = vpop.f32.mrf.mxu1  ;;  %v924_v18 = vrot.slane %v9520_v52, 2  ;;  %v1078_v52 = vld [vmem:[%s9110_s3 + $0x150] sm:$0xff] }
 0x187   : > { %9519 = vst [vmem:[#allocation122_spill] sm:$0xff] %v6174_v47 }
 0x188   : > { %v6191_v47 = vsel %vm895_vm3, %v922_v16, %v924_v18  ;;  %v9523_v16 = vld [vmem:[#allocation43_spill] sm:$0xff]  ;;  %v927_v18 = vrot.slane %v5488_v11, 2 }
 0x18a   : > { %v6161_v60 = vpop.f32.mrf.mxu0 }
 0x18b   : > { %9517 = vst [vmem:[#allocation36_spill] sm:$0xff] %v6161_v60  ;;  %v1080_v60 = vld [vmem:[%s9110_s3 + $0x160] sm:$0xff] }
 0x18c   : > { %1761 = vmatpush.msrb.mxu1 %v1080_v60  ;;  %v1077_v60 = vld [vmem:[%s9110_s3 + $0x148] sm:$0xff] }
 0x18d   : > { %1423 = vmatmul.f32.gmra.mxu0 %v6164_v36 }
 0x18e   : > { %1611 = vmatmul.f32.gmra.mxu3 %v5311_v54  ;;  %1762 = vmatpush.msrb.mxu1 %v1079_v0  ;;  %v926_v0 = vrot.slane %v9523_v16, 2  ;;  %v6213_v54 = vpop.f32.mrf.mxu1 }
 0x18f   : > { %9524 = vst [vmem:[#allocation43_spill] sm:$0xff] %v6213_v54  ;;  %v6241_v54 = vpop.f32.mrf.mxu3 }
 0x190   : > { %1763 = vmatpush.msrb.mxu1 %v1078_v52  ;;  %v1053_v52 = vld [vmem:[%s9110_s3 + $0x88] sm:$0xff]  ;;  %v6221_v5 = vsel %vm895_vm3, %v926_v0, %v927_v18  ;;  %v4584_v0 = vld [vmem:[%s9110_s3 + $0x3f8] sm:$0xff] }
 0x191   : > { %1647 = vmatpush.msra.mxu0 %v1053_v52  ;;  %v1073_v52 = vld [vmem:[%s9110_s3 + $0x128] sm:$0xff]  ;;  %2057 = vmatpush.msra.mxu3 %v4584_v0  ;;  %v1070_v0 = vld [vmem:[%s9110_s3 + $0x110] sm:$0xff] }
 0x192   : > { %v6188_v39 = vpop.f32.mrf.mxu0  ;;  %1764 = vmatpush.msrb.mxu1 %v1077_v60  ;;  %v1075_v60 = vld [vmem:[%s9110_s3 + $0x138] sm:$0xff] }
 0x193   : > { %9521 = vst [vmem:[#allocation40_spill] sm:$0xff] %v6188_v39  ;;  %v1076_v39 = vld [vmem:[%s9110_s3 + $0x140] sm:$0xff] }
 0x194   : > { %1765 = vmatpush.msrb.mxu1 %v1076_v39  ;;  %v9526_v39 = vld [vmem:[#allocation46_spill] sm:$0xff] }
 0x195   : > { %1426 = vmatmul.f32.gmra.mxu0 %v6191_v47  ;;  %9527 = vst [vmem:[#allocation46_spill] sm:$0xff] %v6241_v54 }
 0x196   : > { %4548 = vmatmul.msk.f32.gmra.mxu3 %vm5174_vm2, %v5357_v28  ;;  %1766 = vmatpush.msrb.mxu1 %v1075_v60  ;;  %v1074_v28 = vld [vmem:[%s9110_s3 + $0x130] sm:$0xff]  ;;  %v929_v60 = vrot.slane %v9526_v39, 2  ;;  %v6246_v39 = vpop.f32.mrf.mxu1 }
 0x197   : > { %9528 = vst [vmem:[#allocation125_spill] sm:$0xff] %v6246_v39  ;;  %v932_v39 = vrot.slane %v9478_v23, 2  ;;  %v6278_v43 = vpop.f32.mrf.mxu3 }
 0x198   : > { %1767 = vmatpush.msrb.mxu1 %v1074_v28  ;;  %v1072_v28 = vld [vmem:[%s9110_s3 + $0x120] sm:$0xff]  ;;  %v6251_v21 = vsel %vm895_vm3, %v927_v18, %v929_v60  ;;  %v674_v18 = vsel %vm553_vm0, 0.0, %v5742_v6  ;;  %v4600_v60 = vld [vmem:[%s9110_s3 + $0x478] sm:$0xff] }
 0x199   : > { %v896_v54 = vrot.slane %v674_v18, 2 }
 0x19a   : > { %v6218_v16 = vpop.f32.mrf.mxu0  ;;  %1768 = vmatpush.msrb.mxu1 %v1073_v52  ;;  %v1071_v52 = vld [vmem:[%s9110_s3 + $0x118] sm:$0xff] }
 0x19b   : > { %9525 = vst [vmem:[#allocation124_spill] sm:$0xff] %v6218_v16  ;;  %v1052_v16 = vld [vmem:[%s9110_s3 + $0x80] sm:$0xff] }
 0x19c   : > { %1648 = vmatpush.msra.mxu0 %v1052_v16  ;;  %1769 = vmatpush.msrb.mxu1 %v1072_v28  ;;  %v897_v16 = vrot.slane %v5773_v48, 2  ;;  %v4568_v28 = vld [vmem:[%s9110_s3 + $0x378] sm:$0xff] }
 0x19d   : > { %1429 = vmatmul.f32.gmra.mxu0 %v6221_v5  ;;  %1932 = vmatpush.msrb.mxu2 %v4568_v28 }
 0x19e   : > { %1617 = vmatmul.f32.gmra.mxu3 %v5370_v45  ;;  %1770 = vmatpush.msrb.mxu1 %v1071_v52  ;;  %v1068_v52 = vld [vmem:[%s9110_s3 + $0x100] sm:$0xff]  ;;  %v898_v6 = vsel %vm895_vm3, %v896_v54, %v897_v16  ;;  %v6285_v27 = vpop.f32.mrf.mxu1  ;;  %v4567_v54 = vld [vmem:[%s9110_s3 + $0x370] sm:$0xff] }
 0x19f   : > { %2182 = vmatpush.msrb.mxu0 %v4600_v60  ;;  %9534 = vst [vmem:[#allocation129_spill] sm:$0xff] %v6285_v27  ;;  %v4583_v60 = vld [vmem:[%s9110_s3 + $0x3f0] sm:$0xff]  ;;  %1933 = vmatpush.msrb.mxu2 %v4567_v54 }
 0x1a0   : > { %1771 = vmatpush.msrb.mxu1 %v1070_v0  ;;  %v9530_v0 = vld [vmem:[#allocation54_spill] sm:$0xff]  ;;  %2058 = vmatpush.msra.mxu3 %v4583_v60 }
 0x1a1   : > { %v931_v28 = vrot.slane %v9530_v0, 2  ;;  %9531 = vst [vmem:[#allocation54_spill] sm:$0xff] %v6278_v43 }
 0x1a2   : > { %v6248_v45 = vpop.f32.mrf.mxu0 }
 0x1a3   : > { %9529 = vst [vmem:[#allocation126_spill] sm:$0xff] %v6248_v45  ;;  %v1069_v45 = vld [vmem:[%s9110_s3 + $0x108] sm:$0xff]  ;;  %v6283_v40 = vsel %vm895_vm3, %v931_v28, %v932_v39 }
 0x1a4   : > { %1772 = vmatpush.msrb.mxu1 %v1069_v45  ;;  %9533 = vst [vmem:[#allocation128_spill] sm:$0xff] %v6283_v40 }
 0x1a5   : > { %1432 = vmatmul.f32.gmra.mxu0 %v6251_v21 }
 0x1a6   : > { %4550 = vmatmul.msk.f32.gmra.mxu3 %vm5174_vm2, %v9476_v59  ;;  %1773 = vmatpush.msrb.mxu1 %v1068_v52  ;;  %v9535_v59 = vrot.slane %v5747_v1, 7  ;;  %v9536_v52 = vld [vmem:[#allocation61_spill] sm:$0xff]  ;;  %v6307_v43 = vpop.f32.mrf.mxu1 }
 0x1a7   : > { %1774 = vmatmul.f32.vlgmr.msrb.gmra.mxu1 %v898_v6  ;;  %v934_v28 = vrot.slane %v9536_v52, 2  ;;  %9540 = vst [vmem:[#allocation132_spill] sm:$0xff] %v6307_v43  ;;  %v4599_v52 = vld [vmem:[%s9110_s3 + $0x470] sm:$0xff] }
 0x1a8   : > { %v694_v0 = vsel %vm553_vm0, %v9535_v59, 0.0  ;;  %2183 = vmatpush.msrb.mxu0 %v4599_v52  ;;  %v4579_v43 = vld [vmem:[%s9110_s3 + $0x3d0] sm:$0xff] }
 0x1a9   : > { %v899_v45 = vrot.slane %v694_v0, 2  ;;  %v6303_v6 = vsel %vm895_vm3, %v932_v39, %v934_v28  ;;  %v4566_v28 = vld [vmem:[%s9110_s3 + $0x368] sm:$0xff] }
 0x1aa   : > { %v6280_v63 = vpop.f32.mrf.mxu0  ;;  %9538 = vst [vmem:[#allocation130_spill] sm:$0xff] %v6303_v6  ;;  %1934 = vmatpush.msrb.mxu2 %v4566_v28  ;;  %v4582_v28 = vld [vmem:[%s9110_s3 + $0x3e8] sm:$0xff] }
 0x1ab   : > { %9532 = vst [vmem:[#allocation127_spill] sm:$0xff] %v6280_v63  ;;  %v900_v1 = vsel %vm895_vm3, %v897_v16, %v899_v45  ;;  %v6305_v63 = vpop.f32.mrf.mxu3  ;;  %v9541_v16 = vld [vmem:[#allocation67_spill] sm:$0xff]  ;;  %v9543_v45 = vrot.slane %v5569_v31, 2  ;;  %2059 = vmatpush.msra.mxu3 %v4582_v28  ;;  %v4564_v28 = vld [vmem:[%s9110_s3 + $0x358] sm:$0xff] }
 0x1ac   : > { %9539 = vst [vmem:[#allocation131_spill] sm:$0xff] %v6305_v63  ;;  %v936_v54 = vrot.slane %v9541_v16, 2 }
 0x1ad   : > { %1435 = vmatmul.f32.gmra.mxu0 %v6283_v40 }
 0x1ae   : > { %1623 = vmatmul.f32.gmra.mxu3 %v5441_v62  ;;  %v6323_v60 = vsel %vm895_vm3, %v936_v54, %v9543_v45  ;;  %v6333_v52 = vpop.f32.mrf.mxu1 }
 0x1af   : > { %1777 = vmatmul.f32.gmra.mxu1 %v900_v1  ;;  %9544 = vst [vmem:[#allocation133_spill] sm:$0xff] %v6323_v60  ;;  %v756_v1 = vrot.slane %v5773_v48, 1  ;;  %v4565_v48 = vld [vmem:[%s9110_s3 + $0x360] sm:$0xff] }
 0x1b0   : > { %9546 = vst [vmem:[#allocation135_spill] sm:$0xff] %v6333_v52  ;;  %1935 = vmatpush.msrb.mxu2 %v4565_v48  ;;  %v9552_v48 = vld [vmem:[#allocation6_spill] sm:$0xff]  ;;  %v4560_v52 = vld [vmem:[%s9110_s3 + $0x338] sm:$0xff] }
 0x1b2   : > { %v6300_v59 = vpop.f32.mrf.mxu0  ;;  %1936 = vmatpush.msrb.mxu2 %v4564_v28 }
 0x1b3   : > { %9537 = vst [vmem:[#allocation61_spill] sm:$0xff] %v6300_v59  ;;  %v6330_v16 = vpop.f32.mrf.mxu3  ;;  %v9555_v59 = vld [vmem:[#allocation10_spill] sm:$0xff] }
 0x1b4   : > { %9545 = vst [vmem:[#allocation134_spill] sm:$0xff] %v6330_v16  ;;  %v4562_v16 = vld [vmem:[%s9110_s3 + $0x348] sm:$0xff] }
 0x1b5   : > { %1438 = vmatmul.f32.gmra.mxu0 %v6303_v6 }
 0x1b6   : > { %4552 = vmatmul.msk.f32.gmra.mxu3 %vm5174_vm2, %v9485_v30 }
 0x1b7   : > { %1780 = vmatmul.f32.gmra.mxu1 %v6044_v57  ;;  %v755_v57 = vrot.slane %v674_v18, 1  ;;  %v758_v18 = vrot.slane %v694_v0, 1 }
 0x1b9   : > { %v757_v45 = vsel %vm754_vm1, %v755_v57, %v756_v1  ;;  %v759_v57 = vsel %vm754_vm1, %v756_v1, %v758_v18  ;;  %v4581_v1 = vld [vmem:[%s9110_s3 + $0x3e0] sm:$0xff]  ;;  %v4563_v18 = vld [vmem:[%s9110_s3 + $0x350] sm:$0xff] }
 0x1ba   : > { %v6318_v39 = vpop.f32.mrf.mxu0  ;;  %2060 = vmatpush.msra.mxu3 %v4581_v1  ;;  %1937 = vmatpush.msrb.mxu2 %v4563_v18  ;;  %v9558_v18 = vld [vmem:[#allocation14_spill] sm:$0xff] }
 0x1bb   : > { %9542 = vst [vmem:[#allocation67_spill] sm:$0xff] %v6318_v39  ;;  %v6345_v39 = vpop.f32.mrf.mxu1  ;;  %v6378_v1 = vpop.f32.mrf.mxu3 }
 0x1bc   : > { %9548 = vst [vmem:[#allocation137_spill] sm:$0xff] %v6345_v39  ;;  %1938 = vmatpush.msrb.mxu2 %v4562_v16  ;;  %v4561_v16 = vld [vmem:[%s9110_s3 + $0x340] sm:$0xff] }
 0x1bd   : > { %1441 = vmatmul.f32.gmra.mxu0 %v6323_v60  ;;  %9556 = vst [vmem:[#allocation10_spill] sm:$0xff] %v6378_v1 }
 0x1be   : > { %1629 = vmatmul.f32.gmra.mxu3 %v5552_v19  ;;  %1939 = vmatpush.msrb.mxu2 %v4561_v16  ;;  %v4554_v19 = vld [vmem:[%s9110_s3 + $0x308] sm:$0xff] }
 0x1bf   : > { %1783 = vmatmul.f32.gmra.mxu1 %v6057_v53 }
 0x1c0   : > { %1940 = vmatpush.msrb.mxu2 %v4560_v52  ;;  %v4559_v52 = vld [vmem:[%s9110_s3 + $0x330] sm:$0xff] }
 0x1c2   : > { %v6336_v54 = vpop.f32.mrf.mxu0  ;;  %1941 = vmatpush.msrb.mxu2 %v4559_v52  ;;  %v4558_v52 = vld [vmem:[%s9110_s3 + $0x328] sm:$0xff] }
 0x1c3   : > { %9547 = vst [vmem:[#allocation136_spill] sm:$0xff] %v6336_v54  ;;  %v4598_v54 = vld [vmem:[%s9110_s3 + $0x468] sm:$0xff]  ;;  %v6395_v1 = vpop.f32.mrf.mxu3 }
 0x1c4   : > { %2184 = vmatpush.msrb.mxu0 %v4598_v54  ;;  %9561 = vst [vmem:[#allocation144_spill] sm:$0xff] %v6395_v1  ;;  %v9566_v1 = vld [vmem:[#allocation22_spill] sm:$0xff]  ;;  %1942 = vmatpush.msrb.mxu2 %v4558_v52 }
 0x1c5   : > { %1649 = vmatmul.f32.vlgmr.msra.gmra.mxu0 %v757_v45  ;;  %v6360_v45 = vpop.f32.mrf.mxu1  ;;  %v4557_v52 = vld [vmem:[%s9110_s3 + $0x320] sm:$0xff] }
 0x1c6   : > { %9551 = vst [vmem:[#allocation140_spill] sm:$0xff] %v6360_v45  ;;  %v4596_v45 = vld [vmem:[%s9110_s3 + $0x458] sm:$0xff]  ;;  %1943 = vmatpush.msrb.mxu2 %v4557_v52 }
 0x1c7   : > { %1786 = vmatmul.f32.gmra.mxu1 %v6073_v51 }
 0x1ca   : > { %v6348_v53 = vpop.f32.mrf.mxu0 }
 0x1cb   : > { %9549 = vst [vmem:[#allocation138_spill] sm:$0xff] %v6348_v53  ;;  %v6409_v39 = vpop.f32.mrf.mxu3 }
 0x1cc   : > { %9565 = vst [vmem:[#allocation146_spill] sm:$0xff] %v6409_v39  ;;  %v9570_v39 = vld [vmem:[#allocation26_spill] sm:$0xff] }
 0x1cd   : > { %1652 = vmatmul.f32.gmra.mxu0 %v759_v57  ;;  %v4597_v57 = vld [vmem:[%s9110_s3 + $0x460] sm:$0xff]  ;;  %v6375_v28 = vpop.f32.mrf.mxu1 }
 0x1ce   : > { %2185 = vmatpush.msrb.mxu0 %v4597_v57  ;;  %9554 = vst [vmem:[#allocation141_spill] sm:$0xff] %v6375_v28  ;;  %v4580_v57 = vld [vmem:[%s9110_s3 + $0x3d8] sm:$0xff]  ;;  %v9562_v28 = vld [vmem:[#allocation18_spill] sm:$0xff] }
 0x1cf   : > { %1789 = vmatmul.f32.gmra.mxu1 %v6084_v49  ;;  %2061 = vmatpush.msra.mxu3 %v4580_v57 }
 0x1d0   : > { %2186 = vmatpush.msrb.mxu0 %v4596_v45 }
 0x1d1   : > { %2062 = vmatpush.msra.mxu3 %v4579_v43 }
 0x1d2   : > { %v6358_v0 = vpop.f32.mrf.mxu0 }
 0x1d3   : > { %9550 = vst [vmem:[#allocation139_spill] sm:$0xff] %v6358_v0 }
 0x1d5   : > { %1655 = vmatmul.f32.gmra.mxu0 %v9552_v48  ;;  %v6390_v63 = vpop.f32.mrf.mxu1 }
 0x1d6   : > { %9559 = vst [vmem:[#allocation14_spill] sm:$0xff] %v6390_v63 }
 0x1d7   : > { %1792 = vmatmul.f32.gmra.mxu1 %v6103_v41 }
 0x1da   : > { %v6367_v54 = vpop.f32.mrf.mxu0 }
 0x1db   : > { %9553 = vst [vmem:[#allocation6_spill] sm:$0xff] %v6367_v54  ;;  %v9588_v54 = vld [vmem:[#allocation41_spill] sm:$0xff] }
 0x1dd   : > { %1658 = vmatmul.f32.gmra.mxu0 %v9555_v59  ;;  %v6404_v57 = vpop.f32.mrf.mxu1 }
 0x1de   : > { %9563 = vst [vmem:[#allocation18_spill] sm:$0xff] %v6404_v57  ;;  %v6423_v57 = vpop.f32.mrf.mxu2 }
 0x1df   : > { %1795 = vmatmul.f32.gmra.mxu1 %v6116_v61  ;;  %9569 = vst [vmem:[#allocation148_spill] sm:$0xff] %v6423_v57  ;;  %v9574_v57 = vld [vmem:[#allocation30_spill] sm:$0xff] }
 0x1e2   : > { %v6381_v48 = vpop.f32.mrf.mxu0 }
 0x1e3   : > { %9557 = vst [vmem:[#allocation142_spill] sm:$0xff] %v6381_v48  ;;  %v9583_v48 = vld [vmem:[#allocation38_spill] sm:$0xff] }
 0x1e5   : > { %1661 = vmatmul.f32.gmra.mxu0 %v9558_v18  ;;  %v6421_v16 = vpop.f32.mrf.mxu1 }
 0x1e6   : > { %9568 = vst [vmem:[#allocation147_spill] sm:$0xff] %v6421_v16 }
 0x1e7   : > { %1798 = vmatmul.f32.gmra.mxu1 %v6132_v32 }
 0x1ea   : > { %v6393_v59 = vpop.f32.mrf.mxu0 }
 0x1eb   : > { %9560 = vst [vmem:[#allocation143_spill] sm:$0xff] %v6393_v59  ;;  %v6429_v59 = vpop.f32.mrf.mxu3 }
 0x1ec   : > { %9571 = vst [vmem:[#allocation26_spill] sm:$0xff] %v6429_v59  ;;  %v4578_v59 = vld [vmem:[%s9110_s3 + $0x3c8] sm:$0xff] }
 0x1ed   : > { %1664 = vmatmul.f32.gmra.mxu0 %v9562_v28  ;;  %v6437_v16 = vpop.f32.mrf.mxu1  ;;  %2063 = vmatpush.msra.mxu3 %v4578_v59 }
 0x1ee   : > { %9573 = vst [vmem:[#allocation150_spill] sm:$0xff] %v6437_v16  ;;  %v9578_v16 = vld [vmem:[#allocation34_spill] sm:$0xff] }
 0x1ef   : > { %1801 = vmatmul.f32.gmra.mxu1 %v6142_v22 }
 0x1f2   : > { %v6407_v63 = vpop.f32.mrf.mxu0 }
 0x1f3   : > { %9564 = vst [vmem:[#allocation145_spill] sm:$0xff] %v6407_v63  ;;  %v4595_v63 = vld [vmem:[%s9110_s3 + $0x450] sm:$0xff]  ;;  %v6442_v27 = vpop.f32.mrf.mxu3 }
 0x1f4   : > { %2187 = vmatpush.msrb.mxu0 %v4595_v63  ;;  %9576 = vst [vmem:[#allocation151_spill] sm:$0xff] %v6442_v27 }
 0x1f5   : > { %1667 = vmatmul.f32.gmra.mxu0 %v9566_v1 }
 0x1f7   : > { %1804 = vmatmul.f32.gmra.mxu1 %v6164_v36 }
 0x1fa   : > { %v6419_v45 = vpop.f32.mrf.mxu0 }
 0x1fb   : > { %9567 = vst [vmem:[#allocation22_spill] sm:$0xff] %v6419_v45  ;;  %v6440_v45 = vpop.f32.mrf.mxu2  ;;  %v6464_v59 = vpop.f32.mrf.mxu3 }
 0x1fc   : > { %9575 = vst [vmem:[#allocation30_spill] sm:$0xff] %v6440_v45 }
 0x1fd   : > { %1670 = vmatmul.f32.gmra.mxu0 %v9570_v39  ;;  %9582 = vst [vmem:[#allocation155_spill] sm:$0xff] %v6464_v59  ;;  %v4577_v59 = vld [vmem:[%s9110_s3 + $0x3c0] sm:$0xff] }
 0x1fe   : > { %2064 = vmatpush.msra.mxu3 %v4577_v59 }
 0x1ff   : > { %1807 = vmatmul.f32.gmra.mxu1 %v6191_v47 }
 0x202   : > { %v6432_v43 = vpop.f32.mrf.mxu0 }
 0x203   : > { %9572 = vst [vmem:[#allocation149_spill] sm:$0xff] %v6432_v43  ;;  %v6454_v43 = vpop.f32.mrf.mxu1  ;;  %v6456_v45 = vpop.f32.mrf.mxu2 }
 0x204   : > { %9579 = vst [vmem:[#allocation34_spill] sm:$0xff] %v6454_v43 }
 0x205   : > { %1673 = vmatmul.f32.gmra.mxu0 %v9574_v57  ;;  %9580 = vst [vmem:[#allocation153_spill] sm:$0xff] %v6456_v45 }
 0x207   : > { %1810 = vmatmul.f32.gmra.mxu1 %v6221_v5 }
 0x20a   : > { %v6445_v63 = vpop.f32.mrf.mxu0 }
 0x20b   : > { %9577 = vst [vmem:[#allocation152_spill] sm:$0xff] %v6445_v63  ;;  %v4594_v63 = vld [vmem:[%s9110_s3 + $0x448] sm:$0xff]  ;;  %v6470_v43 = vpop.f32.mrf.mxu1 }
 0x20c   : > { %2188 = vmatpush.msrb.mxu0 %v4594_v63  ;;  %9584 = vst [vmem:[#allocation38_spill] sm:$0xff] %v6470_v43  ;;  %v6480_v63 = vpop.f32.mrf.mxu3  ;;  %v4556_v43 = vld [vmem:[%s9110_s3 + $0x318] sm:$0xff] }
 0x20d   : > { %1676 = vmatmul.f32.gmra.mxu0 %v9578_v16  ;;  %9587 = vst [vmem:[#allocation158_spill] sm:$0xff] %v6480_v63  ;;  %1944 = vmatpush.msrb.mxu2 %v4556_v43  ;;  %v9592_v63 = vld [vmem:[#allocation47_spill] sm:$0xff]  ;;  %v4555_v43 = vld [vmem:[%s9110_s3 + $0x310] sm:$0xff] }
 0x20f   : > { %1813 = vmatmul.f32.gmra.mxu1 %v6251_v21  ;;  %1945 = vmatpush.msrb.mxu2 %v4555_v43 }
 0x211   : > { %1946 = vmatpush.msrb.mxu2 %v4554_v19  ;;  %v4574_v19 = vld [vmem:[%s9110_s3 + $0x3a8] sm:$0xff] }
 0x212   : > { %v6459_v27 = vpop.f32.mrf.mxu0 }
 0x213   : > { %9581 = vst [vmem:[#allocation154_spill] sm:$0xff] %v6459_v27  ;;  %v6475_v27 = vpop.f32.mrf.mxu2 }
 0x214   : > { %9586 = vst [vmem:[#allocation157_spill] sm:$0xff] %v6475_v27  ;;  %v4593_v27 = vld [vmem:[%s9110_s3 + $0x440] sm:$0xff]  ;;  %v6497_v0 = vpop.f32.mrf.mxu3 }
 0x215   : > { %1679 = vmatmul.f32.gmra.mxu0 %v9583_v48  ;;  %9593 = vst [vmem:[#allocation47_spill] sm:$0xff] %v6497_v0 }
 0x216   : > { %2189 = vmatpush.msrb.mxu0 %v4593_v27  ;;  %v4576_v27 = vld [vmem:[%s9110_s3 + $0x3b8] sm:$0xff] }
 0x217   : > { %1816 = vmatmul.f32.gmra.mxu1 %v6283_v40  ;;  %2065 = vmatpush.msra.mxu3 %v4576_v27  ;;  %v4575_v40 = vld [vmem:[%s9110_s3 + $0x3b0] sm:$0xff] }
 0x219   : > { %2066 = vmatpush.msra.mxu3 %v4575_v40  ;;  %v4572_v40 = vld [vmem:[%s9110_s3 + $0x398] sm:$0xff] }
 0x21a   : > { %v6473_v45 = vpop.f32.mrf.mxu0 }
 0x21b   : > { %9585 = vst [vmem:[#allocation156_spill] sm:$0xff] %v6473_v45  ;;  %v6489_v45 = vpop.f32.mrf.mxu1  ;;  %v6494_v59 = vpop.f32.mrf.mxu2  ;;  %2067 = vmatpush.msra.mxu3 %v4574_v19  ;;  %v4591_v19 = vld [vmem:[%s9110_s3 + $0x430] sm:$0xff] }
 0x21c   : > { %9590 = vst [vmem:[#allocation159_spill] sm:$0xff] %v6489_v45  ;;  %v6513_v0 = vpop.f32.mrf.mxu3  ;;  %v9599_v45 = vld [vmem:[#allocation50_spill] sm:$0xff] }
 0x21d   : > { %1682 = vmatmul.f32.gmra.mxu0 %v9588_v54  ;;  %9591 = vst [vmem:[#allocation160_spill] sm:$0xff] %v6494_v59 }
 0x21e   : > { %9598 = vst [vmem:[#allocation163_spill] sm:$0xff] %v6513_v0  ;;  %v9604_v0 = vld [vmem:[#allocation58_spill] sm:$0xff] }
 0x21f   : > { %1819 = vmatmul.f32.gmra.mxu1 %v6303_v6  ;;  %v9596_v6 = vld [vmem:[#allocation51_spill] sm:$0xff] }
 0x222   : > { %v6484_v52 = vpop.f32.mrf.mxu0 }
 0x223   : > { %9589 = vst [vmem:[#allocation41_spill] sm:$0xff] %v6484_v52  ;;  %v6502_v53 = vpop.f32.mrf.mxu1  ;;  %v6511_v59 = vpop.f32.mrf.mxu2 }
 0x224   : > { %9595 = vst [vmem:[#allocation162_spill] sm:$0xff] %v6502_v53  ;;  %v9601_v53 = vld [vmem:[#allocation59_spill] sm:$0xff] }
 0x225   : > { %1685 = vmatmul.f32.gmra.mxu0 %v9592_v63  ;;  %9597 = vst [vmem:[#allocation51_spill] sm:$0xff] %v6511_v59 }
 0x227   : > { %1822 = vmatmul.f32.gmra.mxu1 %v6323_v60  ;;  %v4592_v60 = vld [vmem:[%s9110_s3 + $0x438] sm:$0xff] }
 0x228   : > { %2190 = vmatpush.msrb.mxu0 %v4592_v60  ;;  %v4553_v60 = vld [vmem:[%s9110_s3 + $0x300] sm:$0xff] }
 0x229   : > { %1947 = vmatpush.msrb.mxu2 %v4553_v60 }
 0x22a   : > { %v6500_v52 = vpop.f32.mrf.mxu0  ;;  %4602 = vmatmul.msk.f32.vlgmr.msrb.gmra.mxu2 %vm5174_vm2, %v5211_v4  ;;  %v4571_v4 = vld [vmem:[%s9110_s3 + $0x390] sm:$0xff]  ;;  %2191 = vmatpush.msrb.mxu0 %v4591_v19  ;;  %v4670_v19 = vld [vmem:[%s9112_s5 + $0x278] sm:$0xff] }
 0x22b   : > { %9594 = vst [vmem:[#allocation161_spill] sm:$0xff] %v6500_v52  ;;  %v6525_v43 = vpop.f32.mrf.mxu1  ;;  %v6527_v27 = vpop.f32.mrf.mxu2  ;;  %3197 = vmatpush.msra.mxu2 %v4670_v19  ;;  %v4590_v19 = vld [vmem:[%s9110_s3 + $0x428] sm:$0xff] }
 0x22c   : > { %9602 = vst [vmem:[#allocation59_spill] sm:$0xff] %v6525_v43  ;;  %2192 = vmatpush.msrb.mxu0 %v4590_v19  ;;  %v4669_v19 = vld [vmem:[%s9112_s5 + $0x270] sm:$0xff] }
 0x22d   : > { %1688 = vmatmul.f32.gmra.mxu0 %v9596_v6  ;;  %9603 = vst [vmem:[#allocation165_spill] sm:$0xff] %v6527_v27  ;;  %v9609_v27 = vld [vmem:[#allocation63_spill] sm:$0xff]  ;;  %3198 = vmatpush.msra.mxu2 %v4669_v19 }
 0x22f   : > { %1825 = vmatmul.f32.gmra.mxu1 %v9599_v45  ;;  %v9607_v45 = vld [vmem:[#allocation64_spill] sm:$0xff] }
 0x232   : > { %v6516_v52 = vpop.f32.mrf.mxu0  ;;  %1951 = vmatmul.f32.gmra.mxu2 %v5222_v8 }
 0x233   : > { %9600 = vst [vmem:[#allocation164_spill] sm:$0xff] %v6516_v52  ;;  %v6532_v52 = vpop.f32.mrf.mxu3 }
 0x234   : > { %9606 = vst [vmem:[#allocation167_spill] sm:$0xff] %v6532_v52  ;;  %v6547_v52 = vpop.f32.mrf.mxu1 }
 0x235   : > { %1691 = vmatmul.f32.gmra.mxu0 %v9601_v53  ;;  %9608 = vst [vmem:[#allocation64_spill] sm:$0xff] %v6547_v52 }
 0x237   : > { %1828 = vmatmul.f32.gmra.mxu1 %v9604_v0  ;;  %v6555_v0 = vpop.f32.mrf.mxu2 }
 0x238   : > { %9610 = vst [vmem:[#allocation63_spill] sm:$0xff] %v6555_v0  ;;  %v4569_v0 = vld [vmem:[%s9110_s3 + $0x380] sm:$0xff] }
 0x23a   : > { %v6530_v59 = vpop.f32.mrf.mxu0  ;;  %4604 = vmatmul.msk.f32.gmra.mxu2 %vm5174_vm2, %v5271_v29 }
 0x23b   : > { %9605 = vst [vmem:[#allocation166_spill] sm:$0xff] %v6530_v59  ;;  %v4573_v59 = vld [vmem:[%s9110_s3 + $0x3a0] sm:$0xff]  ;;  %v6560_v60 = vpop.f32.mrf.mxu3 }
 0x23c   : > { %2068 = vmatpush.msra.mxu3 %v4573_v59  ;;  %9611 = vst [vmem:[#allocation168_spill] sm:$0xff] %v6560_v60  ;;  %v4570_v59 = vld [vmem:[%s9110_s3 + $0x388] sm:$0xff]  ;;  %v9612_v60 = vld [vmem:[#allocation70_spill] sm:$0xff]  ;;  %v6579_v52 = vpop.f32.mrf.mxu1 }
 0x23d   : > { %1694 = vmatmul.f32.gmra.mxu0 %v9607_v45  ;;  %9613 = vst [vmem:[#allocation70_spill] sm:$0xff] %v6579_v52 }
 0x23e   : > { %2069 = vmatpush.msra.mxu3 %v4572_v40 }
 0x23f   : > { %1831 = vmatmul.f32.gmra.mxu1 %v9609_v27  ;;  %v6585_v8 = vpop.f32.mrf.mxu2 }
 0x240   : > { %2070 = vmatpush.msra.mxu3 %v4571_v4  ;;  %9614 = vst [vmem:[#allocation169_spill] sm:$0xff] %v6585_v8  ;;  %v4654_v4 = vld [vmem:[%s9112_s5 + $0x1f8] sm:$0xff] }
 0x241   : > { %3084 = vmatpush.msra.mxu1 %v4654_v4 }
 0x242   : > { %v6550_v43 = vpop.f32.mrf.mxu0  ;;  %2071 = vmatpush.msra.mxu3 %v4570_v59  ;;  %1957 = vmatmul.f32.gmra.mxu2 %v5281_v35  ;;  %v4653_v35 = vld [vmem:[%s9112_s5 + $0x1f0] sm:$0xff] }
 0x243   : > { %v6591_v59 = vpop.f32.mrf.mxu3  ;;  %3085 = vmatpush.msra.mxu1 %v4653_v35  ;;  %v4589_v35 = vld [vmem:[%s9110_s3 + $0x420] sm:$0xff] }
 0x244   : > { %2072 = vmatpush.msra.mxu3 %v4569_v0  ;;  %9615 = vst [vmem:[#allocation170_spill] sm:$0xff] %v6591_v59  ;;  %2193 = vmatpush.msrb.mxu0 %v4589_v35 }
 0x245   : > { %1697 = vmatmul.f32.gmra.mxu0 %v5724_v7  ;;  %2073 = vmatmul.f32.vlgmr.msra.gmra.mxu3 %v9558_v18  ;;  %v6599_v18 = vpop.f32.mrf.mxu1 }
 0x247   : > { %1834 = vmatmul.f32.gmra.mxu1 %v9612_v60  ;;  %v6606_v4 = vpop.f32.mrf.mxu2 }
 0x248   : > { %9616 = vst [vmem:[#allocation171_spill] sm:$0xff] %v6606_v4 }
 0x24a   : > { %v6574_v40 = vpop.f32.mrf.mxu0  ;;  %4606 = vmatmul.msk.f32.gmra.mxu2 %vm5174_vm2, %v5327_v3 }
 0x24b   : > { %v6609_v29 = vpop.f32.mrf.mxu3 }
 0x24c   : > { %9617 = vst [vmem:[#allocation172_spill] sm:$0xff] %v6609_v29 }
 0x24d   : > { %1700 = vmatmul.f32.gmra.mxu0 %v5745_v9  ;;  %2076 = vmatmul.f32.gmra.mxu3 %v9562_v28  ;;  %v6615_v28 = vpop.f32.mrf.mxu1 }
 0x24f   : > { %1837 = vmatmul.f32.gmra.mxu1 %v5740_v12  ;;  %v6627_v29 = vpop.f32.mrf.mxu2 }
 0x250   : > { %9618 = vst [vmem:[#allocation173_spill] sm:$0xff] %v6627_v29  ;;  %v9626_v29 = vld [vmem:[#allocation7_spill] sm:$0xff] }
 0x252   : > { %v6597_v0 = vpop.f32.mrf.mxu0  ;;  %1963 = vmatmul.f32.gmra.mxu2 %v5337_v13  ;;  %v4668_v13 = vld [vmem:[%s9112_s5 + $0x268] sm:$0xff] }
 0x253   : > { %v6632_v8 = vpop.f32.mrf.mxu3  ;;  %3199 = vmatpush.msra.mxu2 %v4668_v13 }
 0x255   : > { %1703 = vmatmul.f32.gmra.mxu0 %v5767_v50  ;;  %2079 = vmatmul.f32.gmra.mxu3 %v9566_v1  ;;  %v9619_v1 = vld [vmem:[#allocation73_spill] sm:$0xff]  ;;  %v6636_v52 = vpop.f32.mrf.mxu1 }
 0x256   : > { %9620 = vst [vmem:[#allocation73_spill] sm:$0xff] %v6632_v8 }
 0x257   : > { %1840 = vmatmul.f32.gmra.mxu1 %v5762_v33  ;;  %v6642_v3 = vpop.f32.mrf.mxu2 }
 0x258   : > { %9621 = vst [vmem:[#allocation174_spill] sm:$0xff] %v6642_v3 }
 0x25a   : > { %v6612_v59 = vpop.f32.mrf.mxu0  ;;  %4608 = vmatmul.msk.f32.gmra.mxu2 %vm5174_vm2, %v5386_v2 }
 0x25d   : > { %1706 = vmatmul.f32.gmra.mxu0 %v5789_v34  ;;  %2082 = vmatmul.f32.gmra.mxu3 %v9570_v39  ;;  %v6648_v39 = vpop.f32.mrf.mxu3  ;;  %v6657_v3 = vpop.f32.mrf.mxu1 }
 0x25e   : > { %9622 = vst [vmem:[#allocation175_spill] sm:$0xff] %v6648_v39 }
 0x25f   : > { %1843 = vmatmul.f32.gmra.mxu1 %v9619_v1  ;;  %v6666_v35 = vpop.f32.mrf.mxu2 }
 0x260   : > { %9623 = vst [vmem:[#allocation176_spill] sm:$0xff] %v6666_v35 }
 0x262   : > { %v6630_v4 = vpop.f32.mrf.mxu0  ;;  %1969 = vmatmul.f32.gmra.mxu2 %v5396_v24 }
 0x265   : > { %1709 = vmatmul.f32.gmra.mxu0 %v5808_v20  ;;  %2085 = vmatmul.f32.gmra.mxu3 %v9574_v57  ;;  %v4652_v57 = vld [vmem:[%s9112_s5 + $0x1e8] sm:$0xff]  ;;  %v6669_v13 = vpop.f32.mrf.mxu3  ;;  %v6675_v39 = vpop.f32.mrf.mxu1 }
 0x266   : > { %3086 = vmatpush.msra.mxu1 %v4652_v57  ;;  %9624 = vst [vmem:[#allocation177_spill] sm:$0xff] %v6669_v13  ;;  %v4667_v57 = vld [vmem:[%s9112_s5 + $0x260] sm:$0xff] }
 0x267   : > { %1846 = vmatmul.f32.gmra.mxu1 %v5801_v25  ;;  %3200 = vmatpush.msra.mxu2 %v4667_v57  ;;  %v6685_v24 = vpop.f32.mrf.mxu2 }
 0x268   : > { %9627 = vst [vmem:[#allocation7_spill] sm:$0xff] %v6685_v24  ;;  %v4587_v24 = vld [vmem:[%s9110_s3 + $0x410] sm:$0xff] }
 0x26a   : > { %v6640_v19 = vpop.f32.mrf.mxu0  ;;  %4610 = vmatmul.msk.f32.gmra.mxu2 %vm5174_vm2, %v5469_v58 }
 0x26d   : > { %1712 = vmatmul.f32.gmra.mxu0 %v5823_v14  ;;  %2088 = vmatmul.f32.gmra.mxu3 %v9578_v16  ;;  %v4588_v16 = vld [vmem:[%s9110_s3 + $0x418] sm:$0xff]  ;;  %v6690_v13 = vpop.f32.mrf.mxu3  ;;  %v6696_v35 = vpop.f32.mrf.mxu1 }
 0x26e   : > { %2194 = vmatpush.msrb.mxu0 %v4588_v16  ;;  %9628 = vst [vmem:[#allocation179_spill] sm:$0xff] %v6690_v13  ;;  %v4651_v16 = vld [vmem:[%s9112_s5 + $0x1e0] sm:$0xff] }
 0x26f   : > { %1849 = vmatmul.f32.gmra.mxu1 %v5818_v38  ;;  %v6703_v58 = vpop.f32.mrf.mxu2 }
 0x270   : > { %3087 = vmatpush.msra.mxu1 %v4651_v16  ;;  %2195 = vmatpush.msrb.mxu0 %v4587_v24 }
 0x272   : > { %v6660_v8 = vpop.f32.mrf.mxu0  ;;  %1975 = vmatmul.f32.gmra.mxu2 %v5488_v11 }
 0x275   : > { %1715 = vmatmul.f32.gmra.mxu0 %v5843_v26  ;;  %2091 = vmatmul.f32.gmra.mxu3 %v9583_v48  ;;  %v6708_v13 = vpop.f32.mrf.mxu3  ;;  %v6715_v16 = vpop.f32.mrf.mxu1 }
 0x276   : > { %9632 = vst [vmem:[#allocation181_spill] sm:$0xff] %v6708_v13 }
 0x277   : > { %1852 = vmatmul.f32.gmra.mxu1 %v5836_v42  ;;  %v6723_v13 = vpop.f32.mrf.mxu2 }
 0x278   : > { %9635 = vst [vmem:[#allocation182_spill] sm:$0xff] %v6723_v13 }
 0x27a   : > { %v6673_v2 = vpop.f32.mrf.mxu0  ;;  %4612 = vmatmul.msk.f32.gmra.mxu2 %vm5174_vm2, %v5590_v44  ;;  %v4650_v44 = vld [vmem:[%s9112_s5 + $0x1d8] sm:$0xff] }
 0x27b   : > { %9625 = vst [vmem:[#allocation178_spill] sm:$0xff] %v6673_v2  ;;  %v9629_v2 = vld [vmem:[#allocation11_spill] sm:$0xff]  ;;  %3088 = vmatpush.msra.mxu1 %v4650_v44 }
 0x27c   : > { %9630 = vst [vmem:[#allocation11_spill] sm:$0xff] %v6703_v58  ;;  %v9637_v58 = vld [vmem:[#allocation19_spill] sm:$0xff] }
 0x27d   : > { %1718 = vmatmul.f32.gmra.mxu0 %v9626_v29  ;;  %2094 = vmatmul.f32.gmra.mxu3 %v9588_v54  ;;  %v9633_v54 = vld [vmem:[#allocation15_spill] sm:$0xff]  ;;  %v6729_v24 = vpop.f32.mrf.mxu3 }
 0x27e   : > { %9636 = vst [vmem:[#allocation183_spill] sm:$0xff] %v6729_v24  ;;  %v4586_v24 = vld [vmem:[%s9110_s3 + $0x408] sm:$0xff] }
 0x27f   : > { %1855 = vmatmul.f32.gmra.mxu1 %v5855_v17  ;;  %2196 = vmatpush.msrb.mxu0 %v4586_v24  ;;  %v4665_v24 = vld [vmem:[%s9112_s5 + $0x250] sm:$0xff] }
 0x282   : > { %v6693_v48 = vpop.f32.mrf.mxu0  ;;  %1981 = vmatmul.f32.gmra.mxu2 %v9478_v23 }
 0x285   : > { %1721 = vmatmul.f32.gmra.mxu0 %v9629_v2  ;;  %2097 = vmatmul.f32.gmra.mxu3 %v9592_v63  ;;  %v4666_v63 = vld [vmem:[%s9112_s5 + $0x258] sm:$0xff]  ;;  %v6748_v44 = vpop.f32.mrf.mxu3 }
 0x286   : > { %3201 = vmatpush.msra.mxu2 %v4666_v63  ;;  %v9640_v63 = vld [vmem:[#allocation23_spill] sm:$0xff] }
 0x287   : > { %1858 = vmatmul.f32.gmra.mxu1 %v5869_v37  ;;  %9641 = vst [vmem:[#allocation23_spill] sm:$0xff] %v6748_v44  ;;  %v4649_v44 = vld [vmem:[%s9112_s5 + $0x1d0] sm:$0xff] }
 0x288   : > { %3202 = vmatpush.msra.mxu2 %v4665_v24  ;;  %3089 = vmatpush.msra.mxu1 %v4649_v44  ;;  %v9652_v24 = vld [vmem:[#allocation97_spill] sm:$0xff] }
 0x28a   : > { %v6706_v57 = vpop.f32.mrf.mxu0  ;;  %4614 = vmatmul.msk.f32.gmra.mxu2 %vm5174_vm2, %v9482_v10 }
 0x28b   : > { %9631 = vst [vmem:[#allocation180_spill] sm:$0xff] %v6706_v57 }
 0x28d   : > { %1724 = vmatmul.f32.gmra.mxu0 %v9633_v54  ;;  %2100 = vmatmul.f32.gmra.mxu3 %v9596_v6  ;;  %v6742_v6 = vpop.f32.mrf.mxu2 }
 0x28e   : > { %9639 = vst [vmem:[#allocation184_spill] sm:$0xff] %v6742_v6  ;;  %v9643_v6 = vld [vmem:[#allocation27_spill] sm:$0xff] }
 0x28f   : > { %1861 = vmatmul.f32.gmra.mxu1 %v5880_v55  ;;  %v9650_v55 = vld [vmem:[#allocation55_spill] sm:$0xff] }
 0x292   : > { %v6721_v11 = vpop.f32.mrf.mxu0  ;;  %1987 = vmatmul.f32.gmra.mxu2 %v5569_v31 }
 0x293   : > { %9634 = vst [vmem:[#allocation15_spill] sm:$0xff] %v6721_v11  ;;  %v6736_v11 = vpop.f32.mrf.mxu1 }
 0x295   : > { %1727 = vmatmul.f32.gmra.mxu0 %v9637_v58  ;;  %2103 = vmatmul.f32.gmra.mxu3 %v9601_v53  ;;  %v6766_v10 = vpop.f32.mrf.mxu2 }
 0x296   : > { %9644 = vst [vmem:[#allocation27_spill] sm:$0xff] %v6766_v10  ;;  %v9655_v10 = vld [vmem:[#allocation35_spill] sm:$0xff] }
 0x297   : > { %1864 = vmatmul.f32.gmra.mxu1 %v5894_v15  ;;  %v9649_v15 = vld [vmem:[#allocation31_spill] sm:$0xff] }
 0x29a   : > { %v6739_v13 = vpop.f32.mrf.mxu0  ;;  %4616 = vmatmul.msk.f32.gmra.mxu2 %vm5174_vm2, %v9650_v55  ;;  %v4664_v55 = vld [vmem:[%s9112_s5 + $0x248] sm:$0xff] }
 0x29b   : > { %9638 = vst [vmem:[#allocation19_spill] sm:$0xff] %v6739_v13  ;;  %v6756_v53 = vpop.f32.mrf.mxu1  ;;  %3203 = vmatpush.msra.mxu2 %v4664_v55  ;;  %v9662_v55 = vld [vmem:[#allocation39_spill] sm:$0xff] }
 0x29d   : > { %1730 = vmatmul.f32.gmra.mxu0 %v9640_v63  ;;  %2106 = vmatmul.f32.gmra.mxu3 %v9607_v45  ;;  %v6781_v44 = vpop.f32.mrf.mxu2 }
 0x29e   : > { %9651 = vst [vmem:[#allocation31_spill] sm:$0xff] %v6781_v44 }
 0x29f   : > { %1867 = vmatmul.f32.gmra.mxu1 %v5907_v46  ;;  %v9646_v46 = vld [vmem:[#allocation94_spill] sm:$0xff] }
 0x2a2   : > { %v6754_v23 = vpop.f32.mrf.mxu0 }
 0x2a3   : > { %9642 = vst [vmem:[#allocation185_spill] sm:$0xff] %v6754_v23  ;;  %v6769_v23 = vpop.f32.mrf.mxu3  ;;  %v6775_v13 = vpop.f32.mrf.mxu1 }
 0x2a4   : > { %9645 = vst [vmem:[#allocation186_spill] sm:$0xff] %v6769_v23 }
 0x2a5   : > { %1733 = vmatmul.f32.gmra.mxu0 %v9643_v6  ;;  %2109 = vmatmul.f32.gmra.mxu3 %v5724_v7  ;;  %9648 = vst [vmem:[#allocation188_spill] sm:$0xff] %v6775_v13  ;;  %v4585_v7 = vld [vmem:[%s9110_s3 + $0x400] sm:$0xff]  ;;  %v9676_v13 = vld [vmem:[#allocation4_spill] sm:$0xff] }
 0x2a6   : > { %2197 = vmatpush.msrb.mxu0 %v4585_v7 }
 0x2a7   : > { %1870 = vmatmul.f32.gmra.mxu1 %v9646_v46  ;;  %v9663_v46 = vld [vmem:[#allocation68_spill] sm:$0xff] }
 0x2aa   : > { %v6772_v45 = vpop.f32.mrf.mxu0 }
 0x2ab   : > { %9647 = vst [vmem:[#allocation187_spill] sm:$0xff] %v6772_v45  ;;  %v6786_v23 = vpop.f32.mrf.mxu3  ;;  %v6796_v44 = vpop.f32.mrf.mxu1 }
 0x2ac   : > { %9654 = vst [vmem:[#allocation189_spill] sm:$0xff] %v6786_v23  ;;  %v6802_v45 = vpop.f32.mrf.mxu2 }
 0x2ad   : > { %1736 = vmatmul.f32.gmra.mxu0 %v9649_v15  ;;  %2112 = vmatmul.f32.gmra.mxu3 %v5745_v9  ;;  %9656 = vst [vmem:[#allocation35_spill] sm:$0xff] %v6796_v44  ;;  %v4648_v9 = vld [vmem:[%s9112_s5 + $0x1c8] sm:$0xff]  ;;  %v9673_v44 = vld [vmem:[#allocation2_spill] sm:$0xff] }
 0x2ae   : > { %9660 = vst [vmem:[#allocation190_spill] sm:$0xff] %v6802_v45  ;;  %3090 = vmatpush.msra.mxu1 %v4648_v9  ;;  %v4663_v9 = vld [vmem:[%s9112_s5 + $0x240] sm:$0xff] }
 0x2af   : > { %1873 = vmatmul.f32.gmra.mxu1 %v9652_v24  ;;  %v9657_v24 = vld [vmem:[#allocation56_spill] sm:$0xff]  ;;  %3204 = vmatpush.msra.mxu2 %v4663_v9 }
 0x2b0   : > { %1993 = vmatmul.f32.gmra.mxu2 %v9657_v24 }
 0x2b2   : > { %v6784_v31 = vpop.f32.mrf.mxu0 }
 0x2b3   : > { %9653 = vst [vmem:[#allocation55_spill] sm:$0xff] %v6784_v31  ;;  %v9658_v31 = vld [vmem:[#allocation99_spill] sm:$0xff]  ;;  %v6808_v7 = vpop.f32.mrf.mxu3  ;;  %v6814_v24 = vpop.f32.mrf.mxu1 }
 0x2b4   : > { %9661 = vst [vmem:[#allocation191_spill] sm:$0xff] %v6808_v7 }
 0x2b5   : > { %1739 = vmatmul.f32.gmra.mxu0 %v9655_v10  ;;  %2115 = vmatmul.f32.gmra.mxu3 %v5767_v50  ;;  %9664 = vst [vmem:[#allocation39_spill] sm:$0xff] %v6814_v24  ;;  %v9668_v50 = vld [vmem:[#allocation42_spill] sm:$0xff] }
 0x2b7   : > { %1876 = vmatmul.f32.gmra.mxu1 %v9658_v31  ;;  %v6820_v31 = vpop.f32.mrf.mxu2 }
 0x2b8   : > { %4618 = vmatmul.msk.f32.gmra.mxu2 %vm5174_vm2, %v9663_v46  ;;  %9667 = vst [vmem:[#allocation192_spill] sm:$0xff] %v6820_v31  ;;  %v9670_v46 = vld [vmem:[#allocation69_spill] sm:$0xff] }
 0x2ba   : > { %v6800_v23 = vpop.f32.mrf.mxu0 }
 0x2bb   : > { %9659 = vst [vmem:[#allocation56_spill] sm:$0xff] %v6800_v23  ;;  %v9665_v23 = vld [vmem:[#allocation102_spill] sm:$0xff]  ;;  %v6826_v7 = vpop.f32.mrf.mxu3 }
 0x2bc   : > { %9669 = vst [vmem:[#allocation42_spill] sm:$0xff] %v6826_v7 }
 0x2bd   : > { %1742 = vmatmul.f32.gmra.mxu0 %v9662_v55  ;;  %2118 = vmatmul.f32.gmra.mxu3 %v5789_v34  ;;  %v4647_v34 = vld [vmem:[%s9112_s5 + $0x1c0] sm:$0xff] }
 0x2be   : > { %3091 = vmatpush.msra.mxu1 %v4647_v34 }
 0x2bf   : > { %1879 = vmatmul.f32.gmra.mxu1 %v9665_v23  ;;  %v1949_v31 = vpop.f32.mrf.mxu2 }
 0x2c0   : > { %1999 = vmatmul.f32.gmra.mxu2 %v9670_v46 }
 0x2c2   : > { %v6817_v45 = vpop.f32.mrf.mxu0 }
 0x2c3   : > { %9666 = vst [vmem:[#allocation68_spill] sm:$0xff] %v6817_v45  ;;  %v9672_v45 = vld [vmem:[#allocation48_spill] sm:$0xff] }
 0x2c5   : > { %1745 = vmatmul.f32.gmra.mxu0 %v9668_v50  ;;  %2121 = vmatmul.f32.gmra.mxu3 %v5808_v20  ;;  %v9675_v20 = vld [vmem:[#allocation52_spill] sm:$0xff] }
 0x2c7   : > { %v1952_v7 = vpop.f32.mrf.mxu2 }
 0x2c8   : > { %v2074_v23 = vpop.f32.mrf.mxu3  ;;  %4620 = vmatmul.msk.f32.gmra.mxu2 %vm5174_vm2, %v9673_v44  ;;  %v4662_v44 = vld [vmem:[%s9112_s5 + $0x238] sm:$0xff] }
 0x2c9   : > { %v6839_v9 = vadd.f32 %v2074_v23, %v1949_v31  ;;  %3205 = vmatpush.msra.mxu2 %v4662_v44  ;;  %v9678_v23 = vld [vmem:[#allocation60_spill] sm:$0xff]  ;;  %v4646_v31 = vld [vmem:[%s9112_s5 + $0x1b8] sm:$0xff] }
 0x2ca   : > { %v6829_v24 = vpop.f32.mrf.mxu0  ;;  %3092 = vmatpush.msra.mxu1 %v4646_v31 }
 0x2cb   : > { %9671 = vst [vmem:[#allocation69_spill] sm:$0xff] %v6829_v24 }
 0x2cd   : > { %1748 = vmatmul.f32.gmra.mxu0 %v9672_v45  ;;  %2124 = vmatmul.f32.gmra.mxu3 %v5823_v14 }
 0x2cf   : > { %v1955_v14 = vpop.f32.mrf.mxu2 }
 0x2d0   : > { %v2077_v24 = vpop.f32.mrf.mxu3  ;;  %2005 = vmatmul.f32.gmra.mxu2 %v9676_v13 }
 0x2d1   : > { %v6846_v57 = vadd.f32 %v2077_v24, %v1952_v7  ;;  %v9679_v7 = vld [vmem:[#allocation5_spill] sm:$0xff] }
 0x2d2   : > { %v6841_v46 = vpop.f32.mrf.mxu0 }
 0x2d3   : > { %9674 = vst [vmem:[#allocation48_spill] sm:$0xff] %v6841_v46  ;;  %v9681_v46 = vld [vmem:[#allocation9_spill] sm:$0xff] }
 0x2d5   : > { %1751 = vmatmul.f32.gmra.mxu0 %v9675_v20  ;;  %2127 = vmatmul.f32.gmra.mxu3 %v5843_v26 }
 0x2d7   : > { %v1958_v26 = vpop.f32.mrf.mxu2 }
 0x2d8   : > { %v2080_v13 = vpop.f32.mrf.mxu3  ;;  %4622 = vmatmul.msk.f32.gmra.mxu2 %vm5174_vm2, %v9679_v7 }
 0x2d9   : > { %v6861_v24 = vadd.f32 %v2080_v13, %v1955_v14  ;;  %v4661_v14 = vld [vmem:[%s9112_s5 + $0x230] sm:$0xff] }
 0x2da   : > { %v6848_v34 = vpop.f32.mrf.mxu0  ;;  %3206 = vmatpush.msra.mxu2 %v4661_v14 }
 0x2db   : > { %9677 = vst [vmem:[#allocation2_spill] sm:$0xff] %v6848_v34 }
 0x2dd   : > { %1754 = vmatmul.f32.gmra.mxu0 %v9678_v23  ;;  %2130 = vmatmul.f32.gmra.mxu3 %v9626_v29 }
 0x2df   : > { %v1961_v13 = vpop.f32.mrf.mxu2 }
 0x2e0   : > { %v2083_v44 = vpop.f32.mrf.mxu3  ;;  %2011 = vmatmul.f32.gmra.mxu2 %v9681_v46  ;;  %v9683_v46 = vld [vmem:[#allocation13_spill] sm:$0xff] }
 0x2e1   : > { %v6868_v37 = vadd.f32 %v2083_v44, %v1958_v26  ;;  %v9685_v44 = vld [vmem:[#allocation17_spill] sm:$0xff] }
 0x2e2   : > { %v6863_v34 = vpop.f32.mrf.mxu0 }
 0x2e3   : > { %9680 = vst [vmem:[#allocation52_spill] sm:$0xff] %v6863_v34  ;;  %v9720_v34 = vld [vmem:[#allocation71_spill] sm:$0xff] }
 0x2e5   : > { %2198 = vmatmul.f32.vlgmr.msrb.gmra.mxu0 %v6073_v51  ;;  %2133 = vmatmul.f32.gmra.mxu3 %v9629_v2  ;;  %v4645_v51 = vld [vmem:[%s9112_s5 + $0x1b0] sm:$0xff] }
 0x2e6   : > { %3093 = vmatpush.msra.mxu1 %v4645_v51  ;;  %v4660_v51 = vld [vmem:[%s9112_s5 + $0x228] sm:$0xff] }
 0x2e7   : > { %3207 = vmatpush.msra.mxu2 %v4660_v51 }
 0x2e8   : > { %v2086_v29 = vpop.f32.mrf.mxu3  ;;  %4624 = vmatmul.msk.f32.gmra.mxu2 %vm5174_vm2, %v9683_v46 }
 0x2e9   : > { %v6883_v7 = vadd.f32 %v2086_v29, %v1961_v13 }
 0x2ea   : > { %v6870_v31 = vpop.f32.mrf.mxu0 }
 0x2eb   : > { %9682 = vst [vmem:[#allocation4_spill] sm:$0xff] %v6870_v31 }
 0x2ed   : > { %2201 = vmatmul.f32.gmra.mxu0 %v6084_v49  ;;  %2136 = vmatmul.f32.gmra.mxu3 %v9633_v54  ;;  %v1964_v49 = vpop.f32.mrf.mxu2 }
 0x2f0   : > { %v2089_v26 = vpop.f32.mrf.mxu3  ;;  %2017 = vmatmul.f32.gmra.mxu2 %v9685_v44 }
 0x2f1   : > { %v6890_v31 = vadd.f32 %v2089_v26, %v1964_v49  ;;  %v9689_v26 = vld [vmem:[#allocation25_spill] sm:$0xff] }
 0x2f2   : > { %v6885_v2 = vpop.f32.mrf.mxu0 }
 0x2f3   : > { %9684 = vst [vmem:[#allocation60_spill] sm:$0xff] %v6885_v2 }
 0x2f5   : > { %2204 = vmatmul.f32.gmra.mxu0 %v6103_v41  ;;  %2139 = vmatmul.f32.gmra.mxu3 %v9637_v58  ;;  %v1967_v13 = vpop.f32.mrf.mxu2  ;;  %v9687_v41 = vld [vmem:[#allocation21_spill] sm:$0xff]  ;;  %v4644_v58 = vld [vmem:[%s9112_s5 + $0x1a8] sm:$0xff] }
 0x2f6   : > { %3094 = vmatpush.msra.mxu1 %v4644_v58 }
 0x2f8   : > { %v2092_v54 = vpop.f32.mrf.mxu3  ;;  %4626 = vmatmul.msk.f32.gmra.mxu2 %vm5174_vm2, %v9687_v41  ;;  %v9691_v41 = vld [vmem:[#allocation29_spill] sm:$0xff] }
 0x2f9   : > { %v6902_v29 = vadd.f32 %v2092_v54, %v1967_v13  ;;  %v6921_v54 = vpop.f32.mrf.mxu1 }
 0x2fa   : > { %v6892_v14 = vpop.f32.mrf.mxu0 }
 0x2fb   : > { %9686 = vst [vmem:[#allocation5_spill] sm:$0xff] %v6892_v14  ;;  %v472_v14 = vld [vmem:[%s5577_s8 + $0x18] sm:$0xff] }
 0x2fd   : > { %2207 = vmatmul.f32.gmra.mxu0 %v6116_v61  ;;  %2142 = vmatmul.f32.gmra.mxu3 %v9640_v63  ;;  %v1970_v61 = vpop.f32.mrf.mxu2  ;;  %v4659_v63 = vld [vmem:[%s9112_s5 + $0x220] sm:$0xff] }
 0x2fe   : > { %3208 = vmatpush.msra.mxu2 %v4659_v63 }
 0x300   : > { %v2095_v49 = vpop.f32.mrf.mxu3  ;;  %2023 = vmatmul.f32.gmra.mxu2 %v9689_v26  ;;  %v9693_v26 = vld [vmem:[#allocation33_spill] sm:$0xff] }
 0x301   : > { %v6912_v44 = vadd.f32 %v2095_v49, %v1970_v61  ;;  %v6936_v63 = vpop.f32.mrf.mxu1 }
 0x302   : > { %v6904_v46 = vpop.f32.mrf.mxu0 }
 0x303   : > { %9688 = vst [vmem:[#allocation9_spill] sm:$0xff] %v6904_v46  ;;  %v9714_v46 = vld [vmem:[#allocation65_spill] sm:$0xff] }
 0x305   : > { %2210 = vmatmul.f32.gmra.mxu0 %v6132_v32  ;;  %2145 = vmatmul.f32.gmra.mxu3 %v9643_v6  ;;  %v1973_v13 = vpop.f32.mrf.mxu2 }
 0x308   : > { %v2098_v32 = vpop.f32.mrf.mxu3  ;;  %4628 = vmatmul.msk.f32.gmra.mxu2 %vm5174_vm2, %v9691_v41 }
 0x309   : > { %v6926_v58 = vadd.f32 %v2098_v32, %v1973_v13  ;;  %v9695_v32 = vld [vmem:[#allocation37_spill] sm:$0xff] }
 0x30a   : > { %v6914_v51 = vpop.f32.mrf.mxu0 }
 0x30b   : > { %9690 = vst [vmem:[#allocation13_spill] sm:$0xff] %v6914_v51 }
 0x30d   : > { %2213 = vmatmul.f32.gmra.mxu0 %v6142_v22  ;;  %2148 = vmatmul.f32.gmra.mxu3 %v9649_v15  ;;  %v4643_v22 = vld [vmem:[%s9112_s5 + $0x1a0] sm:$0xff]  ;;  %v1976_v6 = vpop.f32.mrf.mxu2 }
 0x30e   : > { %3095 = vmatpush.msra.mxu1 %v4643_v22 }
 0x310   : > { %v2101_v49 = vpop.f32.mrf.mxu3  ;;  %2029 = vmatmul.f32.gmra.mxu2 %v9693_v26 }
 0x311   : > { %v6938_v41 = vadd.f32 %v2101_v49, %v1976_v6  ;;  %v4658_v6 = vld [vmem:[%s9112_s5 + $0x218] sm:$0xff] }
 0x312   : > { %v6928_v61 = vpop.f32.mrf.mxu0  ;;  %3209 = vmatpush.msra.mxu2 %v4658_v6 }
 0x313   : > { %9692 = vst [vmem:[#allocation17_spill] sm:$0xff] %v6928_v61  ;;  %v6949_v61 = vpop.f32.mrf.mxu1 }
 0x315   : > { %2216 = vmatmul.f32.gmra.mxu0 %v6164_v36  ;;  %2151 = vmatmul.f32.gmra.mxu3 %v9655_v10  ;;  %v1979_v15 = vpop.f32.mrf.mxu2  ;;  %v4642_v10 = vld [vmem:[%s9112_s5 + $0x198] sm:$0xff] }
 0x316   : > { %3096 = vmatpush.msra.mxu1 %v4642_v10 }
 0x318   : > { %v2104_v36 = vpop.f32.mrf.mxu3  ;;  %4630 = vmatmul.msk.f32.gmra.mxu2 %vm5174_vm2, %v9695_v32 }
 0x319   : > { %v6947_v22 = vadd.f32 %v2104_v36, %v1979_v15 }
 0x31a   : > { %v6940_v13 = vpop.f32.mrf.mxu0 }
 0x31b   : > { %9694 = vst [vmem:[#allocation21_spill] sm:$0xff] %v6940_v13  ;;  %v6966_v32 = vpop.f32.mrf.mxu1  ;;  %v9705_v13 = vld [vmem:[#allocation57_spill] sm:$0xff] }
 0x31c   : > { %9698 = vst [vmem:[#allocation33_spill] sm:$0xff] %v6966_v32 }
 0x31d   : > { %2219 = vmatmul.f32.gmra.mxu0 %v6191_v47  ;;  %2154 = vmatmul.f32.gmra.mxu3 %v9662_v55  ;;  %v1982_v47 = vpop.f32.mrf.mxu2 }
 0x320   : > { %v2107_v49 = vpop.f32.mrf.mxu3  ;;  %2035 = vmatmul.f32.gmra.mxu2 %v5441_v62  ;;  %v9700_v62 = vld [vmem:[#allocation128_spill] sm:$0xff] }
 0x321   : > { %v6962_v15 = vadd.f32 %v2107_v49, %v1982_v47  ;;  %v9702_v49 = vld [vmem:[#allocation49_spill] sm:$0xff] }
 0x322   : > { %v6951_v26 = vpop.f32.mrf.mxu0 }
 0x323   : > { %9696 = vst [vmem:[#allocation25_spill] sm:$0xff] %v6951_v26  ;;  %v6992_v10 = vpop.f32.mrf.mxu1 }
 0x324   : > { %9701 = vst [vmem:[#allocation128_spill] sm:$0xff] %v6992_v10  ;;  %v9721_v10 = vld [vmem:[#allocation58_spill] sm:$0xff] }
 0x325   : > { %2222 = vmatmul.f32.gmra.mxu0 %v6221_v5  ;;  %2157 = vmatmul.f32.gmra.mxu3 %v9668_v50  ;;  %v6970_v5 = vpop.f32.mrf.mxu2  ;;  %v4657_v50 = vld [vmem:[%s9112_s5 + $0x210] sm:$0xff] }
 0x326   : > { %3210 = vmatpush.msra.mxu2 %v4657_v50 }
 0x328   : > { %v6972_v55 = vpop.f32.mrf.mxu3  ;;  %4632 = vmatmul.msk.f32.gmra.mxu2 %vm5174_vm2, %v9485_v30  ;;  %v4686_v30 = vld [vmem:[%s9112_s5 + $0x2f8] sm:$0xff] }
 0x329   : > { %3310 = vmatpush.msrb.mxu3 %v4686_v30  ;;  %v9708_v30 = vld [vmem:[#allocation133_spill] sm:$0xff] }
 0x32a   : > { %v6964_v36 = vpop.f32.mrf.mxu0 }
 0x32b   : > { %9697 = vst [vmem:[#allocation29_spill] sm:$0xff] %v6964_v36  ;;  %v7008_v50 = vpop.f32.mrf.mxu1 }
 0x32d   : > { %2225 = vmatmul.f32.gmra.mxu0 %v6251_v21  ;;  %2160 = vmatmul.f32.gmra.mxu3 %v9672_v45  ;;  %v6984_v47 = vpop.f32.mrf.mxu2  ;;  %v4641_v21 = vld [vmem:[%s9112_s5 + $0x190] sm:$0xff] }
 0x32e   : > { %3097 = vmatpush.msra.mxu1 %v4641_v21 }
 0x330   : > { %v6994_v45 = vpop.f32.mrf.mxu3  ;;  %2041 = vmatmul.f32.gmra.mxu2 %v9702_v49 }
 0x332   : > { %v6977_v6 = vpop.f32.mrf.mxu0 }
 0x333   : > { %9699 = vst [vmem:[#allocation37_spill] sm:$0xff] %v6977_v6  ;;  %v9704_v6 = vld [vmem:[#allocation130_spill] sm:$0xff] }
 0x334   : > { %9706 = vst [vmem:[#allocation130_spill] sm:$0xff] %v7008_v50 }
 0x335   : > { %2228 = vmatmul.f32.gmra.mxu0 %v9700_v62  ;;  %2163 = vmatmul.f32.gmra.mxu3 %v9675_v20  ;;  %v7001_v36 = vpop.f32.mrf.mxu2 }
 0x338   : > { %v7003_v26 = vpop.f32.mrf.mxu3  ;;  %4634 = vmatmul.msk.f32.gmra.mxu2 %vm5174_vm2, %v9705_v13  ;;  %v9715_v13 = vld [vmem:[#allocation50_spill] sm:$0xff] }
 0x33a   : > { %v6997_v62 = vpop.f32.mrf.mxu0 }
 0x33b   : > { %9703 = vst [vmem:[#allocation49_spill] sm:$0xff] %v6997_v62  ;;  %v7019_v62 = vpop.f32.mrf.mxu1 }
 0x33d   : > { %2231 = vmatmul.f32.gmra.mxu0 %v9704_v6  ;;  %2166 = vmatmul.f32.gmra.mxu3 %v9678_v23  ;;  %v7014_v49 = vpop.f32.mrf.mxu2  ;;  %v9711_v6 = vld [vmem:[#allocation62_spill] sm:$0xff]  ;;  %v4656_v23 = vld [vmem:[%s9112_s5 + $0x208] sm:$0xff] }
 0x33e   : > { %9709 = vst [vmem:[#allocation133_spill] sm:$0xff] %v7014_v49  ;;  %3211 = vmatpush.msra.mxu2 %v4656_v23  ;;  %v4683_v23 = vld [vmem:[%s9112_s5 + $0x2e0] sm:$0xff] }
 0x33f   : > { %9712 = vst [vmem:[#allocation62_spill] sm:$0xff] %v7019_v62  ;;  %v4682_v62 = vld [vmem:[%s9112_s5 + $0x2d8] sm:$0xff] }
 0x340   : > { %v7016_v20 = vpop.f32.mrf.mxu3  ;;  %2047 = vmatmul.f32.gmra.mxu2 %v9711_v6 }
 0x341   : > { %9710 = vst [vmem:[#allocation193_spill] sm:$0xff] %v7016_v20 }
 0x342   : > { %v7010_v21 = vpop.f32.mrf.mxu0 }
 0x343   : > { %9707 = vst [vmem:[#allocation57_spill] sm:$0xff] %v7010_v21  ;;  %v7048_v2 = vpop.f32.mrf.mxu1 }
 0x344   : > { %9719 = vst [vmem:[#allocation196_spill] sm:$0xff] %v7048_v2  ;;  %v9723_v2 = vld [vmem:[#allocation120_spill] sm:$0xff] }
 0x345   : > { %2234 = vmatmul.f32.gmra.mxu0 %v9708_v30  ;;  %2169 = vmatmul.f32.gmra.mxu3 %v9714_v46  ;;  %v4685_v30 = vld [vmem:[%s9112_s5 + $0x2f0] sm:$0xff]  ;;  %v7031_v6 = vpop.f32.mrf.mxu2  ;;  %v4684_v46 = vld [vmem:[%s9112_s5 + $0x2e8] sm:$0xff] }
 0x346   : > { %3311 = vmatpush.msrb.mxu3 %v4685_v30  ;;  %9716 = vst [vmem:[#allocation65_spill] sm:$0xff] %v7031_v6  ;;  %v471_v30 = vld [vmem:[%s5577_s8 + $0x10] sm:$0xff] }
 0x347   : > { %v479_v50 = vmul.f32 0.0, %v471_v30  ;;  %v9722_v6 = vld [vmem:[#allocation72_spill] sm:$0xff] }
 0x348   : > { %v7033_v21 = vpop.f32.mrf.mxu3  ;;  %3312 = vmatpush.msrb.mxu3 %v4684_v46  ;;  %v480_v46 = vmul.f32 0.0, %v472_v14  ;;  %v1276_v32 = vadd.f32 %v9723_v2, %v9722_v6  ;;  %v4680_v14 = vld [vmem:[%s9112_s5 + $0x2c8] sm:$0xff] }
 0x349   : > { %9717 = vst [vmem:[#allocation50_spill] sm:$0xff] %v7033_v21 }
 0x34a   : > { %v7021_v51 = vpop.f32.mrf.mxu0  ;;  %3313 = vmatpush.msrb.mxu3 %v4683_v23  ;;  %v4681_v23 = vld [vmem:[%s9112_s5 + $0x2d0] sm:$0xff]  ;;  %v612_v21 = vrot.slane %v480_v46, 7 }
 0x34b   : > { %9713 = vst [vmem:[#allocation194_spill] sm:$0xff] %v7021_v51 }
 0x34c   : > { %3314 = vmatpush.msrb.mxu3 %v4682_v62 }
 0x34d   : > { %2237 = vmatmul.f32.gmra.mxu0 %v9715_v13  ;;  %v4640_v13 = vld [vmem:[%s9112_s5 + $0x188] sm:$0xff]  ;;  %2172 = vmatmul.f32.gmra.mxu3 %v9720_v34  ;;  %v7060_v34 = vpop.f32.mrf.mxu2 }
 0x34e   : > { %3098 = vmatpush.msra.mxu1 %v4640_v13  ;;  %v2419_v13 = vlaneseq  ;;  %9724 = vst [vmem:[#allocation71_spill] sm:$0xff] %v7060_v34  ;;  %3315 = vmatpush.msrb.mxu3 %v4681_v23 }
 0x350   : > { %v7062_v20 = vpop.f32.mrf.mxu3  ;;  %3316 = vmatpush.msrb.mxu3 %v4680_v14  ;;  %v7080_v23 = vshrl.u32 %v2419_v13, 7  ;;  %v4655_v13 = vld [vmem:[%s9112_s5 + $0x200] sm:$0xff] }
 0x351   : > { %9725 = vst [vmem:[#allocation58_spill] sm:$0xff] %v7062_v20  ;;  %v4679_v20 = vld [vmem:[%s9112_s5 + $0x2c0] sm:$0xff]  ;;  %3212 = vmatpush.msra.mxu2 %v4655_v13  ;;  %v4676_v13 = vld [vmem:[%s9112_s5 + $0x2a8] sm:$0xff] }
 0x352   : > { %v7041_v51 = vpop.f32.mrf.mxu0  ;;  %3317 = vmatpush.msrb.mxu3 %v4679_v20  ;;  %v2426_v20 = vadd.s32 4294967295, %v7080_v23 }
 0x353   : > { %9718 = vst [vmem:[#allocation195_spill] sm:$0xff] %v7041_v51  ;;  %v611_v51 = vrot.slane %v479_v50, 7  ;;  %v9727_v50 = vld [vmem:[#allocation138_spill] sm:$0xff] }
 0x354   : > { %v1401_v2 = vadd.f32 %v9727_v50, %v1276_v32  ;;  %9729 = vst [vmem:[#allocation138_spill] sm:$0xff] %v7080_v23  ;;  %v9730_v32 = vld [vmem:[#allocation8_spill] sm:$0xff]  ;;  %v7094_v50 = vpop.f32.mrf.mxu1  ;;  %v7115_v23 = vsel %vm553_vm0, %v612_v21, 0.0  ;;  %vm2429_vm4 = vcmp.ge.s32.totalorder %v2426_v20, 0  ;;  %v4674_v20 = vld [vmem:[%s9112_s5 + $0x298] sm:$0xff] }
 0x355   : > { %2240 = vmatmul.f32.gmra.mxu0 %v9721_v10  ;;  %4636 = vmatmul.msk.f32.gmra.mxu2 %vm5174_vm2, %v611_v51  ;;  %v7070_v10 = vsel %vm553_vm0, %v611_v51, %v612_v21  ;;  %v7073_v62 = vsel %vm553_vm0, 0.0, %v611_v51  ;;  %v4678_v51 = vld [vmem:[%s9112_s5 + $0x2b8] sm:$0xff]  ;;  %9731 = vst [vmem:[#allocation8_spill] sm:$0xff] %v7094_v50  ;;  %v7127_v21 = vld [vmem:[%s9111_s4] ss:$0 sm:$0xff] }
 0x356   : > { %9726 = vst [vmem:[#allocation72_spill] sm:$0xff] %v7073_v62  ;;  %v850_v6 = vrot.slane %v7073_v62, 1  ;;  %v851_v30 = vrot.slane %v7070_v10, 1  ;;  %v1526_v14 = vadd.f32 %v9730_v32, %v1401_v2  ;;  %3318 = vmatpush.msrb.mxu3 %v4678_v51  ;;  %v4677_v2 = vld [vmem:[%s9112_s5 + $0x2b0] sm:$0xff]  ;;  %v7106_v51 = vpop.f32.mrf.mxu2  ;;  %v9737_v62 = vld [vmem:[#allocation139_spill] sm:$0xff] }
 0x357   : > { %9736 = vst [vmem:[#allocation197_spill] sm:$0xff] %v7115_v23 }
 0x358   : > { %v852_v34 = vsel %vm754_vm1, %v850_v6, %v851_v30  ;;  %v9732_v6 = vld [vmem:[#allocation74_spill] sm:$0xff]  ;;  %v7108_v50 = vpop.f32.mrf.mxu3  ;;  %3319 = vmatpush.msrb.mxu3 %v4677_v2 }
 0x359   : > { %2175 = vmatmul.f32.gmra.mxu3 %v852_v34  ;;  %v4639_v34 = vld [vmem:[%s9112_s5 + $0x180] sm:$0xff]  ;;  %9734 = vst [vmem:[#allocation74_spill] sm:$0xff] %v7106_v51 }
 0x35a   : > { %v7078_v46 = vpop.f32.mrf.mxu0  ;;  %3099 = vmatpush.msra.mxu1 %v4639_v34  ;;  %3320 = vmatpush.msrb.mxu3 %v4676_v13  ;;  %v4675_v34 = vld [vmem:[%s9112_s5 + $0x2a0] sm:$0xff] }
 0x35b   : > { %9728 = vst [vmem:[#allocation120_spill] sm:$0xff] %v7078_v46  ;;  %v1651_v46 = vadd.f32 %v6550_v43, %v1526_v14  ;;  %v853_v43 = vrot.slane %v7115_v23, 1  ;;  %v9246_v23 = vmov 0.0  }
 0x35c   : > { %3321 = vmatpush.msrb.mxu3 %v4675_v34 }
 0x35d   : > { %2243 = vmatmul.f32.gmra.mxu0 %v9609_v27  ;;  %v9733_v27 = vld [vmem:[#allocation122_spill] sm:$0xff]  ;;  %2053 = vmatmul.f32.gmra.mxu2 %v7070_v10  ;;  %v1776_v2 = vadd.f32 %v6599_v18, %v1651_v46  ;;  %v7135_v18 = vsel %vm2429_vm4, 1.0, %v9246_v23  ;;  %v9740_v46 = vld [vmem:[#allocation43_spill] sm:$0xff]  ;;  %v9745_v23 = vld [vmem:[#allocation116_spill] sm:$0xff] }
 0x35e   : > { %v1279_v32 = vadd.f32 %v9733_v27, %v9732_v6  ;;  %9735 = vst [vmem:[#allocation122_spill] sm:$0xff] %v7108_v50  ;;  %v9738_v27 = vld [vmem:[#allocation12_spill] sm:$0xff]  ;;  %3322 = vmatpush.msrb.mxu3 %v4674_v20  ;;  %v9744_v20 = vld [vmem:[#allocation6_spill] sm:$0xff] }
 0x360   : > { %v1404_v49 = vadd.f32 %v9737_v62, %v1279_v32  ;;  %v854_v62 = vsel %vm754_vm1, %v851_v30, %v853_v43  ;;  %v9739_v30 = vld [vmem:[#allocation76_spill] sm:$0xff] }
 0x361   : > { %2178 = vmatmul.f32.gmra.mxu3 %v854_v62  ;;  %v1282_v43 = vadd.f32 %v9740_v46, %v9739_v30  ;;  %v4672_v62 = vld [vmem:[%s9112_s5 + $0x288] sm:$0xff] }
 0x362   : > { %v2199_v14 = vpop.f32.mrf.mxu0  ;;  %v1529_v32 = vadd.f32 %v9738_v27, %v1404_v49  ;;  %v7145_v49 = vpop.f32.mrf.mxu2 }
 0x363   : > { %v2200_v6 = vadd.f32 %v2199_v14, %v6839_v9  ;;  %v4673_v9 = vld [vmem:[%s9112_s5 + $0x290] sm:$0xff]  ;;  %9741 = vst [vmem:[#allocation139_spill] sm:$0xff] %v7145_v49  ;;  %v1407_v27 = vadd.f32 %v9744_v20, %v1282_v43  ;;  %v9746_v49 = vld [vmem:[#allocation77_spill] sm:$0xff] }
 0x364   : > { %v1654_v14 = vadd.f32 %v6574_v40, %v1529_v32  ;;  %3323 = vmatpush.msrb.mxu3 %v4673_v9  ;;  %v4671_v32 = vld [vmem:[%s9112_s5 + $0x280] sm:$0xff]  ;;  %v9747_v43 = vld [vmem:[#allocation125_spill] sm:$0xff] }
 0x365   : > { %v2307_v13 = vadd.f32 %v2200_v6, %v1776_v2  ;;  %2246 = vmatmul.f32.gmra.mxu0 %v9612_v60  ;;  %v7147_v2 = vpop.f32.mrf.mxu3  ;;  %v7149_v6 = vpop.f32.mrf.mxu1  ;;  %v2447_v60 = vperm.slane %v7135_v18, 0 }
 0x366   : > { %9742 = vst [vmem:[#allocation12_spill] sm:$0xff] %v7147_v2  ;;  %3324 = vmatpush.msrb.mxu3 %v4672_v62 }
 0x367   : > { %v2347_v34 = vadd.f32 %v7127_v21, %v2307_v13  ;;  %9743 = vst [vmem:[#allocation76_spill] sm:$0xff] %v7149_v6  ;;  %v1779_v13 = vadd.f32 %v6615_v28, %v1654_v14  ;;  %v1532_v6 = vadd.f32 %v9745_v23, %v1407_v27  ;;  %v9748_v28 = vld [vmem:[#allocation142_spill] sm:$0xff] }
 0x368   : > { %3325 = vmatpush.msrb.mxu3 %v4671_v32 }
 0x369   : > { %v2383_v30 = vmax.f32 %v2347_v34, 0.0  ;;  %v1285_v34 = vadd.f32 %v9747_v43, %v9746_v49  ;;  %v1657_v62 = vadd.f32 %v6597_v0, %v1532_v6  ;;  %v9750_v0 = vld [vmem:[#allocation117_spill] sm:$0xff] }
 0x36a   : > { %v2202_v40 = vpop.f32.mrf.mxu0  ;;  %v7167_v50 = vpop.f32.mrf.mxu2 }
 0x36b   : > { %v2203_v9 = vadd.f32 %v2202_v40, %v6846_v57  ;;  %v2483_v46 = vmul.f32 %v2447_v60, %v2383_v30  ;;  %v1410_v57 = vadd.f32 %v9748_v28, %v1285_v34  ;;  %v2448_v34 = vperm.slane %v7135_v18, 1 }
 0x36d   : > { %v2308_v2 = vadd.f32 %v2203_v9, %v1779_v13  ;;  %2249 = vmatmul.f32.gmra.mxu0 %v5740_v12  ;;  %v7169_v51 = vpop.f32.mrf.mxu3  ;;  %v7172_v14 = vrot.slane %v2483_v46, 7  ;;  %v7174_v23 = vpop.f32.mrf.mxu1  ;;  %v1782_v12 = vadd.f32 %v6636_v52, %v1657_v62  ;;  %v1535_v6 = vadd.f32 %v9750_v0, %v1410_v57  ;;  %v3018_v13 = vld [vmem:[%s9112_s5 + $0xf8] sm:$0xff]  ;;  %v9751_v46 = vld [vmem:[#allocation79_spill] sm:$0xff] }
 0x36e   : > { %v3002_v9 = vld [vmem:[%s9112_s5 + $0x78] sm:$0xff]  ;;  %3536 = vmatpush.msrb.mxu2 %v3018_v13 }
 0x36f   : > { %v2348_v20 = vadd.f32 %v7127_v21, %v2308_v2  ;;  %9749 = vst [vmem:[#allocation43_spill] sm:$0xff] %v7172_v14  ;;  %v2663_v2 = vsel %vm553_vm0, 0.0, %v7172_v14  ;;  %v1660_v43 = vadd.f32 %v6612_v59, %v1535_v6  ;;  %3423 = vmatpush.msrb.mxu1 %v3002_v9 }
 0x370   : > { %v2735_v28 = vrot.slane %v2663_v2, 1 }
 0x371   : > { %v2384_v30 = vmax.f32 %v2348_v20, 0.0 }
 0x372   : > { %v2205_v27 = vpop.f32.mrf.mxu0  ;;  %v7193_v62 = vpop.f32.mrf.mxu2 }
 0x373   : > { %v2206_v49 = vadd.f32 %v2205_v27, %v6861_v24  ;;  %v2484_v40 = vmul.f32 %v2447_v60, %v2384_v30  ;;  %v9752_v24 = vld [vmem:[#allocation129_spill] sm:$0xff] }
 0x374   : > { %v1288_v60 = vadd.f32 %v9752_v24, %v9751_v46  ;;  %v1785_v24 = vadd.f32 %v6657_v3, %v1660_v43 }
 0x375   : > { %v2309_v32 = vadd.f32 %v2206_v49, %v1782_v12  ;;  %2252 = vmatmul.f32.gmra.mxu0 %v5762_v33  ;;  %v2556_v52 = vrot.slane %v2484_v40, 7  ;;  %v7200_v30 = vpop.f32.mrf.mxu3  ;;  %v2861_v12 = vrot.slane %v2663_v2, 2  ;;  %v9754_v40 = vld [vmem:[#allocation143_spill] sm:$0xff] }
 0x376   : > { %v1413_v0 = vadd.f32 %v9754_v40, %v1288_v60  ;;  %v7219_v60 = vpop.f32.mrf.mxu1 }
 0x377   : > { %v2349_v33 = vadd.f32 %v7127_v21, %v2309_v32  ;;  %v7197_v20 = vsel %vm553_vm0, %v7172_v14, %v2556_v52  ;;  %v2681_v57 = vsel %vm553_vm0, %v2556_v52, 0.0 }
 0x378   : > { %9753 = vst [vmem:[#allocation6_spill] sm:$0xff] %v7197_v20  ;;  %v2736_v27 = vrot.slane %v7197_v20, 1  ;;  %v2862_v59 = vrot.slane %v7197_v20, 2  ;;  %v2738_v49 = vrot.slane %v2681_v57, 1  ;;  %v2864_v32 = vrot.slane %v2681_v57, 2 }
 0x379   : > { %v2385_v6 = vmax.f32 %v2349_v33, 0.0  ;;  %v9759_v33 = vld [vmem:[#allocation28_spill] sm:$0xff] }
 0x37a   : > { %v2208_v13 = vpop.f32.mrf.mxu0  ;;  %v7206_v9 = vsel %vm754_vm1, %v2735_v28, %v2736_v27  ;;  %v7209_v46 = vsel %vm895_vm3, %v2861_v12, %v2862_v59  ;;  %v7212_v52 = vsel %vm754_vm1, %v2736_v27, %v2738_v49  ;;  %v7217_v20 = vsel %vm895_vm3, %v2862_v59, %v2864_v32  ;;  %v9761_v12 = vld [vmem:[#allocation81_spill] sm:$0xff]  ;;  %v9762_v27 = vld [vmem:[#allocation132_spill] sm:$0xff] }
 0x37b   : > { %9755 = vst [vmem:[#allocation116_spill] sm:$0xff] %v7206_v9  ;;  %v2485_v14 = vmul.f32 %v2448_v34, %v2385_v6  ;;  %v2209_v2 = vadd.f32 %v2208_v13, %v6868_v37  ;;  %v1538_v57 = vadd.f32 %v9759_v33, %v1413_v0  ;;  %v1291_v49 = vadd.f32 %v9762_v27, %v9761_v12  ;;  %v9763_v37 = vld [vmem:[#allocation145_spill] sm:$0xff]  ;;  %v7233_v0 = vpop.f32.mrf.mxu2  ;;  %v3017_v12 = vld [vmem:[%s9112_s5 + $0xf0] sm:$0xff]  ;;  %v9766_v27 = vld [vmem:[#allocation135_spill] sm:$0xff] }
 0x37c   : > { %9756 = vst [vmem:[#allocation77_spill] sm:$0xff] %v7209_v46  ;;  %3537 = vmatpush.msrb.mxu2 %v3017_v12 }
 0x37d   : > { %9757 = vst [vmem:[#allocation125_spill] sm:$0xff] %v7212_v52  ;;  %v7222_v28 = vrot.slane %v2485_v14, 7  ;;  %v2310_v40 = vadd.f32 %v2209_v2, %v1785_v24  ;;  %2255 = vmatmul.f32.gmra.mxu0 %v9619_v1  ;;  %v1663_v3 = vadd.f32 %v6630_v4, %v1538_v57  ;;  %v1416_v59 = vadd.f32 %v9763_v37, %v1291_v49  ;;  %v7235_v32 = vpop.f32.mrf.mxu3  ;;  %v9764_v4 = vld [vmem:[#allocation32_spill] sm:$0xff] }
 0x37e   : > { %9758 = vst [vmem:[#allocation142_spill] sm:$0xff] %v7217_v20  ;;  %v7251_v49 = vpop.f32.mrf.mxu1  ;;  %v9785_v20 = vld [vmem:[#allocation92_spill] sm:$0xff] }
 0x37f   : > { %9760 = vst [vmem:[#allocation117_spill] sm:$0xff] %v7222_v28  ;;  %v2350_v43 = vadd.f32 %v7127_v21, %v2310_v40  ;;  %4688 = vmatmul.msk.f32.vlgmr.msra.gmra.mxu1 %vm5174_vm2, %v7222_v28  ;;  %v1788_v1 = vadd.f32 %v6675_v39, %v1663_v3  ;;  %v1541_v2 = vadd.f32 %v9764_v4, %v1416_v59  ;;  %v2664_v40 = vsel %vm553_vm0, 0.0, %v7222_v28  ;;  %v3001_v39 = vld [vmem:[%s9112_s5 + $0x70] sm:$0xff] }
 0x380   : > { %3424 = vmatpush.msrb.mxu1 %v3001_v39 }
 0x381   : > { %v2386_v6 = vmax.f32 %v2350_v43, 0.0  ;;  %v2449_v43 = vperm.slane %v7135_v18, 2 }
 0x382   : > { %v2211_v14 = vpop.f32.mrf.mxu0 }
 0x383   : > { %v2486_v13 = vmul.f32 %v2448_v34, %v2386_v6  ;;  %v2212_v24 = vadd.f32 %v2211_v14, %v6883_v7  ;;  %v9765_v34 = vld [vmem:[#allocation84_spill] sm:$0xff]  ;;  %v2740_v14 = vrot.slane %v2664_v40, 1 }
 0x384   : > { %v1294_v7 = vadd.f32 %v9766_v27, %v9765_v34  ;;  %v7275_v27 = vpop.f32.mrf.mxu2 }
 0x385   : > { %v2311_v33 = vadd.f32 %v2212_v24, %v1788_v1  ;;  %2258 = vmatmul.f32.gmra.mxu0 %v5801_v25  ;;  %v2559_v57 = vrot.slane %v2486_v13, 7  ;;  %v1666_v25 = vadd.f32 %v6640_v19, %v1541_v2  ;;  %v2866_v1 = vrot.slane %v2664_v40, 2  ;;  %v9768_v13 = vld [vmem:[#allocation22_spill] sm:$0xff] }
 0x386   : > { %v1419_v24 = vadd.f32 %v9768_v13, %v1294_v7  ;;  %v7277_v7 = vpop.f32.mrf.mxu3 }
 0x387   : > { %v2351_v3 = vadd.f32 %v7127_v21, %v2311_v33  ;;  %v7258_v37 = vsel %vm553_vm0, %v7222_v28, %v2559_v57  ;;  %v1791_v12 = vadd.f32 %v6696_v35, %v1666_v25  ;;  %v2682_v40 = vsel %vm553_vm0, %v2559_v57, 0.0 }
 0x388   : > { %9767 = vst [vmem:[#allocation79_spill] sm:$0xff] %v7258_v37  ;;  %v2741_v59 = vrot.slane %v7258_v37, 1  ;;  %v2867_v6 = vrot.slane %v7258_v37, 2  ;;  %3103 = vmatmul.f32.gmra.mxu1 %v7258_v37  ;;  %v2743_v35 = vrot.slane %v2682_v40, 1  ;;  %v2869_v25 = vrot.slane %v2682_v40, 2 }
 0x389   : > { %v2387_v4 = vmax.f32 %v2351_v3, 0.0  ;;  %v9771_v3 = vld [vmem:[#allocation121_spill] sm:$0xff] }
 0x38a   : > { %v2214_v19 = vpop.f32.mrf.mxu0  ;;  %v7265_v2 = vsel %vm754_vm1, %v2740_v14, %v2741_v59  ;;  %v7268_v33 = vsel %vm895_vm3, %v2866_v1, %v2867_v6  ;;  %v1544_v14 = vadd.f32 %v9771_v3, %v1419_v24  ;;  %v9774_v24 = vld [vmem:[#allocation149_spill] sm:$0xff]  ;;  %v7297_v40 = vsel %vm895_vm3, %v2867_v6, %v2869_v25 }
 0x38b   : > { %9769 = vst [vmem:[#allocation129_spill] sm:$0xff] %v7265_v2  ;;  %v2487_v39 = vmul.f32 %v2449_v43, %v2387_v4  ;;  %v2215_v34 = vadd.f32 %v2214_v19, %v6890_v31  ;;  %3213 = vmatmul.f32.vlgmr.msra.gmra.mxu2 %v7265_v2  ;;  %3326 = vmatmul.f32.vlgmr.msrb.gmra.mxu3 %v7268_v33  ;;  %v9772_v31 = vld [vmem:[#allocation87_spill] sm:$0xff]  ;;  %v9773_v4 = vld [vmem:[#allocation137_spill] sm:$0xff]  ;;  %v7287_v2 = vpop.f32.mrf.mxu1 }
 0x38c   : > { %9770 = vst [vmem:[#allocation143_spill] sm:$0xff] %v7268_v33  ;;  %v1297_v19 = vadd.f32 %v9773_v4, %v9772_v31  ;;  %v1669_v33 = vadd.f32 %v6660_v8, %v1544_v14  ;;  %v9778_v6 = vld [vmem:[#allocation89_spill] sm:$0xff] }
 0x38d   : > { %v7280_v13 = vrot.slane %v2487_v39, 7  ;;  %v2312_v1 = vadd.f32 %v2215_v34, %v1791_v12  ;;  %2261 = vmatmul.f32.gmra.mxu0 %v5818_v38  ;;  %v7294_v38 = vsel %vm754_vm1, %v2741_v59, %v2743_v35  ;;  %9776 = vst [vmem:[#allocation81_spill] sm:$0xff] %v7297_v40 }
 0x38e   : > { %v1422_v39 = vadd.f32 %v9774_v24, %v1297_v19  ;;  %9775 = vst [vmem:[#allocation28_spill] sm:$0xff] %v7294_v38  ;;  %v1794_v8 = vadd.f32 %v6715_v16, %v1669_v33  ;;  %v3016_v16 = vld [vmem:[%s9112_s5 + $0xe8] sm:$0xff]  ;;  %v9779_v33 = vld [vmem:[#allocation140_spill] sm:$0xff]  ;;  %v7317_v25 = vpop.f32.mrf.mxu3 }
 0x38f   : > { %v2352_v57 = vadd.f32 %v7127_v21, %v2312_v1  ;;  %v9777_v1 = vld [vmem:[#allocation123_spill] sm:$0xff]  ;;  %v2665_v59 = vsel %vm553_vm0, 0.0, %v7280_v13  ;;  %v1300_v35 = vadd.f32 %v9779_v33, %v9778_v6  ;;  %3538 = vmatpush.msrb.mxu2 %v3016_v16 }
 0x390   : > { %4690 = vmatmul.msk.f32.gmra.mxu1 %vm5174_vm2, %v7280_v13  ;;  %v1547_v31 = vadd.f32 %v9777_v1, %v1422_v39  ;;  %v2450_v39 = vperm.slane %v7135_v18, 3  ;;  %v9781_v1 = vld [vmem:[#allocation152_spill] sm:$0xff] }
 0x391   : > { %v2388_v12 = vmax.f32 %v2352_v57, 0.0  ;;  %v1425_v16 = vadd.f32 %v9781_v1, %v1300_v35  ;;  %v9784_v35 = vld [vmem:[#allocation46_spill] sm:$0xff] }
 0x392   : > { %v2217_v34 = vpop.f32.mrf.mxu0 }
 0x393   : > { %v2488_v3 = vmul.f32 %v2449_v43, %v2388_v12  ;;  %v2218_v14 = vadd.f32 %v2217_v34, %v6902_v29  ;;  %3216 = vmatmul.f32.gmra.mxu2 %v7294_v38  ;;  %3329 = vmatmul.f32.gmra.mxu3 %v7297_v40  ;;  %v7310_v43 = vpop.f32.mrf.mxu2  ;;  %v3000_v29 = vld [vmem:[%s9112_s5 + $0x68] sm:$0xff]  ;;  %v2745_v34 = vrot.slane %v2665_v59, 1 }
 0x394   : > { %3425 = vmatpush.msrb.mxu1 %v3000_v29 }
 0x395   : > { %v2562_v4 = vrot.slane %v2488_v3, 7  ;;  %v2313_v19 = vadd.f32 %v2218_v14, %v1794_v8  ;;  %2264 = vmatmul.f32.gmra.mxu0 %v5836_v42  ;;  %v9780_v42 = vld [vmem:[#allocation178_spill] sm:$0xff]  ;;  %v2871_v3 = vrot.slane %v2665_v59, 2 }
 0x396   : > { %v1672_v57 = vadd.f32 %v9780_v42, %v1547_v31  ;;  %v7330_v31 = vpop.f32.mrf.mxu1 }
 0x397   : > { %v2353_v24 = vadd.f32 %v7127_v21, %v2313_v19  ;;  %v7324_v12 = vsel %vm553_vm0, %v7280_v13, %v2562_v4  ;;  %v2683_v59 = vsel %vm553_vm0, %v2562_v4, 0.0 }
 0x398   : > { %3109 = vmatmul.f32.gmra.mxu1 %v7324_v12  ;;  %v2746_v8 = vrot.slane %v7324_v12, 1  ;;  %v2872_v14 = vrot.slane %v7324_v12, 2  ;;  %v1797_v42 = vadd.f32 %v6736_v11, %v1672_v57  ;;  %v2874_v37 = vrot.slane %v2683_v59, 2  ;;  %v9786_v11 = vld [vmem:[#allocation141_spill] sm:$0xff] }
 0x399   : > { %v2389_v29 = vmax.f32 %v2353_v24, 0.0  ;;  %v1550_v24 = vadd.f32 %v9784_v35, %v1425_v16  ;;  %v1303_v57 = vadd.f32 %v9786_v11, %v9785_v20 }
 0x39a   : > { %v2220_v19 = vpop.f32.mrf.mxu0  ;;  %v7333_v6 = vsel %vm754_vm1, %v2745_v34, %v2746_v8  ;;  %v7336_v33 = vsel %vm895_vm3, %v2871_v3, %v2872_v14  ;;  %v2748_v3 = vrot.slane %v2683_v59, 1  ;;  %v7363_v20 = vsel %vm895_vm3, %v2872_v14, %v2874_v37  ;;  %v9793_v14 = vld [vmem:[#allocation14_spill] sm:$0xff] }
 0x39b   : > { %9782 = vst [vmem:[#allocation132_spill] sm:$0xff] %v7333_v6  ;;  %v2489_v40 = vmul.f32 %v2450_v39, %v2389_v29  ;;  %v2221_v38 = vadd.f32 %v2220_v19, %v6912_v44  ;;  %3219 = vmatmul.f32.gmra.mxu2 %v7333_v6  ;;  %3332 = vmatmul.f32.gmra.mxu3 %v7336_v33  ;;  %v7351_v19 = vpop.f32.mrf.mxu2 }
 0x39c   : > { %9783 = vst [vmem:[#allocation145_spill] sm:$0xff] %v7336_v33  ;;  %v1675_v44 = vadd.f32 %v6693_v48, %v1550_v24 }
 0x39d   : > { %v7344_v1 = vrot.slane %v2489_v40, 7  ;;  %v2314_v34 = vadd.f32 %v2221_v38, %v1797_v42  ;;  %2267 = vmatmul.f32.gmra.mxu0 %v5855_v17  ;;  %v7356_v40 = vpop.f32.mrf.mxu3  ;;  %v9787_v38 = vld [vmem:[#allocation154_spill] sm:$0xff]  ;;  %v7360_v42 = vsel %vm754_vm1, %v2746_v8, %v2748_v3  ;;  %9789 = vst [vmem:[#allocation84_spill] sm:$0xff] %v7363_v20  ;;  %v9791_v8 = vld [vmem:[#allocation83_spill] sm:$0xff] }
 0x39e   : > { %v1428_v4 = vadd.f32 %v9787_v38, %v1303_v57  ;;  %9788 = vst [vmem:[#allocation32_spill] sm:$0xff] %v7360_v42  ;;  %v1800_v48 = vadd.f32 %v6756_v53, %v1675_v44  ;;  %v7369_v24 = vpop.f32.mrf.mxu1  ;;  %v3015_v53 = vld [vmem:[%s9112_s5 + $0xe0] sm:$0xff]  ;;  %v9794_v44 = vld [vmem:[#allocation180_spill] sm:$0xff] }
 0x39f   : > { %v2354_v29 = vadd.f32 %v7127_v21, %v2314_v34  ;;  %v9790_v34 = vld [vmem:[#allocation54_spill] sm:$0xff]  ;;  %v2666_v37 = vsel %vm553_vm0, 0.0, %v7344_v1  ;;  %3539 = vmatpush.msrb.mxu2 %v3015_v53 }
 0x3a0   : > { %4692 = vmatmul.msk.f32.gmra.mxu1 %vm5174_vm2, %v7344_v1  ;;  %v1553_v11 = vadd.f32 %v9790_v34, %v1428_v4 }
 0x3a1   : > { %v2390_v17 = vmax.f32 %v2354_v29, 0.0 }
 0x3a2   : > { %v2223_v16 = vpop.f32.mrf.mxu0  ;;  %v1678_v38 = vadd.f32 %v9794_v44, %v1553_v11 }
 0x3a3   : > { %v2490_v59 = vmul.f32 %v2450_v39, %v2390_v17  ;;  %v2224_v35 = vadd.f32 %v2223_v16, %v6926_v58  ;;  %3222 = vmatmul.f32.gmra.mxu2 %v7360_v42  ;;  %3335 = vmatmul.f32.gmra.mxu3 %v7363_v20  ;;  %v2999_v58 = vld [vmem:[%s9112_s5 + $0x60] sm:$0xff]  ;;  %v9792_v39 = vld [vmem:[#allocation95_spill] sm:$0xff]  ;;  %v2451_v17 = vperm.slane %v7135_v18, 4  ;;  %v7394_v11 = vpop.f32.mrf.mxu2  ;;  %v9798_v20 = vld [vmem:[#allocation188_spill] sm:$0xff] }
 0x3a4   : > { %v1306_v3 = vadd.f32 %v9793_v14, %v9792_v39  ;;  %3426 = vmatpush.msrb.mxu1 %v2999_v58  ;;  %v1803_v42 = vadd.f32 %v9798_v20, %v1678_v38  ;;  %v9802_v38 = vld [vmem:[#allocation98_spill] sm:$0xff]  ;;  %v10164_v56 = vld [vmem:[#allocation84_spill] sm:$0xff] }
 0x3a5   : > { %v2565_v57 = vrot.slane %v2490_v59, 7  ;;  %v2315_v29 = vadd.f32 %v2224_v35, %v1800_v48  ;;  %2270 = vmatmul.f32.gmra.mxu0 %v9791_v8  ;;  %v2750_v48 = vrot.slane %v2666_v37, 1  ;;  %v2876_v35 = vrot.slane %v2666_v37, 2  ;;  %v9795_v8 = vld [vmem:[#allocation156_spill] sm:$0xff]  ;;  %v7402_v44 = vpop.f32.mrf.mxu3 }
 0x3a6   : > { %v1431_v53 = vadd.f32 %v9795_v8, %v1306_v3  ;;  %v7413_v52 = vpop.f32.mrf.mxu1 }
 0x3a7   : > { %v2355_v4 = vadd.f32 %v7127_v21, %v2315_v29  ;;  %v7388_v16 = vsel %vm553_vm0, %v7344_v1, %v2565_v57  ;;  %v2684_v3 = vsel %vm553_vm0, %v2565_v57, 0.0  ;;  %9801 = vst [vmem:[#allocation121_spill] sm:$0xff] %v7413_v52 }
 0x3a8   : > { %3115 = vmatmul.f32.gmra.mxu1 %v7388_v16  ;;  %v2751_v59 = vrot.slane %v7388_v16, 1  ;;  %v2877_v34 = vrot.slane %v7388_v16, 2  ;;  %v2753_v28 = vrot.slane %v2684_v3, 1  ;;  %v2879_v20 = vrot.slane %v2684_v3, 2 }
 0x3a9   : > { %v2391_v58 = vmax.f32 %v2355_v4, 0.0  ;;  %v9799_v4 = vld [vmem:[#allocation131_spill] sm:$0xff] }
 0x3aa   : > { %v2226_v29 = vpop.f32.mrf.mxu0  ;;  %v7397_v39 = vsel %vm754_vm1, %v2750_v48, %v2751_v59  ;;  %v7400_v14 = vsel %vm895_vm3, %v2876_v35, %v2877_v34  ;;  %v1556_v8 = vadd.f32 %v9799_v4, %v1431_v53  ;;  %v9800_v35 = vld [vmem:[#allocation85_spill] sm:$0xff]  ;;  %v7427_v3 = vsel %vm895_vm3, %v2877_v34, %v2879_v20  ;;  %v9808_v4 = vld [vmem:[#allocation35_spill] sm:$0xff] }
 0x3ab   : > { %9796 = vst [vmem:[#allocation135_spill] sm:$0xff] %v7397_v39  ;;  %v2491_v33 = vmul.f32 %v2451_v17, %v2391_v58  ;;  %v2227_v37 = vadd.f32 %v2226_v29, %v6938_v41  ;;  %3225 = vmatmul.f32.gmra.mxu2 %v7397_v39  ;;  %3338 = vmatmul.f32.gmra.mxu3 %v7400_v14  ;;  %v9803_v58 = vld [vmem:[#allocation18_spill] sm:$0xff]  ;;  %v9804_v29 = vld [vmem:[#allocation15_spill] sm:$0xff] }
 0x3ac   : > { %9797 = vst [vmem:[#allocation22_spill] sm:$0xff] %v7400_v14  ;;  %v1309_v41 = vadd.f32 %v9803_v58, %v9802_v38  ;;  %v1681_v39 = vadd.f32 %v9804_v29, %v1556_v8  ;;  %v9810_v29 = vld [vmem:[#allocation88_spill] sm:$0xff]  ;;  %v9812_v20 = vld [vmem:[#allocation147_spill] sm:$0xff] }
 0x3ad   : > { %v7410_v48 = vrot.slane %v2491_v33, 7  ;;  %v2316_v6 = vadd.f32 %v2227_v37, %v1803_v42  ;;  %2273 = vmatmul.f32.gmra.mxu0 %v9800_v35  ;;  %v9805_v33 = vld [vmem:[#allocation41_spill] sm:$0xff]  ;;  %v7424_v37 = vsel %vm754_vm1, %v2751_v59, %v2753_v28  ;;  %9807 = vst [vmem:[#allocation137_spill] sm:$0xff] %v7427_v3  ;;  %v7435_v58 = vpop.f32.mrf.mxu3 }
 0x3ae   : > { %v1434_v57 = vadd.f32 %v9805_v33, %v1309_v41  ;;  %9806 = vst [vmem:[#allocation87_spill] sm:$0xff] %v7424_v37  ;;  %v1806_v35 = vadd.f32 %v9808_v4, %v1681_v39  ;;  %v9811_v39 = vld [vmem:[#allocation101_spill] sm:$0xff]  ;;  %v2452_v4 = vperm.slane %v7135_v18, 5 }
 0x3af   : > { %v2356_v14 = vadd.f32 %v7127_v21, %v2316_v6  ;;  %v7433_v6 = vpop.f32.mrf.mxu2  ;;  %v2667_v34 = vsel %vm553_vm0, 0.0, %v7410_v48  ;;  %v1312_v33 = vadd.f32 %v9812_v20, %v9811_v39 }
 0x3b0   : > { %4694 = vmatmul.msk.f32.gmra.mxu1 %vm5174_vm2, %v7410_v48 }
 0x3b1   : > { %v2392_v42 = vmax.f32 %v2356_v14, 0.0  ;;  %v9809_v14 = vld [vmem:[#allocation134_spill] sm:$0xff] }
 0x3b2   : > { %v2229_v53 = vpop.f32.mrf.mxu0  ;;  %v1559_v41 = vadd.f32 %v9809_v14, %v1434_v57  ;;  %v9813_v57 = vld [vmem:[#allocation19_spill] sm:$0xff] }
 0x3b3   : > { %v2492_v38 = vmul.f32 %v2451_v17, %v2392_v42  ;;  %v2230_v8 = vadd.f32 %v2229_v53, %v6947_v22  ;;  %3228 = vmatmul.f32.gmra.mxu2 %v7424_v37  ;;  %3341 = vmatmul.f32.gmra.mxu3 %v7427_v3  ;;  %v3014_v22 = vld [vmem:[%s9112_s5 + $0xd8] sm:$0xff]  ;;  %v9818_v3 = vld [vmem:[#allocation39_spill] sm:$0xff] }
 0x3b4   : > { %v2998_v17 = vld [vmem:[%s9112_s5 + $0x58] sm:$0xff]  ;;  %3540 = vmatpush.msrb.mxu2 %v3014_v22  ;;  %v1684_v42 = vadd.f32 %v9813_v57, %v1559_v41 }
 0x3b5   : > { %v2568_v28 = vrot.slane %v2492_v38, 7  ;;  %v2317_v59 = vadd.f32 %v2230_v8, %v1806_v35  ;;  %2276 = vmatmul.f32.gmra.mxu0 %v9810_v29  ;;  %3427 = vmatpush.msrb.mxu1 %v2998_v17  ;;  %v7456_v38 = vpop.f32.mrf.mxu1  ;;  %v2755_v8 = vrot.slane %v2667_v34, 1  ;;  %v2881_v29 = vrot.slane %v2667_v34, 2  ;;  %v9815_v17 = vld [vmem:[#allocation161_spill] sm:$0xff] }
 0x3b6   : > { %9814 = vst [vmem:[#allocation149_spill] sm:$0xff] %v7456_v38  ;;  %v1437_v41 = vadd.f32 %v9815_v17, %v1312_v33  ;;  %v1809_v37 = vadd.f32 %v9818_v3, %v1684_v42  ;;  %v9819_v33 = vld [vmem:[#allocation10_spill] sm:$0xff]  ;;  %v9820_v38 = vld [vmem:[#allocation91_spill] sm:$0xff]  ;;  %v7479_v42 = vpop.f32.mrf.mxu3 }
 0x3b7   : > { %v2357_v53 = vadd.f32 %v7127_v21, %v2317_v59  ;;  %v7454_v35 = vsel %vm553_vm0, %v7410_v48, %v2568_v28  ;;  %v2685_v34 = vsel %vm553_vm0, %v2568_v28, 0.0 }
 0x3b8   : > { %3121 = vmatmul.f32.gmra.mxu1 %v7454_v35  ;;  %v2756_v14 = vrot.slane %v7454_v35, 1  ;;  %v2882_v22 = vrot.slane %v7454_v35, 2  ;;  %v2758_v52 = vrot.slane %v2685_v34, 1  ;;  %v2884_v3 = vrot.slane %v2685_v34, 2 }
 0x3b9   : > { %v2393_v39 = vmax.f32 %v2357_v53, 0.0  ;;  %v1562_v53 = vadd.f32 %v9819_v33, %v1437_v41 }
 0x3ba   : > { %v2232_v59 = vpop.f32.mrf.mxu0  ;;  %v7463_v20 = vsel %vm754_vm1, %v2755_v8, %v2756_v14  ;;  %v7466_v57 = vsel %vm895_vm3, %v2881_v29, %v2882_v22  ;;  %v7477_v29 = vpop.f32.mrf.mxu2  ;;  %v7494_v33 = vsel %vm754_vm1, %v2756_v14, %v2758_v52  ;;  %v3013_v14 = vld [vmem:[%s9112_s5 + $0xd0] sm:$0xff] }
 0x3bb   : > { %9816 = vst [vmem:[#allocation123_spill] sm:$0xff] %v7463_v20  ;;  %v2493_v46 = vmul.f32 %v2452_v4, %v2393_v39  ;;  %v2233_v9 = vadd.f32 %v2232_v59, %v6962_v15  ;;  %3231 = vmatmul.f32.gmra.mxu2 %v7463_v20  ;;  %3344 = vmatmul.f32.gmra.mxu3 %v7466_v57  ;;  %v9821_v15 = vld [vmem:[#allocation103_spill] sm:$0xff]  ;;  %v9822_v39 = vld [vmem:[#allocation150_spill] sm:$0xff]  ;;  %v9823_v20 = vld [vmem:[#allocation185_spill] sm:$0xff] }
 0x3bc   : > { %9817 = vst [vmem:[#allocation89_spill] sm:$0xff] %v7466_v57  ;;  %v1315_v59 = vadd.f32 %v9822_v39, %v9821_v15  ;;  %v1687_v57 = vadd.f32 %v9823_v20, %v1562_v53  ;;  %v7497_v20 = vsel %vm895_vm3, %v2882_v22, %v2884_v3  ;;  %v9828_v39 = vld [vmem:[#allocation144_spill] sm:$0xff]  ;;  %v9831_v22 = vld [vmem:[#allocation34_spill] sm:$0xff]  ;;  %3541 = vmatpush.msrb.mxu2 %v3013_v14  ;;  %v4766_v3 = vld [vmem:[%s9112_s5 + $0x378] sm:$0xff] }
 0x3bd   : > { %v7474_v17 = vrot.slane %v2493_v46, 7  ;;  %v2318_v8 = vadd.f32 %v2233_v9, %v1809_v37  ;;  %2279 = vmatmul.f32.gmra.mxu0 %v9820_v38  ;;  %v9824_v9 = vld [vmem:[#allocation164_spill] sm:$0xff]  ;;  %v2111_v37 = vadd.f32 %v6972_v55, %v6970_v5  ;;  %v7491_v41 = vpop.f32.mrf.mxu1  ;;  %9826 = vst [vmem:[#allocation178_spill] sm:$0xff] %v7494_v33  ;;  %v9833_v14 = vld [vmem:[#allocation166_spill] sm:$0xff] }
 0x3be   : > { %v1440_v46 = vadd.f32 %v9824_v9, %v1315_v59  ;;  %9825 = vst [vmem:[#allocation140_spill] sm:$0xff] %v7491_v41  ;;  %v1812_v53 = vadd.f32 %v6921_v54, %v1687_v57  ;;  %v2997_v54 = vld [vmem:[%s9112_s5 + $0x50] sm:$0xff]  ;;  %v9832_v9 = vld [vmem:[#allocation187_spill] sm:$0xff]  ;;  %3811 = vmatpush.msra.mxu0 %v4766_v3 }
 0x3bf   : > { %v2358_v28 = vadd.f32 %v7127_v21, %v2318_v8  ;;  %9827 = vst [vmem:[#allocation152_spill] sm:$0xff] %v7497_v20  ;;  %v2668_v52 = vsel %vm553_vm0, 0.0, %v7474_v17  ;;  %3428 = vmatpush.msrb.mxu1 %v2997_v54 }
 0x3c0   : > { %4696 = vmatmul.msk.f32.gmra.mxu1 %vm5174_vm2, %v7474_v17  ;;  %v1565_v5 = vadd.f32 %v9828_v39, %v1440_v46  ;;  %v2886_v39 = vrot.slane %v2668_v52, 2 }
 0x3c1   : > { %v2394_v38 = vmax.f32 %v2358_v28, 0.0  ;;  %v9829_v28 = vld [vmem:[#allocation94_spill] sm:$0xff] }
 0x3c2   : > { %v2235_v34 = vpop.f32.mrf.mxu0  ;;  %v1690_v46 = vadd.f32 %v9832_v9, %v1565_v5  ;;  %v7529_v5 = vpop.f32.mrf.mxu3 }
 0x3c3   : > { %v2494_v8 = vmul.f32 %v2452_v4, %v2394_v38  ;;  %v2236_v15 = vadd.f32 %v2235_v34, %v2111_v37  ;;  %3234 = vmatmul.f32.gmra.mxu2 %v7494_v33  ;;  %3347 = vmatmul.f32.gmra.mxu3 %v7497_v20  ;;  %v9830_v4 = vld [vmem:[#allocation106_spill] sm:$0xff]  ;;  %v2453_v38 = vperm.slane %v7135_v18, 6  ;;  %v4764_v20 = vld [vmem:[%s9112_s5 + $0x368] sm:$0xff] }
 0x3c4   : > { %v1318_v57 = vadd.f32 %v9831_v22, %v9830_v4  ;;  %v2114_v4 = vadd.f32 %v6994_v45, %v6984_v47  ;;  %v1815_v33 = vadd.f32 %v6936_v63, %v1690_v46  ;;  %v9838_v46 = vld [vmem:[#allocation97_spill] sm:$0xff] }
 0x3c5   : > { %v2571_v55 = vrot.slane %v2494_v8, 7  ;;  %v2319_v59 = vadd.f32 %v2236_v15, %v1812_v53  ;;  %2282 = vmatmul.f32.gmra.mxu0 %v9829_v28  ;;  %v7524_v53 = vpop.f32.mrf.mxu2  ;;  %v2760_v8 = vrot.slane %v2668_v52, 1  ;;  %v7550_v45 = vpop.f32.mrf.mxu1 }
 0x3c6   : > { %v1443_v54 = vadd.f32 %v9833_v14, %v1318_v57  ;;  %9836 = vst [vmem:[#allocation141_spill] sm:$0xff] %v7550_v45  ;;  %v9839_v14 = vld [vmem:[#allocation66_spill] sm:$0xff] }
 0x3c7   : > { %v2359_v37 = vadd.f32 %v7127_v21, %v2319_v59  ;;  %v7522_v34 = vsel %vm553_vm0, %v7474_v17, %v2571_v55  ;;  %v4765_v59 = vld [vmem:[%s9112_s5 + $0x370] sm:$0xff]  ;;  %v2686_v47 = vsel %vm553_vm0, %v2571_v55, 0.0  ;;  %v9841_v55 = vld [vmem:[#allocation55_spill] sm:$0xff] }
 0x3c8   : > { %3127 = vmatmul.f32.gmra.mxu1 %v7522_v34  ;;  %v2761_v15 = vrot.slane %v7522_v34, 1  ;;  %v2887_v28 = vrot.slane %v7522_v34, 2  ;;  %3812 = vmatpush.msra.mxu0 %v4765_v59 }
 0x3c9   : > { %v2395_v22 = vmax.f32 %v2359_v37, 0.0  ;;  %v4763_v37 = vld [vmem:[%s9112_s5 + $0x360] sm:$0xff] }
 0x3ca   : > { %v2238_v3 = vpop.f32.mrf.mxu0  ;;  %v7538_v9 = vsel %vm754_vm1, %v2760_v8, %v2761_v15  ;;  %v7541_v52 = vsel %vm895_vm3, %v2886_v39, %v2887_v28  ;;  %3813 = vmatpush.msra.mxu0 %v4764_v20  ;;  %v9837_v8 = vld [vmem:[#allocation146_spill] sm:$0xff]  ;;  %v4762_v20 = vld [vmem:[%s9112_s5 + $0x358] sm:$0xff] }
 0x3cb   : > { %9834 = vst [vmem:[#allocation46_spill] sm:$0xff] %v7538_v9  ;;  %v2495_v41 = vmul.f32 %v2453_v38, %v2395_v22  ;;  %v2239_v57 = vadd.f32 %v2238_v3, %v2114_v4  ;;  %3237 = vmatmul.f32.gmra.mxu2 %v7538_v9  ;;  %3350 = vmatmul.f32.gmra.mxu3 %v7541_v52  ;;  %v9840_v4 = vld [vmem:[#allocation38_spill] sm:$0xff]  ;;  %v2763_v3 = vrot.slane %v2686_v47, 1 }
 0x3cc   : > { %9835 = vst [vmem:[#allocation92_spill] sm:$0xff] %v7541_v52  ;;  %v1568_v39 = vadd.f32 %v9837_v8, %v1443_v54  ;;  %v1321_v22 = vadd.f32 %v9840_v4, %v9839_v14  ;;  %v2889_v52 = vrot.slane %v2686_v47, 2  ;;  %3814 = vmatpush.msra.mxu0 %v4763_v37  ;;  %v9843_v47 = vld [vmem:[#allocation148_spill] sm:$0xff]  ;;  %v4760_v14 = vld [vmem:[%s9112_s5 + $0x348] sm:$0xff] }
 0x3cd   : > { %v7556_v59 = vrot.slane %v2495_v41, 7  ;;  %v2320_v63 = vadd.f32 %v2239_v57, %v1815_v33  ;;  %2285 = vmatmul.f32.gmra.mxu0 %v9838_v46  ;;  %v4761_v41 = vld [vmem:[%s9112_s5 + $0x350] sm:$0xff]  ;;  %v2117_v33 = vadd.f32 %v7003_v26, %v7001_v36  ;;  %v7574_v57 = vpop.f32.mrf.mxu2  ;;  %v7583_v46 = vpop.f32.mrf.mxu3 }
 0x3ce   : > { %v1693_v9 = vadd.f32 %v9841_v55, %v1568_v39  ;;  %3815 = vmatpush.msra.mxu0 %v4762_v20  ;;  %9842 = vst [vmem:[#allocation154_spill] sm:$0xff] %v7574_v57  ;;  %v1446_v37 = vadd.f32 %v9843_v47, %v1321_v22  ;;  %v7578_v39 = vsel %vm754_vm1, %v2761_v15, %v2763_v3  ;;  %v4759_v15 = vld [vmem:[%s9112_s5 + $0x340] sm:$0xff]  ;;  %v9848_v3 = vld [vmem:[#allocation99_spill] sm:$0xff]  ;;  %v9849_v20 = vld [vmem:[#allocation108_spill] sm:$0xff] }
 0x3cf   : > { %v2360_v45 = vadd.f32 %v7127_v21, %v2320_v63  ;;  %9844 = vst [vmem:[#allocation54_spill] sm:$0xff] %v7578_v39  ;;  %v7581_v63 = vsel %vm895_vm3, %v2887_v28, %v2889_v52  ;;  %v9847_v28 = vld [vmem:[#allocation26_spill] sm:$0xff]  ;;  %v9850_v55 = vld [vmem:[#allocation159_spill] sm:$0xff]  ;;  %v9852_v47 = vld [vmem:[#allocation56_spill] sm:$0xff] }
 0x3d0   : > { %4698 = vmatmul.msk.f32.gmra.mxu1 %vm5174_vm2, %v7556_v59  ;;  %9845 = vst [vmem:[#allocation83_spill] sm:$0xff] %v7581_v63  ;;  %3816 = vmatpush.msra.mxu0 %v4761_v41  ;;  %v1818_v26 = vadd.f32 %v6949_v61, %v1693_v9  ;;  %v1571_v52 = vadd.f32 %v9847_v28, %v1446_v37  ;;  %v2669_v61 = vsel %vm553_vm0, 0.0, %v7556_v59  ;;  %v2996_v9 = vld [vmem:[%s9112_s5 + $0x48] sm:$0xff] }
 0x3d1   : > { %v2396_v54 = vmax.f32 %v2360_v45, 0.0  ;;  %9846 = vst [vmem:[#allocation95_spill] sm:$0xff] %v7583_v46  ;;  %v1324_v41 = vadd.f32 %v9850_v55, %v9849_v20  ;;  %3429 = vmatpush.msrb.mxu1 %v2996_v9  ;;  %v2891_v28 = vrot.slane %v2669_v61, 2  ;;  %v9855_v9 = vld [vmem:[#allocation193_spill] sm:$0xff] }
 0x3d2   : > { %v2241_v8 = vpop.f32.mrf.mxu0  ;;  %3817 = vmatpush.msra.mxu0 %v4760_v14  ;;  %v1696_v37 = vadd.f32 %v9852_v47, %v1571_v52  ;;  %v2454_v14 = vperm.slane %v7135_v18, 7  ;;  %v4757_v18 = vld [vmem:[%s9112_s5 + $0x330] sm:$0xff] }
 0x3d3   : > { %v2496_v36 = vmul.f32 %v2453_v38, %v2396_v54  ;;  %v2242_v45 = vadd.f32 %v2241_v8, %v2117_v33  ;;  %3240 = vmatmul.f32.gmra.mxu2 %v7578_v39  ;;  %3353 = vmatmul.f32.gmra.mxu3 %v7581_v63  ;;  %v3012_v38 = vld [vmem:[%s9112_s5 + $0xc8] sm:$0xff]  ;;  %v7606_v33 = vpop.f32.mrf.mxu1  ;;  %v4758_v54 = vld [vmem:[%s9112_s5 + $0x338] sm:$0xff] }
 0x3d4   : > { %9851 = vst [vmem:[#allocation14_spill] sm:$0xff] %v7606_v33  ;;  %3542 = vmatpush.msrb.mxu2 %v3012_v38  ;;  %3818 = vmatpush.msra.mxu0 %v4759_v15  ;;  %v9854_v38 = vld [vmem:[#allocation133_spill] sm:$0xff] }
 0x3d5   : > { %v2574_v4 = vrot.slane %v2496_v36, 7  ;;  %v2321_v22 = vadd.f32 %v2242_v45, %v1818_v26  ;;  %2288 = vmatmul.f32.gmra.mxu0 %v9848_v3  ;;  %v2765_v36 = vrot.slane %v2669_v61, 1  ;;  %v2120_v52 = vadd.f32 %v9855_v9, %v9854_v38  ;;  %v9859_v61 = vld [vmem:[#allocation33_spill] sm:$0xff] }
 0x3d6   : > { %3819 = vmatpush.msra.mxu0 %v4758_v54  ;;  %v1821_v39 = vadd.f32 %v9859_v61, %v1696_v37 }
 0x3d7   : > { %v2361_v8 = vadd.f32 %v7127_v21, %v2321_v22  ;;  %v7616_v26 = vsel %vm553_vm0, %v7556_v59, %v2574_v4  ;;  %v9856_v22 = vld [vmem:[#allocation30_spill] sm:$0xff]  ;;  %v2687_v54 = vsel %vm553_vm0, %v2574_v4, 0.0 }
 0x3d8   : > { %9853 = vst [vmem:[#allocation180_spill] sm:$0xff] %v7616_v26  ;;  %3133 = vmatmul.f32.gmra.mxu1 %v7616_v26  ;;  %v2766_v45 = vrot.slane %v7616_v26, 1  ;;  %v2892_v3 = vrot.slane %v7616_v26, 2  ;;  %v1449_v55 = vadd.f32 %v9856_v22, %v1324_v41  ;;  %v4756_v41 = vld [vmem:[%s9112_s5 + $0x328] sm:$0xff]  ;;  %3820 = vmatpush.msra.mxu0 %v4757_v18  ;;  %v4755_v4 = vld [vmem:[%s9112_s5 + $0x320] sm:$0xff]  ;;  %v2768_v61 = vrot.slane %v2687_v54, 1 }
 0x3d9   : > { %v2397_v20 = vmax.f32 %v2361_v8, 0.0  ;;  %v7637_v8 = vpop.f32.mrf.mxu2  ;;  %v9866_v22 = vld [vmem:[#allocation162_spill] sm:$0xff] }
 0x3da   : > { %v2244_v15 = vpop.f32.mrf.mxu0  ;;  %v7628_v47 = vsel %vm754_vm1, %v2765_v36, %v2766_v45  ;;  %v7631_v63 = vsel %vm895_vm3, %v2891_v28, %v2892_v3  ;;  %9860 = vst [vmem:[#allocation131_spill] sm:$0xff] %v7637_v8  ;;  %v7642_v36 = vpop.f32.mrf.mxu3  ;;  %v9862_v28 = vld [vmem:[#allocation151_spill] sm:$0xff]  ;;  %3821 = vmatpush.msra.mxu0 %v4756_v41  ;;  %v9871_v41 = vld [vmem:[#allocation153_spill] sm:$0xff] }
 0x3db   : > { %9857 = vst [vmem:[#allocation156_spill] sm:$0xff] %v7628_v47  ;;  %v2497_v33 = vmul.f32 %v2454_v14, %v2397_v20  ;;  %v2245_v46 = vadd.f32 %v2244_v15, %v2120_v52  ;;  %3243 = vmatmul.f32.gmra.mxu2 %v7628_v47  ;;  %3356 = vmatmul.f32.gmra.mxu3 %v7631_v63  ;;  %v9864_v52 = vld [vmem:[#allocation102_spill] sm:$0xff]  ;;  %v9865_v20 = vld [vmem:[#allocation109_spill] sm:$0xff]  ;;  %v9867_v47 = vld [vmem:[#allocation68_spill] sm:$0xff] }
 0x3dc   : > { %9858 = vst [vmem:[#allocation188_spill] sm:$0xff] %v7631_v63  ;;  %v1574_v38 = vadd.f32 %v9862_v28, %v1449_v55  ;;  %v1327_v15 = vadd.f32 %v9866_v22, %v9865_v20  ;;  %v2894_v63 = vrot.slane %v2687_v54, 2  ;;  %3822 = vmatpush.msra.mxu0 %v4755_v4  ;;  %v9870_v55 = vld [vmem:[#allocation50_spill] sm:$0xff]  ;;  %v9874_v22 = vld [vmem:[#allocation128_spill] sm:$0xff] }
 0x3dd   : > { %9861 = vst [vmem:[#allocation85_spill] sm:$0xff] %v7642_v36  ;;  %v7645_v37 = vrot.slane %v2497_v33, 7  ;;  %v2322_v9 = vadd.f32 %v2245_v46, %v1821_v39  ;;  %2291 = vmatmul.f32.gmra.mxu0 %v9864_v52  ;;  %v4754_v39 = vld [vmem:[%s9112_s5 + $0x318] sm:$0xff]  ;;  %v7658_v46 = vpop.f32.mrf.mxu1  ;;  %v7670_v52 = vsel %vm754_vm1, %v2766_v45, %v2768_v61 }
 0x3de   : > { %v1699_v36 = vadd.f32 %v9867_v47, %v1574_v38  ;;  %9868 = vst [vmem:[#allocation18_spill] sm:$0xff] %v7658_v46  ;;  %v9869_v33 = vld [vmem:[#allocation65_spill] sm:$0xff]  ;;  %v4753_v47 = vld [vmem:[%s9112_s5 + $0x310] sm:$0xff]  ;;  %v1452_v38 = vadd.f32 %v9871_v41, %v1327_v15  ;;  %v7673_v20 = vsel %vm895_vm3, %v2892_v3, %v2894_v63  ;;  %3823 = vmatpush.msra.mxu0 %v4754_v39  ;;  %v4752_v15 = vld [vmem:[%s9112_s5 + $0x308] sm:$0xff] }
 0x3df   : > { %9863 = vst [vmem:[#allocation98_spill] sm:$0xff] %v7645_v37  ;;  %v2362_v18 = vadd.f32 %v7127_v21, %v2322_v9  ;;  %v2123_v28 = vadd.f32 %v9870_v55, %v9869_v33  ;;  %v9876_v63 = vld [vmem:[#allocation105_spill] sm:$0xff]  ;;  %v2670_v3 = vsel %vm553_vm0, 0.0, %v7645_v37  ;;  %v2995_v39 = vld [vmem:[%s9112_s5 + $0x40] sm:$0xff] }
 0x3e0   : > { %4700 = vmatmul.msk.f32.gmra.mxu1 %vm5174_vm2, %v7645_v37  ;;  %9872 = vst [vmem:[#allocation15_spill] sm:$0xff] %v7670_v52  ;;  %v1824_v4 = vadd.f32 %v9874_v22, %v1699_v36  ;;  %3824 = vmatpush.msra.mxu0 %v4753_v47  ;;  %v3011_v36 = vld [vmem:[%s9112_s5 + $0xc0] sm:$0xff]  ;;  %v9881_v47 = vld [vmem:[#allocation69_spill] sm:$0xff] }
 0x3e1   : > { %v2398_v54 = vmax.f32 %v2362_v18, 0.0  ;;  %9873 = vst [vmem:[#allocation41_spill] sm:$0xff] %v7673_v20  ;;  %v9875_v18 = vld [vmem:[#allocation155_spill] sm:$0xff]  ;;  %v9878_v55 = vld [vmem:[#allocation110_spill] sm:$0xff]  ;;  %3543 = vmatpush.msrb.mxu2 %v3011_v36  ;;  %3430 = vmatpush.msrb.mxu1 %v2995_v39  ;;  %v2896_v36 = vrot.slane %v2670_v3, 2 }
 0x3e2   : > { %v2247_v9 = vpop.f32.mrf.mxu0  ;;  %v1577_v45 = vadd.f32 %v9875_v18, %v1452_v38  ;;  %3825 = vmatpush.msra.mxu0 %v4752_v15  ;;  %v2770_v18 = vrot.slane %v2670_v3, 1 }
 0x3e3   : > { %v2498_v46 = vmul.f32 %v2454_v14, %v2398_v54  ;;  %v2248_v8 = vadd.f32 %v2247_v9, %v2123_v28  ;;  %3246 = vmatmul.f32.gmra.mxu2 %v7670_v52  ;;  %3359 = vmatmul.f32.gmra.mxu3 %v7673_v20  ;;  %v7685_v14 = vpop.f32.mrf.mxu2  ;;  %v9879_v28 = vld [vmem:[#allocation59_spill] sm:$0xff]  ;;  %v9291_v9 = vmov 1.0  }
 0x3e4   : > { %9877 = vst [vmem:[#allocation35_spill] sm:$0xff] %v7685_v14  ;;  %v1330_v54 = vadd.f32 %v9879_v28, %v9878_v55  ;;  %v1702_v41 = vadd.f32 %v9881_v47, %v1577_v45  ;;  %v2455_v22 = vperm.slane %v9291_v9, 0  ;;  %v9883_v55 = vld [vmem:[#allocation71_spill] sm:$0xff]  ;;  %v9884_v45 = vld [vmem:[#allocation58_spill] sm:$0xff]  ;;  %v9885_v47 = vld [vmem:[#allocation157_spill] sm:$0xff] }
 0x3e5   : > { %v2577_v61 = vrot.slane %v2498_v46, 7  ;;  %v2323_v33 = vadd.f32 %v2248_v8, %v1824_v4  ;;  %2294 = vmatmul.f32.gmra.mxu0 %v9876_v63  ;;  %v7695_v46 = vpop.f32.mrf.mxu3  ;;  %v4751_v8 = vld [vmem:[%s9112_s5 + $0x300] sm:$0xff]  ;;  %v2126_v28 = vadd.f32 %v9884_v45, %v9883_v55  ;;  %v7713_v20 = vpop.f32.mrf.mxu1 }
 0x3e6   : > { %9880 = vst [vmem:[#allocation134_spill] sm:$0xff] %v7695_v46  ;;  %3826 = vmatpush.msra.mxu0 %v4751_v8  ;;  %v1455_v9 = vadd.f32 %v9885_v47, %v1330_v54  ;;  %v9889_v14 = vld [vmem:[#allocation130_spill] sm:$0xff]  ;;  %v9890_v54 = vld [vmem:[#allocation112_spill] sm:$0xff] }
 0x3e7   : > { %v2363_v38 = vadd.f32 %v7127_v21, %v2323_v33  ;;  %v7705_v4 = vsel %vm553_vm0, %v7645_v37, %v2577_v61  ;;  %9886 = vst [vmem:[#allocation101_spill] sm:$0xff] %v7713_v20  ;;  %v1827_v3 = vadd.f32 %v9889_v14, %v1702_v41  ;;  %v2688_v8 = vsel %vm553_vm0, %v2577_v61, 0.0  ;;  %v9892_v45 = vld [vmem:[#allocation158_spill] sm:$0xff]  ;;  %v9895_v41 = vld [vmem:[#allocation72_spill] sm:$0xff] }
 0x3e8   : > { %9882 = vst [vmem:[#allocation88_spill] sm:$0xff] %v7705_v4  ;;  %3139 = vmatmul.f32.gmra.mxu1 %v7705_v4  ;;  %v2771_v63 = vrot.slane %v7705_v4, 1  ;;  %v2897_v39 = vrot.slane %v7705_v4, 2  ;;  %v1580_v47 = vadd.f32 %v9892_v45, %v1455_v9  ;;  %v2773_v57 = vrot.slane %v2688_v8, 1  ;;  %v9899_v9 = vld [vmem:[#allocation74_spill] sm:$0xff] }
 0x3e9   : > { %v2399_v33 = vmax.f32 %v2363_v38, 0.0  ;;  %v9891_v38 = vld [vmem:[#allocation64_spill] sm:$0xff]  ;;  %v2899_v14 = vrot.slane %v2688_v8, 2 }
 0x3ea   : > { %v2250_v52 = vpop.f32.mrf.mxu0  ;;  %v7716_v15 = vsel %vm754_vm1, %v2770_v18, %v2771_v63  ;;  %v7719_v46 = vsel %vm895_vm3, %v2896_v36, %v2897_v39  ;;  %v1333_v55 = vadd.f32 %v9891_v38, %v9890_v54  ;;  %v9894_v36 = vld [vmem:[#allocation53_spill] sm:$0xff]  ;;  %v9901_v54 = vld [vmem:[#allocation160_spill] sm:$0xff] }
 0x3eb   : > { %9887 = vst [vmem:[#allocation147_spill] sm:$0xff] %v7716_v15  ;;  %v2499_v37 = vmul.f32 %v2455_v22, %v2399_v33  ;;  %v2251_v4 = vadd.f32 %v2250_v52, %v2126_v28  ;;  %3249 = vmatmul.f32.gmra.mxu2 %v7716_v15  ;;  %3362 = vmatmul.f32.gmra.mxu3 %v7719_v46  ;;  %v991_v52 = vrot.slane %v9895_v41, 2  ;;  %v992_v28 = vrot.slane %v7070_v10, 2  ;;  %v9896_v33 = vld [vmem:[#allocation48_spill] sm:$0xff]  ;;  %v7735_v15 = vpop.f32.mrf.mxu2 }
 0x3ec   : > { %9888 = vst [vmem:[#allocation19_spill] sm:$0xff] %v7719_v46  ;;  %v1705_v46 = vadd.f32 %v9896_v33, %v1580_v47  ;;  %v1458_v38 = vadd.f32 %v9901_v54, %v1333_v55  ;;  %v7746_v10 = vsel %vm754_vm1, %v2771_v63, %v2773_v57  ;;  %v9904_v47 = vld [vmem:[#allocation62_spill] sm:$0xff]  ;;  %v9906_v55 = vld [vmem:[#allocation47_spill] sm:$0xff] }
 0x3ed   : > { %v7728_v18 = vrot.slane %v2499_v37, 7  ;;  %v2324_v20 = vadd.f32 %v2251_v4, %v1827_v3  ;;  %2297 = vmatmul.f32.gmra.mxu0 %v9894_v36  ;;  %9897 = vst [vmem:[#allocation39_spill] sm:$0xff] %v7735_v15  ;;  %v7740_v37 = vpop.f32.mrf.mxu3  ;;  %v9900_v4 = vld [vmem:[#allocation122_spill] sm:$0xff] }
 0x3ee   : > { %9898 = vst [vmem:[#allocation10_spill] sm:$0xff] %v7740_v37  ;;  %v2129_v3 = vadd.f32 %v9900_v4, %v9899_v9  ;;  %v1830_v36 = vadd.f32 %v9904_v47, %v1705_v46  ;;  %v1583_v9 = vadd.f32 %v9906_v55, %v1458_v38  ;;  %v3010_v46 = vld [vmem:[%s9112_s5 + $0xb8] sm:$0xff]  ;;  %v9910_v54 = vld [vmem:[#allocation2_spill] sm:$0xff]  ;;  %v9911_v47 = vmov 1.0  }
 0x3ef   : > { %9893 = vst [vmem:[#allocation161_spill] sm:$0xff] %v7728_v18  ;;  %v2364_v61 = vadd.f32 %v7127_v21, %v2324_v20  ;;  %v7749_v21 = vsel %vm895_vm3, %v2897_v39, %v2899_v14  ;;  %v993_v20 = vsel %vm895_vm3, %v991_v52, %v992_v28  ;;  %v2671_v63 = vsel %vm553_vm0, 0.0, %v7728_v18  ;;  %v9907_v39 = vld [vmem:[#allocation113_spill] sm:$0xff]  ;;  %v9908_v14 = vld [vmem:[#allocation70_spill] sm:$0xff]  ;;  %3544 = vmatpush.msrb.mxu2 %v3010_v46 }
 0x3f0   : > { %4702 = vmatmul.msk.f32.gmra.mxu1 %vm5174_vm2, %v7728_v18  ;;  %9902 = vst [vmem:[#allocation91_spill] sm:$0xff] %v7746_v10  ;;  %v1336_v52 = vadd.f32 %v9908_v14, %v9907_v39  ;;  %v1708_v38 = vadd.f32 %v9910_v54, %v1583_v9  ;;  %v2901_v46 = vrot.slane %v2671_v63, 2  ;;  %v9914_v39 = vld [vmem:[#allocation12_spill] sm:$0xff] }
 0x3f1   : > { %v2400_v8 = vmax.f32 %v2364_v61, 0.0  ;;  %9903 = vst [vmem:[#allocation103_spill] sm:$0xff] %v7749_v21  ;;  %v7755_v61 = vpop.f32.mrf.mxu1 }
 0x3f2   : > { %v2253_v45 = vpop.f32.mrf.mxu0  ;;  %9905 = vst [vmem:[#allocation150_spill] sm:$0xff] %v7755_v61 }
 0x3f3   : > { %v2500_v41 = vmul.f32 %v2455_v22, %v2400_v8  ;;  %v2254_v33 = vadd.f32 %v2253_v45, %v2129_v3  ;;  %3252 = vmatmul.f32.gmra.mxu2 %v7746_v10  ;;  %3365 = vmatmul.f32.gmra.mxu3 %v7749_v21  ;;  %v2994_v22 = vld [vmem:[%s9112_s5 + $0x38] sm:$0xff]  ;;  %v7773_v45 = vld [vmem:[%s9111_s4] ss:$0 sm:$0xff]  ;;  %v7786_v54 = vpop.f32.mrf.mxu2 }
 0x3f4   : > { %v9909_v3 = vld [vmem:[#allocation197_spill] sm:$0xff]  ;;  %3431 = vmatpush.msrb.mxu1 %v2994_v22  ;;  %v9913_v22 = vld [vmem:[#allocation139_spill] sm:$0xff]  ;;  %9915 = vst [vmem:[#allocation164_spill] sm:$0xff] %v7786_v54 }
 0x3f5   : > { %v2580_v4 = vrot.slane %v2500_v41, 7  ;;  %v2325_v57 = vadd.f32 %v2254_v33, %v1830_v36  ;;  %2300 = vmatmul.f32.gmra.mxu0 %v993_v20  ;;  %v994_v8 = vrot.slane %v9909_v3, 2  ;;  %v2456_v36 = vperm.slane %v9911_v47, 1 }
 0x3f6   : > { %v2775_v33 = vrot.slane %v2671_v63, 1  ;;  %v2132_v14 = vadd.f32 %v9914_v39, %v9913_v22  ;;  %v7796_v63 = vpop.f32.mrf.mxu3 }
 0x3f7   : > { %v2365_v20 = vadd.f32 %v7773_v45, %v2325_v57  ;;  %v7779_v41 = vsel %vm553_vm0, %v7728_v18, %v2580_v4  ;;  %v9916_v57 = vld [vmem:[#allocation51_spill] sm:$0xff]  ;;  %v995_v15 = vsel %vm895_vm3, %v992_v28, %v994_v8  ;;  %9917 = vst [vmem:[#allocation144_spill] sm:$0xff] %v7796_v63  ;;  %v9920_v28 = vld [vmem:[#allocation114_spill] sm:$0xff] }
 0x3f8   : > { %9912 = vst [vmem:[#allocation185_spill] sm:$0xff] %v7779_v41  ;;  %3145 = vmatmul.f32.gmra.mxu1 %v7779_v41  ;;  %v2776_v55 = vrot.slane %v7779_v41, 1  ;;  %v2902_v9 = vrot.slane %v7779_v41, 2  ;;  %v1461_v61 = vadd.f32 %v9916_v57, %v1336_v52  ;;  %v9918_v41 = vld [vmem:[#allocation196_spill] sm:$0xff]  ;;  %v2689_v52 = vsel %vm553_vm0, %v2580_v4, 0.0  ;;  %v9921_v8 = vld [vmem:[#allocation75_spill] sm:$0xff] }
 0x3f9   : > { %v2401_v3 = vmax.f32 %v2365_v20, 0.0  ;;  %v1833_v18 = vadd.f32 %v9918_v41, %v1708_v38  ;;  %v1339_v63 = vadd.f32 %v9921_v8, %v9920_v28  ;;  %v2778_v38 = vrot.slane %v2689_v52, 1  ;;  %v9923_v4 = vld [vmem:[#allocation165_spill] sm:$0xff] }
 0x3fa   : > { %v2256_v21 = vpop.f32.mrf.mxu0  ;;  %v7790_v10 = vsel %vm754_vm1, %v2775_v33, %v2776_v55  ;;  %v7793_v37 = vsel %vm895_vm3, %v2901_v46, %v2902_v9  ;;  %v9919_v33 = vld [vmem:[#allocation163_spill] sm:$0xff]  ;;  %v2904_v41 = vrot.slane %v2689_v52, 2 }
 0x3fb   : > { %v2501_v26 = vmul.f32 %v2456_v36, %v2401_v3  ;;  %v2257_v22 = vadd.f32 %v2256_v21, %v2132_v14  ;;  %3255 = vmatmul.f32.gmra.mxu2 %v7790_v10  ;;  %3368 = vmatmul.f32.gmra.mxu3 %v7793_v37  ;;  %v1586_v39 = vadd.f32 %v9919_v33, %v1461_v61  ;;  %v9922_v21 = vld [vmem:[#allocation52_spill] sm:$0xff]  ;;  %v7826_v8 = vpop.f32.mrf.mxu2 }
 0x3fc   : > { %v7802_v20 = vpop.f32.mrf.mxu1  ;;  %v2135_v61 = vadd.f32 %v7169_v51, %v7167_v50  ;;  %v7821_v52 = vsel %vm895_vm3, %v2902_v9, %v2904_v41  ;;  %v9925_v33 = vld [vmem:[#allocation8_spill] sm:$0xff]  ;;  %9926 = vst [vmem:[#allocation106_spill] sm:$0xff] %v7826_v8  ;;  %v9928_v51 = vld [vmem:[#allocation167_spill] sm:$0xff] }
 0x3fd   : > { %v7805_v46 = vrot.slane %v2501_v26, 7  ;;  %v2326_v57 = vadd.f32 %v2257_v22, %v1833_v18  ;;  %2303 = vmatmul.f32.gmra.mxu0 %v995_v15  ;;  %v1711_v14 = vadd.f32 %v9922_v21, %v1586_v39  ;;  %v1464_v18 = vadd.f32 %v9923_v4, %v1339_v63  ;;  %9924 = vst [vmem:[#allocation94_spill] sm:$0xff] %v7821_v52  ;;  %v3009_v9 = vld [vmem:[%s9112_s5 + $0xb0] sm:$0xff] }
 0x3fe   : > { %v7818_v22 = vsel %vm754_vm1, %v2776_v55, %v2778_v38  ;;  %v7828_v50 = vpop.f32.mrf.mxu3  ;;  %v2993_v41 = vld [vmem:[%s9112_s5 + $0x30] sm:$0xff]  ;;  %3545 = vmatpush.msrb.mxu2 %v3009_v9  ;;  %v2138_v9 = vadd.f32 %v7200_v30, %v7193_v62 }
 0x3ff   : > { %v2366_v3 = vadd.f32 %v7773_v45, %v2326_v57  ;;  %v1836_v39 = vadd.f32 %v9925_v33, %v1711_v14  ;;  %9927 = vst [vmem:[#allocation34_spill] sm:$0xff] %v7828_v50  ;;  %v1589_v63 = vadd.f32 %v9928_v51, %v1464_v18  ;;  %v9929_v14 = vld [vmem:[#allocation115_spill] sm:$0xff]  ;;  %3432 = vmatpush.msrb.mxu1 %v2993_v41  ;;  %v9935_v50 = vld [vmem:[#allocation76_spill] sm:$0xff] }
 0x400   : > { %4704 = vmatmul.msk.f32.gmra.mxu1 %vm5174_vm2, %v7805_v46  ;;  %v9932_v41 = vld [vmem:[#allocation63_spill] sm:$0xff]  ;;  %v9936_v30 = vld [vmem:[#allocation168_spill] sm:$0xff] }
 0x401   : > { %v2402_v26 = vmax.f32 %v2366_v3, 0.0  ;;  %v9930_v3 = vld [vmem:[#allocation78_spill] sm:$0xff] }
 0x402   : > { %v2259_v15 = vpop.f32.mrf.mxu0 }
 0x403   : > { %v2502_v57 = vmul.f32 %v2456_v36, %v2402_v26  ;;  %v2260_v28 = vadd.f32 %v2259_v15, %v2135_v61  ;;  %3258 = vmatmul.f32.gmra.mxu2 %v7818_v22  ;;  %3371 = vmatmul.f32.gmra.mxu3 %v7821_v52  ;;  %v2672_v36 = vsel %vm553_vm0, 0.0, %v7805_v46  ;;  %v1342_v61 = vadd.f32 %v9930_v3, %v9929_v14  ;;  %v9931_v26 = vld [vmem:[#allocation4_spill] sm:$0xff] }
 0x404   : > { %v1714_v4 = vadd.f32 %v9931_v26, %v1589_v63  ;;  %v2457_v15 = vperm.slane %v9911_v47, 2 }
 0x405   : > { %v2583_v21 = vrot.slane %v2502_v57, 7  ;;  %v2327_v55 = vadd.f32 %v2260_v28, %v1836_v39  ;;  %v7831_v38 = vpop.f32.mrf.mxu1  ;;  %4800 = vmatmul.msk.f32.vlgmr.msra.gmra.mxu0 %vm5174_vm2, %v7280_v13  ;;  %v2780_v39 = vrot.slane %v2672_v36, 1  ;;  %v2906_v28 = vrot.slane %v2672_v36, 2 }
 0x406   : > { %v1839_v8 = vadd.f32 %v9935_v50, %v1714_v4 }
 0x407   : > { %v2367_v18 = vadd.f32 %v7773_v45, %v2327_v55  ;;  %v7851_v33 = vsel %vm553_vm0, %v7805_v46, %v2583_v21  ;;  %v1467_v55 = vadd.f32 %v9932_v41, %v1342_v61  ;;  %v2690_v62 = vsel %vm553_vm0, %v2583_v21, 0.0  ;;  %v9938_v41 = vld [vmem:[#allocation80_spill] sm:$0xff] }
 0x408   : > { %3151 = vmatmul.f32.gmra.mxu1 %v7851_v33  ;;  %v2781_v57 = vrot.slane %v7851_v33, 1  ;;  %v2907_v51 = vrot.slane %v7851_v33, 2 }
 0x409   : > { %v2403_v63 = vmax.f32 %v2367_v18, 0.0  ;;  %v1592_v36 = vadd.f32 %v9936_v30, %v1467_v55  ;;  %v9940_v30 = vld [vmem:[#allocation169_spill] sm:$0xff] }
 0x40a   : > { %v2262_v14 = vpop.f32.mrf.mxu0  ;;  %v7860_v3 = vsel %vm754_vm1, %v2780_v39, %v2781_v57  ;;  %v7863_v26 = vsel %vm895_vm3, %v2906_v28, %v2907_v51  ;;  %v9937_v28 = vld [vmem:[#allocation16_spill] sm:$0xff] }
 0x40b   : > { %9933 = vst [vmem:[#allocation187_spill] sm:$0xff] %v7860_v3  ;;  %v2503_v54 = vmul.f32 %v2457_v15, %v2403_v63  ;;  %v2263_v52 = vadd.f32 %v2262_v14, %v2138_v9  ;;  %3261 = vmatmul.f32.gmra.mxu2 %v7860_v3  ;;  %3374 = vmatmul.f32.gmra.mxu3 %v7863_v26  ;;  %v2783_v63 = vrot.slane %v2690_v62, 1  ;;  %v2909_v14 = vrot.slane %v2690_v62, 2  ;;  %v9939_v3 = vld [vmem:[#allocation60_spill] sm:$0xff] }
 0x40c   : > { %9934 = vst [vmem:[#allocation166_spill] sm:$0xff] %v7863_v26  ;;  %v1345_v50 = vadd.f32 %v9938_v41, %v9937_v28  ;;  %v1717_v26 = vadd.f32 %v9939_v3, %v1592_v36 }
 0x40d   : > { %v7870_v61 = vrot.slane %v2503_v54, 7  ;;  %v2328_v18 = vadd.f32 %v2263_v52, %v1839_v8  ;;  %v7872_v39 = vpop.f32.mrf.mxu1  ;;  %3830 = vmatmul.f32.gmra.mxu0 %v7324_v12  ;;  %v2141_v54 = vadd.f32 %v7235_v32, %v7233_v0  ;;  %v7889_v62 = vsel %vm754_vm1, %v2781_v57, %v2783_v63  ;;  %v9942_v0 = vld [vmem:[#allocation170_spill] sm:$0xff] }
 0x40e   : > { %v3214_v4 = vpop.f32.mrf.mxu2  ;;  %v3327_v9 = vpop.f32.mrf.mxu3  ;;  %v1470_v28 = vadd.f32 %v9940_v30, %v1345_v50  ;;  %v7892_v3 = vsel %vm895_vm3, %v2907_v51, %v2909_v14  ;;  %v9943_v51 = vld [vmem:[#allocation20_spill] sm:$0xff]  ;;  %v9945_v14 = vld [vmem:[#allocation5_spill] sm:$0xff]  ;;  %v2458_v30 = vperm.slane %v9911_v47, 3 }
 0x40f   : > { %v2368_v21 = vadd.f32 %v7773_v45, %v2328_v18  ;;  %v3215_v55 = vadd.f32 %v3214_v4, %v7802_v20  ;;  %9941 = vst [vmem:[#allocation146_spill] sm:$0xff] %v7892_v3  ;;  %v1842_v20 = vadd.f32 %v7174_v23, %v1717_v26  ;;  %v2673_v57 = vsel %vm553_vm0, 0.0, %v7870_v61  ;;  %v3008_v23 = vld [vmem:[%s9112_s5 + $0xa8] sm:$0xff]  ;;  %v9944_v26 = vld [vmem:[#allocation82_spill] sm:$0xff] }
 0x410   : > { %4706 = vmatmul.msk.f32.gmra.mxu1 %vm5174_vm2, %v7870_v61  ;;  %v1595_v32 = vadd.f32 %v9942_v0, %v1470_v28  ;;  %v1348_v63 = vadd.f32 %v9944_v26, %v9943_v51  ;;  %3546 = vmatpush.msrb.mxu2 %v3008_v23 }
 0x411   : > { %v2404_v52 = vmax.f32 %v2368_v21, 0.0  ;;  %v7885_v8 = vadd.f32 %v3327_v9, %v3215_v55 }
 0x412   : > { %v2265_v41 = vpop.f32.mrf.mxu0  ;;  %v1720_v21 = vadd.f32 %v9945_v14, %v1595_v32  ;;  %v2144_v32 = vadd.f32 %v7277_v7, %v7275_v27  ;;  %v9948_v7 = vld [vmem:[#allocation172_spill] sm:$0xff] }
 0x413   : > { %v2504_v36 = vmul.f32 %v2457_v15, %v2404_v52  ;;  %v2266_v18 = vadd.f32 %v2265_v41, %v2141_v54  ;;  %3264 = vmatmul.f32.gmra.mxu2 %v7889_v62  ;;  %3377 = vmatmul.f32.gmra.mxu3 %v7892_v3  ;;  %v2992_v15 = vld [vmem:[%s9112_s5 + $0x28] sm:$0xff] }
 0x414   : > { %3433 = vmatpush.msrb.mxu1 %v2992_v15  ;;  %v9946_v15 = vld [vmem:[#allocation171_spill] sm:$0xff] }
 0x415   : > { %v2586_v4 = vrot.slane %v2504_v36, 7  ;;  %v2329_v9 = vadd.f32 %v2266_v18, %v1842_v20  ;;  %v7898_v50 = vpop.f32.mrf.mxu1  ;;  %4802 = vmatmul.msk.f32.gmra.mxu0 %vm5174_vm2, %v7344_v1  ;;  %v2785_v20 = vrot.slane %v2673_v57, 1  ;;  %v2911_v18 = vrot.slane %v2673_v57, 2 }
 0x416   : > { %v3217_v55 = vpop.f32.mrf.mxu2  ;;  %v3330_v54 = vpop.f32.mrf.mxu3 }
 0x417   : > { %v2369_v52 = vadd.f32 %v7773_v45, %v2329_v9  ;;  %v3218_v28 = vadd.f32 %v3217_v55, %v7831_v38  ;;  %v7919_v41 = vsel %vm553_vm0, %v7870_v61, %v2586_v4  ;;  %v1473_v38 = vadd.f32 %v9946_v15, %v1348_v63 }
 0x418   : > { %3157 = vmatmul.f32.gmra.mxu1 %v7919_v41  ;;  %v2786_v36 = vrot.slane %v7919_v41, 1  ;;  %v2912_v0 = vrot.slane %v7919_v41, 2  ;;  %v1845_v55 = vadd.f32 %v7219_v60, %v1720_v21  ;;  %v2691_v27 = vsel %vm553_vm0, %v2586_v4, 0.0 }
 0x419   : > { %v2405_v9 = vmax.f32 %v2369_v52, 0.0  ;;  %v7926_v23 = vadd.f32 %v3330_v54, %v3218_v28  ;;  %v1598_v54 = vadd.f32 %v9948_v7, %v1473_v38  ;;  %v2914_v15 = vrot.slane %v2691_v27, 2  ;;  %v9952_v7 = vld [vmem:[#allocation173_spill] sm:$0xff] }
 0x41a   : > { %v2268_v51 = vpop.f32.mrf.mxu0  ;;  %v7930_v26 = vsel %vm754_vm1, %v2785_v20, %v2786_v36  ;;  %v7933_v14 = vsel %vm895_vm3, %v2911_v18, %v2912_v0  ;;  %v9949_v20 = vld [vmem:[#allocation24_spill] sm:$0xff]  ;;  %v9950_v18 = vld [vmem:[#allocation86_spill] sm:$0xff] }
 0x41b   : > { %9947 = vst [vmem:[#allocation97_spill] sm:$0xff] %v7933_v14  ;;  %v2505_v57 = vmul.f32 %v2458_v30, %v2405_v9  ;;  %v2269_v3 = vadd.f32 %v2268_v51, %v2144_v32  ;;  %3267 = vmatmul.f32.gmra.mxu2 %v7930_v26  ;;  %3380 = vmatmul.f32.gmra.mxu3 %v7933_v14  ;;  %v2788_v9 = vrot.slane %v2691_v27, 1  ;;  %v9951_v51 = vld [vmem:[#allocation9_spill] sm:$0xff] }
 0x41c   : > { %v1351_v60 = vadd.f32 %v9950_v18, %v9949_v20  ;;  %v1723_v14 = vadd.f32 %v9951_v51, %v1598_v54  ;;  %v7962_v54 = vsel %vm895_vm3, %v2912_v0, %v2914_v15  ;;  %v9956_v0 = vld [vmem:[#allocation118_spill] sm:$0xff]  ;;  %v9958_v15 = vld [vmem:[#allocation13_spill] sm:$0xff] }
 0x41d   : > { %v7940_v63 = vrot.slane %v2505_v57, 7  ;;  %v2330_v52 = vadd.f32 %v2269_v3, %v1845_v55  ;;  %v7942_v28 = vpop.f32.mrf.mxu1  ;;  %3836 = vmatmul.f32.gmra.mxu0 %v7388_v16  ;;  %v2147_v3 = vadd.f32 %v7317_v25, %v7310_v43  ;;  %v7959_v27 = vsel %vm754_vm1, %v2786_v36, %v2788_v9  ;;  %9954 = vst [vmem:[#allocation38_spill] sm:$0xff] %v7962_v54  ;;  %v9955_v43 = vld [vmem:[#allocation73_spill] sm:$0xff] }
 0x41e   : > { %v3220_v21 = vpop.f32.mrf.mxu2  ;;  %v3333_v32 = vpop.f32.mrf.mxu3  ;;  %v1476_v20 = vadd.f32 %v9952_v7, %v1351_v60  ;;  %9953 = vst [vmem:[#allocation66_spill] sm:$0xff] %v7959_v27  ;;  %v2459_v7 = vperm.slane %v9911_v47, 4 }
 0x41f   : > { %v2370_v4 = vadd.f32 %v7773_v45, %v2330_v52  ;;  %v3221_v38 = vadd.f32 %v3220_v21, %v7872_v39  ;;  %v1848_v39 = vadd.f32 %v7251_v49, %v1723_v14  ;;  %v2674_v36 = vsel %vm553_vm0, 0.0, %v7940_v63  ;;  %v3007_v49 = vld [vmem:[%s9112_s5 + $0xa0] sm:$0xff] }
 0x420   : > { %4708 = vmatmul.msk.f32.gmra.mxu1 %vm5174_vm2, %v7940_v63  ;;  %v1601_v25 = vadd.f32 %v9955_v43, %v1476_v20  ;;  %v9957_v14 = vld [vmem:[#allocation90_spill] sm:$0xff]  ;;  %3547 = vmatpush.msrb.mxu2 %v3007_v49 }
 0x421   : > { %v2406_v55 = vmax.f32 %v2370_v4, 0.0  ;;  %v7955_v57 = vadd.f32 %v3333_v32, %v3221_v38  ;;  %v1354_v9 = vadd.f32 %v9957_v14, %v9956_v0 }
 0x422   : > { %v2271_v18 = vpop.f32.mrf.mxu0  ;;  %v1726_v4 = vadd.f32 %v9958_v15, %v1601_v25  ;;  %v2150_v25 = vadd.f32 %v7356_v40, %v7351_v19  ;;  %v9962_v40 = vld [vmem:[#allocation175_spill] sm:$0xff] }
 0x423   : > { %v2506_v52 = vmul.f32 %v2458_v30, %v2406_v55  ;;  %v2272_v21 = vadd.f32 %v2271_v18, %v2147_v3  ;;  %3270 = vmatmul.f32.gmra.mxu2 %v7959_v27  ;;  %3383 = vmatmul.f32.gmra.mxu3 %v7962_v54  ;;  %v2991_v30 = vld [vmem:[%s9112_s5 + $0x20] sm:$0xff] }
 0x424   : > { %3434 = vmatpush.msrb.mxu1 %v2991_v30  ;;  %v9959_v30 = vld [vmem:[#allocation174_spill] sm:$0xff] }
 0x425   : > { %v2589_v32 = vrot.slane %v2506_v52, 7  ;;  %v2331_v51 = vadd.f32 %v2272_v21, %v1848_v39  ;;  %v7968_v60 = vpop.f32.mrf.mxu1  ;;  %4804 = vmatmul.msk.f32.gmra.mxu0 %vm5174_vm2, %v7410_v48  ;;  %v2790_v39 = vrot.slane %v2674_v36, 1  ;;  %v2916_v21 = vrot.slane %v2674_v36, 2 }
 0x426   : > { %v3223_v38 = vpop.f32.mrf.mxu2  ;;  %v3336_v3 = vpop.f32.mrf.mxu3 }
 0x427   : > { %v2371_v55 = vadd.f32 %v7773_v45, %v2331_v51  ;;  %v3224_v20 = vadd.f32 %v3223_v38, %v7898_v50  ;;  %v7989_v18 = vsel %vm553_vm0, %v7940_v63, %v2589_v32  ;;  %v1479_v50 = vadd.f32 %v9959_v30, %v1354_v9 }
 0x428   : > { %3163 = vmatmul.f32.gmra.mxu1 %v7989_v18  ;;  %v2791_v52 = vrot.slane %v7989_v18, 1  ;;  %v2917_v43 = vrot.slane %v7989_v18, 2  ;;  %v1851_v38 = vadd.f32 %v7287_v2, %v1726_v4  ;;  %v2692_v19 = vsel %vm553_vm0, %v2589_v32, 0.0 }
 0x429   : > { %v2407_v51 = vmax.f32 %v2371_v55, 0.0  ;;  %v7996_v49 = vadd.f32 %v3336_v3, %v3224_v20  ;;  %v1604_v3 = vadd.f32 %v9962_v40, %v1479_v50  ;;  %v2919_v30 = vrot.slane %v2692_v19, 2  ;;  %v9966_v40 = vld [vmem:[#allocation176_spill] sm:$0xff] }
 0x42a   : > { %v2274_v0 = vpop.f32.mrf.mxu0  ;;  %v8000_v14 = vsel %vm754_vm1, %v2790_v39, %v2791_v52  ;;  %v8003_v15 = vsel %vm895_vm3, %v2916_v21, %v2917_v43  ;;  %v9963_v39 = vld [vmem:[#allocation119_spill] sm:$0xff]  ;;  %v9964_v21 = vld [vmem:[#allocation93_spill] sm:$0xff] }
 0x42b   : > { %9960 = vst [vmem:[#allocation55_spill] sm:$0xff] %v8000_v14  ;;  %v2507_v36 = vmul.f32 %v2459_v7, %v2407_v51  ;;  %v2275_v54 = vadd.f32 %v2274_v0, %v2150_v25  ;;  %3273 = vmatmul.f32.gmra.mxu2 %v8000_v14  ;;  %3386 = vmatmul.f32.gmra.mxu3 %v8003_v15  ;;  %v2793_v51 = vrot.slane %v2692_v19, 1  ;;  %v9965_v0 = vld [vmem:[#allocation17_spill] sm:$0xff] }
 0x42c   : > { %9961 = vst [vmem:[#allocation148_spill] sm:$0xff] %v8003_v15  ;;  %v1357_v2 = vadd.f32 %v9964_v21, %v9963_v39  ;;  %v1729_v15 = vadd.f32 %v9965_v0, %v1604_v3  ;;  %v8032_v3 = vsel %vm895_vm3, %v2917_v43, %v2919_v30  ;;  %v9970_v43 = vld [vmem:[#allocation36_spill] sm:$0xff]  ;;  %v9972_v30 = vld [vmem:[#allocation21_spill] sm:$0xff] }
 0x42d   : > { %v8010_v9 = vrot.slane %v2507_v36, 7  ;;  %v2332_v55 = vadd.f32 %v2275_v54, %v1851_v38  ;;  %v8012_v20 = vpop.f32.mrf.mxu1  ;;  %3842 = vmatmul.f32.gmra.mxu0 %v7454_v35  ;;  %v2153_v54 = vadd.f32 %v7402_v44, %v7394_v11  ;;  %v8029_v19 = vsel %vm754_vm1, %v2791_v52, %v2793_v51  ;;  %9968 = vst [vmem:[#allocation99_spill] sm:$0xff] %v8032_v3  ;;  %v9969_v11 = vld [vmem:[#allocation177_spill] sm:$0xff] }
 0x42e   : > { %v3226_v4 = vpop.f32.mrf.mxu2  ;;  %v3339_v25 = vpop.f32.mrf.mxu3  ;;  %v1482_v39 = vadd.f32 %v9966_v40, %v1357_v2  ;;  %9967 = vst [vmem:[#allocation26_spill] sm:$0xff] %v8029_v19  ;;  %v2460_v40 = vperm.slane %v9911_v47, 5 }
 0x42f   : > { %v2372_v32 = vadd.f32 %v7773_v45, %v2332_v55  ;;  %v3227_v50 = vadd.f32 %v3226_v4, %v7942_v28  ;;  %v1854_v28 = vadd.f32 %v7330_v31, %v1729_v15  ;;  %v2675_v52 = vsel %vm553_vm0, 0.0, %v8010_v9  ;;  %v3006_v31 = vld [vmem:[%s9112_s5 + $0x98] sm:$0xff]  ;;  %v9971_v15 = vld [vmem:[#allocation96_spill] sm:$0xff] }
 0x430   : > { %4710 = vmatmul.msk.f32.gmra.mxu1 %vm5174_vm2, %v8010_v9  ;;  %v1607_v44 = vadd.f32 %v9969_v11, %v1482_v39  ;;  %v1360_v51 = vadd.f32 %v9971_v15, %v9970_v43  ;;  %3548 = vmatpush.msrb.mxu2 %v3006_v31 }
 0x431   : > { %v2408_v38 = vmax.f32 %v2372_v32, 0.0  ;;  %v8025_v36 = vadd.f32 %v3339_v25, %v3227_v50 }
 0x432   : > { %v2277_v21 = vpop.f32.mrf.mxu0  ;;  %v1732_v32 = vadd.f32 %v9972_v30, %v1607_v44  ;;  %v2156_v44 = vadd.f32 %v7435_v58, %v7433_v6  ;;  %v9977_v58 = vld [vmem:[#allocation179_spill] sm:$0xff] }
 0x433   : > { %v2508_v55 = vmul.f32 %v2459_v7, %v2408_v38  ;;  %v2278_v4 = vadd.f32 %v2277_v21, %v2153_v54  ;;  %3276 = vmatmul.f32.gmra.mxu2 %v8029_v19  ;;  %3389 = vmatmul.f32.gmra.mxu3 %v8032_v3  ;;  %v2990_v7 = vld [vmem:[%s9112_s5 + $0x18] sm:$0xff] }
 0x434   : > { %3435 = vmatpush.msrb.mxu1 %v2990_v7  ;;  %v9974_v7 = vld [vmem:[#allocation7_spill] sm:$0xff] }
 0x435   : > { %v2592_v25 = vrot.slane %v2508_v55, 7  ;;  %v2333_v0 = vadd.f32 %v2278_v4, %v1854_v28  ;;  %v8038_v2 = vpop.f32.mrf.mxu1  ;;  %4806 = vmatmul.msk.f32.gmra.mxu0 %vm5174_vm2, %v7474_v17  ;;  %v2795_v28 = vrot.slane %v2675_v52, 1  ;;  %v2921_v4 = vrot.slane %v2675_v52, 2 }
 0x436   : > { %v3229_v50 = vpop.f32.mrf.mxu2  ;;  %v3342_v54 = vpop.f32.mrf.mxu3 }
 0x437   : > { %v2373_v38 = vadd.f32 %v7773_v45, %v2333_v0  ;;  %v3230_v39 = vadd.f32 %v3229_v50, %v7968_v60  ;;  %v8059_v21 = vsel %vm553_vm0, %v8010_v9, %v2592_v25  ;;  %v1485_v60 = vadd.f32 %v9974_v7, %v1360_v51 }
 0x438   : > { %3169 = vmatmul.f32.gmra.mxu1 %v8059_v21  ;;  %v2796_v55 = vrot.slane %v8059_v21, 1  ;;  %v2922_v11 = vrot.slane %v8059_v21, 2  ;;  %v1857_v50 = vadd.f32 %v7369_v24, %v1732_v32  ;;  %v2693_v6 = vsel %vm553_vm0, %v2592_v25, 0.0 }
 0x439   : > { %v2409_v0 = vmax.f32 %v2373_v38, 0.0  ;;  %v8066_v31 = vadd.f32 %v3342_v54, %v3230_v39  ;;  %v1610_v54 = vadd.f32 %v9977_v58, %v1485_v60  ;;  %v2924_v7 = vrot.slane %v2693_v6, 2  ;;  %v9982_v58 = vld [vmem:[#allocation11_spill] sm:$0xff] }
 0x43a   : > { %v2280_v43 = vpop.f32.mrf.mxu0  ;;  %v8070_v15 = vsel %vm754_vm1, %v2795_v28, %v2796_v55  ;;  %v8073_v30 = vsel %vm895_vm3, %v2921_v4, %v2922_v11  ;;  %v9978_v28 = vld [vmem:[#allocation40_spill] sm:$0xff] }
 0x43b   : > { %9973 = vst [vmem:[#allocation108_spill] sm:$0xff] %v8066_v31  ;;  %v2509_v52 = vmul.f32 %v2460_v40, %v2409_v0  ;;  %v2281_v3 = vadd.f32 %v2280_v43, %v2156_v44  ;;  %3279 = vmatmul.f32.gmra.mxu2 %v8070_v15  ;;  %3392 = vmatmul.f32.gmra.mxu3 %v8073_v30  ;;  %v9979_v4 = vld [vmem:[#allocation100_spill] sm:$0xff]  ;;  %v2798_v0 = vrot.slane %v2693_v6, 1  ;;  %v9980_v43 = vld [vmem:[#allocation25_spill] sm:$0xff] }
 0x43c   : > { %9975 = vst [vmem:[#allocation159_spill] sm:$0xff] %v8070_v15  ;;  %v1363_v24 = vadd.f32 %v9979_v4, %v9978_v28 }
 0x43d   : > { %9976 = vst [vmem:[#allocation56_spill] sm:$0xff] %v8073_v30  ;;  %v8080_v51 = vrot.slane %v2509_v52, 7  ;;  %v2334_v38 = vadd.f32 %v2281_v3, %v1857_v50  ;;  %v8082_v39 = vpop.f32.mrf.mxu1  ;;  %3848 = vmatmul.f32.gmra.mxu0 %v7522_v34  ;;  %v1735_v30 = vadd.f32 %v9980_v43, %v1610_v54  ;;  %v2159_v3 = vadd.f32 %v7479_v42, %v7477_v29  ;;  %v9986_v29 = vld [vmem:[#allocation181_spill] sm:$0xff] }
 0x43e   : > { %v3232_v32 = vpop.f32.mrf.mxu2  ;;  %v3345_v44 = vpop.f32.mrf.mxu3  ;;  %v1488_v28 = vadd.f32 %v9982_v58, %v1363_v24  ;;  %v8099_v6 = vsel %vm754_vm1, %v2796_v55, %v2798_v0  ;;  %v8102_v54 = vsel %vm895_vm3, %v2922_v11, %v2924_v7  ;;  %v2989_v11 = vld [vmem:[%s9112_s5 + $0x10] sm:$0xff] }
 0x43f   : > { %v2374_v25 = vadd.f32 %v7773_v45, %v2334_v38  ;;  %v3233_v60 = vadd.f32 %v3232_v32, %v8012_v20  ;;  %9983 = vst [vmem:[#allocation193_spill] sm:$0xff] %v8099_v6  ;;  %v9985_v20 = vld [vmem:[#allocation121_spill] sm:$0xff]  ;;  %v2676_v55 = vsel %vm553_vm0, 0.0, %v8080_v51  ;;  %v9988_v0 = vld [vmem:[#allocation104_spill] sm:$0xff]  ;;  %3436 = vmatpush.msrb.mxu1 %v2989_v11 }
 0x440   : > { %4712 = vmatmul.msk.f32.gmra.mxu1 %vm5174_vm2, %v8080_v51  ;;  %9984 = vst [vmem:[#allocation30_spill] sm:$0xff] %v8102_v54  ;;  %v1860_v38 = vadd.f32 %v9985_v20, %v1735_v30  ;;  %v1613_v42 = vadd.f32 %v9986_v29, %v1488_v28  ;;  %v9987_v30 = vld [vmem:[#allocation124_spill] sm:$0xff]  ;;  %v2926_v29 = vrot.slane %v2676_v55, 2 }
 0x441   : > { %v2410_v50 = vmax.f32 %v2374_v25, 0.0  ;;  %v8095_v52 = vadd.f32 %v3345_v44, %v3233_v60  ;;  %v1366_v7 = vadd.f32 %v9988_v0, %v9987_v30  ;;  %v9989_v60 = vld [vmem:[#allocation29_spill] sm:$0xff]  ;;  %v9991_v30 = vld [vmem:[#allocation182_spill] sm:$0xff] }
 0x442   : > { %v2283_v4 = vpop.f32.mrf.mxu0 }
 0x443   : > { %9981 = vst [vmem:[#allocation133_spill] sm:$0xff] %v8095_v52  ;;  %v2510_v32 = vmul.f32 %v2460_v40, %v2410_v50  ;;  %v2284_v43 = vadd.f32 %v2283_v4, %v2159_v3  ;;  %3282 = vmatmul.f32.gmra.mxu2 %v8099_v6  ;;  %3395 = vmatmul.f32.gmra.mxu3 %v8102_v54  ;;  %v3005_v40 = vld [vmem:[%s9112_s5 + $0x90] sm:$0xff]  ;;  %v2461_v4 = vperm.slane %v9911_v47, 6  ;;  %v9994_v54 = vld [vmem:[#allocation149_spill] sm:$0xff] }
 0x444   : > { %v1738_v3 = vadd.f32 %v9989_v60, %v1613_v42  ;;  %3549 = vmatpush.msrb.mxu2 %v3005_v40  ;;  %v2162_v40 = vadd.f32 %v7529_v5, %v7524_v53  ;;  %v3034_v5 = vld [vmem:[%s9112_s5 + $0x178] sm:$0xff] }
 0x445   : > { %v2595_v44 = vrot.slane %v2510_v32, 7  ;;  %v2335_v25 = vadd.f32 %v2284_v43, %v1860_v38  ;;  %v8108_v24 = vpop.f32.mrf.mxu1  ;;  %4808 = vmatmul.msk.f32.gmra.mxu0 %vm5174_vm2, %v7556_v59  ;;  %v2800_v32 = vrot.slane %v2676_v55, 1  ;;  %3649 = vmatpush.msra.mxu3 %v3034_v5  ;;  %v3032_v5 = vld [vmem:[%s9112_s5 + $0x168] sm:$0xff] }
 0x446   : > { %v3235_v50 = vpop.f32.mrf.mxu2  ;;  %v3348_v58 = vpop.f32.mrf.mxu3  ;;  %v1863_v6 = vadd.f32 %v9994_v54, %v1738_v3  ;;  %v9996_v54 = vld [vmem:[#allocation180_spill] sm:$0xff]  ;;  %v9997_v3 = vld [vmem:[#allocation126_spill] sm:$0xff] }
 0x447   : > { %v2375_v28 = vadd.f32 %v7773_v45, %v2335_v25  ;;  %v3236_v20 = vadd.f32 %v3235_v50, %v8038_v2  ;;  %v8129_v38 = vsel %vm553_vm0, %v8080_v51, %v2595_v44  ;;  %v1491_v2 = vadd.f32 %v9991_v30, %v1366_v7  ;;  %v9995_v7 = vld [vmem:[#allocation183_spill] sm:$0xff] }
 0x448   : > { %3175 = vmatmul.f32.gmra.mxu1 %v8129_v38  ;;  %v2801_v43 = vrot.slane %v8129_v38, 1  ;;  %v2927_v42 = vrot.slane %v8129_v38, 2  ;;  %v2694_v53 = vsel %vm553_vm0, %v2595_v44, 0.0 }
 0x449   : > { %v2411_v25 = vmax.f32 %v2375_v28, 0.0  ;;  %v8136_v11 = vadd.f32 %v3348_v58, %v3236_v20  ;;  %v1616_v58 = vadd.f32 %v9995_v7, %v1491_v2  ;;  %v2803_v44 = vrot.slane %v2694_v53, 1  ;;  %v9999_v2 = vld [vmem:[#allocation37_spill] sm:$0xff]  ;;  %v10001_v7 = vld [vmem:[#allocation95_spill] sm:$0xff] }
 0x44a   : > { %v2286_v0 = vpop.f32.mrf.mxu0  ;;  %v8140_v60 = vsel %vm754_vm1, %v2800_v32, %v2801_v43  ;;  %v8143_v50 = vsel %vm895_vm3, %v2926_v29, %v2927_v42  ;;  %v9998_v29 = vld [vmem:[#allocation107_spill] sm:$0xff] }
 0x44b   : > { %9990 = vst [vmem:[#allocation33_spill] sm:$0xff] %v8136_v11  ;;  %v2511_v55 = vmul.f32 %v2461_v4, %v2411_v25  ;;  %v2287_v15 = vadd.f32 %v2286_v0, %v2162_v40  ;;  %3285 = vmatmul.f32.gmra.mxu2 %v8140_v60  ;;  %3398 = vmatmul.f32.gmra.mxu3 %v8143_v50  ;;  %v2929_v0 = vrot.slane %v2694_v53, 2  ;;  %v10000_v53 = vld [vmem:[#allocation154_spill] sm:$0xff]  ;;  %v10006_v11 = vld [vmem:[#allocation140_spill] sm:$0xff] }
 0x44c   : > { %9992 = vst [vmem:[#allocation151_spill] sm:$0xff] %v8140_v60  ;;  %v1369_v40 = vadd.f32 %v9998_v29, %v9997_v3  ;;  %v2165_v3 = vadd.f32 %v10001_v7, %v10000_v53  ;;  %v10010_v7 = vld [vmem:[#allocation45_spill] sm:$0xff] }
 0x44d   : > { %9993 = vst [vmem:[#allocation102_spill] sm:$0xff] %v8143_v50  ;;  %v8153_v28 = vrot.slane %v2511_v55, 7  ;;  %v2336_v20 = vadd.f32 %v2287_v15, %v1863_v6  ;;  %v8155_v32 = vpop.f32.mrf.mxu1  ;;  %3854 = vmatmul.f32.gmra.mxu0 %v9996_v54  ;;  %v3033_v50 = vld [vmem:[%s9112_s5 + $0x170] sm:$0xff]  ;;  %v1741_v55 = vadd.f32 %v9999_v2, %v1616_v58 }
 0x44e   : > { %v3238_v25 = vpop.f32.mrf.mxu2  ;;  %v3351_v30 = vpop.f32.mrf.mxu3  ;;  %3650 = vmatpush.msra.mxu3 %v3033_v50  ;;  %v10003_v58 = vld [vmem:[#allocation184_spill] sm:$0xff]  ;;  %v8181_v50 = vsel %vm895_vm3, %v2927_v42, %v2929_v0  ;;  %v2988_v42 = vld [vmem:[%s9112_s5 + $0x8] sm:$0xff] }
 0x44f   : > { %v2376_v15 = vadd.f32 %v7773_v45, %v2336_v20  ;;  %v3239_v6 = vadd.f32 %v3238_v25, %v8082_v39  ;;  %v1494_v20 = vadd.f32 %v10003_v58, %v1369_v40  ;;  %v8178_v39 = vsel %vm754_vm1, %v2801_v43, %v2803_v44  ;;  %10005 = vst [vmem:[#allocation68_spill] sm:$0xff] %v8181_v50  ;;  %v3031_v25 = vld [vmem:[%s9112_s5 + $0x160] sm:$0xff]  ;;  %v3004_v43 = vld [vmem:[%s9112_s5 + $0x88] sm:$0xff] }
 0x450   : > { %4714 = vmatmul.msk.f32.gmra.mxu1 %vm5174_vm2, %v8153_v28  ;;  %3651 = vmatpush.msra.mxu3 %v3032_v5  ;;  %10004 = vst [vmem:[#allocation162_spill] sm:$0xff] %v8178_v39  ;;  %v1866_v19 = vadd.f32 %v10006_v11, %v1741_v55  ;;  %v10007_v40 = vld [vmem:[#allocation23_spill] sm:$0xff]  ;;  %v10008_v55 = vld [vmem:[#allocation98_spill] sm:$0xff] }
 0x451   : > { %v2412_v29 = vmax.f32 %v2376_v15, 0.0  ;;  %v8174_v60 = vadd.f32 %v3351_v30, %v3239_v6  ;;  %v1619_v30 = vadd.f32 %v10007_v40, %v1494_v20  ;;  %3550 = vmatpush.msrb.mxu2 %v3004_v43  ;;  %3437 = vmatpush.msrb.mxu1 %v2988_v42  ;;  %v2677_v6 = vsel %vm553_vm0, 0.0, %v8153_v28  ;;  %v10009_v5 = vld [vmem:[#allocation127_spill] sm:$0xff] }
 0x452   : > { %v2289_v2 = vpop.f32.mrf.mxu0  ;;  %3652 = vmatpush.msra.mxu3 %v3031_v25  ;;  %v2805_v42 = vrot.slane %v2677_v6, 1 }
 0x453   : > { %10002 = vst [vmem:[#allocation109_spill] sm:$0xff] %v8174_v60  ;;  %v2512_v53 = vmul.f32 %v2461_v4, %v2412_v29  ;;  %v2290_v15 = vadd.f32 %v2289_v2, %v2165_v3  ;;  %3288 = vmatmul.f32.gmra.mxu2 %v8178_v39  ;;  %3401 = vmatmul.f32.gmra.mxu3 %v8181_v50  ;;  %v3030_v4 = vld [vmem:[%s9112_s5 + $0x158] sm:$0xff]  ;;  %v10016_v39 = vld [vmem:[#allocation27_spill] sm:$0xff] }
 0x454   : > { %v1372_v3 = vadd.f32 %v10010_v7, %v10009_v5  ;;  %v10011_v29 = vld [vmem:[#allocation49_spill] sm:$0xff]  ;;  %3653 = vmatpush.msra.mxu3 %v3030_v4  ;;  %v10012_v7 = vld [vmem:[#allocation131_spill] sm:$0xff] }
 0x455   : > { %v2598_v11 = vrot.slane %v2512_v53, 7  ;;  %v2337_v44 = vadd.f32 %v2290_v15, %v1866_v19  ;;  %v8199_v0 = vpop.f32.mrf.mxu1  ;;  %4810 = vmatmul.msk.f32.gmra.mxu0 %vm5174_vm2, %v10008_v55  ;;  %v1744_v58 = vadd.f32 %v10011_v29, %v1619_v30  ;;  %v3029_v19 = vld [vmem:[%s9112_s5 + $0x150] sm:$0xff]  ;;  %v2462_v15 = vperm.slane %v9911_v47, 7  ;;  %v10013_v29 = vld [vmem:[#allocation85_spill] sm:$0xff]  ;;  %v3028_v4 = vld [vmem:[%s9112_s5 + $0x148] sm:$0xff] }
 0x456   : > { %v3241_v20 = vpop.f32.mrf.mxu2  ;;  %v3354_v2 = vpop.f32.mrf.mxu3  ;;  %v2931_v30 = vrot.slane %v2677_v6, 2  ;;  %3654 = vmatpush.msra.mxu3 %v3029_v19  ;;  %v1497_v60 = vadd.f32 %v10016_v39, %v1372_v3  ;;  %v3027_v39 = vld [vmem:[%s9112_s5 + $0x140] sm:$0xff] }
 0x457   : > { %v2377_v53 = vadd.f32 %v7773_v45, %v2337_v44  ;;  %v3242_v43 = vadd.f32 %v3241_v20, %v8108_v24  ;;  %v8217_v25 = vsel %vm553_vm0, %v8153_v28, %v2598_v11  ;;  %v2168_v44 = vadd.f32 %v10013_v29, %v10012_v7  ;;  %v10015_v24 = vld [vmem:[#allocation138_spill] sm:$0xff]  ;;  %v10019_v7 = vld [vmem:[#allocation141_spill] sm:$0xff] }
 0x458   : > { %3181 = vmatmul.f32.gmra.mxu1 %v8217_v25  ;;  %v2806_v40 = vrot.slane %v8217_v25, 1  ;;  %v2932_v5 = vrot.slane %v8217_v25, 2  ;;  %v2422_v20 = vadd.s32 16, %v10015_v24  ;;  %v2695_v19 = vsel %vm553_vm0, %v2598_v11, 0.0  ;;  %3655 = vmatpush.msra.mxu3 %v3028_v4  ;;  %v10020_v3 = vld [vmem:[#allocation186_spill] sm:$0xff]  ;;  %v10022_v11 = vld [vmem:[#allocation61_spill] sm:$0xff] }
 0x459   : > { %v2413_v50 = vmax.f32 %v2377_v53, 0.0  ;;  %v8224_v47 = vadd.f32 %v3354_v2, %v3242_v43  ;;  %v1869_v53 = vadd.f32 %v10019_v7, %v1744_v58  ;;  %v3026_v58 = vld [vmem:[%s9112_s5 + $0x138] sm:$0xff]  ;;  %v2808_v4 = vrot.slane %v2695_v19, 1 }
 0x45a   : > { %v2292_v52 = vpop.f32.mrf.mxu0  ;;  %v8232_v6 = vsel %vm754_vm1, %v2805_v42, %v2806_v40  ;;  %v8235_v14 = vsel %vm895_vm3, %v2931_v30, %v2932_v5  ;;  %v1622_v42 = vadd.f32 %v10020_v3, %v1497_v60  ;;  %3656 = vmatpush.msra.mxu3 %v3027_v39  ;;  %v10024_v60 = vld [vmem:[#allocation57_spill] sm:$0xff]  ;;  %v2987_v3 = vld [vmem:[%s9112_s5] sm:$0xff] }
 0x45b   : > { %10014 = vst [vmem:[#allocation65_spill] sm:$0xff] %v8224_v47  ;;  %v2513_v2 = vmul.f32 %v2462_v15, %v2413_v50  ;;  %v2293_v43 = vadd.f32 %v2292_v52, %v2168_v44  ;;  %3291 = vmatmul.f32.gmra.mxu2 %v8232_v6  ;;  %3404 = vmatmul.f32.gmra.mxu3 %v8235_v14  ;;  %v10021_v50 = vld [vmem:[#allocation88_spill] sm:$0xff]  ;;  %v2428_v52 = vadd.s32 4294967295, %v2422_v20  ;;  %v2934_v47 = vrot.slane %v2695_v19, 2  ;;  %v10025_v19 = vld [vmem:[#allocation35_spill] sm:$0xff]  ;;  %v10026_v39 = vld [vmem:[#allocation134_spill] sm:$0xff] }
 0x45c   : > { %10017 = vst [vmem:[#allocation50_spill] sm:$0xff] %v8232_v6  ;;  %v10023_v44 = vld [vmem:[#allocation44_spill] sm:$0xff]  ;;  %3657 = vmatpush.msra.mxu3 %v3026_v58  ;;  %3438 = vmatpush.msrb.mxu1 %v2987_v3  ;;  %v8279_v58 = vsel %vm754_vm1, %v2806_v40, %v2808_v4  ;;  %v10032_v3 = vld [vmem:[#allocation189_spill] sm:$0xff]  ;;  %v10033_v4 = vmov 0.0  }
 0x45d   : > { %10018 = vst [vmem:[#allocation153_spill] sm:$0xff] %v8235_v14  ;;  %v8245_v29 = vrot.slane %v2513_v2, 7  ;;  %v2338_v30 = vadd.f32 %v2293_v43, %v1869_v53  ;;  %v8247_v24 = vpop.f32.mrf.mxu1  ;;  %3860 = vmatmul.f32.gmra.mxu0 %v10021_v50  ;;  %v1375_v7 = vadd.f32 %v10023_v44, %v10022_v11  ;;  %v1747_v2 = vadd.f32 %v10024_v60, %v1622_v42  ;;  %v3025_v20 = vld [vmem:[%s9112_s5 + $0x130] sm:$0xff]  ;;  %v10028_v44 = vld [vmem:[#allocation31_spill] sm:$0xff] }
 0x45e   : > { %v3244_v14 = vpop.f32.mrf.mxu2  ;;  %v3357_v6 = vpop.f32.mrf.mxu3  ;;  %v2171_v42 = vadd.f32 %v10026_v39, %v10025_v19  ;;  %vm2434_vm5 = vcmp.lt.s32.totalorder %v2428_v52, 16  ;;  %10029 = vst [vmem:[#allocation155_spill] sm:$0xff] %v8279_v58  ;;  %3658 = vmatpush.msra.mxu3 %v3025_v20 }
 0x45f   : > { %v2378_v53 = vadd.f32 %v7773_v45, %v2338_v30  ;;  %v3245_v43 = vadd.f32 %v3244_v14, %v8155_v32  ;;  %v3003_v14 = vld [vmem:[%s9112_s5 + $0x80] sm:$0xff]  ;;  %v3024_v32 = vld [vmem:[%s9112_s5 + $0x128] sm:$0xff]  ;;  %v1500_v60 = vadd.f32 %v10028_v44, %v1375_v7 }
 0x460   : > { %4716 = vmatmul.msk.f32.gmra.mxu1 %vm5174_vm2, %v8245_v29  ;;  %3551 = vmatpush.msrb.mxu2 %v3003_v14  ;;  %v3023_v7 = vld [vmem:[%s9112_s5 + $0x120] sm:$0xff] }
 0x461   : > { %v2414_v11 = vmax.f32 %v2378_v53, 0.0  ;;  %v8269_v30 = vadd.f32 %v3357_v6, %v3245_v43  ;;  %v8282_v53 = vsel %vm895_vm3, %v2932_v5, %v2934_v47  ;;  %v10031_v6 = vld [vmem:[#allocation14_spill] sm:$0xff]  ;;  %v1625_v40 = vadd.f32 %v10032_v3, %v1500_v60  ;;  %3659 = vmatpush.msra.mxu3 %v3024_v32 }
 0x462   : > { %v2295_v31 = vpop.f32.mrf.mxu0  ;;  %10030 = vst [vmem:[#allocation105_spill] sm:$0xff] %v8282_v53  ;;  %v1872_v43 = vadd.f32 %v10031_v6, %v1747_v2  ;;  %v8293_v5 = vsel %vm2434_vm5, 1.0, %v10033_v4  ;;  %v10038_v4 = vld [vmem:[#allocation10_spill] sm:$0xff] }
 0x463   : > { %10027 = vst [vmem:[#allocation128_spill] sm:$0xff] %v8269_v30  ;;  %v2514_v19 = vmul.f32 %v2462_v15, %v2414_v11  ;;  %v2296_v39 = vadd.f32 %v2295_v31, %v2171_v42  ;;  %3294 = vmatmul.f32.gmra.mxu2 %v8279_v58  ;;  %3407 = vmatmul.f32.gmra.mxu3 %v8282_v53  ;;  %v10035_v31 = vld [vmem:[#allocation161_spill] sm:$0xff]  ;;  %v2678_v15 = vsel %vm553_vm0, 0.0, %v8245_v29  ;;  %v10036_v11 = vld [vmem:[#allocation194_spill] sm:$0xff] }
 0x464   : > { %10034 = vst [vmem:[#allocation110_spill] sm:$0xff] %v8293_v5  ;;  %v3022_v42 = vld [vmem:[%s9112_s5 + $0x118] sm:$0xff]  ;;  %v1750_v52 = vadd.f32 %v10036_v11, %v1625_v40  ;;  %3660 = vmatpush.msra.mxu3 %v3023_v7  ;;  %v2936_v7 = vrot.slane %v2678_v15, 2 }
 0x465   : > { %v2601_v47 = vrot.slane %v2514_v19, 7  ;;  %v2339_v20 = vadd.f32 %v2296_v39, %v1872_v43  ;;  %v8295_v2 = vpop.f32.mrf.mxu1  ;;  %4812 = vmatmul.msk.f32.gmra.mxu0 %vm5174_vm2, %v10035_v31  ;;  %v2463_v43 = vperm.slane %v8293_v5, 0  ;;  %v3021_v19 = vld [vmem:[%s9112_s5 + $0x110] sm:$0xff]  ;;  %v2810_v39 = vrot.slane %v2678_v15, 1  ;;  %v3020_v5 = vld [vmem:[%s9112_s5 + $0x108] sm:$0xff]  ;;  %v10039_v15 = vld [vmem:[#allocation18_spill] sm:$0xff] }
 0x466   : > { %v3247_v14 = vpop.f32.mrf.mxu2  ;;  %v3360_v44 = vpop.f32.mrf.mxu3  ;;  %3661 = vmatpush.msra.mxu3 %v3022_v42  ;;  %v1875_v42 = vadd.f32 %v10039_v15, %v1750_v52 }
 0x467   : > { %v2379_v32 = vadd.f32 %v7773_v45, %v2339_v20  ;;  %v3248_v60 = vadd.f32 %v3247_v14, %v8199_v0  ;;  %v8310_v6 = vsel %vm553_vm0, %v8245_v29, %v2601_v47  ;;  %v10037_v0 = vld [vmem:[#allocation39_spill] sm:$0xff] }
 0x468   : > { %3187 = vmatmul.f32.gmra.mxu1 %v8310_v6  ;;  %v2811_v3 = vrot.slane %v8310_v6, 1  ;;  %v2937_v40 = vrot.slane %v8310_v6, 2  ;;  %v2174_v20 = vadd.f32 %v10038_v4, %v10037_v0  ;;  %3662 = vmatpush.msra.mxu3 %v3021_v19 }
 0x469   : > { %v2415_v11 = vmax.f32 %v2379_v32, 0.0  ;;  %v8321_v14 = vadd.f32 %v3360_v44, %v3248_v60  ;;  %v2696_v32 = vsel %vm553_vm0, %v2601_v47, 0.0  ;;  %v3019_v60 = vld [vmem:[%s9112_s5 + $0x100] sm:$0xff] }
 0x46a   : > { %v2298_v53 = vpop.f32.mrf.mxu0  ;;  %v8327_v58 = vsel %vm754_vm1, %v2810_v39, %v2811_v3  ;;  %v8330_v30 = vsel %vm895_vm3, %v2936_v7, %v2937_v40  ;;  %v4798_v39 = vld [vmem:[%s9112_s5 + $0x478] sm:$0xff]  ;;  %3663 = vmatpush.msra.mxu3 %v3020_v5  ;;  %v2813_v47 = vrot.slane %v2696_v32, 1 }
 0x46b   : > { %v2299_v27 = vadd.f32 %v2298_v53, %v2174_v20  ;;  %3297 = vmatmul.f32.gmra.mxu2 %v8327_v58  ;;  %3410 = vmatmul.f32.gmra.mxu3 %v8330_v30  ;;  %v2515_v44 = vmul.f32 %v2463_v43, %v2415_v11  ;;  %v10040_v53 = vld [vmem:[#allocation185_spill] sm:$0xff]  ;;  %v2939_v20 = vrot.slane %v2696_v32, 2 }
 0x46c   : > { %4037 = vmatpush.msra.mxu2 %v4798_v39  ;;  %3664 = vmatpush.msra.mxu3 %v3019_v60  ;;  %v4916_v5 = vld [vmem:[%s9112_s5 + $0x378] sm:$0xff]  ;;  %v4918_v39 = vld [vmem:[%s9112_s5 + $0x368] sm:$0xff] }
 0x46d   : > { %v2340_v19 = vadd.f32 %v2299_v27, %v1875_v42  ;;  %v8342_v52 = vpop.f32.mrf.mxu1  ;;  %3866 = vmatmul.f32.gmra.mxu0 %v10040_v53  ;;  %v8345_v7 = vrot.slane %v2515_v44, 7  ;;  %v4782_v44 = vld [vmem:[%s9112_s5 + $0x3f8] sm:$0xff]  ;;  %v8367_v32 = vsel %vm895_vm3, %v2937_v40, %v2939_v20 }
 0x46e   : > { %v3250_v0 = vpop.f32.mrf.mxu2  ;;  %v3363_v4 = vpop.f32.mrf.mxu3  ;;  %4871 = vmatpush.msrb.mxu3 %v4916_v5  ;;  %3924 = vmatpush.msra.mxu1 %v4782_v44  ;;  %v4920_v44 = vld [vmem:[%s9112_s5 + $0x358] sm:$0xff] }
 0x46f   : > { %v2380_v11 = vadd.f32 %v7773_v45, %v2340_v19  ;;  %v3251_v15 = vadd.f32 %v3250_v0, %v8247_v24  ;;  %v4917_v45 = vld [vmem:[%s9112_s5 + $0x370] sm:$0xff]  ;;  %v8364_v24 = vsel %vm754_vm1, %v2811_v3, %v2813_v47  ;;  %v2679_v40 = vsel %vm553_vm0, 0.0, %v8345_v7 }
 0x470   : > { %4718 = vmatmul.msk.f32.gmra.mxu1 %vm5174_vm2, %v8345_v7  ;;  %4872 = vmatpush.msrb.mxu3 %v4917_v45  ;;  %v2941_v5 = vrot.slane %v2679_v40, 2 }
 0x471   : > { %v2416_v27 = vmax.f32 %v2380_v11, 0.0  ;;  %v8355_v42 = vadd.f32 %v3363_v4, %v3251_v15  ;;  %v4919_v4 = vld [vmem:[%s9112_s5 + $0x360] sm:$0xff]  ;;  %v2815_v11 = vrot.slane %v2679_v40, 1 }
 0x472   : > { %4873 = vmatpush.msrb.mxu3 %v4918_v39  ;;  %v4921_v39 = vld [vmem:[%s9112_s5 + $0x350] sm:$0xff] }
 0x473   : > { %v2516_v60 = vmul.f32 %v2463_v43, %v2416_v27  ;;  %3300 = vmatmul.f32.gmra.mxu2 %v8364_v24  ;;  %3413 = vmatmul.f32.gmra.mxu3 %v8367_v32 }
 0x474   : > { %4874 = vmatpush.msrb.mxu3 %v4919_v4 }
 0x475   : > { %v3146_v19 = vpop.f32.mrf.mxu1  ;;  %4814 = vmatmul.msk.f32.gmra.mxu0 %vm5174_vm2, %v7805_v46  ;;  %v2604_v3 = vrot.slane %v2516_v60, 7 }
 0x476   : > { %v3253_v0 = vpop.f32.mrf.mxu2  ;;  %v3366_v43 = vpop.f32.mrf.mxu3  ;;  %4875 = vmatpush.msrb.mxu3 %v4920_v44 }
 0x477   : > { %v3254_v47 = vadd.f32 %v3253_v0, %v8295_v2  ;;  %v8385_v20 = vsel %vm553_vm0, %v8345_v7, %v2604_v3  ;;  %v2697_v40 = vsel %vm553_vm0, %v2604_v3, 0.0  ;;  %v4797_v0 = vld [vmem:[%s9112_s5 + $0x470] sm:$0xff]  ;;  %v4923_v3 = vld [vmem:[%s9112_s5 + $0x340] sm:$0xff] }
 0x478   : > { %3193 = vmatmul.f32.gmra.mxu1 %v8385_v20  ;;  %v2816_v15 = vrot.slane %v8385_v20, 1  ;;  %v2942_v27 = vrot.slane %v8385_v20, 2  ;;  %4876 = vmatpush.msrb.mxu3 %v4921_v39  ;;  %v2944_v44 = vrot.slane %v2697_v40, 2 }
 0x479   : > { %v8393_v45 = vadd.f32 %v3366_v43, %v3254_v47  ;;  %4038 = vmatpush.msra.mxu2 %v4797_v0  ;;  %v4922_v43 = vld [vmem:[%s9112_s5 + $0x348] sm:$0xff] }
 0x47a   : > { %v8396_v2 = vsel %vm754_vm1, %v2815_v11, %v2816_v15  ;;  %v8399_v60 = vsel %vm895_vm3, %v2941_v5, %v2942_v27  ;;  %4877 = vmatpush.msrb.mxu3 %v4922_v43  ;;  %v2818_v5 = vrot.slane %v2697_v40, 1  ;;  %v10043_v0 = vld [vmem:[#allocation43_spill] sm:$0xff]  ;;  %v4924_v43 = vld [vmem:[%s9112_s5 + $0x338] sm:$0xff]  ;;  %v4781_v40 = vld [vmem:[%s9112_s5 + $0x3f0] sm:$0xff] }
 0x47b   : > { %10041 = vst [vmem:[#allocation59_spill] sm:$0xff] %v8396_v2  ;;  %3303 = vmatmul.f32.gmra.mxu2 %v8396_v2  ;;  %3416 = vmatmul.f32.gmra.mxu3 %v8399_v60 }
 0x47c   : > { %10042 = vst [vmem:[#allocation69_spill] sm:$0xff] %v8399_v60  ;;  %4878 = vmatpush.msrb.mxu3 %v4923_v3  ;;  %v8430_v2 = vsel %vm754_vm1, %v2816_v15, %v2818_v5  ;;  %3925 = vmatpush.msra.mxu1 %v4781_v40  ;;  %v4929_v40 = vld [vmem:[%s9112_s5 + $0x310] sm:$0xff] }
 0x47d   : > { %v3149_v4 = vpop.f32.mrf.mxu1  ;;  %3872 = vmatmul.f32.gmra.mxu0 %v7851_v33  ;;  %10044 = vst [vmem:[#allocation71_spill] sm:$0xff] %v8430_v2 }
 0x47e   : > { %v3256_v47 = vpop.f32.mrf.mxu2  ;;  %v3369_v11 = vpop.f32.mrf.mxu3  ;;  %4879 = vmatpush.msrb.mxu3 %v4924_v43 }
 0x47f   : > { %v3257_v39 = vadd.f32 %v3256_v47, %v8342_v52  ;;  %v8433_v52 = vsel %vm895_vm3, %v2942_v27, %v2944_v44  ;;  %v4925_v47 = vld [vmem:[%s9112_s5 + $0x330] sm:$0xff]  ;;  %v4927_v44 = vld [vmem:[%s9112_s5 + $0x320] sm:$0xff] }
 0x480   : > { %4720 = vmatmul.msk.f32.vlgmr.msrb.gmra.mxu1 %vm5174_vm2, %v10043_v0  ;;  %10045 = vst [vmem:[#allocation58_spill] sm:$0xff] %v8433_v52  ;;  %4880 = vmatpush.msrb.mxu3 %v4925_v47  ;;  %v4928_v0 = vld [vmem:[%s9112_s5 + $0x318] sm:$0xff]  ;;  %v10048_v47 = vld [vmem:[#allocation116_spill] sm:$0xff] }
 0x481   : > { %v8424_v60 = vadd.f32 %v3369_v11, %v3257_v39  ;;  %v4926_v11 = vld [vmem:[%s9112_s5 + $0x328] sm:$0xff]  ;;  %v10046_v39 = vld [vmem:[#allocation6_spill] sm:$0xff] }
 0x482   : > { %4881 = vmatpush.msrb.mxu3 %v4926_v11  ;;  %v10049_v11 = vld [vmem:[#allocation77_spill] sm:$0xff] }
 0x483   : > { %3306 = vmatmul.f32.gmra.mxu2 %v8430_v2  ;;  %3419 = vmatmul.f32.gmra.mxu3 %v8433_v52  ;;  %v10057_v2 = vld [vmem:[#allocation143_spill] sm:$0xff] }
 0x484   : > { %4882 = vmatpush.msrb.mxu3 %v4927_v44 }
 0x485   : > { %v3152_v15 = vpop.f32.mrf.mxu1  ;;  %4816 = vmatmul.msk.f32.gmra.mxu0 %vm5174_vm2, %v7870_v61 }
 0x486   : > { %v3259_v27 = vpop.f32.mrf.mxu2  ;;  %v3372_v5 = vpop.f32.mrf.mxu3  ;;  %4883 = vmatpush.msrb.mxu3 %v4928_v0 }
 0x487   : > { %v3260_v3 = vadd.f32 %v3259_v27, %v3146_v19  ;;  %v4796_v19 = vld [vmem:[%s9112_s5 + $0x468] sm:$0xff] }
 0x488   : > { %3442 = vmatmul.f32.gmra.mxu1 %v10046_v39  ;;  %4884 = vmatpush.msrb.mxu3 %v4929_v40  ;;  %v4930_v27 = vld [vmem:[%s9112_s5 + $0x308] sm:$0xff]  ;;  %v4931_v39 = vld [vmem:[%s9112_s5 + $0x300] sm:$0xff]  ;;  %v10050_v40 = vld [vmem:[#allocation117_spill] sm:$0xff] }
 0x489   : > { %v8453_v43 = vadd.f32 %v3372_v5, %v3260_v3  ;;  %4039 = vmatpush.msra.mxu2 %v4796_v19  ;;  %v10052_v19 = vld [vmem:[#allocation125_spill] sm:$0xff] }
 0x48a   : > { %4885 = vmatpush.msrb.mxu3 %v4930_v27  ;;  %v10053_v27 = vld [vmem:[#allocation142_spill] sm:$0xff] }
 0x48b   : > { %10047 = vst [vmem:[#allocation157_spill] sm:$0xff] %v8453_v43  ;;  %3552 = vmatmul.f32.vlgmr.msrb.gmra.mxu2 %v10048_v47  ;;  %3665 = vmatmul.f32.vlgmr.msra.gmra.mxu3 %v10049_v11  ;;  %v4780_v11 = vld [vmem:[%s9112_s5 + $0x3e8] sm:$0xff] }
 0x48c   : > { %4886 = vmatpush.msrb.mxu3 %v4931_v39  ;;  %3926 = vmatpush.msra.mxu1 %v4780_v11  ;;  %v4795_v11 = vld [vmem:[%s9112_s5 + $0x460] sm:$0xff] }
 0x48d   : > { %v3155_v5 = vpop.f32.mrf.mxu1  ;;  %3878 = vmatmul.f32.gmra.mxu0 %v7919_v41  ;;  %4040 = vmatpush.msra.mxu2 %v4795_v11  ;;  %v10063_v11 = vld [vmem:[#allocation145_spill] sm:$0xff] }
 0x48e   : > { %v3262_v44 = vpop.f32.mrf.mxu2  ;;  %v3375_v3 = vpop.f32.mrf.mxu3 }
 0x48f   : > { %v3263_v0 = vadd.f32 %v3262_v44, %v3149_v4 }
 0x490   : > { %4722 = vmatmul.msk.f32.gmra.mxu1 %vm5174_vm2, %v10050_v40  ;;  %v10054_v40 = vld [vmem:[#allocation79_spill] sm:$0xff] }
 0x491   : > { %v8473_v47 = vadd.f32 %v3375_v3, %v3263_v0  ;;  %v10056_v0 = vld [vmem:[#allocation129_spill] sm:$0xff] }
 0x493   : > { %10051 = vst [vmem:[#allocation130_spill] sm:$0xff] %v8473_v47  ;;  %3555 = vmatmul.f32.gmra.mxu2 %v10052_v19  ;;  %3668 = vmatmul.f32.gmra.mxu3 %v10053_v27 }
 0x495   : > { %v3158_v52 = vpop.f32.mrf.mxu1  ;;  %4818 = vmatmul.msk.f32.gmra.mxu0 %vm5174_vm2, %v7940_v63 }
 0x496   : > { %v3265_v4 = vpop.f32.mrf.mxu2  ;;  %v3378_v44 = vpop.f32.mrf.mxu3 }
 0x497   : > { %v3266_v39 = vadd.f32 %v3265_v4, %v3152_v15  ;;  %v10059_v4 = vld [vmem:[#allocation28_spill] sm:$0xff] }
 0x498   : > { %3448 = vmatmul.f32.gmra.mxu1 %v10054_v40 }
 0x499   : > { %v8484_v3 = vadd.f32 %v3378_v44, %v3266_v39  ;;  %v10060_v44 = vld [vmem:[#allocation81_spill] sm:$0xff] }
 0x49b   : > { %10055 = vst [vmem:[#allocation112_spill] sm:$0xff] %v8484_v3  ;;  %3558 = vmatmul.f32.gmra.mxu2 %v10056_v0  ;;  %3671 = vmatmul.f32.gmra.mxu3 %v10057_v2  ;;  %v4779_v2 = vld [vmem:[%s9112_s5 + $0x3e0] sm:$0xff]  ;;  %v8505_v0 = vpop.f32.mrf.mxu0 }
 0x49c   : > { %3927 = vmatpush.msra.mxu1 %v4779_v2 }
 0x49d   : > { %v3161_v19 = vpop.f32.mrf.mxu1  ;;  %3884 = vmatmul.f32.gmra.mxu0 %v7989_v18 }
 0x49e   : > { %v3268_v27 = vpop.f32.mrf.mxu2  ;;  %v3381_v47 = vpop.f32.mrf.mxu3 }
 0x49f   : > { %v3269_v43 = vadd.f32 %v3268_v27, %v3155_v5  ;;  %v4794_v27 = vld [vmem:[%s9112_s5 + $0x458] sm:$0xff] }
 0x4a0   : > { %4724 = vmatmul.msk.f32.gmra.mxu1 %vm5174_vm2, %v7280_v13  ;;  %4041 = vmatpush.msra.mxu2 %v4794_v27 }
 0x4a1   : > { %v8495_v15 = vadd.f32 %v3381_v47, %v3269_v43  ;;  %v10062_v47 = vld [vmem:[#allocation132_spill] sm:$0xff] }
 0x4a3   : > { %10058 = vst [vmem:[#allocation64_spill] sm:$0xff] %v8495_v15  ;;  %3561 = vmatmul.f32.gmra.mxu2 %v10059_v4  ;;  %3674 = vmatmul.f32.gmra.mxu3 %v10060_v44 }
 0x4a5   : > { %v3164_v39 = vpop.f32.mrf.mxu1  ;;  %4820 = vmatmul.msk.f32.gmra.mxu0 %vm5174_vm2, %v8010_v9 }
 0x4a6   : > { %v3271_v5 = vpop.f32.mrf.mxu2  ;;  %v3384_v40 = vpop.f32.mrf.mxu3 }
 0x4a7   : > { %v3272_v13 = vadd.f32 %v3271_v5, %v3158_v52  ;;  %v4778_v5 = vld [vmem:[%s9112_s5 + $0x3d8] sm:$0xff] }
 0x4a8   : > { %3454 = vmatmul.f32.gmra.mxu1 %v7324_v12  ;;  %v8519_v12 = vpop.f32.mrf.mxu0 }
 0x4a9   : > { %v8508_v43 = vadd.f32 %v3384_v40, %v3272_v13  ;;  %3928 = vmatpush.msra.mxu1 %v4778_v5  ;;  %v10065_v40 = vld [vmem:[#allocation32_spill] sm:$0xff]  ;;  %v10070_v5 = vld [vmem:[#allocation22_spill] sm:$0xff] }
 0x4aa   : > { %v10066_v13 = vld [vmem:[#allocation84_spill] sm:$0xff] }
 0x4ab   : > { %10061 = vst [vmem:[#allocation158_spill] sm:$0xff] %v8508_v43  ;;  %3564 = vmatmul.f32.gmra.mxu2 %v10062_v47  ;;  %3677 = vmatmul.f32.gmra.mxu3 %v10063_v11  ;;  %v4793_v43 = vld [vmem:[%s9112_s5 + $0x450] sm:$0xff] }
 0x4ac   : > { %4042 = vmatpush.msra.mxu2 %v4793_v43  ;;  %v10073_v43 = vld [vmem:[#allocation137_spill] sm:$0xff] }
 0x4ad   : > { %v3167_v2 = vpop.f32.mrf.mxu1  ;;  %3890 = vmatmul.f32.gmra.mxu0 %v8059_v21 }
 0x4ae   : > { %v3274_v4 = vpop.f32.mrf.mxu2  ;;  %v3387_v44 = vpop.f32.mrf.mxu3 }
 0x4af   : > { %v3275_v15 = vadd.f32 %v3274_v4, %v3161_v19 }
 0x4b0   : > { %4726 = vmatmul.msk.f32.gmra.mxu1 %vm5174_vm2, %v7344_v1 }
 0x4b1   : > { %v8521_v52 = vadd.f32 %v3387_v44, %v3275_v15  ;;  %v8534_v44 = vpop.f32.mrf.mxu0 }
 0x4b2   : > { %10068 = vst [vmem:[#allocation48_spill] sm:$0xff] %v8534_v44 }
 0x4b3   : > { %10064 = vst [vmem:[#allocation53_spill] sm:$0xff] %v8521_v52  ;;  %3567 = vmatmul.f32.gmra.mxu2 %v10065_v40  ;;  %3680 = vmatmul.f32.gmra.mxu3 %v10066_v13  ;;  %v10069_v52 = vld [vmem:[#allocation135_spill] sm:$0xff] }
 0x4b5   : > { %v3170_v27 = vpop.f32.mrf.mxu1  ;;  %4822 = vmatmul.msk.f32.gmra.mxu0 %vm5174_vm2, %v8080_v51 }
 0x4b6   : > { %v3277_v19 = vpop.f32.mrf.mxu2  ;;  %v3390_v1 = vpop.f32.mrf.mxu3 }
 0x4b7   : > { %v3278_v4 = vadd.f32 %v3277_v19, %v3164_v39 }
 0x4b8   : > { %3460 = vmatmul.f32.gmra.mxu1 %v7388_v16 }
 0x4b9   : > { %v8532_v15 = vadd.f32 %v3390_v1, %v3278_v4  ;;  %v4777_v1 = vld [vmem:[%s9112_s5 + $0x3d0] sm:$0xff]  ;;  %v10072_v4 = vld [vmem:[#allocation87_spill] sm:$0xff]  ;;  %v8552_v44 = vpop.f32.mrf.mxu0 }
 0x4ba   : > { %3929 = vmatpush.msra.mxu1 %v4777_v1  ;;  %10074 = vst [vmem:[#allocation122_spill] sm:$0xff] %v8552_v44  ;;  %v10077_v1 = vld [vmem:[#allocation89_spill] sm:$0xff]  ;;  %v4792_v44 = vld [vmem:[%s9112_s5 + $0x448] sm:$0xff] }
 0x4bb   : > { %10067 = vst [vmem:[#allocation72_spill] sm:$0xff] %v8532_v15  ;;  %3570 = vmatmul.f32.gmra.mxu2 %v10069_v52  ;;  %3683 = vmatmul.f32.gmra.mxu3 %v10070_v5 }
 0x4bc   : > { %4043 = vmatpush.msra.mxu2 %v4792_v44  ;;  %v10080_v44 = vld [vmem:[#allocation178_spill] sm:$0xff] }
 0x4bd   : > { %v3173_v3 = vpop.f32.mrf.mxu1  ;;  %3896 = vmatmul.f32.gmra.mxu0 %v8129_v38 }
 0x4be   : > { %v3280_v13 = vpop.f32.mrf.mxu2  ;;  %v3393_v39 = vpop.f32.mrf.mxu3 }
 0x4bf   : > { %v3281_v19 = vadd.f32 %v3280_v13, %v3167_v2 }
 0x4c0   : > { %4728 = vmatmul.msk.f32.gmra.mxu1 %vm5174_vm2, %v7410_v48 }
 0x4c1   : > { %v8545_v16 = vadd.f32 %v3393_v39, %v3281_v19  ;;  %v10076_v19 = vld [vmem:[#allocation123_spill] sm:$0xff] }
 0x4c3   : > { %10071 = vst [vmem:[#allocation74_spill] sm:$0xff] %v8545_v16  ;;  %3573 = vmatmul.f32.gmra.mxu2 %v10072_v4  ;;  %3686 = vmatmul.f32.gmra.mxu3 %v10073_v43  ;;  %v8566_v4 = vpop.f32.mrf.mxu0 }
 0x4c4   : > { %10078 = vst [vmem:[#allocation62_spill] sm:$0xff] %v8566_v4 }
 0x4c5   : > { %v3176_v15 = vpop.f32.mrf.mxu1  ;;  %4824 = vmatmul.msk.f32.gmra.mxu0 %vm5174_vm2, %v8153_v28 }
 0x4c6   : > { %v3283_v2 = vpop.f32.mrf.mxu2  ;;  %v3396_v48 = vpop.f32.mrf.mxu3 }
 0x4c7   : > { %v3284_v13 = vadd.f32 %v3283_v2, %v3170_v27  ;;  %v4776_v2 = vld [vmem:[%s9112_s5 + $0x3c8] sm:$0xff] }
 0x4c8   : > { %3466 = vmatmul.f32.gmra.mxu1 %v7454_v35 }
 0x4c9   : > { %v8558_v39 = vadd.f32 %v3396_v48, %v3284_v13  ;;  %3930 = vmatpush.msra.mxu1 %v4776_v2  ;;  %v10081_v48 = vld [vmem:[#allocation152_spill] sm:$0xff] }
 0x4ca   : > { %v10085_v2 = vld [vmem:[#allocation92_spill] sm:$0xff] }
 0x4cb   : > { %10075 = vst [vmem:[#allocation160_spill] sm:$0xff] %v8558_v39  ;;  %3576 = vmatmul.f32.gmra.mxu2 %v10076_v19  ;;  %3689 = vmatmul.f32.gmra.mxu3 %v10077_v1 }
 0x4cd   : > { %v3179_v16 = vpop.f32.mrf.mxu1  ;;  %3902 = vmatmul.f32.gmra.mxu0 %v8217_v25 }
 0x4ce   : > { %v3286_v43 = vpop.f32.mrf.mxu2  ;;  %v3399_v5 = vpop.f32.mrf.mxu3 }
 0x4cf   : > { %v3287_v27 = vadd.f32 %v3286_v43, %v3173_v3 }
 0x4d0   : > { %4730 = vmatmul.msk.f32.gmra.mxu1 %vm5174_vm2, %v7474_v17  ;;  %v8582_v17 = vpop.f32.mrf.mxu0 }
 0x4d1   : > { %v8571_v35 = vadd.f32 %v3399_v5, %v3287_v27  ;;  %10082 = vst [vmem:[#allocation113_spill] sm:$0xff] %v8582_v17  ;;  %v10084_v27 = vld [vmem:[#allocation46_spill] sm:$0xff]  ;;  %v10089_v17 = vld [vmem:[#allocation83_spill] sm:$0xff] }
 0x4d3   : > { %10079 = vst [vmem:[#allocation47_spill] sm:$0xff] %v8571_v35  ;;  %3579 = vmatmul.f32.gmra.mxu2 %v10080_v44  ;;  %3692 = vmatmul.f32.gmra.mxu3 %v10081_v48  ;;  %v4791_v35 = vld [vmem:[%s9112_s5 + $0x440] sm:$0xff] }
 0x4d4   : > { %4044 = vmatpush.msra.mxu2 %v4791_v35  ;;  %v10088_v35 = vld [vmem:[#allocation54_spill] sm:$0xff] }
 0x4d5   : > { %v3182_v13 = vpop.f32.mrf.mxu1  ;;  %4826 = vmatmul.msk.f32.gmra.mxu0 %vm5174_vm2, %v8245_v29 }
 0x4d6   : > { %v3289_v3 = vpop.f32.mrf.mxu2  ;;  %v3402_v43 = vpop.f32.mrf.mxu3 }
 0x4d7   : > { %v3290_v4 = vadd.f32 %v3289_v3, %v3176_v15 }
 0x4d8   : > { %3472 = vmatmul.f32.gmra.mxu1 %v7522_v34 }
 0x4d9   : > { %v8584_v5 = vadd.f32 %v3402_v43, %v3290_v4  ;;  %v4775_v4 = vld [vmem:[%s9112_s5 + $0x3c0] sm:$0xff]  ;;  %v8600_v43 = vpop.f32.mrf.mxu0 }
 0x4da   : > { %3931 = vmatpush.msra.mxu1 %v4775_v4  ;;  %10087 = vst [vmem:[#allocation2_spill] sm:$0xff] %v8600_v43  ;;  %v10092_v4 = vld [vmem:[#allocation188_spill] sm:$0xff]  ;;  %v4790_v43 = vld [vmem:[%s9112_s5 + $0x438] sm:$0xff] }
 0x4db   : > { %10083 = vst [vmem:[#allocation70_spill] sm:$0xff] %v8584_v5  ;;  %3582 = vmatmul.f32.gmra.mxu2 %v10084_v27  ;;  %3695 = vmatmul.f32.gmra.mxu3 %v10085_v2 }
 0x4dc   : > { %4045 = vmatpush.msra.mxu2 %v4790_v43  ;;  %v10095_v43 = vld [vmem:[#allocation15_spill] sm:$0xff] }
 0x4dd   : > { %v3185_v39 = vpop.f32.mrf.mxu1  ;;  %3908 = vmatmul.f32.gmra.mxu0 %v8310_v6 }
 0x4de   : > { %v3292_v48 = vpop.f32.mrf.mxu2  ;;  %v3405_v15 = vpop.f32.mrf.mxu3 }
 0x4df   : > { %v3293_v3 = vadd.f32 %v3292_v48, %v3179_v16 }
 0x4e0   : > { %4732 = vmatmul.msk.f32.gmra.mxu1 %vm5174_vm2, %v7556_v59 }
 0x4e1   : > { %v8595_v34 = vadd.f32 %v3405_v15, %v3293_v3  ;;  %v10091_v3 = vld [vmem:[#allocation156_spill] sm:$0xff] }
 0x4e3   : > { %10086 = vst [vmem:[#allocation197_spill] sm:$0xff] %v8595_v34  ;;  %3585 = vmatmul.f32.gmra.mxu2 %v10088_v35  ;;  %3698 = vmatmul.f32.gmra.mxu3 %v10089_v17  ;;  %v8615_v34 = vpop.f32.mrf.mxu0 }
 0x4e4   : > { %10093 = vst [vmem:[#allocation12_spill] sm:$0xff] %v8615_v34 }
 0x4e5   : > { %v3188_v5 = vpop.f32.mrf.mxu1  ;;  %4828 = vmatmul.msk.f32.gmra.mxu0 %vm5174_vm2, %v8345_v7 }
 0x4e6   : > { %v3295_v16 = vpop.f32.mrf.mxu2  ;;  %v3408_v59 = vpop.f32.mrf.mxu3 }
 0x4e7   : > { %v3296_v48 = vadd.f32 %v3295_v16, %v3182_v13 }
 0x4e8   : > { %3478 = vmatmul.f32.gmra.mxu1 %v9996_v54 }
 0x4e9   : > { %v8608_v15 = vadd.f32 %v3408_v59, %v3296_v48  ;;  %v4774_v59 = vld [vmem:[%s9112_s5 + $0x3b8] sm:$0xff] }
 0x4ea   : > { %3932 = vmatpush.msra.mxu1 %v4774_v59  ;;  %v10096_v48 = vld [vmem:[#allocation41_spill] sm:$0xff] }
 0x4eb   : > { %10090 = vst [vmem:[#allocation139_spill] sm:$0xff] %v8608_v15  ;;  %3588 = vmatmul.f32.gmra.mxu2 %v10091_v3  ;;  %3701 = vmatmul.f32.gmra.mxu3 %v10092_v4 }
 0x4ed   : > { %v3191_v17 = vpop.f32.mrf.mxu1  ;;  %3914 = vmatmul.f32.gmra.mxu0 %v8385_v20 }
 0x4ee   : > { %v3298_v7 = vpop.f32.mrf.mxu2  ;;  %v3411_v13 = vpop.f32.mrf.mxu3 }
 0x4ef   : > { %v3299_v16 = vadd.f32 %v3298_v7, %v3185_v39  ;;  %v10099_v7 = vld [vmem:[#allocation19_spill] sm:$0xff] }
 0x4f0   : > { %4734 = vmatmul.msk.f32.gmra.mxu1 %vm5174_vm2, %v10008_v55  ;;  %v10098_v55 = vld [vmem:[#allocation147_spill] sm:$0xff] }
 0x4f1   : > { %v8621_v54 = vadd.f32 %v3411_v13, %v3299_v16  ;;  %v4789_v13 = vld [vmem:[%s9112_s5 + $0x430] sm:$0xff] }
 0x4f2   : > { %4046 = vmatpush.msra.mxu2 %v4789_v13 }
 0x4f3   : > { %10094 = vst [vmem:[#allocation51_spill] sm:$0xff] %v8621_v54  ;;  %3591 = vmatmul.f32.gmra.mxu2 %v10095_v43  ;;  %3704 = vmatmul.f32.gmra.mxu3 %v10096_v48 }
 0x4f5   : > { %v3194_v34 = vpop.f32.mrf.mxu1 }
 0x4f6   : > { %v3301_v20 = vpop.f32.mrf.mxu2  ;;  %v3414_v15 = vpop.f32.mrf.mxu3 }
 0x4f7   : > { %v3302_v4 = vadd.f32 %v3301_v20, %v3188_v5  ;;  %v4773_v5 = vld [vmem:[%s9112_s5 + $0x3b0] sm:$0xff] }
 0x4f8   : > { %3484 = vmatmul.f32.gmra.mxu1 %v10021_v50 }
 0x4f9   : > { %v8629_v39 = vadd.f32 %v3414_v15, %v3302_v4  ;;  %3933 = vmatpush.msra.mxu1 %v4773_v5  ;;  %v10101_v15 = vld [vmem:[#allocation91_spill] sm:$0xff] }
 0x4fa   : > { %v10102_v4 = vld [vmem:[#allocation103_spill] sm:$0xff] }
 0x4fb   : > { %10097 = vst [vmem:[#allocation196_spill] sm:$0xff] %v8629_v39  ;;  %3594 = vmatmul.f32.gmra.mxu2 %v10098_v55  ;;  %3707 = vmatmul.f32.gmra.mxu3 %v10099_v7 }
 0x4fd   : > { %v3440_v16 = vpop.f32.mrf.mxu1 }
 0x4fe   : > { %v3304_v59 = vpop.f32.mrf.mxu2  ;;  %v3417_v54 = vpop.f32.mrf.mxu3 }
 0x4ff   : > { %v3305_v48 = vadd.f32 %v3304_v59, %v3191_v17 }
 0x500   : > { %4736 = vmatmul.msk.f32.gmra.mxu1 %vm5174_vm2, %v10035_v31  ;;  %v4788_v31 = vld [vmem:[%s9112_s5 + $0x428] sm:$0xff] }
 0x501   : > { %v8639_v50 = vadd.f32 %v3417_v54, %v3305_v48  ;;  %4047 = vmatpush.msra.mxu2 %v4788_v31  ;;  %v3441_v54 = vadd.f32 %v3440_v16, %v7885_v8 }
 0x503   : > { %10100 = vst [vmem:[#allocation163_spill] sm:$0xff] %v8639_v50  ;;  %3597 = vmatmul.f32.gmra.mxu2 %v10101_v15  ;;  %3710 = vmatmul.f32.gmra.mxu3 %v10102_v4 }
 0x505   : > { %v3443_v20 = vpop.f32.mrf.mxu1 }
 0x506   : > { %v3307_v13 = vpop.f32.mrf.mxu2  ;;  %v3420_v39 = vpop.f32.mrf.mxu3  ;;  %v3444_v8 = vadd.f32 %v3443_v20, %v7926_v23 }
 0x507   : > { %v3308_v7 = vadd.f32 %v3307_v13, %v3194_v34  ;;  %v4772_v34 = vld [vmem:[%s9112_s5 + $0x3a8] sm:$0xff] }
 0x508   : > { %3490 = vmatmul.f32.gmra.mxu1 %v10040_v53 }
 0x509   : > { %v8647_v17 = vadd.f32 %v3420_v39, %v3308_v7  ;;  %3934 = vmatpush.msra.mxu1 %v4772_v34  ;;  %v10104_v39 = vld [vmem:[#allocation94_spill] sm:$0xff] }
 0x50b   : > { %3600 = vmatmul.f32.gmra.mxu2 %v7790_v10  ;;  %3713 = vmatmul.f32.gmra.mxu3 %v7793_v37 }
 0x50d   : > { %v3446_v48 = vpop.f32.mrf.mxu1 }
 0x50e   : > { %v3553_v59 = vpop.f32.mrf.mxu2  ;;  %v3666_v5 = vpop.f32.mrf.mxu3 }
 0x50f   : > { %v3554_v50 = vadd.f32 %v3553_v59, %v3441_v54  ;;  %v10107_v54 = vld [vmem:[#allocation166_spill] sm:$0xff] }
 0x510   : > { %4738 = vmatmul.msk.f32.gmra.mxu1 %vm5174_vm2, %v7805_v46  ;;  %v4787_v59 = vld [vmem:[%s9112_s5 + $0x420] sm:$0xff] }
 0x511   : > { %v8658_v53 = vadd.f32 %v3666_v5, %v3554_v50  ;;  %v10106_v50 = vld [vmem:[#allocation187_spill] sm:$0xff]  ;;  %4048 = vmatpush.msra.mxu2 %v4787_v59  ;;  %v3447_v5 = vadd.f32 %v3446_v48, %v7955_v57 }
 0x513   : > { %10103 = vst [vmem:[#allocation114_spill] sm:$0xff] %v8658_v53  ;;  %3603 = vmatmul.f32.gmra.mxu2 %v7818_v22  ;;  %3716 = vmatmul.f32.gmra.mxu3 %v10104_v39 }
 0x515   : > { %v3449_v7 = vpop.f32.mrf.mxu1 }
 0x516   : > { %v3556_v16 = vpop.f32.mrf.mxu2  ;;  %v3669_v13 = vpop.f32.mrf.mxu3  ;;  %v3450_v57 = vadd.f32 %v3449_v7, %v7996_v49 }
 0x517   : > { %v3557_v31 = vadd.f32 %v3556_v16, %v3444_v8  ;;  %v4771_v8 = vld [vmem:[%s9112_s5 + $0x3a0] sm:$0xff] }
 0x518   : > { %3496 = vmatmul.f32.gmra.mxu1 %v7851_v33  ;;  %v10109_v16 = vld [vmem:[#allocation146_spill] sm:$0xff] }
 0x519   : > { %v8667_v46 = vadd.f32 %v3669_v13, %v3557_v31  ;;  %3935 = vmatpush.msra.mxu1 %v4771_v8 }
 0x51b   : > { %10105 = vst [vmem:[#allocation75_spill] sm:$0xff] %v8667_v46  ;;  %3606 = vmatmul.f32.gmra.mxu2 %v10106_v50  ;;  %3719 = vmatmul.f32.gmra.mxu3 %v10107_v54 }
 0x51d   : > { %v3452_v23 = vpop.f32.mrf.mxu1 }
 0x51e   : > { %v3559_v20 = vpop.f32.mrf.mxu2  ;;  %v3672_v34 = vpop.f32.mrf.mxu3 }
 0x51f   : > { %v3560_v53 = vadd.f32 %v3559_v20, %v3447_v5  ;;  %v4786_v5 = vld [vmem:[%s9112_s5 + $0x418] sm:$0xff]  ;;  %v3453_v20 = vadd.f32 %v3452_v23, %v8025_v36  ;;  %v10115_v36 = vld [vmem:[#allocation108_spill] sm:$0xff] }
 0x520   : > { %4740 = vmatmul.msk.f32.gmra.mxu1 %vm5174_vm2, %v7870_v61  ;;  %4049 = vmatpush.msra.mxu2 %v4786_v5 }
 0x521   : > { %v8678_v33 = vadd.f32 %v3672_v34, %v3560_v53  ;;  %v10111_v53 = vld [vmem:[#allocation97_spill] sm:$0xff] }
 0x523   : > { %10108 = vst [vmem:[#allocation52_spill] sm:$0xff] %v8678_v33  ;;  %3609 = vmatmul.f32.gmra.mxu2 %v7889_v62  ;;  %3722 = vmatmul.f32.gmra.mxu3 %v10109_v16 }
 0x525   : > { %v3455_v48 = vpop.f32.mrf.mxu1 }
 0x526   : > { %v3562_v13 = vpop.f32.mrf.mxu2  ;;  %v3675_v31 = vpop.f32.mrf.mxu3  ;;  %v3456_v23 = vadd.f32 %v3455_v48, %v10115_v36 }
 0x527   : > { %v3563_v59 = vadd.f32 %v3562_v13, %v3450_v57  ;;  %v4770_v57 = vld [vmem:[%s9112_s5 + $0x398] sm:$0xff]  ;;  %v10113_v13 = vld [vmem:[#allocation66_spill] sm:$0xff] }
 0x528   : > { %3502 = vmatmul.f32.gmra.mxu1 %v7919_v41 }
 0x529   : > { %v8687_v61 = vadd.f32 %v3675_v31, %v3563_v59  ;;  %3936 = vmatpush.msra.mxu1 %v4770_v57  ;;  %v10114_v31 = vld [vmem:[#allocation38_spill] sm:$0xff]  ;;  %v4785_v57 = vld [vmem:[%s9112_s5 + $0x410] sm:$0xff] }
 0x52a   : > { %4050 = vmatpush.msra.mxu2 %v4785_v57 }
 0x52b   : > { %10110 = vst [vmem:[#allocation165_spill] sm:$0xff] %v8687_v61  ;;  %3612 = vmatmul.f32.gmra.mxu2 %v7930_v26  ;;  %3725 = vmatmul.f32.gmra.mxu3 %v10111_v53 }
 0x52d   : > { %v3458_v49 = vpop.f32.mrf.mxu1 }
 0x52e   : > { %v3565_v7 = vpop.f32.mrf.mxu2  ;;  %v3678_v34 = vpop.f32.mrf.mxu3 }
 0x52f   : > { %v3566_v8 = vadd.f32 %v3565_v7, %v3453_v20 }
 0x530   : > { %4742 = vmatmul.msk.f32.gmra.mxu1 %vm5174_vm2, %v7940_v63 }
 0x531   : > { %v8698_v41 = vadd.f32 %v3678_v34, %v3566_v8  ;;  %v10117_v34 = vld [vmem:[#allocation55_spill] sm:$0xff]  ;;  %v10118_v8 = vld [vmem:[#allocation148_spill] sm:$0xff] }
 0x533   : > { %10112 = vst [vmem:[#allocation8_spill] sm:$0xff] %v8698_v41  ;;  %3615 = vmatmul.f32.gmra.mxu2 %v10113_v13  ;;  %3728 = vmatmul.f32.gmra.mxu3 %v10114_v31  ;;  %v10119_v41 = vld [vmem:[#allocation133_spill] sm:$0xff] }
 0x534   : > { %v3459_v61 = vadd.f32 %v3458_v49, %v10119_v41  ;;  %v10123_v49 = vld [vmem:[#allocation33_spill] sm:$0xff] }
 0x535   : > { %v3461_v59 = vpop.f32.mrf.mxu1 }
 0x536   : > { %v3568_v5 = vpop.f32.mrf.mxu2  ;;  %v3681_v20 = vpop.f32.mrf.mxu3  ;;  %v3462_v41 = vadd.f32 %v3461_v59, %v10123_v49 }
 0x537   : > { %v3569_v7 = vadd.f32 %v3568_v5, %v3456_v23  ;;  %v4769_v23 = vld [vmem:[%s9112_s5 + $0x390] sm:$0xff]  ;;  %v10121_v5 = vld [vmem:[#allocation26_spill] sm:$0xff] }
 0x538   : > { %3508 = vmatmul.f32.gmra.mxu1 %v7989_v18 }
 0x539   : > { %v8707_v63 = vadd.f32 %v3681_v20, %v3569_v7  ;;  %3937 = vmatpush.msra.mxu1 %v4769_v23  ;;  %v10122_v20 = vld [vmem:[#allocation99_spill] sm:$0xff] }
 0x53a   : > { %v4784_v23 = vld [vmem:[%s9112_s5 + $0x408] sm:$0xff] }
 0x53b   : > { %10116 = vst [vmem:[#allocation167_spill] sm:$0xff] %v8707_v63  ;;  %3618 = vmatmul.f32.gmra.mxu2 %v10117_v34  ;;  %3731 = vmatmul.f32.gmra.mxu3 %v10118_v8 }
 0x53c   : > { %4051 = vmatpush.msra.mxu2 %v4784_v23 }
 0x53d   : > { %v3464_v48 = vpop.f32.mrf.mxu1 }
 0x53e   : > { %v3571_v36 = vpop.f32.mrf.mxu2  ;;  %v3684_v33 = vpop.f32.mrf.mxu3 }
 0x53f   : > { %v3572_v46 = vadd.f32 %v3571_v36, %v3459_v61 }
 0x540   : > { %4744 = vmatmul.msk.f32.gmra.mxu1 %vm5174_vm2, %v8010_v9 }
 0x541   : > { %v8718_v18 = vadd.f32 %v3684_v33, %v3572_v46  ;;  %v10125_v46 = vld [vmem:[#allocation159_spill] sm:$0xff]  ;;  %v10126_v33 = vld [vmem:[#allocation56_spill] sm:$0xff] }
 0x543   : > { %10120 = vst [vmem:[#allocation115_spill] sm:$0xff] %v8718_v18  ;;  %3621 = vmatmul.f32.gmra.mxu2 %v10121_v5  ;;  %3734 = vmatmul.f32.gmra.mxu3 %v10122_v20  ;;  %v10127_v18 = vld [vmem:[#allocation109_spill] sm:$0xff] }
 0x544   : > { %v3465_v63 = vadd.f32 %v3464_v48, %v10127_v18  ;;  %v10131_v48 = vld [vmem:[#allocation65_spill] sm:$0xff] }
 0x545   : > { %v3467_v7 = vpop.f32.mrf.mxu1 }
 0x546   : > { %v3574_v57 = vpop.f32.mrf.mxu2  ;;  %v3687_v61 = vpop.f32.mrf.mxu3  ;;  %v3468_v18 = vadd.f32 %v3467_v7, %v10131_v48 }
 0x547   : > { %v3575_v36 = vadd.f32 %v3574_v57, %v3462_v41  ;;  %v4768_v41 = vld [vmem:[%s9112_s5 + $0x388] sm:$0xff]  ;;  %v10129_v57 = vld [vmem:[#allocation193_spill] sm:$0xff] }
 0x548   : > { %3514 = vmatmul.f32.gmra.mxu1 %v8059_v21 }
 0x549   : > { %v8727_v9 = vadd.f32 %v3687_v61, %v3575_v36  ;;  %3938 = vmatpush.msra.mxu1 %v4768_v41  ;;  %v10130_v61 = vld [vmem:[#allocation30_spill] sm:$0xff] }
 0x54a   : > { %v4783_v41 = vld [vmem:[%s9112_s5 + $0x400] sm:$0xff] }
 0x54b   : > { %10124 = vst [vmem:[#allocation78_spill] sm:$0xff] %v8727_v9  ;;  %3624 = vmatmul.f32.gmra.mxu2 %v10125_v46  ;;  %3737 = vmatmul.f32.gmra.mxu3 %v10126_v33 }
 0x54c   : > { %4052 = vmatpush.msra.mxu2 %v4783_v41  ;;  %v10141_v41 = vld [vmem:[#allocation111_spill] sm:$0xff] }
 0x54d   : > { %v3470_v59 = vpop.f32.mrf.mxu1 }
 0x54e   : > { %v3577_v49 = vpop.f32.mrf.mxu2  ;;  %v3690_v20 = vpop.f32.mrf.mxu3 }
 0x54f   : > { %v3578_v8 = vadd.f32 %v3577_v49, %v3465_v63 }
 0x550   : > { %4746 = vmatmul.msk.f32.gmra.mxu1 %vm5174_vm2, %v8080_v51 }
 0x551   : > { %v8738_v21 = vadd.f32 %v3690_v20, %v3578_v8  ;;  %v10133_v8 = vld [vmem:[#allocation151_spill] sm:$0xff]  ;;  %v10134_v20 = vld [vmem:[#allocation102_spill] sm:$0xff] }
 0x553   : > { %10128 = vst [vmem:[#allocation4_spill] sm:$0xff] %v8738_v21  ;;  %3627 = vmatmul.f32.gmra.mxu2 %v10129_v57  ;;  %3740 = vmatmul.f32.gmra.mxu3 %v10130_v61  ;;  %v10135_v21 = vld [vmem:[#allocation128_spill] sm:$0xff] }
 0x554   : > { %v3471_v9 = vadd.f32 %v3470_v59, %v10135_v21 }
 0x555   : > { %v3473_v36 = vpop.f32.mrf.mxu1 }
 0x556   : > { %v3580_v23 = vpop.f32.mrf.mxu2  ;;  %v3693_v49 = vpop.f32.mrf.mxu3 }
 0x557   : > { %v3581_v63 = vadd.f32 %v3580_v23, %v3468_v18  ;;  %v10137_v18 = vld [vmem:[#allocation162_spill] sm:$0xff]  ;;  %v10138_v23 = vld [vmem:[#allocation68_spill] sm:$0xff] }
 0x558   : > { %3520 = vmatmul.f32.gmra.mxu1 %v8129_v38  ;;  %v4767_v38 = vld [vmem:[%s9112_s5 + $0x380] sm:$0xff] }
 0x559   : > { %v8747_v51 = vadd.f32 %v3693_v49, %v3581_v63  ;;  %3939 = vmatpush.msra.mxu1 %v4767_v38  ;;  %v3474_v63 = vadd.f32 %v3473_v36, %v8321_v14  ;;  %v10146_v36 = vld [vmem:[#allocation136_spill] sm:$0xff] }
 0x55b   : > { %10132 = vst [vmem:[#allocation63_spill] sm:$0xff] %v8747_v51  ;;  %3630 = vmatmul.f32.gmra.mxu2 %v10133_v8  ;;  %3743 = vmatmul.f32.gmra.mxu3 %v10134_v20  ;;  %v10143_v51 = vld [vmem:[#allocation153_spill] sm:$0xff] }
 0x55c   : > { %v10153_v8 = vld [vmem:[#allocation105_spill] sm:$0xff] }
 0x55d   : > { %v3476_v7 = vpop.f32.mrf.mxu1 }
 0x55e   : > { %v3583_v48 = vpop.f32.mrf.mxu2 }
 0x55f   : > { %v8755_v61 = vadd.f32 %v3583_v48, %v3471_v9  ;;  %v10140_v9 = vld [vmem:[#allocation67_spill] sm:$0xff] }
 0x560   : > { %4748 = vmatmul.msk.f32.gmra.mxu1 %vm5174_vm2, %v8153_v28  ;;  %v1378_v48 = vadd.f32 %v10141_v41, %v10140_v9  ;;  %v3477_v28 = vadd.f32 %v3476_v7, %v8355_v42  ;;  %v10149_v41 = vld [vmem:[#allocation195_spill] sm:$0xff] }
 0x561   : > { %10136 = vst [vmem:[#allocation76_spill] sm:$0xff] %v8755_v61  ;;  %v10142_v61 = vld [vmem:[#allocation50_spill] sm:$0xff]  ;;  %v10152_v7 = vld [vmem:[#allocation155_spill] sm:$0xff] }
 0x563   : > { %3633 = vmatmul.f32.gmra.mxu2 %v10137_v18  ;;  %3746 = vmatmul.f32.gmra.mxu3 %v10138_v23  ;;  %v10144_v23 = vld [vmem:[#allocation190_spill] sm:$0xff] }
 0x564   : > { %v1503_v18 = vadd.f32 %v10144_v23, %v1378_v48 }
 0x565   : > { %v3479_v59 = vpop.f32.mrf.mxu1 }
 0x566   : > { %v3586_v21 = vpop.f32.mrf.mxu2 }
 0x567   : > { %v8766_v49 = vadd.f32 %v3586_v21, %v3474_v63  ;;  %v10147_v63 = vld [vmem:[#allocation3_spill] sm:$0xff] }
 0x568   : > { %3526 = vmatmul.f32.gmra.mxu1 %v8217_v25  ;;  %v1381_v21 = vadd.f32 %v10147_v63, %v10146_v36  ;;  %v10148_v25 = vld [vmem:[#allocation191_spill] sm:$0xff]  ;;  %v10155_v63 = vld [vmem:[#allocation42_spill] sm:$0xff] }
 0x569   : > { %10139 = vst [vmem:[#allocation168_spill] sm:$0xff] %v8766_v49  ;;  %v1628_v9 = vadd.f32 %v10148_v25, %v1503_v18  ;;  %v10156_v18 = vld [vmem:[#allocation101_spill] sm:$0xff] }
 0x56b   : > { %3636 = vmatmul.f32.gmra.mxu2 %v10142_v61  ;;  %3749 = vmatmul.f32.gmra.mxu3 %v10143_v51  ;;  %v1753_v49 = vadd.f32 %v10149_v41, %v1628_v9  ;;  %v10150_v51 = vld [vmem:[#allocation164_spill] sm:$0xff] }
 0x56c   : > { %v10151_v61 = vld [vmem:[#allocation144_spill] sm:$0xff] }
 0x56d   : > { %v3482_v38 = vpop.f32.mrf.mxu1  ;;  %v2177_v42 = vadd.f32 %v10151_v61, %v10150_v51  ;;  %v1878_v25 = vadd.f32 %v10156_v18, %v1753_v49  ;;  %v10157_v41 = vld [vmem:[#allocation120_spill] sm:$0xff]  ;;  %v10158_v51 = vld [vmem:[#allocation106_spill] sm:$0xff] }
 0x56e   : > { %v3589_v20 = vpop.f32.mrf.mxu2  ;;  %v4932_v49 = vld [vmem:[%s9111_s4] ss:$0 sm:$0xff] }
 0x56f   : > { %v8775_v14 = vadd.f32 %v3589_v20, %v3477_v28  ;;  %v10154_v20 = vld [vmem:[#allocation192_spill] sm:$0xff]  ;;  %v2302_v48 = vadd.f32 %v8505_v0, %v2177_v42  ;;  %v3480_v28 = vadd.f32 %v3479_v59, %v8393_v45  ;;  %v10160_v45 = vld [vmem:[#allocation150_spill] sm:$0xff]  ;;  %v3483_v42 = vadd.f32 %v3482_v38, %v8424_v60 }
 0x570   : > { %4750 = vmatmul.msk.f32.gmra.mxu1 %vm5174_vm2, %v8245_v29  ;;  %v1506_v23 = vadd.f32 %v10154_v20, %v1381_v21 }
 0x571   : > { %10145 = vst [vmem:[#allocation16_spill] sm:$0xff] %v8775_v14  ;;  %v2341_v21 = vadd.f32 %v2302_v48, %v1878_v25 }
 0x572   : > { %v1631_v29 = vadd.f32 %v10155_v63, %v1506_v23 }
 0x573   : > { %3639 = vmatmul.f32.gmra.mxu2 %v10152_v7  ;;  %3752 = vmatmul.f32.gmra.mxu3 %v10153_v8  ;;  %v10159_v7 = vld [vmem:[#allocation34_spill] sm:$0xff] }
 0x574   : > { %v1756_v61 = vadd.f32 %v10157_v41, %v1631_v29  ;;  %v2180_v33 = vadd.f32 %v10159_v7, %v10158_v51  ;;  %v10162_v29 = vld [vmem:[#allocation157_spill] sm:$0xff]  ;;  %v10163_v51 = vld [vmem:[#allocation130_spill] sm:$0xff] }
 0x575   : > { %v3485_v36 = vpop.f32.mrf.mxu1 }
 0x576   : > { %v3592_v14 = vpop.f32.mrf.mxu2  ;;  %v2305_v0 = vadd.f32 %v8519_v12, %v2180_v33  ;;  %v1881_v59 = vadd.f32 %v10160_v45, %v1756_v61  ;;  %v10161_v33 = vld [vmem:[#allocation110_spill] sm:$0xff]  ;;  %v3486_v18 = vadd.f32 %v3485_v36, %v10162_v29 }
 0x577   : > { %v8793_v9 = vadd.f32 %v3592_v14, %v3480_v28  ;;  %v2381_v14 = vadd.f32 %v4932_v49, %v2341_v21  ;;  %v2464_v48 = vperm.slane %v10161_v33, 1  ;;  %v10170_v29 = vld [vmem:[#allocation158_spill] sm:$0xff] }
 0x578   : > { %3532 = vmatmul.f32.gmra.mxu1 %v8310_v6  ;;  %v2342_v7 = vadd.f32 %v2305_v0, %v1881_v59 }
 0x579   : > { %v2417_v12 = vmax.f32 %v2381_v14, 0.0 }
 0x57a   : > { %v2382_v28 = vadd.f32 %v4932_v49, %v2342_v7  ;;  %v10166_v7 = vld [vmem:[#allocation87_spill] sm:$0xff] }
 0x57b   : > { %3642 = vmatmul.f32.gmra.mxu2 %v8327_v58  ;;  %3755 = vmatmul.f32.gmra.mxu3 %v8330_v30  ;;  %v2517_v63 = vmul.f32 %v2464_v48, %v2417_v12 }
 0x57c   : > { %v2418_v60 = vmax.f32 %v2382_v28, 0.0 }
 0x57d   : > { %v3488_v20 = vpop.f32.mrf.mxu1  ;;  %v8817_v61 = vrot.slane %v2517_v63, 7  ;;  %v10169_v63 = vld [vmem:[#allocation137_spill] sm:$0xff] }
 0x57e   : > { %v3595_v23 = vpop.f32.mrf.mxu2  ;;  %v3489_v21 = vadd.f32 %v3488_v20, %v10163_v51  ;;  %v10171_v51 = vld [vmem:[#allocation53_spill] sm:$0xff] }
 0x57f   : > { %v8807_v6 = vadd.f32 %v3595_v23, %v3483_v42  ;;  %v10167_v23 = vld [vmem:[#allocation22_spill] sm:$0xff] }
 0x580   : > { %3940 = vmatmul.f32.vlgmr.msra.gmra.mxu1 %v10062_v47  ;;  %v8819_v47 = vmul.f32 %v2464_v48, %v2418_v60 }
 0x582   : > { %v2607_v45 = vrot.slane %v8819_v47, 7 }
 0x583   : > { %3645 = vmatmul.f32.gmra.mxu2 %v8364_v24  ;;  %3758 = vmatmul.f32.gmra.mxu3 %v8367_v32 }
 0x585   : > { %v3491_v25 = vpop.f32.mrf.mxu1 }
 0x586   : > { %v3598_v38 = vpop.f32.mrf.mxu2 }
 0x587   : > { %v8814_v41 = vadd.f32 %v3598_v38, %v3486_v18 }
 0x588   : > { %3943 = vmatmul.f32.gmra.mxu1 %v10065_v40  ;;  %v8834_v40 = vsel %vm553_vm0, %v8817_v61, %v2607_v45 }
 0x58b   : > { %4830 = vmatmul.msk.f32.vlgmr.msrb.gmra.mxu3 %vm5174_vm2, %v8817_v61  ;;  %4053 = vmatmul.f32.vlgmr.msra.gmra.mxu2 %v10063_v11  ;;  %v10165_v11 = vld [vmem:[#allocation112_spill] sm:$0xff] }
 0x58c   : > { %v3492_v49 = vadd.f32 %v3491_v25, %v10165_v11  ;;  %v10173_v11 = vld [vmem:[#allocation72_spill] sm:$0xff] }
 0x58d   : > { %v3494_v36 = vpop.f32.mrf.mxu1 }
 0x58e   : > { %v3601_v0 = vpop.f32.mrf.mxu2 }
 0x58f   : > { %v8827_v59 = vadd.f32 %v3601_v0, %v3489_v21 }
 0x590   : > { %3946 = vmatmul.f32.gmra.mxu1 %v10069_v52  ;;  %v10168_v52 = vld [vmem:[#allocation64_spill] sm:$0xff] }
 0x591   : > { %v3495_v12 = vadd.f32 %v3494_v36, %v10168_v52 }
 0x593   : > { %3920 = vmatmul.f32.gmra.mxu3 %v8834_v40  ;;  %4056 = vmatmul.f32.gmra.mxu2 %v10164_v56 }
 0x595   : > { %v3497_v14 = vpop.f32.mrf.mxu1 }
 0x596   : > { %v3604_v42 = vpop.f32.mrf.mxu2  ;;  %v3498_v18 = vadd.f32 %v3497_v14, %v10170_v29 }
 0x597   : > { %v8839_v20 = vadd.f32 %v3604_v42, %v3492_v49 }
 0x598   : > { %3949 = vmatmul.f32.gmra.mxu1 %v10166_v7 }
 0x59b   : > { %4059 = vmatmul.f32.gmra.mxu2 %v10167_v23 }
 0x59d   : > { %v3500_v33 = vpop.f32.mrf.mxu1 }
 0x59e   : > { %v3607_v48 = vpop.f32.mrf.mxu2  ;;  %v3501_v21 = vadd.f32 %v3500_v33, %v10171_v51  ;;  %v10176_v33 = vld [vmem:[#allocation160_spill] sm:$0xff] }
 0x59f   : > { %v8844_v28 = vadd.f32 %v3607_v48, %v3495_v12 }
 0x5a0   : > { %3952 = vmatmul.f32.gmra.mxu1 %v10076_v19  ;;  %v10172_v19 = vld [vmem:[#allocation152_spill] sm:$0xff] }
 0x5a3   : > { %4062 = vmatmul.f32.gmra.mxu2 %v10169_v63 }
 0x5a5   : > { %v3503_v25 = vpop.f32.mrf.mxu1 }
 0x5a6   : > { %v3610_v60 = vpop.f32.mrf.mxu2  ;;  %v3504_v49 = vadd.f32 %v3503_v25, %v10173_v11 }
 0x5a7   : > { %v8849_v38 = vadd.f32 %v3610_v60, %v3498_v18 }
 0x5a8   : > { %3955 = vmatmul.f32.gmra.mxu1 %v10080_v44 }
 0x5ab   : > { %4065 = vmatmul.f32.gmra.mxu2 %v10077_v1  ;;  %v10174_v1 = vld [vmem:[#allocation74_spill] sm:$0xff] }
 0x5ad   : > { %v3506_v36 = vpop.f32.mrf.mxu1 }
 0x5ae   : > { %v3613_v0 = vpop.f32.mrf.mxu2  ;;  %v3507_v44 = vadd.f32 %v3506_v36, %v10174_v1  ;;  %v10180_v36 = vld [vmem:[#allocation70_spill] sm:$0xff] }
 0x5af   : > { %v8854_v56 = vadd.f32 %v3613_v0, %v3501_v21 }
 0x5b0   : > { %3958 = vmatmul.f32.gmra.mxu1 %v10084_v27  ;;  %v10175_v27 = vld [vmem:[#allocation83_spill] sm:$0xff] }
 0x5b3   : > { %4068 = vmatmul.f32.gmra.mxu2 %v10172_v19 }
 0x5b5   : > { %v3509_v14 = vpop.f32.mrf.mxu1 }
 0x5b6   : > { %v3616_v42 = vpop.f32.mrf.mxu2  ;;  %v3510_v48 = vadd.f32 %v3509_v14, %v10176_v33  ;;  %v10182_v14 = vld [vmem:[#allocation197_spill] sm:$0xff] }
 0x5b7   : > { %v8859_v7 = vadd.f32 %v3616_v42, %v3504_v49 }
 0x5b8   : > { %3961 = vmatmul.f32.gmra.mxu1 %v10088_v35  ;;  %v10177_v35 = vld [vmem:[#allocation188_spill] sm:$0xff] }
 0x5bb   : > { %4071 = vmatmul.f32.gmra.mxu2 %v10085_v2  ;;  %v10178_v2 = vld [vmem:[#allocation47_spill] sm:$0xff] }
 0x5bd   : > { %v3512_v23 = vpop.f32.mrf.mxu1 }
 0x5be   : > { %v3619_v52 = vpop.f32.mrf.mxu2  ;;  %v3513_v25 = vadd.f32 %v3512_v23, %v10178_v2 }
 0x5bf   : > { %v8864_v12 = vadd.f32 %v3619_v52, %v3507_v44 }
 0x5c0   : > { %3964 = vmatmul.f32.gmra.mxu1 %v10091_v3  ;;  %v10179_v3 = vld [vmem:[#allocation41_spill] sm:$0xff] }
 0x5c3   : > { %4074 = vmatmul.f32.gmra.mxu2 %v10175_v27 }
 0x5c5   : > { %v3515_v63 = vpop.f32.mrf.mxu1 }
 0x5c6   : > { %v3622_v29 = vpop.f32.mrf.mxu2  ;;  %v3516_v0 = vadd.f32 %v3515_v63, %v10180_v36 }
 0x5c7   : > { %v8869_v18 = vadd.f32 %v3622_v29, %v3510_v48 }
 0x5c8   : > { %3967 = vmatmul.f32.gmra.mxu1 %v10095_v43  ;;  %v10181_v43 = vld [vmem:[#allocation19_spill] sm:$0xff] }
 0x5cb   : > { %4077 = vmatmul.f32.gmra.mxu2 %v10177_v35 }
 0x5cd   : > { %v3518_v60 = vpop.f32.mrf.mxu1 }
 0x5ce   : > { %v3625_v51 = vpop.f32.mrf.mxu2  ;;  %v3519_v42 = vadd.f32 %v3518_v60, %v10182_v14  ;;  %v8914_v14 = vpop.f32.mrf.mxu0 }
 0x5cf   : > { %v8874_v21 = vadd.f32 %v3625_v51, %v3513_v25 }
 0x5d0   : > { %3970 = vmatmul.f32.gmra.mxu1 %v10098_v55  ;;  %v10183_v55 = vld [vmem:[#allocation139_spill] sm:$0xff] }
 0x5d3   : > { %4080 = vmatmul.f32.gmra.mxu2 %v10179_v3 }
 0x5d5   : > { %v3521_v19 = vpop.f32.mrf.mxu1 }
 0x5d6   : > { %v3628_v11 = vpop.f32.mrf.mxu2  ;;  %v3522_v52 = vadd.f32 %v3521_v19, %v10183_v55 }
 0x5d7   : > { %v8879_v49 = vadd.f32 %v3628_v11, %v3516_v0 }
 0x5d8   : > { %3973 = vmatmul.f32.gmra.mxu1 %v10101_v15  ;;  %v10184_v15 = vld [vmem:[#allocation51_spill] sm:$0xff] }
 0x5db   : > { %4083 = vmatmul.f32.gmra.mxu2 %v10181_v43 }
 0x5dd   : > { %v3524_v1 = vpop.f32.mrf.mxu1 }
 0x5de   : > { %v3631_v44 = vpop.f32.mrf.mxu2  ;;  %v3525_v63 = vadd.f32 %v3524_v1, %v10184_v15  ;;  %v10190_v15 = vld [vmem:[#allocation75_spill] sm:$0xff] }
 0x5df   : > { %v8884_v23 = vadd.f32 %v3631_v44, %v3519_v42 }
 0x5e0   : > { %3976 = vmatmul.f32.gmra.mxu1 %v7790_v10  ;;  %v10185_v10 = vld [vmem:[#allocation196_spill] sm:$0xff] }
 0x5e3   : > { %4086 = vmatmul.f32.gmra.mxu2 %v10102_v4 }
 0x5e5   : > { %v3527_v27 = vpop.f32.mrf.mxu1 }
 0x5e6   : > { %v3634_v33 = vpop.f32.mrf.mxu2  ;;  %v3528_v4 = vadd.f32 %v3527_v27, %v10185_v10 }
 0x5e7   : > { %v8889_v48 = vadd.f32 %v3634_v33, %v3522_v52  ;;  %v8933_v33 = vpop.f32.mrf.mxu0 }
 0x5e8   : > { %3979 = vmatmul.f32.gmra.mxu1 %v7818_v22 }
 0x5eb   : > { %4089 = vmatmul.f32.gmra.mxu2 %v7793_v37  ;;  %v10186_v37 = vld [vmem:[#allocation163_spill] sm:$0xff] }
 0x5ed   : > { %v3530_v29 = vpop.f32.mrf.mxu1 }
 0x5ee   : > { %v3637_v35 = vpop.f32.mrf.mxu2  ;;  %v3531_v22 = vadd.f32 %v3530_v29, %v10186_v37  ;;  %v10191_v29 = vld [vmem:[#allocation148_spill] sm:$0xff] }
 0x5ef   : > { %v8894_v2 = vadd.f32 %v3637_v35, %v3525_v63  ;;  %v10192_v35 = vld [vmem:[#allocation62_spill] sm:$0xff] }
 0x5f0   : > { %3982 = vmatmul.f32.gmra.mxu1 %v10106_v50 }
 0x5f3   : > { %4092 = vmatmul.f32.gmra.mxu2 %v10104_v39 }
 0x5f5   : > { %v3533_v25 = vpop.f32.mrf.mxu1 }
 0x5f6   : > { %v3640_v60 = vpop.f32.mrf.mxu2  ;;  %v3534_v39 = vadd.f32 %v3533_v25, %v8647_v17  ;;  %v8919_v17 = vld [vmem:[%s9113_s6] ss:$0 sm:$0xff] }
 0x5f7   : > { %v8899_v51 = vadd.f32 %v3640_v60, %v3528_v4  ;;  %v8940_v60 = vpop.f32.mrf.mxu3 }
 0x5f8   : > { %3985 = vmatmul.f32.gmra.mxu1 %v7889_v62  ;;  %v10187_v62 = vld [vmem:[#allocation48_spill] sm:$0xff] }
 0x5fb   : > { %4095 = vmatmul.f32.gmra.mxu2 %v10107_v54 }
 0x5fd   : > { %v3941_v3 = vpop.f32.mrf.mxu1 }
 0x5fe   : > { %v3643_v36 = vpop.f32.mrf.mxu2  ;;  %v3942_v54 = vadd.f32 %v3941_v3, %v10187_v62  ;;  %v10193_v3 = vld [vmem:[#allocation52_spill] sm:$0xff] }
 0x5ff   : > { %v8904_v0 = vadd.f32 %v3643_v36, %v3531_v22  ;;  %v3852_v36 = vpop.f32.mrf.mxu0 }
 0x600   : > { %3988 = vmatmul.f32.gmra.mxu1 %v7930_v26 }
 0x603   : > { %4098 = vmatmul.f32.gmra.mxu2 %v10109_v16  ;;  %v10188_v16 = vld [vmem:[#allocation114_spill] sm:$0xff] }
 0x605   : > { %v3944_v50 = vpop.f32.mrf.mxu1 }
 0x606   : > { %v3646_v19 = vpop.f32.mrf.mxu2 }
 0x607   : > { %v8909_v11 = vadd.f32 %v3646_v19, %v3534_v39  ;;  %v10195_v19 = vld [vmem:[#allocation113_spill] sm:$0xff] }
 0x608   : > { %3991 = vmatmul.f32.gmra.mxu1 %v10113_v13 }
 0x60b   : > { %4101 = vmatmul.f32.gmra.mxu2 %v10111_v53  ;;  %v10189_v53 = vld [vmem:[#allocation122_spill] sm:$0xff] }
 0x60c   : > { %v3945_v44 = vadd.f32 %v3944_v50, %v10189_v53  ;;  %v10194_v50 = vld [vmem:[#allocation99_spill] sm:$0xff]  ;;  %v10197_v53 = vld [vmem:[#allocation56_spill] sm:$0xff] }
 0x60d   : > { %v3947_v43 = vpop.f32.mrf.mxu1 }
 0x60e   : > { %v4054_v42 = vpop.f32.mrf.mxu2  ;;  %v3948_v10 = vadd.f32 %v3947_v43, %v10192_v35 }
 0x60f   : > { %v4055_v26 = vadd.f32 %v4054_v42, %v3942_v54 }
 0x610   : > { %3994 = vmatmul.f32.gmra.mxu1 %v10117_v34 }
 0x611   : > { %v4150_v1 = vadd.f32 %v4055_v26, %v10188_v16  ;;  %v8949_v16 = vpop.f32.mrf.mxu3 }
 0x613   : > { %v4186_v13 = vadd.f32 %v8919_v17, %v4150_v1  ;;  %4104 = vmatmul.f32.gmra.mxu2 %v10114_v31 }
 0x615   : > { %v4218_v55 = vmax.f32 %v4186_v13, 0.0  ;;  %v3950_v52 = vpop.f32.mrf.mxu1 }
 0x616   : > { %v4057_v27 = vpop.f32.mrf.mxu2  ;;  %v3951_v62 = vadd.f32 %v3950_v52, %v10195_v19  ;;  %v10203_v19 = vld [vmem:[#allocation162_spill] sm:$0xff] }
 0x617   : > { %4250 = vst [vmem:[%s8929_s11] sm:$0xff] %v4218_v55  ;;  %v4058_v34 = vadd.f32 %v4057_v27, %v3945_v44  ;;  %v3855_v44 = vpop.f32.mrf.mxu0  ;;  %v10198_v55 = vld [vmem:[#allocation2_spill] sm:$0xff] }
 0x618   : > { %3997 = vmatmul.f32.gmra.mxu1 %v10121_v5 }
 0x619   : > { %v4151_v31 = vadd.f32 %v4058_v34, %v10190_v15 }
 0x61b   : > { %v4187_v63 = vadd.f32 %v8919_v17, %v4151_v31  ;;  %4107 = vmatmul.f32.gmra.mxu2 %v10191_v29  ;;  %v10200_v29 = vld [vmem:[#allocation8_spill] sm:$0xff] }
 0x61d   : > { %v4219_v4 = vmax.f32 %v4187_v63, 0.0  ;;  %v3953_v25 = vpop.f32.mrf.mxu1  ;;  %v10199_v63 = vld [vmem:[#allocation151_spill] sm:$0xff] }
 0x61e   : > { %v4060_v37 = vpop.f32.mrf.mxu2  ;;  %v3954_v27 = vadd.f32 %v3953_v25, %v10198_v55 }
 0x61f   : > { %4251 = vst [vmem:[%s8929_s11 + $0x8] sm:$0xff] %v4219_v4  ;;  %v4061_v22 = vadd.f32 %v4060_v37, %v3948_v10  ;;  %v10201_v4 = vld [vmem:[#allocation30_spill] sm:$0xff]  ;;  %v10202_v37 = vld [vmem:[#allocation12_spill] sm:$0xff] }
 0x620   : > { %4000 = vmatmul.f32.gmra.mxu1 %v10125_v46  ;;  %v10196_v46 = vld [vmem:[#allocation165_spill] sm:$0xff] }
 0x621   : > { %v4152_v5 = vadd.f32 %v4061_v22, %v10193_v3 }
 0x623   : > { %v4188_v39 = vadd.f32 %v8919_v17, %v4152_v5  ;;  %4110 = vmatmul.f32.gmra.mxu2 %v10194_v50  ;;  %v3858_v5 = vpop.f32.mrf.mxu0 }
 0x625   : > { %v4220_v54 = vmax.f32 %v4188_v39, 0.0  ;;  %v3956_v43 = vpop.f32.mrf.mxu1 }
 0x626   : > { %v4063_v42 = vpop.f32.mrf.mxu2  ;;  %v3957_v22 = vadd.f32 %v3956_v43, %v10202_v37 }
 0x627   : > { %4252 = vst [vmem:[%s8929_s11 + $0x10] sm:$0xff] %v4220_v54  ;;  %v4064_v26 = vadd.f32 %v4063_v42, %v3951_v62  ;;  %v10204_v62 = vld [vmem:[#allocation167_spill] sm:$0xff] }
 0x628   : > { %4003 = vmatmul.f32.gmra.mxu1 %v10129_v57  ;;  %v8959_v57 = vpop.f32.mrf.mxu3 }
 0x629   : > { %v4153_v1 = vadd.f32 %v4064_v26, %v10196_v46  ;;  %v10205_v26 = vld [vmem:[#allocation102_spill] sm:$0xff] }
 0x62b   : > { %v4189_v13 = vadd.f32 %v8919_v17, %v4153_v1  ;;  %4113 = vmatmul.f32.gmra.mxu2 %v10197_v53 }
 0x62d   : > { %v4221_v52 = vmax.f32 %v4189_v13, 0.0  ;;  %v3959_v34 = vpop.f32.mrf.mxu1 }
 0x62e   : > { %v4066_v15 = vpop.f32.mrf.mxu2  ;;  %v3960_v1 = vadd.f32 %v3959_v34, %v8914_v14 }
 0x62f   : > { %4253 = vst [vmem:[%s8929_s11 + $0x18] sm:$0xff] %v4221_v52  ;;  %v4067_v31 = vadd.f32 %v4066_v15, %v3954_v27  ;;  %v3861_v27 = vpop.f32.mrf.mxu0  ;;  %v10206_v52 = vld [vmem:[#allocation50_spill] sm:$0xff]  ;;  %v10207_v15 = vld [vmem:[#allocation115_spill] sm:$0xff] }
 0x630   : > { %4006 = vmatmul.f32.gmra.mxu1 %v10199_v63  ;;  %v8969_v46 = vpop.f32.mrf.mxu3 }
 0x631   : > { %v4154_v35 = vadd.f32 %v4067_v31, %v10200_v29  ;;  %v10208_v29 = vld [vmem:[#allocation68_spill] sm:$0xff] }
 0x633   : > { %v4190_v10 = vadd.f32 %v8919_v17, %v4154_v35  ;;  %4116 = vmatmul.f32.gmra.mxu2 %v10201_v4 }
 0x635   : > { %v4222_v25 = vmax.f32 %v4190_v10, 0.0  ;;  %v3962_v3 = vpop.f32.mrf.mxu1 }
 0x636   : > { %v4069_v39 = vpop.f32.mrf.mxu2  ;;  %v3963_v35 = vadd.f32 %v3962_v3, %v8933_v33 }
 0x637   : > { %4254 = vst [vmem:[%s8929_s11 + $0x20] sm:$0xff] %v4222_v25  ;;  %v4070_v50 = vadd.f32 %v4069_v39, %v3957_v22  ;;  %v10209_v22 = vld [vmem:[#allocation155_spill] sm:$0xff]  ;;  %v10210_v25 = vld [vmem:[#allocation78_spill] sm:$0xff] }
 0x638   : > { %4009 = vmatmul.f32.gmra.mxu1 %v10203_v19  ;;  %v8978_v34 = vpop.f32.mrf.mxu3 }
 0x639   : > { %v4155_v54 = vadd.f32 %v4070_v50, %v10204_v62  ;;  %v3864_v50 = vpop.f32.mrf.mxu0  ;;  %v10211_v62 = vld [vmem:[#allocation153_spill] sm:$0xff] }
 0x63b   : > { %v4191_v42 = vadd.f32 %v8919_v17, %v4155_v54  ;;  %4119 = vmatmul.f32.gmra.mxu2 %v10205_v26 }
 0x63d   : > { %v4223_v43 = vmax.f32 %v4191_v42, 0.0  ;;  %v3965_v13 = vpop.f32.mrf.mxu1 }
 0x63e   : > { %v4072_v53 = vpop.f32.mrf.mxu2  ;;  %v3966_v54 = vadd.f32 %v3965_v13, %v3852_v36 }
 0x63f   : > { %4255 = vst [vmem:[%s8929_s11 + $0x28] sm:$0xff] %v4223_v43  ;;  %v4073_v55 = vadd.f32 %v4072_v53, %v3960_v1  ;;  %v10212_v43 = vld [vmem:[#allocation4_spill] sm:$0xff] }
 0x640   : > { %4012 = vmatmul.f32.gmra.mxu1 %v10206_v52  ;;  %v8986_v1 = vpop.f32.mrf.mxu3 }
 0x641   : > { %v4156_v31 = vadd.f32 %v4073_v55, %v10207_v15  ;;  %v3867_v52 = vpop.f32.mrf.mxu0 }
 0x643   : > { %v4192_v63 = vadd.f32 %v8919_v17, %v4156_v31  ;;  %4122 = vmatmul.f32.gmra.mxu2 %v10208_v29  ;;  %v10213_v29 = vld [vmem:[#allocation63_spill] sm:$0xff] }
 0x645   : > { %v4224_v10 = vmax.f32 %v4192_v63, 0.0  ;;  %v3968_v14 = vpop.f32.mrf.mxu1 }
 0x646   : > { %v4075_v4 = vpop.f32.mrf.mxu2  ;;  %v3969_v15 = vadd.f32 %v3968_v14, %v3855_v44 }
 0x647   : > { %4256 = vst [vmem:[%s8929_s11 + $0x30] sm:$0xff] %v4224_v10  ;;  %v4076_v37 = vadd.f32 %v4075_v4, %v3963_v35 }
 0x648   : > { %4015 = vmatmul.f32.gmra.mxu1 %v10209_v22  ;;  %v8995_v10 = vpop.f32.mrf.mxu3  ;;  %v10214_v22 = vld [vmem:[#allocation76_spill] sm:$0xff] }
 0x649   : > { %v4157_v39 = vadd.f32 %v4076_v37, %v10210_v25  ;;  %v3870_v44 = vpop.f32.mrf.mxu0  ;;  %v3697_v25 = vadd.f32 %v8940_v60, %v10214_v22 }
 0x64b   : > { %v4193_v19 = vadd.f32 %v8919_v17, %v4157_v39  ;;  %4125 = vmatmul.f32.gmra.mxu2 %v10211_v62 }
 0x64d   : > { %v4225_v33 = vmax.f32 %v4193_v19, 0.0  ;;  %v3971_v3 = vpop.f32.mrf.mxu1 }
 0x64e   : > { %v4078_v42 = vpop.f32.mrf.mxu2  ;;  %v3972_v4 = vadd.f32 %v3971_v3, %v3858_v5 }
 0x64f   : > { %4257 = vst [vmem:[%s8929_s11 + $0x38] sm:$0xff] %v4225_v33  ;;  %v4079_v26 = vadd.f32 %v4078_v42, %v3966_v54  ;;  %v10216_v42 = vld [vmem:[#allocation168_spill] sm:$0xff] }
 0x650   : > { %4018 = vmatmul.f32.gmra.mxu1 %v8327_v58  ;;  %v9005_v54 = vpop.f32.mrf.mxu3 }
 0x651   : > { %v4158_v53 = vadd.f32 %v4079_v26, %v10212_v43  ;;  %v3700_v26 = vadd.f32 %v8949_v16, %v10216_v42  ;;  %v3873_v43 = vpop.f32.mrf.mxu0 }
 0x653   : > { %v4194_v55 = vadd.f32 %v8919_v17, %v4158_v53  ;;  %4128 = vmatmul.f32.gmra.mxu2 %v10153_v8  ;;  %v10217_v53 = vld [vmem:[#allocation71_spill] sm:$0xff] }
 0x655   : > { %v4226_v31 = vmax.f32 %v4194_v55, 0.0  ;;  %v3974_v36 = vpop.f32.mrf.mxu1 }
 0x656   : > { %v4081_v13 = vpop.f32.mrf.mxu2 }
 0x657   : > { %4258 = vst [vmem:[%s8929_s11 + $0x40] sm:$0xff] %v4226_v31  ;;  %v4082_v63 = vadd.f32 %v4081_v13, %v3969_v15  ;;  %v2680_v15 = vsel %vm553_vm0, 0.0, %v8817_v61  ;;  %v10218_v31 = vld [vmem:[#allocation69_spill] sm:$0xff] }
 0x658   : > { %4021 = vmatmul.f32.gmra.mxu1 %v8364_v24  ;;  %v10215_v24 = vld [vmem:[#allocation59_spill] sm:$0xff]  ;;  %v2820_v16 = vrot.slane %v2680_v15, 1  ;;  %v2946_v42 = vrot.slane %v2680_v15, 2 }
 0x659   : > { %v4159_v35 = vadd.f32 %v4082_v63, %v10213_v29  ;;  %v9016_v29 = vpop.f32.mrf.mxu3 }
 0x65b   : > { %v4195_v58 = vadd.f32 %v8919_v17, %v4159_v35  ;;  %4131 = vmatmul.f32.gmra.mxu2 %v8330_v30  ;;  %v3975_v30 = vadd.f32 %v3974_v36, %v3861_v27 }
 0x65d   : > { %v4227_v8 = vmax.f32 %v4195_v58, 0.0  ;;  %v3977_v37 = vpop.f32.mrf.mxu1  ;;  %v10219_v58 = vld [vmem:[#allocation16_spill] sm:$0xff] }
 0x65e   : > { %v4084_v14 = vpop.f32.mrf.mxu2  ;;  %v3978_v36 = vadd.f32 %v3977_v37, %v3864_v50  ;;  %v3876_v37 = vpop.f32.mrf.mxu0 }
 0x65f   : > { %4259 = vst [vmem:[%s8929_s11 + $0x48] sm:$0xff] %v4227_v8  ;;  %v4085_v39 = vadd.f32 %v4084_v14, %v3972_v4  ;;  %v3703_v4 = vadd.f32 %v8959_v57, %v10219_v58  ;;  %v2698_v14 = vsel %vm553_vm0, %v2607_v45, 0.0 }
 0x660   : > { %4024 = vmatmul.f32.gmra.mxu1 %v10215_v24 }
 0x661   : > { %v4160_v19 = vadd.f32 %v4085_v39, %v3697_v25  ;;  %v10220_v25 = vld [vmem:[#allocation58_spill] sm:$0xff]  ;;  %v2823_v39 = vrot.slane %v2698_v14, 1 }
 0x663   : > { %v4196_v62 = vadd.f32 %v8919_v17, %v4160_v19  ;;  %4134 = vmatmul.f32.gmra.mxu2 %v8367_v32  ;;  %v2821_v32 = vrot.slane %v8834_v40, 1 }
 0x665   : > { %v4228_v5 = vmax.f32 %v4196_v62, 0.0  ;;  %v3980_v33 = vpop.f32.mrf.mxu1  ;;  %v2822_v61 = vsel %vm754_vm1, %v2820_v16, %v2821_v32  ;;  %v2947_v62 = vrot.slane %v8834_v40, 2  ;;  %v2824_v45 = vsel %vm754_vm1, %v2821_v32, %v2823_v39 }
 0x666   : > { %v4087_v3 = vpop.f32.mrf.mxu2  ;;  %v3981_v24 = vadd.f32 %v3980_v33, %v3867_v52  ;;  %v3879_v40 = vpop.f32.mrf.mxu0  ;;  %v3709_v32 = vadd.f32 %v8978_v34, %v8807_v6 }
 0x667   : > { %4260 = vst [vmem:[%s8929_s11 + $0x50] sm:$0xff] %v4228_v5  ;;  %v4088_v60 = vadd.f32 %v4087_v3, %v3975_v30  ;;  %v3706_v5 = vadd.f32 %v8969_v46, %v8793_v9  ;;  %v9032_v3 = vpop.f32.mrf.mxu3  ;;  %v2948_v52 = vsel %vm895_vm3, %v2946_v42, %v2947_v62  ;;  %v2949_v46 = vrot.slane %v2698_v14, 2 }
 0x668   : > { %4027 = vmatmul.f32.gmra.mxu1 %v10217_v53 }
 0x669   : > { %v4161_v55 = vadd.f32 %v4088_v60, %v3700_v26 }
 0x66b   : > { %v4197_v27 = vadd.f32 %v8919_v17, %v4161_v55  ;;  %4137 = vmatmul.f32.gmra.mxu2 %v10218_v31 }
 0x66d   : > { %v4229_v13 = vmax.f32 %v4197_v27, 0.0  ;;  %v3983_v63 = vpop.f32.mrf.mxu1 }
 0x66e   : > { %v4090_v35 = vpop.f32.mrf.mxu2  ;;  %v3984_v60 = vadd.f32 %v3983_v63, %v3870_v44 }
 0x66f   : > { %4261 = vst [vmem:[%s8929_s11 + $0x58] sm:$0xff] %v4229_v13  ;;  %v4091_v8 = vadd.f32 %v4090_v35, %v3978_v36  ;;  %v3726_v15 = vpop.f32.mrf.mxu3  ;;  %v2950_v36 = vsel %vm895_vm3, %v2947_v62, %v2949_v46  ;;  %v3882_v35 = vpop.f32.mrf.mxu0 }
 0x670   : > { %4030 = vmatmul.f32.gmra.mxu1 %v2822_v61 }
 0x671   : > { %v4162_v50 = vadd.f32 %v4091_v8, %v3703_v4  ;;  %v3712_v4 = vadd.f32 %v8986_v1, %v8814_v41 }
 0x673   : > { %v4198_v22 = vadd.f32 %v8919_v17, %v4162_v50  ;;  %4140 = vmatmul.f32.gmra.mxu2 %v10220_v25 }
 0x675   : > { %v4230_v19 = vmax.f32 %v4198_v22, 0.0  ;;  %v3986_v57 = vpop.f32.mrf.mxu1 }
 0x676   : > { %v4093_v30 = vpop.f32.mrf.mxu2  ;;  %v3987_v16 = vadd.f32 %v3986_v57, %v3873_v43  ;;  %v3715_v43 = vadd.f32 %v8995_v10, %v8827_v59 }
 0x677   : > { %4262 = vst [vmem:[%s8929_s11 + $0x60] sm:$0xff] %v4230_v19  ;;  %v4094_v47 = vadd.f32 %v4093_v30, %v3981_v24  ;;  %v3729_v61 = vpop.f32.mrf.mxu3  ;;  %v3885_v24 = vpop.f32.mrf.mxu0 }
 0x678   : > { %4033 = vmatmul.f32.gmra.mxu1 %v2824_v45 }
 0x679   : > { %v4163_v26 = vadd.f32 %v4094_v47, %v3706_v5 }
 0x67b   : > { %v4199_v33 = vadd.f32 %v8919_v17, %v4163_v26  ;;  %4143 = vmatmul.f32.gmra.mxu2 %v2948_v52 }
 0x67d   : > { %v4231_v53 = vmax.f32 %v4199_v33, 0.0  ;;  %v3989_v55 = vpop.f32.mrf.mxu1 }
 0x67e   : > { %v4096_v9 = vpop.f32.mrf.mxu2  ;;  %v3990_v14 = vadd.f32 %v3989_v55, %v3876_v37  ;;  %v3718_v37 = vadd.f32 %v9005_v54, %v8839_v20 }
 0x67f   : > { %4263 = vst [vmem:[%s8929_s11 + $0x68] sm:$0xff] %v4231_v53  ;;  %v4097_v27 = vadd.f32 %v4096_v9, %v3984_v60  ;;  %v3732_v30 = vpop.f32.mrf.mxu3  ;;  %v3888_v42 = vpop.f32.mrf.mxu0 }
 0x681   : > { %v4164_v31 = vadd.f32 %v4097_v27, %v3709_v32 }
 0x683   : > { %v4200_v13 = vadd.f32 %v8919_v17, %v4164_v31  ;;  %4146 = vmatmul.f32.gmra.mxu2 %v2950_v36  ;;  %v3724_v31 = vadd.f32 %v9032_v3, %v8849_v38 }
 0x685   : > { %v4232_v44 = vmax.f32 %v4200_v13, 0.0  ;;  %v3992_v63 = vpop.f32.mrf.mxu1 }
 0x686   : > { %v4099_v58 = vpop.f32.mrf.mxu2  ;;  %v3993_v1 = vadd.f32 %v3992_v63, %v3879_v40  ;;  %v3721_v40 = vadd.f32 %v9016_v29, %v8844_v28 }
 0x687   : > { %4264 = vst [vmem:[%s8929_s11 + $0x70] sm:$0xff] %v4232_v44  ;;  %v4100_v6 = vadd.f32 %v4099_v58, %v3987_v16  ;;  %v3735_v53 = vpop.f32.mrf.mxu3  ;;  %v3891_v54 = vpop.f32.mrf.mxu0 }
 0x689   : > { %v4165_v34 = vadd.f32 %v4100_v6, %v3712_v4  ;;  %v3727_v4 = vadd.f32 %v3726_v15, %v8854_v56 }
 0x68b   : > { %v4201_v8 = vadd.f32 %v8919_v17, %v4165_v34 }
 0x68d   : > { %v4233_v50 = vmax.f32 %v4201_v8, 0.0  ;;  %v3995_v22 = vpop.f32.mrf.mxu1 }
 0x68e   : > { %v4102_v25 = vpop.f32.mrf.mxu2  ;;  %v3996_v10 = vadd.f32 %v3995_v22, %v3882_v35 }
 0x68f   : > { %4265 = vst [vmem:[%s8929_s11 + $0x78] sm:$0xff] %v4233_v50  ;;  %v4103_v39 = vadd.f32 %v4102_v25, %v3990_v14  ;;  %v3738_v16 = vpop.f32.mrf.mxu3  ;;  %v3894_v35 = vpop.f32.mrf.mxu0  ;;  %v3730_v25 = vadd.f32 %v3729_v61, %v8859_v7 }
 0x691   : > { %v4166_v19 = vadd.f32 %v4103_v39, %v3715_v43 }
 0x693   : > { %v4202_v41 = vadd.f32 %v8919_v17, %v4166_v19 }
 0x695   : > { %v4234_v57 = vmax.f32 %v4202_v41, 0.0  ;;  %v3998_v62 = vpop.f32.mrf.mxu1 }
 0x696   : > { %v4105_v5 = vpop.f32.mrf.mxu2  ;;  %v3999_v9 = vadd.f32 %v3998_v62, %v3885_v24  ;;  %v3733_v62 = vadd.f32 %v3732_v30, %v8864_v12 }
 0x697   : > { %4266 = vst [vmem:[%s8929_s11 + $0x80] sm:$0xff] %v4234_v57  ;;  %v4106_v47 = vadd.f32 %v4105_v5, %v3993_v1  ;;  %v3741_v38 = vpop.f32.mrf.mxu3  ;;  %v3897_v39 = vpop.f32.mrf.mxu0 }
 0x699   : > { %v4167_v45 = vadd.f32 %v4106_v47, %v3718_v37 }
 0x69b   : > { %v4203_v59 = vadd.f32 %v8919_v17, %v4167_v45 }
 0x69d   : > { %v4235_v26 = vmax.f32 %v4203_v59, 0.0  ;;  %v4001_v52 = vpop.f32.mrf.mxu1 }
 0x69e   : > { %v4108_v33 = vpop.f32.mrf.mxu2  ;;  %v4002_v29 = vadd.f32 %v4001_v52, %v3888_v42 }
 0x69f   : > { %4267 = vst [vmem:[%s8929_s11 + $0x88] sm:$0xff] %v4235_v26  ;;  %v4109_v60 = vadd.f32 %v4108_v33, %v3996_v10  ;;  %v3744_v1 = vpop.f32.mrf.mxu3  ;;  %v3900_v47 = vpop.f32.mrf.mxu0  ;;  %v3736_v10 = vadd.f32 %v3735_v53, %v8869_v18 }
 0x6a1   : > { %v4168_v55 = vadd.f32 %v4109_v60, %v3721_v40 }
 0x6a3   : > { %v4204_v20 = vadd.f32 %v8919_v17, %v4168_v55 }
 0x6a5   : > { %v4236_v46 = vmax.f32 %v4204_v20, 0.0  ;;  %v4004_v32 = vpop.f32.mrf.mxu1  ;;  %v3739_v20 = vadd.f32 %v3738_v16, %v8874_v21 }
 0x6a6   : > { %v4111_v27 = vpop.f32.mrf.mxu2  ;;  %v4005_v3 = vadd.f32 %v4004_v32, %v3891_v54 }
 0x6a7   : > { %4268 = vst [vmem:[%s8929_s11 + $0x90] sm:$0xff] %v4236_v46  ;;  %v4112_v36 = vadd.f32 %v4111_v27, %v3999_v9  ;;  %v3747_v52 = vpop.f32.mrf.mxu3  ;;  %v3903_v12 = vpop.f32.mrf.mxu0 }
 0x6a9   : > { %v4169_v13 = vadd.f32 %v4112_v36, %v3724_v31 }
 0x6ab   : > { %v4205_v28 = vadd.f32 %v8919_v17, %v4169_v13  ;;  %v3742_v13 = vadd.f32 %v3741_v38, %v8879_v49 }
 0x6ad   : > { %v4237_v44 = vmax.f32 %v4205_v28, 0.0  ;;  %v4007_v63 = vpop.f32.mrf.mxu1 }
 0x6ae   : > { %v4114_v58 = vpop.f32.mrf.mxu2  ;;  %v4008_v56 = vadd.f32 %v4007_v63, %v3894_v35 }
 0x6af   : > { %4269 = vst [vmem:[%s8929_s11 + $0x98] sm:$0xff] %v4237_v44  ;;  %v4115_v6 = vadd.f32 %v4114_v58, %v4002_v29  ;;  %v3750_v32 = vpop.f32.mrf.mxu3  ;;  %v3906_v31 = vpop.f32.mrf.mxu0 }
 0x6b1   : > { %v4170_v34 = vadd.f32 %v4115_v6, %v3727_v4  ;;  %v3745_v4 = vadd.f32 %v3744_v1, %v8884_v23  ;;  %v3751_v1 = vadd.f32 %v3750_v32, %v8894_v2 }
 0x6b3   : > { %v4206_v8 = vadd.f32 %v8919_v17, %v4170_v34 }
 0x6b5   : > { %v4238_v14 = vmax.f32 %v4206_v8, 0.0  ;;  %v4010_v50 = vpop.f32.mrf.mxu1 }
 0x6b6   : > { %v4117_v22 = vpop.f32.mrf.mxu2  ;;  %v4011_v61 = vadd.f32 %v4010_v50, %v3897_v39 }
 0x6b7   : > { %4270 = vst [vmem:[%s8929_s11 + $0xa0] sm:$0xff] %v4238_v14  ;;  %v4118_v43 = vadd.f32 %v4117_v22, %v4005_v3  ;;  %v3753_v16 = vpop.f32.mrf.mxu3  ;;  %v3909_v34 = vpop.f32.mrf.mxu0 }
 0x6b9   : > { %v4171_v24 = vadd.f32 %v4118_v43, %v3730_v25  ;;  %v3748_v25 = vadd.f32 %v3747_v52, %v8889_v48 }
 0x6bb   : > { %v4207_v19 = vadd.f32 %v8919_v17, %v4171_v24 }
 0x6bd   : > { %v4239_v15 = vmax.f32 %v4207_v19, 0.0  ;;  %v4013_v41 = vpop.f32.mrf.mxu1 }
 0x6be   : > { %v4120_v57 = vpop.f32.mrf.mxu2  ;;  %v4014_v30 = vadd.f32 %v4013_v41, %v3900_v47 }
 0x6bf   : > { %4271 = vst [vmem:[%s8929_s11 + $0xa8] sm:$0xff] %v4239_v15  ;;  %v4121_v5 = vadd.f32 %v4120_v57, %v4008_v56  ;;  %v3756_v50 = vpop.f32.mrf.mxu3  ;;  %v3912_v24 = vpop.f32.mrf.mxu0 }
 0x6c1   : > { %v4172_v37 = vadd.f32 %v4121_v5, %v3733_v62 }
 0x6c3   : > { %v4208_v7 = vadd.f32 %v8919_v17, %v4172_v37 }
 0x6c5   : > { %v4240_v45 = vmax.f32 %v4208_v7, 0.0  ;;  %v4016_v42 = vpop.f32.mrf.mxu1 }
 0x6c6   : > { %v4123_v59 = vpop.f32.mrf.mxu2  ;;  %v4017_v53 = vadd.f32 %v4016_v42, %v3903_v12  ;;  %v3757_v12 = vadd.f32 %v3756_v50, %v8904_v0 }
 0x6c7   : > { %4272 = vst [vmem:[%s8929_s11 + $0xb0] sm:$0xff] %v4240_v45  ;;  %v4124_v26 = vadd.f32 %v4123_v59, %v4011_v61  ;;  %v3759_v62 = vpop.f32.mrf.mxu3  ;;  %v3915_v48 = vpop.f32.mrf.mxu0  ;;  %v3754_v45 = vadd.f32 %v3753_v16, %v8899_v51 }
 0x6c8   : > { %v3760_v32 = vadd.f32 %v3759_v62, %v8909_v11 }
 0x6c9   : > { %v4173_v33 = vadd.f32 %v4124_v26, %v3736_v10 }
 0x6cb   : > { %v4209_v40 = vadd.f32 %v8919_v17, %v4173_v33 }
 0x6cd   : > { %v4241_v60 = vmax.f32 %v4209_v40, 0.0  ;;  %v4019_v9 = vpop.f32.mrf.mxu1 }
 0x6ce   : > { %v4126_v55 = vpop.f32.mrf.mxu2  ;;  %v4020_v63 = vadd.f32 %v4019_v9, %v3906_v31 }
 0x6cf   : > { %4273 = vst [vmem:[%s8929_s11 + $0xb8] sm:$0xff] %v4241_v60  ;;  %v4127_v54 = vadd.f32 %v4126_v55, %v4014_v30  ;;  %v3918_v26 = vpop.f32.mrf.mxu3 }
 0x6d1   : > { %v4174_v46 = vadd.f32 %v4127_v54, %v3739_v20 }
 0x6d3   : > { %v4210_v18 = vadd.f32 %v8919_v17, %v4174_v46 }
 0x6d5   : > { %v4242_v27 = vmax.f32 %v4210_v18, 0.0  ;;  %v4022_v44 = vpop.f32.mrf.mxu1 }
 0x6d6   : > { %v4129_v36 = vpop.f32.mrf.mxu2  ;;  %v4023_v38 = vadd.f32 %v4022_v44, %v3909_v34 }
 0x6d7   : > { %4274 = vst [vmem:[%s8929_s11 + $0xc0] sm:$0xff] %v4242_v27  ;;  %v4130_v28 = vadd.f32 %v4129_v36, %v4017_v53  ;;  %v3921_v20 = vpop.f32.mrf.mxu3 }
 0x6d9   : > { %v4175_v29 = vadd.f32 %v4130_v28, %v3742_v13 }
 0x6db   : > { %v4211_v21 = vadd.f32 %v8919_v17, %v4175_v29 }
 0x6dd   : > { %v4243_v35 = vmax.f32 %v4211_v21, 0.0  ;;  %v4025_v49 = vpop.f32.mrf.mxu1 }
 0x6de   : > { %v4132_v58 = vpop.f32.mrf.mxu2  ;;  %v4026_v19 = vadd.f32 %v4025_v49, %v3912_v24 }
 0x6df   : > { %4275 = vst [vmem:[%s8929_s11 + $0xc8] sm:$0xff] %v4243_v35  ;;  %v4133_v6 = vadd.f32 %v4132_v58, %v4020_v63 }
 0x6e1   : > { %v4176_v8 = vadd.f32 %v4133_v6, %v3745_v4 }
 0x6e3   : > { %v4212_v3 = vadd.f32 %v8919_v17, %v4176_v8 }
 0x6e5   : > { %v4244_v14 = vmax.f32 %v4212_v3, 0.0  ;;  %v4028_v15 = vpop.f32.mrf.mxu1 }
 0x6e6   : > { %v4135_v22 = vpop.f32.mrf.mxu2  ;;  %v4029_v47 = vadd.f32 %v4028_v15, %v3915_v48 }
 0x6e7   : > { %4276 = vst [vmem:[%s8929_s11 + $0xd0] sm:$0xff] %v4244_v14  ;;  %v4136_v43 = vadd.f32 %v4135_v22, %v4023_v38 }
 0x6e9   : > { %v4177_v39 = vadd.f32 %v4136_v43, %v3748_v25 }
 0x6eb   : > { %v4213_v23 = vadd.f32 %v8919_v17, %v4177_v39 }
 0x6ed   : > { %v4245_v56 = vmax.f32 %v4213_v23, 0.0  ;;  %v4031_v59 = vpop.f32.mrf.mxu1 }
 0x6ee   : > { %v4138_v41 = vpop.f32.mrf.mxu2  ;;  %v4032_v52 = vadd.f32 %v4031_v59, %v3918_v26 }
 0x6ef   : > { %4277 = vst [vmem:[%s8929_s11 + $0xd8] sm:$0xff] %v4245_v56  ;;  %v4139_v57 = vadd.f32 %v4138_v41, %v4026_v19 }
 0x6f1   : > { %v4178_v5 = vadd.f32 %v4139_v57, %v3751_v1 }
 0x6f3   : > { %v4214_v37 = vadd.f32 %v8919_v17, %v4178_v5 }
 0x6f5   : > { %v4246_v7 = vmax.f32 %v4214_v37, 0.0  ;;  %v4034_v55 = vpop.f32.mrf.mxu1 }
 0x6f6   : > { %v4141_v61 = vpop.f32.mrf.mxu2  ;;  %v4035_v54 = vadd.f32 %v4034_v55, %v3921_v20 }
 0x6f7   : > { %4278 = vst [vmem:[%s8929_s11 + $0xe0] sm:$0xff] %v4246_v7  ;;  %v4142_v42 = vadd.f32 %v4141_v61, %v4029_v47 }
 0x6f9   : > { %v4179_v10 = vadd.f32 %v4142_v42, %v3754_v45 }
 0x6fb   : > { %v4215_v2 = vadd.f32 %v8919_v17, %v4179_v10 }
 0x6fd   : > { %v4247_v33 = vmax.f32 %v4215_v2, 0.0 }
 0x6fe   : > { %v4144_v40 = vpop.f32.mrf.mxu2 }
 0x6ff   : > { %4279 = vst [vmem:[%s8929_s11 + $0xe8] sm:$0xff] %v4247_v33  ;;  %v4145_v30 = vadd.f32 %v4144_v40, %v4032_v52 }
 0x701   : > { %v4180_v60 = vadd.f32 %v4145_v30, %v3757_v12 }
 0x703   : > { %v4216_v51 = vadd.f32 %v8919_v17, %v4180_v60 }
 0x705   : > { %v4248_v9 = vmax.f32 %v4216_v51, 0.0 }
 0x706   : > { %v4147_v46 = vpop.f32.mrf.mxu2 }
 0x707   : > { %4280 = vst [vmem:[%s8929_s11 + $0xf0] sm:$0xff] %v4248_v9  ;;  %v4148_v18 = vadd.f32 %v4147_v46, %v4035_v54 }
 0x709   : > { %v4181_v53 = vadd.f32 %v4148_v18, %v3760_v32 }
 0x70b   : > { %v4217_v27 = vadd.f32 %v8919_v17, %v4181_v53 }
 0x70d   : > { %v4249_v31 = vmax.f32 %v4217_v27, 0.0 }
 0x70f   : > { %4281 = vst [vmem:[%s8929_s11 + $0xf8] sm:$0xff] %v4249_v31 }
 0x710 PF: > { %s17_s26 = sadd.s32 1, %s4955_s26   ;;  %s10221_s24 = smov %s4951_s25 }
 0x711   : > { %p14_p5 = scmp.ge.s32.totalorder %s17_s26, 4   ;;  %s10222_s25 = smov %s10224_s27 }
 0x713   :  { %16 = sbr.rel (!%p14_p5) target bundleno = 2 (0x2), region = 88 }

</bundles_post_ra>
